<compile_context>
chip_gen: v7x
topology: tpu7x:2x2x1
jax: 0.10.0
libtpu: 0.0.40
codegen_flags: <defaults>
</compile_context>

<pallas_src>
import jax
import jax.numpy as jnp
import numpy as np
from jax import lax
from jax.experimental import pallas as pl
from jax.experimental.pallas import tpu as pltpu

LEAK = 0.2
HID = 128        # LSTM hidden size
SEQ = 100        # x.view(-1, 100, 40)
F_IN = 40        # LSTM input size
F_MID1 = 640
F_MID2 = 4000    # SEQ * F_IN
F_OUT = 77       # features_shape
F_PAD = 128      # lane-dense padded head width
UNROLL = 5       # manual unroll of the recurrence (must divide SEQ)
assert SEQ % UNROLL == 0


def _leaky(v):
    return jnp.where(v > 0, v, LEAK * v)


# ---------------- Kernel 1: dense_r_1 + leaky + dense_r_2 + leaky ------------
def mlp_kernel(x_ref, w1_ref, b1_ref, w2_ref, b2_ref, o_ref):
    # x / w1 / w2 arrive bf16; accumulate in f32 on the MXU, keep biases /
    # activations in f32.
    h = jnp.dot(x_ref[...], w1_ref[...],
                preferred_element_type=jnp.float32) + b1_ref[...]
    h = _leaky(h)
    y = jnp.dot(h.astype(jnp.bfloat16), w2_ref[...],
                preferred_element_type=jnp.float32) + b2_ref[...]
    o_ref[...] = _leaky(y)


# ------------- Kernel 2: LSTM recurrence + leaky + dense_r_3 + tanh ----------
def lstm_head_kernel(seq_ref, wih_ref, whh_ref, bl_ref, w3_ref, b3_ref, o_ref):
    # seq_ref : (SEQ, B, F_IN)  bf16, time-major
    # wih_ref : (F_IN, 4H) bf16   whh_ref : (HID, 4H) bf16   (gate order i|f|o|g)
    # bl_ref  : (1, 4H) f32       w3_ref  : (HID, F_PAD) bf16  b3_ref: (1,F_PAD) f32
    # o_ref   : (SEQ, B, F_PAD) f32, time-major, lane-dense
    bsz = seq_ref.shape[1]

    def step(t, h, c):
        # ---- serial recurrent chain (latency-bound) ----
        g = (jnp.dot(seq_ref[t], wih_ref[...],          # off-chain MXU work
                     preferred_element_type=jnp.float32)
             + jnp.dot(h.astype(jnp.bfloat16), whh_ref[...],
                       preferred_element_type=jnp.float32)
             + bl_ref[...])
        sg = jax.nn.sigmoid(g[:, :3 * HID])              # i | f | o in one EUP pass
        gg = jnp.tanh(g[:, 3 * HID:])                    # g gate
        c = sg[:, HID:2 * HID] * c + sg[:, :HID] * gg    # f*c + i*g
        h = sg[:, 2 * HID:3 * HID] * jnp.tanh(c)         # o*tanh(c)

        # ---- head: leaky -> dense_r_3 -> tanh (not on the recurrent chain) ----
        y = jnp.dot(_leaky(h).astype(jnp.bfloat16), w3_ref[...],
                    preferred_element_type=jnp.float32) + b3_ref[...]
        o_ref[t] = jnp.tanh(y)                           # dense (B, F_PAD) store
        return h, c

    def outer(s_idx, carry):
        h, c = carry
        t0 = s_idx * UNROLL
        for u in range(UNROLL):          # manual unroll: cross-step overlap
            h, c = step(t0 + u, h, c)
        return h, c

    h0 = jnp.zeros((bsz, HID), jnp.float32)
    c0 = jnp.zeros((bsz, HID), jnp.float32)
    lax.fori_loop(0, SEQ // UNROLL, outer, (h0, c0))


# ------------------------------- Wrapper -------------------------------------
def _to_ifog(a):
    """Permute the 4*HID gate columns from PyTorch order [i,f,g,o] to [i,f,o,g]."""
    i, f, g, o = jnp.split(a, 4, axis=-1)
    return jnp.concatenate([i, f, o, g], axis=-1)


def prepare_params(p):
    """One-time packing of the inference params for the kernels."""
    return {
        "w1": p["w1"].astype(jnp.bfloat16),
        "b1": p["b1"],
        "w2": p["w2"].astype(jnp.bfloat16),     # dominant HBM load: halve bytes
        "b2": p["b2"],
        "wih": _to_ifog(p["wih"]).astype(jnp.bfloat16),
        "whh": _to_ifog(p["whh"]).astype(jnp.bfloat16),
        "b_lstm": _to_ifog(p["b_lstm"]),
        "w3p": jnp.pad(p["w3"], ((0, 0), (0, F_PAD - F_OUT))).astype(jnp.bfloat16),
        "b3p": jnp.pad(p["b3"], ((0, 0), (0, F_PAD - F_OUT))),
    }


@jax.jit
def generator_forward(x, kp):
    B = x.shape[0]
    x_bf = x.astype(jnp.float32).astype(jnp.bfloat16)
    vmem = pl.BlockSpec(memory_space=pltpu.MemorySpace.VMEM)

    # Kernel 1: (B,40) -> (B,4000). Total VMEM ~5.3 MiB, fits the default limit.
    mlp_out = pl.pallas_call(
        mlp_kernel,
        out_shape=jax.ShapeDtypeStruct((B, F_MID2), jnp.float32),
        in_specs=[vmem] * 5,
        out_specs=vmem,
    )(x_bf, kp["w1"], kp["b1"], kp["w2"], kp["b2"])

    # Tiny XLA relayout (32 KB): row-major (B, SEQ*F_IN) -> time-major
    # (SEQ, B, F_IN), cast to bf16 once for the input-projection dot operand.
    seq = mlp_out.reshape(B, SEQ, F_IN).transpose(1, 0, 2).astype(jnp.bfloat16)

    # Kernel 2: fused LSTM + head, time-major lane-dense output.
    out_tm = pl.pallas_call(
        lstm_head_kernel,
        out_shape=jax.ShapeDtypeStruct((SEQ, B, F_PAD), jnp.float32),
        in_specs=[vmem] * 6,
        out_specs=vmem,
    )(seq, kp["wih"], kp["whh"], kp["b_lstm"], kp["w3p"], kp["b3p"])

    # Tiny XLA epilogue (100 KB): back to batch-major, drop the pad columns.
    return out_tm.transpose(1, 0, 2)[:, :, :F_OUT]        # (B, SEQ, 77)


# --------------------------- Parameter init ----------------------------------
def init_params(key):
    def uni(k, shape, fan):
        bound = 1.0 / float(np.sqrt(fan))
        return jax.random.uniform(k, shape, jnp.float32, -bound, bound)

    ks = jax.random.split(key, 9)
    return {
        "w1": uni(ks[0], (F_IN, F_MID1), F_IN),
        "b1": uni(ks[1], (1, F_MID1), F_IN),
        "w2": uni(ks[2], (F_MID1, F_MID2), F_MID1),
        "b2": uni(ks[3], (1, F_MID2), F_MID1),
        # PyTorch LSTM params (W_ih, W_hh, b_ih + b_hh combined), gate order i,f,g,o
        "wih": uni(ks[4], (F_IN, 4 * HID), HID),
        "whh": uni(ks[5], (HID, 4 * HID), HID),
        "b_lstm": uni(ks[6], (1, 4 * HID), HID),
        "w3": uni(ks[7], (HID, F_OUT), HID),
        "b3": uni(ks[8], (1, F_OUT), HID),
    }


# ------------------------- Pure-JAX reference (f32) --------------------------
def ref_forward(x, p):
    h = _leaky(x @ p["w1"] + p["b1"])
    h = _leaky(h @ p["w2"] + p["b2"])
    seq = h.reshape(-1, SEQ, F_IN)
    B = seq.shape[0]

    def step(carry, x_t):
        hh, cc = carry
        g = x_t @ p["wih"] + hh @ p["whh"] + p["b_lstm"]
        i = jax.nn.sigmoid(g[:, :HID])
        f = jax.nn.sigmoid(g[:, HID:2 * HID])
        gg = jnp.tanh(g[:, 2 * HID:3 * HID])
        o = jax.nn.sigmoid(g[:, 3 * HID:])
        cc = f * cc + i * gg
        hh = o * jnp.tanh(cc)
        return (hh, cc), hh

    init = (jnp.zeros((B, HID), jnp.float32), jnp.zeros((B, HID), jnp.float32))
    _, hs = jax.lax.scan(step, init, seq.transpose(1, 0, 2))   # (T, B, HID)
    y = jnp.tanh(_leaky(hs) @ p["w3"] + p["b3"])
    return y.transpose(1, 0, 2)


if __name__ == "__main__":
    key = jax.random.PRNGKey(0)
    pkey, xkey = jax.random.split(key)
    params = init_params(pkey)
    kparams = prepare_params(params)          # bf16 weights, gates -> i|f|o|g, padded head

    B = 2
    x = jax.random.normal(xkey, (B, F_IN), jnp.float32)

    out = generator_forward(x, kparams)
    out = jax.block_until_ready(out)
    assert out.shape == (B, SEQ, F_OUT)

    ref = ref_forward(x, params)
    # Tolerance relaxed vs pure-f32 because every matmul operand (including the
    # 100-step recurrent W_hh/h products) is bf16 with f32 accumulation; state
    # (h, c) and all activations stay f32, so the compounded error stays well
    # inside these bounds.
    np.testing.assert_allclose(np.asarray(out), np.asarray(ref),
                               rtol=1e-2, atol=1e-2)
    print("KERNEL_OK")
</pallas_src>

<mosaic_0001>
module attributes {stable_mosaic.version = 11 : i64} {
  func.func @mlp_kernel(%arg0: memref<2x40xbf16, #tpu.memory_space<vmem>>, %arg1: memref<40x640xbf16, #tpu.memory_space<vmem>>, %arg2: memref<1x640xf32, #tpu.memory_space<vmem>>, %arg3: memref<640x4000xbf16, #tpu.memory_space<vmem>>, %arg4: memref<1x4000xf32, #tpu.memory_space<vmem>>, %arg5: memref<2x4000xf32, #tpu.memory_space<vmem>>) attributes {dimension_semantics = [], scalar_prefetch = 0 : i64, scratch_operands = 0 : i64, tpu.core_type = #tpu.core_type<tc>} {
    %c0 = arith.constant 0 : index
    %c0_0 = arith.constant 0 : index
    %0 = vector.load %arg0[%c0, %c0_0] : memref<2x40xbf16, #tpu.memory_space<vmem>>, vector<2x40xbf16>
    %c0_1 = arith.constant 0 : index
    %c0_2 = arith.constant 0 : index
    %1 = vector.load %arg1[%c0_1, %c0_2] : memref<40x640xbf16, #tpu.memory_space<vmem>>, vector<40x640xbf16>
    %cst = arith.constant dense<0.000000e+00> : vector<2x640xf32>
    %2 = tpu.matmul %0, %1, %cst {dimension_numbers = #tpu.dot_dimension_numbers<[1], [0], [0], [1], [0, 0, 1, 1], [], []>} : vector<2x40xbf16>, vector<40x640xbf16>, vector<2x640xf32> -> vector<2x640xf32>
    %c0_3 = arith.constant 0 : index
    %c0_4 = arith.constant 0 : index
    %3 = vector.load %arg2[%c0_3, %c0_4] : memref<1x640xf32, #tpu.memory_space<vmem>>, vector<1x640xf32>
    %4 = vector.broadcast %3 : vector<1x640xf32> to vector<2x640xf32>
    %5 = arith.addf %2, %4 : vector<2x640xf32>
    %cst_5 = arith.constant 0.000000e+00 : f32
    %6 = vector.broadcast %cst_5 : f32 to vector<2x640xf32>
    %7 = arith.cmpf ogt, %5, %6 : vector<2x640xf32>
    %cst_6 = arith.constant 2.000000e-01 : f32
    %8 = vector.broadcast %cst_6 : f32 to vector<2x640xf32>
    %9 = arith.mulf %8, %5 : vector<2x640xf32>
    %10 = arith.select %7, %5, %9 : vector<2x640xi1>, vector<2x640xf32>
    %11 = arith.truncf %10 : vector<2x640xf32> to vector<2x640xbf16>
    %c0_7 = arith.constant 0 : index
    %c0_8 = arith.constant 0 : index
    %12 = vector.load %arg3[%c0_7, %c0_8] : memref<640x4000xbf16, #tpu.memory_space<vmem>>, vector<640x4000xbf16>
    %cst_9 = arith.constant dense<0.000000e+00> : vector<2x4000xf32>
    %13 = tpu.matmul %11, %12, %cst_9 {dimension_numbers = #tpu.dot_dimension_numbers<[1], [0], [0], [1], [0, 0, 1, 1], [], []>} : vector<2x640xbf16>, vector<640x4000xbf16>, vector<2x4000xf32> -> vector<2x4000xf32>
    %c0_10 = arith.constant 0 : index
    %c0_11 = arith.constant 0 : index
    %14 = vector.load %arg4[%c0_10, %c0_11] : memref<1x4000xf32, #tpu.memory_space<vmem>>, vector<1x4000xf32>
    %15 = vector.broadcast %14 : vector<1x4000xf32> to vector<2x4000xf32>
    %16 = arith.addf %13, %15 : vector<2x4000xf32>
    %cst_12 = arith.constant 0.000000e+00 : f32
    %17 = vector.broadcast %cst_12 : f32 to vector<2x4000xf32>
    %18 = arith.cmpf ogt, %16, %17 : vector<2x4000xf32>
    %cst_13 = arith.constant 2.000000e-01 : f32
    %19 = vector.broadcast %cst_13 : f32 to vector<2x4000xf32>
    %20 = arith.mulf %19, %16 : vector<2x4000xf32>
    %21 = arith.select %18, %16, %20 : vector<2x4000xi1>, vector<2x4000xf32>
    %c0_14 = arith.constant 0 : index
    %c0_15 = arith.constant 0 : index
    %22 = vector.load %arg5[%c0_14, %c0_15] : memref<2x4000xf32, #tpu.memory_space<vmem>>, vector<2x4000xf32>
    tpu.vector_store %arg5[%c0_14, %c0_15], %21 {strides = array<i32>} : memref<2x4000xf32, #tpu.memory_space<vmem>>, vector<2x4000xf32>,
    return
  }
}

module attributes {stable_mosaic.version = 11 : i64} {
  func.func @lstm_head_kernel(%arg0: memref<100x2x40xbf16, #tpu.memory_space<vmem>>, %arg1: memref<40x512xbf16, #tpu.memory_space<vmem>>, %arg2: memref<128x512xbf16, #tpu.memory_space<vmem>>, %arg3: memref<1x512xf32, #tpu.memory_space<vmem>>, %arg4: memref<128x128xbf16, #tpu.memory_space<vmem>>, %arg5: memref<1x128xf32, #tpu.memory_space<vmem>>, %arg6: memref<100x2x128xf32, #tpu.memory_space<vmem>>) attributes {dimension_semantics = [], scalar_prefetch = 0 : i64, scratch_operands = 0 : i64, tpu.core_type = #tpu.core_type<tc>} {
    %cst = arith.constant 0.000000e+00 : f32
    %0 = vector.broadcast %cst : f32 to vector<2x128xf32>
    %cst_0 = arith.constant 0.000000e+00 : f32
    %1 = vector.broadcast %cst_0 : f32 to vector<2x128xf32>
    %c0_i32 = arith.constant 0 : i32
    %c20_i32 = arith.constant 20 : i32
    %2 = arith.addi %c0_i32, %c20_i32 : i32
    %c1_i32 = arith.constant 1 : i32
    %3:2 = scf.for %arg7 = %c0_i32 to %2 step %c1_i32 iter_args(%arg8 = %0, %arg9 = %1) -> (vector<2x128xf32>, vector<2x128xf32>)  : i32 {
      %c5_i32 = arith.constant 5 : i32
      %4 = arith.muli %arg7, %c5_i32 : i32
      %c0_i32_2 = arith.constant 0 : i32
      %5 = arith.addi %4, %c0_i32_2 : i32
      %6 = arith.index_cast %5 : i32 to index
      %c0 = arith.constant 0 : index
      %c0_3 = arith.constant 0 : index
      %7 = vector.load %arg0[%6, %c0, %c0_3] : memref<100x2x40xbf16, #tpu.memory_space<vmem>>, vector<1x2x40xbf16>
      %8 = vector.shape_cast %7 : vector<1x2x40xbf16> to vector<2x40xbf16>
      %c0_4 = arith.constant 0 : index
      %c0_5 = arith.constant 0 : index
      %9 = vector.load %arg1[%c0_4, %c0_5] : memref<40x512xbf16, #tpu.memory_space<vmem>>, vector<40x512xbf16>
      %cst_6 = arith.constant dense<0.000000e+00> : vector<2x512xf32>
      %10 = tpu.matmul %8, %9, %cst_6 {dimension_numbers = #tpu.dot_dimension_numbers<[1], [0], [0], [1], [0, 0, 1, 1], [], []>} : vector<2x40xbf16>, vector<40x512xbf16>, vector<2x512xf32> -> vector<2x512xf32>
      %11 = arith.truncf %arg8 : vector<2x128xf32> to vector<2x128xbf16>
      %c0_7 = arith.constant 0 : index
      %c0_8 = arith.constant 0 : index
      %12 = vector.load %arg2[%c0_7, %c0_8] : memref<128x512xbf16, #tpu.memory_space<vmem>>, vector<128x512xbf16>
      %cst_9 = arith.constant dense<0.000000e+00> : vector<2x512xf32>
      %13 = tpu.matmul %11, %12, %cst_9 {dimension_numbers = #tpu.dot_dimension_numbers<[1], [0], [0], [1], [0, 0, 1, 1], [], []>} : vector<2x128xbf16>, vector<128x512xbf16>, vector<2x512xf32> -> vector<2x512xf32>
      %14 = arith.addf %10, %13 : vector<2x512xf32>
      %c0_10 = arith.constant 0 : index
      %c0_11 = arith.constant 0 : index
      %15 = vector.load %arg3[%c0_10, %c0_11] : memref<1x512xf32, #tpu.memory_space<vmem>>, vector<1x512xf32>
      %16 = vector.broadcast %15 : vector<1x512xf32> to vector<2x512xf32>
      %17 = arith.addf %14, %16 : vector<2x512xf32>
      %18 = vector.extract_strided_slice %17 {offsets = [0, 0], sizes = [2, 384], strides = [1, 1]} : vector<2x512xf32> to vector<2x384xf32>
      %19 = arith.negf %18 : vector<2x384xf32>
      %20 = math.exp %19 : vector<2x384xf32>
      %cst_12 = arith.constant 1.000000e+00 : f32
      %21 = vector.broadcast %cst_12 : f32 to vector<2x384xf32>
      %22 = arith.addf %21, %20 : vector<2x384xf32>
      %23 = arith.divf %21, %22 : vector<2x384xf32>
      %24 = vector.extract_strided_slice %17 {offsets = [0, 384], sizes = [2, 128], strides = [1, 1]} : vector<2x512xf32> to vector<2x128xf32>
      %25 = math.tanh %24 : vector<2x128xf32>
      %26 = vector.extract_strided_slice %23 {offsets = [0, 128], sizes = [2, 128], strides = [1, 1]} : vector<2x384xf32> to vector<2x128xf32>
      %27 = arith.mulf %26, %arg9 : vector<2x128xf32>
      %28 = vector.extract_strided_slice %23 {offsets = [0, 0], sizes = [2, 128], strides = [1, 1]} : vector<2x384xf32> to vector<2x128xf32>
      %29 = arith.mulf %28, %25 : vector<2x128xf32>
      %30 = arith.addf %27, %29 : vector<2x128xf32>
      %31 = vector.extract_strided_slice %23 {offsets = [0, 256], sizes = [2, 128], strides = [1, 1]} : vector<2x384xf32> to vector<2x128xf32>
      %32 = math.tanh %30 : vector<2x128xf32>
      %33 = arith.mulf %31, %32 : vector<2x128xf32>
      %cst_13 = arith.constant 0.000000e+00 : f32
      %34 = vector.broadcast %cst_13 : f32 to vector<2x128xf32>
      %35 = arith.cmpf ogt, %33, %34 : vector<2x128xf32>
      %cst_14 = arith.constant 2.000000e-01 : f32
      %36 = vector.broadcast %cst_14 : f32 to vector<2x128xf32>
      %37 = arith.mulf %36, %33 : vector<2x128xf32>
      %38 = arith.select %35, %33, %37 : vector<2x128xi1>, vector<2x128xf32>
      %39 = arith.truncf %38 : vector<2x128xf32> to vector<2x128xbf16>
      %c0_15 = arith.constant 0 : index
      %c0_16 = arith.constant 0 : index
      %40 = vector.load %arg4[%c0_15, %c0_16] : memref<128x128xbf16, #tpu.memory_space<vmem>>, vector<128x128xbf16>
      %cst_17 = arith.constant dense<0.000000e+00> : vector<2x128xf32>
      %41 = tpu.matmul %39, %40, %cst_17 {dimension_numbers = #tpu.dot_dimension_numbers<[1], [0], [0], [1], [0, 0, 1, 1], [], []>} : vector<2x128xbf16>, vector<128x128xbf16>, vector<2x128xf32> -> vector<2x128xf32>
      %c0_18 = arith.constant 0 : index
      %c0_19 = arith.constant 0 : index
      %42 = vector.load %arg5[%c0_18, %c0_19] : memref<1x128xf32, #tpu.memory_space<vmem>>, vector<1x128xf32>
      %43 = vector.broadcast %42 : vector<1x128xf32> to vector<2x128xf32>
      %44 = arith.addf %41, %43 : vector<2x128xf32>
      %45 = math.tanh %44 : vector<2x128xf32>
      %46 = arith.index_cast %5 : i32 to index
      %c0_20 = arith.constant 0 : index
      %c0_21 = arith.constant 0 : index
      %47 = vector.load %arg6[%46, %c0_20, %c0_21] : memref<100x2x128xf32, #tpu.memory_space<vmem>>, vector<1x2x128xf32>
      %48 = vector.shape_cast %47 : vector<1x2x128xf32> to vector<2x128xf32>
      %49 = vector.shape_cast %45 : vector<2x128xf32> to vector<1x2x128xf32>
      tpu.vector_store %arg6[%46, %c0_20, %c0_21], %49 {strides = array<i32>} : memref<100x2x128xf32, #tpu.memory_space<vmem>>, vector<1x2x128xf32>,
      %c1_i32_22 = arith.constant 1 : i32
      %50 = arith.addi %4, %c1_i32_22 : i32
      %51 = arith.index_cast %50 : i32 to index
      %c0_23 = arith.constant 0 : index
      %c0_24 = arith.constant 0 : index
      %52 = vector.load %arg0[%51, %c0_23, %c0_24] : memref<100x2x40xbf16, #tpu.memory_space<vmem>>, vector<1x2x40xbf16>
      %53 = vector.shape_cast %52 : vector<1x2x40xbf16> to vector<2x40xbf16>
      %c0_25 = arith.constant 0 : index
      %c0_26 = arith.constant 0 : index
      %54 = vector.load %arg1[%c0_25, %c0_26] : memref<40x512xbf16, #tpu.memory_space<vmem>>, vector<40x512xbf16>
      %cst_27 = arith.constant dense<0.000000e+00> : vector<2x512xf32>
      %55 = tpu.matmul %53, %54, %cst_27 {dimension_numbers = #tpu.dot_dimension_numbers<[1], [0], [0], [1], [0, 0, 1, 1], [], []>} : vector<2x40xbf16>, vector<40x512xbf16>, vector<2x512xf32> -> vector<2x512xf32>
      %56 = arith.truncf %33 : vector<2x128xf32> to vector<2x128xbf16>
      %c0_28 = arith.constant 0 : index
      %c0_29 = arith.constant 0 : index
      %57 = vector.load %arg2[%c0_28, %c0_29] : memref<128x512xbf16, #tpu.memory_space<vmem>>, vector<128x512xbf16>
      %cst_30 = arith.constant dense<0.000000e+00> : vector<2x512xf32>
      %58 = tpu.matmul %56, %57, %cst_30 {dimension_numbers = #tpu.dot_dimension_numbers<[1], [0], [0], [1], [0, 0, 1, 1], [], []>} : vector<2x128xbf16>, vector<128x512xbf16>, vector<2x512xf32> -> vector<2x512xf32>
      %59 = arith.addf %55, %58 : vector<2x512xf32>
      %c0_31 = arith.constant 0 : index
      %c0_32 = arith.constant 0 : index
      %60 = vector.load %arg3[%c0_31, %c0_32] : memref<1x512xf32, #tpu.memory_space<vmem>>, vector<1x512xf32>
      %61 = vector.broadcast %60 : vector<1x512xf32> to vector<2x512xf32>
      %62 = arith.addf %59, %61 : vector<2x512xf32>
      %63 = vector.extract_strided_slice %62 {offsets = [0, 0], sizes = [2, 384], strides = [1, 1]} : vector<2x512xf32> to vector<2x384xf32>
      %64 = arith.negf %63 : vector<2x384xf32>
      %65 = math.exp %64 : vector<2x384xf32>
      %cst_33 = arith.constant 1.000000e+00 : f32
      %66 = vector.broadcast %cst_33 : f32 to vector<2x384xf32>
      %67 = arith.addf %66, %65 : vector<2x384xf32>
      %68 = arith.divf %66, %67 : vector<2x384xf32>
      %69 = vector.extract_strided_slice %62 {offsets = [0, 384], sizes = [2, 128], strides = [1, 1]} : vector<2x512xf32> to vector<2x128xf32>
      %70 = math.tanh %69 : vector<2x128xf32>
      %71 = vector.extract_strided_slice %68 {offsets = [0, 128], sizes = [2, 128], strides = [1, 1]} : vector<2x384xf32> to vector<2x128xf32>
      %72 = arith.mulf %71, %30 : vector<2x128xf32>
      %73 = vector.extract_strided_slice %68 {offsets = [0, 0], sizes = [2, 128], strides = [1, 1]} : vector<2x384xf32> to vector<2x128xf32>
      %74 = arith.mulf %73, %70 : vector<2x128xf32>
      %75 = arith.addf %72, %74 : vector<2x128xf32>
      %76 = vector.extract_strided_slice %68 {offsets = [0, 256], sizes = [2, 128], strides = [1, 1]} : vector<2x384xf32> to vector<2x128xf32>
      %77 = math.tanh %75 : vector<2x128xf32>
      %78 = arith.mulf %76, %77 : vector<2x128xf32>
      %cst_34 = arith.constant 0.000000e+00 : f32
      %79 = vector.broadcast %cst_34 : f32 to vector<2x128xf32>
      %80 = arith.cmpf ogt, %78, %79 : vector<2x128xf32>
      %cst_35 = arith.constant 2.000000e-01 : f32
      %81 = vector.broadcast %cst_35 : f32 to vector<2x128xf32>
      %82 = arith.mulf %81, %78 : vector<2x128xf32>
      %83 = arith.select %80, %78, %82 : vector<2x128xi1>, vector<2x128xf32>
      %84 = arith.truncf %83 : vector<2x128xf32> to vector<2x128xbf16>
      %c0_36 = arith.constant 0 : index
      %c0_37 = arith.constant 0 : index
      %85 = vector.load %arg4[%c0_36, %c0_37] : memref<128x128xbf16, #tpu.memory_space<vmem>>, vector<128x128xbf16>
      %cst_38 = arith.constant dense<0.000000e+00> : vector<2x128xf32>
      %86 = tpu.matmul %84, %85, %cst_38 {dimension_numbers = #tpu.dot_dimension_numbers<[1], [0], [0], [1], [0, 0, 1, 1], [], []>} : vector<2x128xbf16>, vector<128x128xbf16>, vector<2x128xf32> -> vector<2x128xf32>
      %c0_39 = arith.constant 0 : index
      %c0_40 = arith.constant 0 : index
      %87 = vector.load %arg5[%c0_39, %c0_40] : memref<1x128xf32, #tpu.memory_space<vmem>>, vector<1x128xf32>
      %88 = vector.broadcast %87 : vector<1x128xf32> to vector<2x128xf32>
      %89 = arith.addf %86, %88 : vector<2x128xf32>
      %90 = math.tanh %89 : vector<2x128xf32>
      %91 = arith.index_cast %50 : i32 to index
      %c0_41 = arith.constant 0 : index
      %c0_42 = arith.constant 0 : index
      %92 = vector.load %arg6[%91, %c0_41, %c0_42] : memref<100x2x128xf32, #tpu.memory_space<vmem>>, vector<1x2x128xf32>
      %93 = vector.shape_cast %92 : vector<1x2x128xf32> to vector<2x128xf32>
      %94 = vector.shape_cast %90 : vector<2x128xf32> to vector<1x2x128xf32>
      tpu.vector_store %arg6[%91, %c0_41, %c0_42], %94 {strides = array<i32>} : memref<100x2x128xf32, #tpu.memory_space<vmem>>, vector<1x2x128xf32>,
      %c2_i32 = arith.constant 2 : i32
      %95 = arith.addi %4, %c2_i32 : i32
      %96 = arith.index_cast %95 : i32 to index
      %c0_43 = arith.constant 0 : index
      %c0_44 = arith.constant 0 : index
      %97 = vector.load %arg0[%96, %c0_43, %c0_44] : memref<100x2x40xbf16, #tpu.memory_space<vmem>>, vector<1x2x40xbf16>
      %98 = vector.shape_cast %97 : vector<1x2x40xbf16> to vector<2x40xbf16>
      %c0_45 = arith.constant 0 : index
      %c0_46 = arith.constant 0 : index
      %99 = vector.load %arg1[%c0_45, %c0_46] : memref<40x512xbf16, #tpu.memory_space<vmem>>, vector<40x512xbf16>
      %cst_47 = arith.constant dense<0.000000e+00> : vector<2x512xf32>
      %100 = tpu.matmul %98, %99, %cst_47 {dimension_numbers = #tpu.dot_dimension_numbers<[1], [0], [0], [1], [0, 0, 1, 1], [], []>} : vector<2x40xbf16>, vector<40x512xbf16>, vector<2x512xf32> -> vector<2x512xf32>
      %101 = arith.truncf %78 : vector<2x128xf32> to vector<2x128xbf16>
      %c0_48 = arith.constant 0 : index
      %c0_49 = arith.constant 0 : index
      %102 = vector.load %arg2[%c0_48, %c0_49] : memref<128x512xbf16, #tpu.memory_space<vmem>>, vector<128x512xbf16>
      %cst_50 = arith.constant dense<0.000000e+00> : vector<2x512xf32>
      %103 = tpu.matmul %101, %102, %cst_50 {dimension_numbers = #tpu.dot_dimension_numbers<[1], [0], [0], [1], [0, 0, 1, 1], [], []>} : vector<2x128xbf16>, vector<128x512xbf16>, vector<2x512xf32> -> vector<2x512xf32>
      %104 = arith.addf %100, %103 : vector<2x512xf32>
      %c0_51 = arith.constant 0 : index
      %c0_52 = arith.constant 0 : index
      %105 = vector.load %arg3[%c0_51, %c0_52] : memref<1x512xf32, #tpu.memory_space<vmem>>, vector<1x512xf32>
      %106 = vector.broadcast %105 : vector<1x512xf32> to vector<2x512xf32>
      %107 = arith.addf %104, %106 : vector<2x512xf32>
      %108 = vector.extract_strided_slice %107 {offsets = [0, 0], sizes = [2, 384], strides = [1, 1]} : vector<2x512xf32> to vector<2x384xf32>
      %109 = arith.negf %108 : vector<2x384xf32>
      %110 = math.exp %109 : vector<2x384xf32>
      %cst_53 = arith.constant 1.000000e+00 : f32
      %111 = vector.broadcast %cst_53 : f32 to vector<2x384xf32>
      %112 = arith.addf %111, %110 : vector<2x384xf32>
      %113 = arith.divf %111, %112 : vector<2x384xf32>
      %114 = vector.extract_strided_slice %107 {offsets = [0, 384], sizes = [2, 128], strides = [1, 1]} : vector<2x512xf32> to vector<2x128xf32>
      %115 = math.tanh %114 : vector<2x128xf32>
      %116 = vector.extract_strided_slice %113 {offsets = [0, 128], sizes = [2, 128], strides = [1, 1]} : vector<2x384xf32> to vector<2x128xf32>
      %117 = arith.mulf %116, %75 : vector<2x128xf32>
      %118 = vector.extract_strided_slice %113 {offsets = [0, 0], sizes = [2, 128], strides = [1, 1]} : vector<2x384xf32> to vector<2x128xf32>
      %119 = arith.mulf %118, %115 : vector<2x128xf32>
      %120 = arith.addf %117, %119 : vector<2x128xf32>
      %121 = vector.extract_strided_slice %113 {offsets = [0, 256], sizes = [2, 128], strides = [1, 1]} : vector<2x384xf32> to vector<2x128xf32>
      %122 = math.tanh %120 : vector<2x128xf32>
      %123 = arith.mulf %121, %122 : vector<2x128xf32>
      %cst_54 = arith.constant 0.000000e+00 : f32
      %124 = vector.broadcast %cst_54 : f32 to vector<2x128xf32>
      %125 = arith.cmpf ogt, %123, %124 : vector<2x128xf32>
      %cst_55 = arith.constant 2.000000e-01 : f32
      %126 = vector.broadcast %cst_55 : f32 to vector<2x128xf32>
      %127 = arith.mulf %126, %123 : vector<2x128xf32>
      %128 = arith.select %125, %123, %127 : vector<2x128xi1>, vector<2x128xf32>
      %129 = arith.truncf %128 : vector<2x128xf32> to vector<2x128xbf16>
      %c0_56 = arith.constant 0 : index
      %c0_57 = arith.constant 0 : index
      %130 = vector.load %arg4[%c0_56, %c0_57] : memref<128x128xbf16, #tpu.memory_space<vmem>>, vector<128x128xbf16>
      %cst_58 = arith.constant dense<0.000000e+00> : vector<2x128xf32>
      %131 = tpu.matmul %129, %130, %cst_58 {dimension_numbers = #tpu.dot_dimension_numbers<[1], [0], [0], [1], [0, 0, 1, 1], [], []>} : vector<2x128xbf16>, vector<128x128xbf16>, vector<2x128xf32> -> vector<2x128xf32>
      %c0_59 = arith.constant 0 : index
      %c0_60 = arith.constant 0 : index
      %132 = vector.load %arg5[%c0_59, %c0_60] : memref<1x128xf32, #tpu.memory_space<vmem>>, vector<1x128xf32>
      %133 = vector.broadcast %132 : vector<1x128xf32> to vector<2x128xf32>
      %134 = arith.addf %131, %133 : vector<2x128xf32>
      %135 = math.tanh %134 : vector<2x128xf32>
      %136 = arith.index_cast %95 : i32 to index
      %c0_61 = arith.constant 0 : index
      %c0_62 = arith.constant 0 : index
      %137 = vector.load %arg6[%136, %c0_61, %c0_62] : memref<100x2x128xf32, #tpu.memory_space<vmem>>, vector<1x2x128xf32>
      %138 = vector.shape_cast %137 : vector<1x2x128xf32> to vector<2x128xf32>
      %139 = vector.shape_cast %135 : vector<2x128xf32> to vector<1x2x128xf32>
      tpu.vector_store %arg6[%136, %c0_61, %c0_62], %139 {strides = array<i32>} : memref<100x2x128xf32, #tpu.memory_space<vmem>>, vector<1x2x128xf32>,
      %c3_i32 = arith.constant 3 : i32
      %140 = arith.addi %4, %c3_i32 : i32
      %141 = arith.index_cast %140 : i32 to index
      %c0_63 = arith.constant 0 : index
      %c0_64 = arith.constant 0 : index
      %142 = vector.load %arg0[%141, %c0_63, %c0_64] : memref<100x2x40xbf16, #tpu.memory_space<vmem>>, vector<1x2x40xbf16>
      %143 = vector.shape_cast %142 : vector<1x2x40xbf16> to vector<2x40xbf16>
      %c0_65 = arith.constant 0 : index
      %c0_66 = arith.constant 0 : index
      %144 = vector.load %arg1[%c0_65, %c0_66] : memref<40x512xbf16, #tpu.memory_space<vmem>>, vector<40x512xbf16>
      %cst_67 = arith.constant dense<0.000000e+00> : vector<2x512xf32>
      %145 = tpu.matmul %143, %144, %cst_67 {dimension_numbers = #tpu.dot_dimension_numbers<[1], [0], [0], [1], [0, 0, 1, 1], [], []>} : vector<2x40xbf16>, vector<40x512xbf16>, vector<2x512xf32> -> vector<2x512xf32>
      %146 = arith.truncf %123 : vector<2x128xf32> to vector<2x128xbf16>
      %c0_68 = arith.constant 0 : index
      %c0_69 = arith.constant 0 : index
      %147 = vector.load %arg2[%c0_68, %c0_69] : memref<128x512xbf16, #tpu.memory_space<vmem>>, vector<128x512xbf16>
      %cst_70 = arith.constant dense<0.000000e+00> : vector<2x512xf32>
      %148 = tpu.matmul %146, %147, %cst_70 {dimension_numbers = #tpu.dot_dimension_numbers<[1], [0], [0], [1], [0, 0, 1, 1], [], []>} : vector<2x128xbf16>, vector<128x512xbf16>, vector<2x512xf32> -> vector<2x512xf32>
      %149 = arith.addf %145, %148 : vector<2x512xf32>
      %c0_71 = arith.constant 0 : index
      %c0_72 = arith.constant 0 : index
      %150 = vector.load %arg3[%c0_71, %c0_72] : memref<1x512xf32, #tpu.memory_space<vmem>>, vector<1x512xf32>
      %151 = vector.broadcast %150 : vector<1x512xf32> to vector<2x512xf32>
      %152 = arith.addf %149, %151 : vector<2x512xf32>
      %153 = vector.extract_strided_slice %152 {offsets = [0, 0], sizes = [2, 384], strides = [1, 1]} : vector<2x512xf32> to vector<2x384xf32>
      %154 = arith.negf %153 : vector<2x384xf32>
      %155 = math.exp %154 : vector<2x384xf32>
      %cst_73 = arith.constant 1.000000e+00 : f32
      %156 = vector.broadcast %cst_73 : f32 to vector<2x384xf32>
      %157 = arith.addf %156, %155 : vector<2x384xf32>
      %158 = arith.divf %156, %157 : vector<2x384xf32>
      %159 = vector.extract_strided_slice %152 {offsets = [0, 384], sizes = [2, 128], strides = [1, 1]} : vector<2x512xf32> to vector<2x128xf32>
      %160 = math.tanh %159 : vector<2x128xf32>
      %161 = vector.extract_strided_slice %158 {offsets = [0, 128], sizes = [2, 128], strides = [1, 1]} : vector<2x384xf32> to vector<2x128xf32>
      %162 = arith.mulf %161, %120 : vector<2x128xf32>
      %163 = vector.extract_strided_slice %158 {offsets = [0, 0], sizes = [2, 128], strides = [1, 1]} : vector<2x384xf32> to vector<2x128xf32>
      %164 = arith.mulf %163, %160 : vector<2x128xf32>
      %165 = arith.addf %162, %164 : vector<2x128xf32>
      %166 = vector.extract_strided_slice %158 {offsets = [0, 256], sizes = [2, 128], strides = [1, 1]} : vector<2x384xf32> to vector<2x128xf32>
      %167 = math.tanh %165 : vector<2x128xf32>
      %168 = arith.mulf %166, %167 : vector<2x128xf32>
      %cst_74 = arith.constant 0.000000e+00 : f32
      %169 = vector.broadcast %cst_74 : f32 to vector<2x128xf32>
      %170 = arith.cmpf ogt, %168, %169 : vector<2x128xf32>
      %cst_75 = arith.constant 2.000000e-01 : f32
      %171 = vector.broadcast %cst_75 : f32 to vector<2x128xf32>
      %172 = arith.mulf %171, %168 : vector<2x128xf32>
      %173 = arith.select %170, %168, %172 : vector<2x128xi1>, vector<2x128xf32>
      %174 = arith.truncf %173 : vector<2x128xf32> to vector<2x128xbf16>
      %c0_76 = arith.constant 0 : index
      %c0_77 = arith.constant 0 : index
      %175 = vector.load %arg4[%c0_76, %c0_77] : memref<128x128xbf16, #tpu.memory_space<vmem>>, vector<128x128xbf16>
      %cst_78 = arith.constant dense<0.000000e+00> : vector<2x128xf32>
      %176 = tpu.matmul %174, %175, %cst_78 {dimension_numbers = #tpu.dot_dimension_numbers<[1], [0], [0], [1], [0, 0, 1, 1], [], []>} : vector<2x128xbf16>, vector<128x128xbf16>, vector<2x128xf32> -> vector<2x128xf32>
      %c0_79 = arith.constant 0 : index
      %c0_80 = arith.constant 0 : index
      %177 = vector.load %arg5[%c0_79, %c0_80] : memref<1x128xf32, #tpu.memory_space<vmem>>, vector<1x128xf32>
      %178 = vector.broadcast %177 : vector<1x128xf32> to vector<2x128xf32>
      %179 = arith.addf %176, %178 : vector<2x128xf32>
      %180 = math.tanh %179 : vector<2x128xf32>
      %181 = arith.index_cast %140 : i32 to index
      %c0_81 = arith.constant 0 : index
      %c0_82 = arith.constant 0 : index
      %182 = vector.load %arg6[%181, %c0_81, %c0_82] : memref<100x2x128xf32, #tpu.memory_space<vmem>>, vector<1x2x128xf32>
      %183 = vector.shape_cast %182 : vector<1x2x128xf32> to vector<2x128xf32>
      %184 = vector.shape_cast %180 : vector<2x128xf32> to vector<1x2x128xf32>
      tpu.vector_store %arg6[%181, %c0_81, %c0_82], %184 {strides = array<i32>} : memref<100x2x128xf32, #tpu.memory_space<vmem>>, vector<1x2x128xf32>,
      %c4_i32 = arith.constant 4 : i32
      %185 = arith.addi %4, %c4_i32 : i32
      %186 = arith.index_cast %185 : i32 to index
      %c0_83 = arith.constant 0 : index
      %c0_84 = arith.constant 0 : index
      %187 = vector.load %arg0[%186, %c0_83, %c0_84] : memref<100x2x40xbf16, #tpu.memory_space<vmem>>, vector<1x2x40xbf16>
      %188 = vector.shape_cast %187 : vector<1x2x40xbf16> to vector<2x40xbf16>
      %c0_85 = arith.constant 0 : index
      %c0_86 = arith.constant 0 : index
      %189 = vector.load %arg1[%c0_85, %c0_86] : memref<40x512xbf16, #tpu.memory_space<vmem>>, vector<40x512xbf16>
      %cst_87 = arith.constant dense<0.000000e+00> : vector<2x512xf32>
      %190 = tpu.matmul %188, %189, %cst_87 {dimension_numbers = #tpu.dot_dimension_numbers<[1], [0], [0], [1], [0, 0, 1, 1], [], []>} : vector<2x40xbf16>, vector<40x512xbf16>, vector<2x512xf32> -> vector<2x512xf32>
      %191 = arith.truncf %168 : vector<2x128xf32> to vector<2x128xbf16>
      %c0_88 = arith.constant 0 : index
      %c0_89 = arith.constant 0 : index
      %192 = vector.load %arg2[%c0_88, %c0_89] : memref<128x512xbf16, #tpu.memory_space<vmem>>, vector<128x512xbf16>
      %cst_90 = arith.constant dense<0.000000e+00> : vector<2x512xf32>
      %193 = tpu.matmul %191, %192, %cst_90 {dimension_numbers = #tpu.dot_dimension_numbers<[1], [0], [0], [1], [0, 0, 1, 1], [], []>} : vector<2x128xbf16>, vector<128x512xbf16>, vector<2x512xf32> -> vector<2x512xf32>
      %194 = arith.addf %190, %193 : vector<2x512xf32>
      %c0_91 = arith.constant 0 : index
      %c0_92 = arith.constant 0 : index
      %195 = vector.load %arg3[%c0_91, %c0_92] : memref<1x512xf32, #tpu.memory_space<vmem>>, vector<1x512xf32>
      %196 = vector.broadcast %195 : vector<1x512xf32> to vector<2x512xf32>
      %197 = arith.addf %194, %196 : vector<2x512xf32>
      %198 = vector.extract_strided_slice %197 {offsets = [0, 0], sizes = [2, 384], strides = [1, 1]} : vector<2x512xf32> to vector<2x384xf32>
      %199 = arith.negf %198 : vector<2x384xf32>
      %200 = math.exp %199 : vector<2x384xf32>
      %cst_93 = arith.constant 1.000000e+00 : f32
      %201 = vector.broadcast %cst_93 : f32 to vector<2x384xf32>
      %202 = arith.addf %201, %200 : vector<2x384xf32>
      %203 = arith.divf %201, %202 : vector<2x384xf32>
      %204 = vector.extract_strided_slice %197 {offsets = [0, 384], sizes = [2, 128], strides = [1, 1]} : vector<2x512xf32> to vector<2x128xf32>
      %205 = math.tanh %204 : vector<2x128xf32>
      %206 = vector.extract_strided_slice %203 {offsets = [0, 128], sizes = [2, 128], strides = [1, 1]} : vector<2x384xf32> to vector<2x128xf32>
      %207 = arith.mulf %206, %165 : vector<2x128xf32>
      %208 = vector.extract_strided_slice %203 {offsets = [0, 0], sizes = [2, 128], strides = [1, 1]} : vector<2x384xf32> to vector<2x128xf32>
      %209 = arith.mulf %208, %205 : vector<2x128xf32>
      %210 = arith.addf %207, %209 : vector<2x128xf32>
      %211 = vector.extract_strided_slice %203 {offsets = [0, 256], sizes = [2, 128], strides = [1, 1]} : vector<2x384xf32> to vector<2x128xf32>
      %212 = math.tanh %210 : vector<2x128xf32>
      %213 = arith.mulf %211, %212 : vector<2x128xf32>
      %cst_94 = arith.constant 0.000000e+00 : f32
      %214 = vector.broadcast %cst_94 : f32 to vector<2x128xf32>
      %215 = arith.cmpf ogt, %213, %214 : vector<2x128xf32>
      %cst_95 = arith.constant 2.000000e-01 : f32
      %216 = vector.broadcast %cst_95 : f32 to vector<2x128xf32>
      %217 = arith.mulf %216, %213 : vector<2x128xf32>
      %218 = arith.select %215, %213, %217 : vector<2x128xi1>, vector<2x128xf32>
      %219 = arith.truncf %218 : vector<2x128xf32> to vector<2x128xbf16>
      %c0_96 = arith.constant 0 : index
      %c0_97 = arith.constant 0 : index
      %220 = vector.load %arg4[%c0_96, %c0_97] : memref<128x128xbf16, #tpu.memory_space<vmem>>, vector<128x128xbf16>
      %cst_98 = arith.constant dense<0.000000e+00> : vector<2x128xf32>
      %221 = tpu.matmul %219, %220, %cst_98 {dimension_numbers = #tpu.dot_dimension_numbers<[1], [0], [0], [1], [0, 0, 1, 1], [], []>} : vector<2x128xbf16>, vector<128x128xbf16>, vector<2x128xf32> -> vector<2x128xf32>
      %c0_99 = arith.constant 0 : index
      %c0_100 = arith.constant 0 : index
      %222 = vector.load %arg5[%c0_99, %c0_100] : memref<1x128xf32, #tpu.memory_space<vmem>>, vector<1x128xf32>
      %223 = vector.broadcast %222 : vector<1x128xf32> to vector<2x128xf32>
      %224 = arith.addf %221, %223 : vector<2x128xf32>
      %225 = math.tanh %224 : vector<2x128xf32>
      %226 = arith.index_cast %185 : i32 to index
      %c0_101 = arith.constant 0 : index
      %c0_102 = arith.constant 0 : index
      %227 = vector.load %arg6[%226, %c0_101, %c0_102] : memref<100x2x128xf32, #tpu.memory_space<vmem>>, vector<1x2x128xf32>
      %228 = vector.shape_cast %227 : vector<1x2x128xf32> to vector<2x128xf32>
      %229 = vector.shape_cast %225 : vector<2x128xf32> to vector<1x2x128xf32>
      tpu.vector_store %arg6[%226, %c0_101, %c0_102], %229 {strides = array<i32>} : memref<100x2x128xf32, #tpu.memory_space<vmem>>, vector<1x2x128xf32>,
      scf.yield %213, %210 : vector<2x128xf32>, vector<2x128xf32>
    }
    %c20_i32_1 = arith.constant 20 : i32
    return
  }
}

</mosaic_0001>

<bundles_post_ra>
// kernel: generator_forward.3
= control target key start
LH: loop header
LB: loop body
LE: loop exit
PB: predicated region body
PF: predicated region fallthrough
CT: control target
= control target key end

     0   :  { %v3906_v0 = vmov 0.0   ;;  %v3908_v1 = vmov 0.0   ;;  %s3910_s21 = smov 0   ;;  %s4889_s0 = inlined_call_operand.vmem [shape: bf16[100,2,40], index: 0, kind: input, shape index: {}]   ;;  %s4890_s1 = inlined_call_operand.vmem [shape: bf16[40,512], index: 1, kind: input, shape index: {}]   ;;  %s4891_s2 = inlined_call_operand.vmem [shape: bf16[128,512], index: 2, kind: input, shape index: {}]   ;;  %s4892_s3 = inlined_call_operand.vmem [shape: f32[1,512], index: 3, kind: input, shape index: {}]   ;;  %s4893_s4 = inlined_call_operand.vmem [shape: bf16[128,128], index: 4, kind: input, shape index: {}]   ;;  %s4894_s5 = inlined_call_operand.vmem [shape: f32[1,128], index: 5, kind: input, shape index: {}]   ;;  %s4895_s6 = inlined_call_operand.vmem [shape: f32[100,2,128], index: 6, kind: output, shape index: {}]  }
   0x1 LB: > { %v3924_v2 = vld [vmem:[%s4891_s2 + $0xc] ss:$16 sps:$4 sm:$0xff]   ;;  %v3929_v3 = vld [vmem:[%s4891_s2 + $0x8] ss:$16 sps:$4 sm:$0xff]   ;;  %v4898_v4 = vmov 0   ;;  %vm374_vm0 = vcmask 1043456   ;;  %v45_v37 = vpack.c.bf16 %v3862_v1, %v3862_v1  ;;  %v471_v62 = vlaneseq  ;;  %s3866_s21 = sphi %s3910_s21, %s29_s21   ;;  %v3862_v1 = vphi %v3908_v1, %v2934_v1   ;;  %v3858_v0 = vphi %v3906_v0, %v2932_v0  }
   0x2   : > { %311 = vmatprep.mubr.bf16.mxu1 %v4898_v4  ;;  %270 = vmatprep.mubr.bf16.mxu0 %v4898_v4  ;;  %v3937_v5 = vld [vmem:[%s4891_s2 + $0x2c] ss:$16 sps:$4 sm:$0xff]   ;;  %v3943_v6 = vld [vmem:[%s4891_s2 + $0x28] ss:$16 sps:$4 sm:$0xff]   ;;  %v3954_v8 = vld [vmem:[%s4891_s2 + $0x4] ss:$16 sps:$4 sm:$0xff]  }
   0x3   : > { %279 = vmatprep.subr.bf16.mxu1 %v3924_v2  ;;  %v3949_v7 = vld [vmem:[%s4891_s2 + $0x4c] ss:$16 sps:$4 sm:$0xff]   ;;  %v3959_v9 = vld [vmem:[%s4891_s2] ss:$16 sps:$4 sm:$0xff]   ;;  %238 = vmatprep.subr.bf16.mxu0 %v3954_v8  ;;  %v3966_v10 = vld [vmem:[%s4891_s2 + $0x48] ss:$16 sps:$4 sm:$0xff]  }
   0x4   : > { %280 = vmatpush1.bf16.msra.mxu1 %v3929_v3  ;;  %239 = vmatpush1.bf16.msra.mxu0 %v3959_v9  ;;  %v3972_v11 = vld [vmem:[%s4891_s2 + $0x24] ss:$16 sps:$4 sm:$0xff]   ;;  %v3977_v12 = vld [vmem:[%s4891_s2 + $0x20] ss:$16 sps:$4 sm:$0xff]   ;;  %v3983_v13 = vld [vmem:[%s4891_s2 + $0x6c] ss:$16 sps:$4 sm:$0xff]  }
   0x5   : > { %281 = vmatprep.subr.bf16.mxu1 %v3937_v5  ;;  %240 = vmatprep.subr.bf16.mxu0 %v3972_v11  ;;  %v3989_v14 = vld [vmem:[%s4891_s2 + $0x44] ss:$16 sps:$4 sm:$0xff]   ;;  %v3994_v15 = vld [vmem:[%s4891_s2 + $0x68] ss:$16 sps:$4 sm:$0xff]   ;;  %v4001_v16 = vld [vmem:[%s4891_s2 + $0x40] ss:$16 sps:$4 sm:$0xff]  }
   0x6   : > { %v4007_v17 = vld [vmem:[%s4891_s2 + $0x8c] ss:$16 sps:$4 sm:$0xff]   ;;  %v4013_v18 = vld [vmem:[%s4891_s2 + $0x64] ss:$16 sps:$4 sm:$0xff]   ;;  %v4019_v19 = vld [vmem:[%s4891_s2 + $0x88] ss:$16 sps:$4 sm:$0xff]  }
   0x7   : > { %v4025_v20 = vld [vmem:[%s4891_s2 + $0xac] ss:$16 sps:$4 sm:$0xff]   ;;  %v4030_v21 = vld [vmem:[%s4891_s2 + $0x60] ss:$16 sps:$4 sm:$0xff]   ;;  %v4037_v22 = vld [vmem:[%s4891_s2 + $0x84] ss:$16 sps:$4 sm:$0xff]  }
   0x8   : > { %282 = vmatpush1.bf16.msra.mxu1 %v3943_v6  ;;  %241 = vmatpush1.bf16.msra.mxu0 %v3977_v12  ;;  %v4042_v23 = vld [vmem:[%s4891_s2 + $0xa8] ss:$16 sps:$4 sm:$0xff]   ;;  %v4049_v24 = vld [vmem:[%s4891_s2 + $0xcc] ss:$16 sps:$4 sm:$0xff]   ;;  %v4054_v25 = vld [vmem:[%s4891_s2 + $0x80] ss:$16 sps:$4 sm:$0xff]  }
   0x9   : > { %283 = vmatprep.subr.bf16.mxu1 %v3949_v7  ;;  %242 = vmatprep.subr.bf16.mxu0 %v3989_v14  ;;  %v4061_v26 = vld [vmem:[%s4891_s2 + $0xa4] ss:$16 sps:$4 sm:$0xff]   ;;  %v4067_v27 = vld [vmem:[%s4891_s2 + $0xc8] ss:$16 sps:$4 sm:$0xff]   ;;  %v4073_v28 = vld [vmem:[%s4891_s2 + $0xa0] ss:$16 sps:$4 sm:$0xff]  }
   0xa   : > { %v4079_v29 = vld [vmem:[%s4891_s2 + $0xec] ss:$16 sps:$4 sm:$0xff]   ;;  %v4085_v30 = vld [vmem:[%s4891_s2 + $0xc4] ss:$16 sps:$4 sm:$0xff]   ;;  %v4090_v31 = vld [vmem:[%s4891_s2 + $0xe8] ss:$16 sps:$4 sm:$0xff]  }
   0xb   : > { %v4095_v32 = vld [vmem:[%s4890_s1 + $0x4] ss:$16 sps:$4 sm:$0xff]   ;;  %v4102_v33 = vld [vmem:[%s4891_s2 + $0xc0] ss:$16 sps:$4 sm:$0xff]   ;;  %s32_s23 = smul.u32 5, %s3866_s21  ;;  %vm370_vm1 = vcmask 326656  }
   0xc   : > { %284 = vmatpush1.bf16.msra.mxu1 %v3966_v10  ;;  %243 = vmatpush1.bf16.msra.mxu0 %v4001_v16  ;;  %4907 = vst [vmem:[#allocation2_spill] sm:$0xff] %v4095_v32  ;;  %v4107_v34 = vld [vmem:[%s4891_s2 + $0xe4] ss:$16 sps:$4 sm:$0xff]   ;;  %v4114_v35 = vld [vmem:[%s4890_s1] ss:$16 sps:$4 sm:$0xff]   ;;  %v44_v48 = vld [vmem:[%s4890_s1 + $0x48] sm:$0xff] }
   0xd   : > { %285 = vmatprep.subr.bf16.mxu1 %v3983_v13  ;;  %244 = vmatprep.subr.bf16.mxu0 %v4013_v18  ;;  %4908 = vst [vmem:[#allocation3_spill] sm:$0xff] %v4107_v34  ;;  %v4119_v36 = vld [vmem:[%s4891_s2 + $0xe0] ss:$16 sps:$4 sm:$0xff]   ;;  %v4126_v38 = vld [vmem:[%s4890_s1 + $0x24] ss:$16 sps:$4 sm:$0xff]   ;;  %s4150_s30 = scalar_lea.vmem %s4889_s0, %s32_s23  ;;  %v4188_v50 = vcombine.high %v44_v48, %v44_v48  ;;  %v3143_v51 = vcombine.low %v44_v48, %v44_v48  ;;  %v4896_v54 = vmov 0.0  }
   0xe   : > { %4909 = vst [vmem:[#allocation4_spill] sm:$0xff] %v4119_v36  ;;  %v43_v39 = vld [vmem:[%s4890_s1 + $0x40] sm:$0xff]  ;;  %v4155_v43 = vld [vmem:[%s4890_s1 + $0xc] ss:$16 sps:$4 sm:$0xff]   ;;  %v4167_v46 = vld [vmem:[%s4890_s1 + $0x8] ss:$16 sps:$4 sm:$0xff]  }
   0xf   : > { %v4139_v40 = vld [vmem:[%s4890_s1 + $0x20] ss:$16 sps:$4 sm:$0xff]   ;;  %v4144_v41 = vcombine.high %v43_v39, %v43_v39  ;;  %v3141_v42 = vcombine.low %v43_v39, %v43_v39  ;;  %v4172_v47 = vld [vmem:[%s4890_s1 + $0x2c] ss:$16 sps:$4 sm:$0xff]   ;;  %v4182_v49 = vld [vmem:[%s4890_s1 + $0x28] ss:$16 sps:$4 sm:$0xff]  }
  0x10   : > { %286 = vmatpush1.bf16.msra.mxu1 %v3994_v15  ;;  %245 = vmatpush1.bf16.msra.mxu0 %v4030_v21  ;;  %v34_v45 = vld [vmem:[%s4150_s30] sm:$0x1]  ;;  %v4194_v52 = vsel %vm374_vm0, %v3143_v51, 0  ;;  %v3651_v55 = vld [vmem:[%s4893_s4 + $0x8] sm:$0xff]   ;;  %v3652_v56 = vld [vmem:[%s4893_s4 + $0x10] sm:$0xff]   ;;  %vm3870_vm2 = vmmov 0  }
  0x11   : > { %287 = vmatprep.subr.bf16.mxu1 %v4007_v17  ;;  %246 = vmatprep.subr.bf16.mxu0 %v4037_v22  ;;  %v4161_v44 = vsel %vm374_vm0, %v3141_v42, 0  ;;  %v3650_v53 = vld [vmem:[%s4893_s4] sm:$0xff]   ;;  %v3653_v57 = vld [vmem:[%s4893_s4 + $0x18] sm:$0xff]   ;;  %v3655_v59 = vld [vmem:[%s4893_s4 + $0x28] sm:$0xff]   ;;  %v472_v42 = vshrl.u32 %v471_v62, 7  ;;  %s3161_s13 = smul.u32 10, %s3866_s21 }
  0x12   : > { %v3654_v58 = vld [vmem:[%s4893_s4 + $0x20] sm:$0xff]   ;;  %v3656_v60 = vld [vmem:[%s4893_s4 + $0x30] sm:$0xff]   ;;  %v3657_v61 = vld [vmem:[%s4893_s4 + $0x38] sm:$0xff]   ;;  %s29_s21 = sadd.s32 1, %s3866_s21  }
  0x13   : > { %s4377_s16 = scalar_lea.vmem %s4895_s6, %s3161_s13  ;;  %p26_p0 = scmp.ge.s32.totalorder %s29_s21, 20  }
  0x14   : > { %288 = vmatpush1.bf16.msra.mxu1 %v4019_v19  ;;  %247 = vmatpush1.bf16.msra.mxu0 %v4054_v25 }
  0x15   : > { %289 = vmatprep.subr.bf16.mxu1 %v4025_v20  ;;  %248 = vmatprep.subr.bf16.mxu0 %v4061_v26 }
  0x18   : > { %290 = vmatpush1.bf16.msra.mxu1 %v4042_v23  ;;  %249 = vmatpush1.bf16.msra.mxu0 %v4073_v28 }
  0x19   : > { %291 = vmatprep.subr.bf16.mxu1 %v4049_v24  ;;  %250 = vmatprep.subr.bf16.mxu0 %v4085_v30 }
  0x1c   : > { %292 = vmatpush1.bf16.msra.mxu1 %v4067_v27  ;;  %251 = vmatpush1.bf16.msra.mxu0 %v4102_v33 }
  0x1d   : > { %293 = vmatprep.subr.bf16.mxu1 %v4079_v29  ;;  %252 = vmatprep.subr.bf16.mxu0 %v4107_v34 }
  0x20   : > { %294 = vmatpush1.bf16.msra.mxu1 %v4090_v31  ;;  %253 = vmatpush1.bf16.msra.mxu0 %v4119_v36 }
  0x21   : > { %387 = vmatprep.subr.bf16.mxu1 %v4095_v32  ;;  %3459 = vmatprep.subr.bf16.mxu0 %v4896_v54 }
  0x23   : > { %312 = vmatmul.mubr.bf16.vlgmr.msra.gmra.mrb[0].mxu1 %v45_v37  ;;  %271 = vmatmul.mubr.bf16.vlgmr.msra.gmra.mrb[0].mxu0 %v45_v37 }
  0x24   : > { %388 = vmatpush1.bf16.msra.mxu1 %v4114_v35  ;;  %419 = vmatprep.mubr.bf16.mxu1 %v4898_v4 }
  0x25   : > { %389 = vmatprep.subr.bf16.mxu1 %v4126_v38  ;;  %3460 = vmatpush3.bf16.msra.mxu0 %v3650_v53 }
  0x26   : > { %3461 = vmatprep.subr.bf16.mxu0 %v4896_v54  ;;  %3475 = vmatprep.mubr.msk.bf16.mxu0 %vm3870_vm2, %v4896_v54 }
  0x28   : > { %390 = vmatpush1.bf16.msra.mxu1 %v4139_v40 }
  0x29   : > { %3145 = vmatprep.subr.msk.bf16.mxu1 %vm374_vm0, %v4144_v41  ;;  %3462 = vmatpush3.bf16.msra.mxu0 %v3651_v55  ;;  %v4251_v55 = vsub.s32 0, %v472_v42 }
  0x2a   : > { %3463 = vmatprep.subr.bf16.mxu0 %v4896_v54 }
  0x2b   : > { %4910 = vst [vmem:[#allocation5_spill] sm:$0xff] %v4251_v55 }
  0x2c   : > { %392 = vmatpush1.bf16.msra.mxu1 %v4161_v44 }
  0x2d   : > { %428 = vmatprep.subr.bf16.mxu1 %v4155_v43  ;;  %3464 = vmatpush3.bf16.msra.mxu0 %v3652_v56  ;;  %v4256_v56 = vsub.s32 1, %v472_v42 }
  0x2e   : > { %3465 = vmatprep.subr.bf16.mxu0 %v4896_v54 }
  0x2f   : > { %3146 = vmatmul.mubr.msk.bf16.vlgmr.msra.gmra.mrb[4].mxu1 %vm370_vm1, %v34_v45  ;;  %4911 = vst [vmem:[#allocation6_spill] sm:$0xff] %v4256_v56 }
  0x30   : > { %429 = vmatpush1.bf16.msra.mxu1 %v4167_v46  ;;  %460 = vmatprep.mubr.bf16.mxu1 %v4898_v4 }
  0x31   : > { %430 = vmatprep.subr.bf16.mxu1 %v4172_v47  ;;  %3466 = vmatpush3.bf16.msra.mxu0 %v3653_v57 }
  0x32   : > { %3467 = vmatprep.subr.bf16.mxu0 %v4896_v54 }
  0x34   : > { %431 = vmatpush1.bf16.msra.mxu1 %v4182_v49 }
  0x35   : > { %3147 = vmatprep.subr.msk.bf16.mxu1 %vm374_vm0, %v4188_v50  ;;  %3468 = vmatpush3.bf16.msra.mxu0 %v3654_v58 }
  0x36   : > { %3469 = vmatprep.subr.bf16.mxu0 %v4896_v54 }
  0x38   : > { %433 = vmatpush1.bf16.msra.mxu1 %v4194_v52 }
  0x39   : > { %844 = vmatprep.subr.bf16.mxu1 %v3954_v8  ;;  %3470 = vmatpush3.bf16.msra.mxu0 %v3655_v59 }
  0x3a   : > { %3471 = vmatprep.subr.bf16.mxu0 %v4896_v54 }
  0x3b   : > { %3148 = vmatmul.mubr.msk.bf16.vlgmr.msra.gmra.mrb[8].mxu1 %vm370_vm1, %v34_v45 }
  0x3c   : > { %845 = vmatpush1.bf16.msra.mxu1 %v3959_v9  ;;  %876 = vmatprep.mubr.bf16.mxu1 %v4898_v4 }
  0x3d   : > { %846 = vmatprep.subr.bf16.mxu1 %v3972_v11  ;;  %3472 = vmatpush3.bf16.msra.mxu0 %v3656_v60 }
  0x3e   : > { %3473 = vmatprep.subr.bf16.mxu0 %v4896_v54 }
  0x40   : > { %847 = vmatpush1.bf16.msra.mxu1 %v3977_v12 }
  0x41   : > { %848 = vmatprep.subr.bf16.mxu1 %v3989_v14  ;;  %3474 = vmatpush3.bf16.msra.mxu0 %v3657_v61 }
  0x42   : > { %885 = vmatprep.subr.bf16.mxu0 %v3924_v2  ;;  %v469_v2 = vld [vmem:[%s4892_s3] sm:$0xf] }
  0x43   : > { %v474_v57 = vrot.slane %v469_v2, %v4251_v55  ;;  %v478_v59 = vrot.slane %v469_v2, %v4256_v56 }
  0x44   : > { %849 = vmatpush1.bf16.msra.mxu1 %v4001_v16 }
  0x45   : > { %850 = vmatprep.subr.bf16.mxu1 %v4013_v18 }
  0x48   : > { %851 = vmatpush1.bf16.msra.mxu1 %v4030_v21 }
  0x49   : > { %852 = vmatprep.subr.bf16.mxu1 %v4037_v22 }
  0x4c   : > { %853 = vmatpush1.bf16.msra.mxu1 %v4054_v25 }
  0x4d   : > { %854 = vmatprep.subr.bf16.mxu1 %v4061_v26 }
  0x50   : > { %855 = vmatpush1.bf16.msra.mxu1 %v4073_v28 }
  0x51   : > { %856 = vmatprep.subr.bf16.mxu1 %v4085_v30 }
  0x54   : > { %857 = vmatpush1.bf16.msra.mxu1 %v4102_v33 }
  0x55   : > { %858 = vmatprep.subr.bf16.mxu1 %v4107_v34 }
  0x58   : > { %859 = vmatpush1.bf16.msra.mxu1 %v4119_v36  ;;  %v4262_v36 = vsub.s32 3, %v472_v42 }
  0x59   : > { %991 = vmatprep.subr.bf16.mxu1 %v4095_v32  ;;  %v4260_v32 = vsub.s32 2, %v472_v42 }
  0x5a   : > { %v486_v56 = vrot.slane %v469_v2, %v4262_v36 }
  0x5b   : > { %v482_v55 = vrot.slane %v469_v2, %v4260_v32 }
  0xf6   : > { %v313_v63 = vpop.f32.mrb[0].mxu1  ;;  %v272_v45 = vpop.f32.mrb[0].mxu0 }
  0xf7   : > { %v315_v1 = vpop.f32.mrb[1].mxu1  ;;  %v274_v48 = vpop.f32.mrb[1].mxu0 }
  0xf8   : > { %v317_v37 = vpop.f32.mrb[2].mxu1  ;;  %v276_v51 = vpop.f32.mrb[2].mxu0 }
  0xf9   : > { %v318_v39 = vpop.f32.mrb[3].mxu1  ;;  %v277_v53 = vpop.f32.mrb[3].mxu0 }
 0x102   : > { %v421_v58 = vpop.f32.mrb[4].mxu1 }
 0x103   : > { %v422_v60 = vadd.f32 %v421_v58, %v272_v45  ;;  %v423_v61 = vpop.f32.mrb[5].mxu1 }
 0x104   : > { %v424_v62 = vadd.f32 %v423_v61, %v274_v48  ;;  %v425_v37 = vpop.f32.mrb[6].mxu1 }
 0x105   : > { %v491_v39 = vadd.f32 %v474_v57, %v422_v60  ;;  %v426_v51 = vpop.f32.mrb[7].mxu1 }
 0x106   : > { %v492_v53 = vadd.f32 %v478_v59, %v424_v62 }
 0x107   : > { %v3149_v54 = vmul.f32 -1.442695, %v491_v39 }
 0x108   : > { %v3150_v4 = vmul.f32 -1.442695, %v492_v53 }
 0x109   : > { %3754 = vpow2.f32 %v3149_v54 }
 0x10a   : > { %3756 = vpow2.f32 %v3150_v4 }
 0x10e   : > { %v462_v34 = vpop.f32.mrb[8].mxu1 }
 0x10f   : > { %v463_v45 = vadd.f32 %v462_v34, %v313_v63  ;;  %v464_v58 = vpop.f32.mrb[9].mxu1 }
 0x110   : > { %v465_v48 = vadd.f32 %v464_v58, %v315_v1  ;;  %v466_v61 = vpop.f32.mrb[10].mxu1 }
 0x111   : > { %v493_v57 = vadd.f32 %v482_v55, %v463_v45  ;;  %v467_v60 = vpop.f32.mrb[11].mxu1 }
 0x112   : > { %v494_v59 = vadd.f32 %v486_v56, %v465_v48 }
 0x113   : > { %v3755_v62 = vpop.eup %3754  ;;  %v3151_v37 = vmul.f32 -1.442695, %v493_v57 }
 0x114   : > { %v3757_v54 = vpop.eup %3756  ;;  %v504_v39 = vadd.f32 1.0, %v3755_v62  ;;  %3758 = vtanh.f32 %v494_v59  ;;  %v4912_v59 = vmov 0  }
 0x115   : > { %v505_v4 = vadd.f32 1.0, %v3757_v54  ;;  %3760 = vpow2.f32 %v3151_v37 }
 0x116   : > { %3762 = vrcp.f32 %v504_v39 }
 0x117   : > { %3764 = vrcp.f32 %v505_v4 }
 0x11e   : > { %v3759_v42 = vpop.eup %3758 }
 0x11f   : > { %v3761_v51 = vpop.eup %3760 }
 0x120   : > { %v3763_v53 = vpop.eup %3762  ;;  %v506_v34 = vadd.f32 1.0, %v3761_v51 }
 0x121   : > { %v3765_v2 = vpop.eup %3764  ;;  %v515_v63 = vmul.f32 %v3763_v53, %v3759_v42 }
 0x122   : > { %v514_v1 = vmul.f32 %v3858_v0, %v3765_v2  ;;  %3766 = vrcp.f32 %v506_v34  ;;  %v3162_v0 = vld [vmem:[%s4150_s30 + $0x1] sm:$0x1] }
 0x124   : > { %v4267_v55 = vadd.f32 %v515_v63, %v514_v1 }
 0x126   : > { %3768 = vtanh.f32 %v4267_v55 }
 0x12c   : > { %v3767_v56 = vpop.eup %3766 }
 0x130   : > { %v3769_v45 = vpop.eup %3768 }
 0x131   : > { %v518_v58 = vmul.f32 %v3769_v45, %v3767_v56 }
 0x133   : > { %v651_v48 = vpack.c.bf16 %v518_v58, %v518_v58  ;;  %vm519_vm3 = vcmp.gt.f32.partialorder %v518_v58, 0.0  ;;  %v520_v61 = vmul.f32 0.2, %v518_v58 }
 0x135   : > { %877 = vmatmul.mubr.bf16.vlgmr.msra.gmra.mrb[12].mxu1 %v651_v48  ;;  %v521_v57 = vsel %vm519_vm3, %v518_v58, %v520_v61 }
 0x136   : > { %992 = vmatpush1.bf16.msra.mxu1 %v4114_v35  ;;  %v522_v60 = vpack.c.bf16 %v521_v57, %v521_v57  ;;  %1023 = vmatprep.mubr.bf16.mxu1 %v4912_v59 }
 0x137   : > { %993 = vmatprep.subr.bf16.mxu1 %v4126_v38 }
 0x138   : > { %3476 = vmatmul.mubr.bf16.vlgmr.msra.gmra.mrb[4].mxu0 %v522_v60 }
 0x139   : > { %886 = vmatpush1.bf16.msra.mxu0 %v3929_v3  ;;  %917 = vmatprep.mubr.bf16.mxu0 %v4912_v59  ;;  %v4913_v3 = vmov 0.0  }
 0x13a   : > { %994 = vmatpush1.bf16.msra.mxu1 %v4139_v40  ;;  %887 = vmatprep.subr.bf16.mxu0 %v3937_v5  ;;  %v4914_v5 = vld [vmem:[#allocation3_spill] sm:$0xff] }
 0x13b   : > { %3207 = vmatprep.subr.msk.bf16.mxu1 %vm374_vm0, %v4144_v41 }
 0x13d   : > { %888 = vmatpush1.bf16.msra.mxu0 %v3943_v6  ;;  %v4915_v6 = vld [vmem:[#allocation4_spill] sm:$0xff] }
 0x13e   : > { %996 = vmatpush1.bf16.msra.mxu1 %v4161_v44  ;;  %889 = vmatprep.subr.bf16.mxu0 %v3949_v7  ;;  %v4916_v7 = vld [vmem:[#allocation2_spill] sm:$0xff] }
 0x13f   : > { %1032 = vmatprep.subr.bf16.mxu1 %v4155_v43 }
 0x141   : > { %890 = vmatpush1.bf16.msra.mxu0 %v3966_v10  ;;  %3208 = vmatmul.mubr.msk.bf16.vlgmr.msra.gmra.mrb[16].mxu1 %vm370_vm1, %v3162_v0  ;;  %v3660_v10 = vld [vmem:[%s4893_s4 + $0x10] sm:$0xff]  }
 0x142   : > { %891 = vmatprep.subr.bf16.mxu0 %v3983_v13  ;;  %1033 = vmatpush1.bf16.msra.mxu1 %v4167_v46  ;;  %v3663_v13 = vld [vmem:[%s4893_s4 + $0x28] sm:$0xff]  }
 0x143   : > { %1034 = vmatprep.subr.bf16.mxu1 %v4172_v47  ;;  %1064 = vmatprep.mubr.bf16.mxu1 %v4912_v59 }
 0x145   : > { %892 = vmatpush1.bf16.msra.mxu0 %v3994_v15  ;;  %v3665_v15 = vld [vmem:[%s4893_s4 + $0x38] sm:$0xff]  }
 0x146   : > { %893 = vmatprep.subr.bf16.mxu0 %v4007_v17  ;;  %1035 = vmatpush1.bf16.msra.mxu1 %v4182_v49 }
 0x147   : > { %3209 = vmatprep.subr.msk.bf16.mxu1 %vm374_vm0, %v4188_v50 }
 0x149   : > { %894 = vmatpush1.bf16.msra.mxu0 %v4019_v19  ;;  %v4365_v19 = vld [vmem:[%s4894_s5] ss:$0 sm:$0xff] }
 0x14a   : > { %895 = vmatprep.subr.bf16.mxu0 %v4025_v20  ;;  %1037 = vmatpush1.bf16.msra.mxu1 %v4194_v52 }
 0x14b   : > { %3479 = vmatprep.subr.bf16.mxu1 %v4913_v3 }
 0x14d   : > { %896 = vmatpush1.bf16.msra.mxu0 %v4042_v23  ;;  %3210 = vmatmul.mubr.msk.bf16.vlgmr.msra.gmra.mrb[20].mxu1 %vm370_vm1, %v3162_v0 }
 0x14e   : > { %897 = vmatprep.subr.bf16.mxu0 %v4049_v24  ;;  %3495 = vmatprep.mubr.msk.bf16.mxu1 %vm3870_vm2, %v4913_v3 }
 0x151   : > { %898 = vmatpush1.bf16.msra.mxu0 %v4067_v27  ;;  %v1073_v27 = vld [vmem:[%s4892_s3] sm:$0xf] }
 0x152   : > { %899 = vmatprep.subr.bf16.mxu0 %v4079_v29  ;;  %v1086_v61 = vrot.slane %v1073_v27, %v4260_v32  ;;  %v1090_v0 = vrot.slane %v1073_v27, %v4262_v36 }
 0x155   : > { %900 = vmatpush1.bf16.msra.mxu0 %v4090_v31  ;;  %v4918_v31 = vld [vmem:[#allocation6_spill] sm:$0xff] }
 0x156   : > { %1448 = vmatprep.subr.bf16.mxu0 %v3954_v8  ;;  %v3658_v8 = vld [vmem:[%s4893_s4] sm:$0xff]  }
 0x157   : > { %3480 = vmatpush3.bf16.msra.mxu1 %v3658_v8 }
 0x158   : > { %918 = vmatmul.mubr.bf16.vlgmr.msra.gmra.mrb[8].mxu0 %v651_v48  ;;  %3481 = vmatprep.subr.bf16.mxu1 %v4913_v3 }
 0x159   : > { %1449 = vmatpush1.bf16.msra.mxu0 %v3959_v9  ;;  %1480 = vmatprep.mubr.bf16.mxu0 %v4912_v59  ;;  %v3659_v9 = vld [vmem:[%s4893_s4 + $0x8] sm:$0xff]  }
 0x15a   : > { %1450 = vmatprep.subr.bf16.mxu0 %v3972_v11  ;;  %v3661_v11 = vld [vmem:[%s4893_s4 + $0x18] sm:$0xff]  }
 0x15b   : > { %3482 = vmatpush3.bf16.msra.mxu1 %v3659_v9 }
 0x15c   : > { %3483 = vmatprep.subr.bf16.mxu1 %v4913_v3 }
 0x15d   : > { %1451 = vmatpush1.bf16.msra.mxu0 %v3977_v12  ;;  %v3662_v12 = vld [vmem:[%s4893_s4 + $0x20] sm:$0xff]  }
 0x15e   : > { %1452 = vmatprep.subr.bf16.mxu0 %v3989_v14  ;;  %v3664_v14 = vld [vmem:[%s4893_s4 + $0x30] sm:$0xff]  }
 0x15f   : > { %3484 = vmatpush3.bf16.msra.mxu1 %v3660_v10 }
 0x160   : > { %3485 = vmatprep.subr.bf16.mxu1 %v4913_v3 }
 0x161   : > { %1453 = vmatpush1.bf16.msra.mxu0 %v4001_v16  ;;  %v4359_v16 = vld [vmem:[%s4891_s2 + $0xc] ss:$16 sps:$4 sm:$0xff]  }
 0x162   : > { %1454 = vmatprep.subr.bf16.mxu0 %v4013_v18 }
 0x163   : > { %3486 = vmatpush3.bf16.msra.mxu1 %v3661_v11 }
 0x164   : > { %3487 = vmatprep.subr.bf16.mxu1 %v4913_v3 }
 0x165   : > { %1455 = vmatpush1.bf16.msra.mxu0 %v4030_v21 }
 0x166   : > { %1456 = vmatprep.subr.bf16.mxu0 %v4037_v22 }
 0x167   : > { %3488 = vmatpush3.bf16.msra.mxu1 %v3662_v12 }
 0x168   : > { %3489 = vmatprep.subr.bf16.mxu1 %v4913_v3 }
 0x169   : > { %1457 = vmatpush1.bf16.msra.mxu0 %v4054_v25 }
 0x16a   : > { %1458 = vmatprep.subr.bf16.mxu0 %v4061_v26 }
 0x16b   : > { %3490 = vmatpush3.bf16.msra.mxu1 %v3663_v13 }
 0x16c   : > { %3491 = vmatprep.subr.bf16.mxu1 %v4913_v3 }
 0x16d   : > { %1459 = vmatpush1.bf16.msra.mxu0 %v4073_v28  ;;  %v4917_v28 = vld [vmem:[#allocation5_spill] sm:$0xff] }
 0x16e   : > { %1460 = vmatprep.subr.bf16.mxu0 %v4085_v30  ;;  %v1078_v29 = vrot.slane %v1073_v27, %v4917_v28 }
 0x16f   : > { %3492 = vmatpush3.bf16.msra.mxu1 %v3664_v14 }
 0x170   : > { %3493 = vmatprep.subr.bf16.mxu1 %v4913_v3 }
 0x171   : > { %1461 = vmatpush1.bf16.msra.mxu0 %v4102_v33  ;;  %v1082_v33 = vrot.slane %v1073_v27, %v4918_v31 }
 0x172   : > { %1462 = vmatprep.subr.bf16.mxu0 %v4914_v5 }
 0x173   : > { %3494 = vmatpush3.bf16.msra.mxu1 %v3665_v15 }
 0x174   : > { %1489 = vmatprep.subr.bf16.mxu1 %v4359_v16 }
 0x175   : > { %1463 = vmatpush1.bf16.msra.mxu0 %v4915_v6 }
 0x176   : > { %1595 = vmatprep.subr.bf16.mxu0 %v4916_v7 }
 0x208   : > { %v878_v17 = vpop.f32.mrb[12].mxu1 }
 0x209   : > { %v880_v18 = vpop.f32.mrb[13].mxu1 }
 0x20a   : > { %v882_v20 = vpop.f32.mrb[14].mxu1 }
 0x20b   : > { %v628_v21 = vpop.f32.mrb[4].mxu0  ;;  %v883_v22 = vpop.f32.mrb[15].mxu1 }
 0x20c   : > { %v629_v23 = vadd.f32 %v4365_v19, %v628_v21  ;;  %v3477_v24 = vpop.f32.mrb[5].mxu0 }
 0x20d   : > { %v631_v25 = vpop.f32.mrb[6].mxu0 }
 0x20e   : > { %3770 = vtanh.f32 %v629_v23  ;;  %v3478_v26 = vpop.f32.mrb[7].mxu0 }
 0x214   : > { %v1025_v30 = vpop.f32.mrb[16].mxu1 }
 0x215   : > { %v1026_v62 = vadd.f32 %v1025_v30, %v878_v17  ;;  %v1027_v37 = vpop.f32.mrb[17].mxu1  ;;  %v4389_v30 = vld [vmem:[%s4891_s2 + $0x8] ss:$16 sps:$4 sm:$0xff]  }
 0x216   : > { %v1028_v54 = vadd.f32 %v1027_v37, %v880_v18  ;;  %v1029_v39 = vpop.f32.mrb[18].mxu1  ;;  %v4403_v37 = vld [vmem:[%s4891_s2 + $0x28] ss:$16 sps:$4 sm:$0xff]  }
 0x217   : > { %v1095_v4 = vadd.f32 %v1078_v29, %v1026_v62  ;;  %v1030_v42 = vpop.f32.mrb[19].mxu1  ;;  %v4395_v62 = vld [vmem:[%s4891_s2 + $0x2c] ss:$16 sps:$4 sm:$0xff]  }
 0x218   : > { %v3771_v51 = vpop.eup %3770  ;;  %v1096_v53 = vadd.f32 %v1082_v33, %v1028_v54  ;;  %v4427_v54 = vld [vmem:[%s4891_s2 + $0x6c] ss:$16 sps:$4 sm:$0xff]   ;;  %v4507_v42 = vld [vmem:[%s4891_s2] ss:$16 sps:$4 sm:$0xff]  }
 0x219   : > { %637 = vst [vmem:[%s4377_s16] sm:$0x3] %v3771_v51  ;;  %v3211_v34 = vmul.f32 -1.442695, %v1095_v4  ;;  %v4456_v39 = vld [vmem:[%s4891_s2 + $0xac] ss:$16 sps:$4 sm:$0xff]   ;;  %v3693_v51 = vld [vmem:[%s4893_s4] sm:$0xff]  }
 0x21a   : > { %v3212_v2 = vmul.f32 -1.442695, %v1096_v53  ;;  %v4502_v4 = vld [vmem:[%s4891_s2 + $0x4] ss:$16 sps:$4 sm:$0xff]  }
 0x21b   : > { %v4517_v53 = vld [vmem:[%s4891_s2 + $0x24] ss:$16 sps:$4 sm:$0xff]  }
 0x21c   : > { %3772 = vpow2.f32 %v3212_v2  ;;  %v4522_v2 = vld [vmem:[%s4891_s2 + $0x20] ss:$16 sps:$4 sm:$0xff]  }
 0x21d   : > { %3774 = vpow2.f32 %v3211_v34  ;;  %v3697_v34 = vld [vmem:[%s4893_s4 + $0x8] sm:$0xff]  }
 0x220   : > { %v1066_v63 = vpop.f32.mrb[20].mxu1 }
 0x221   : > { %v1068_v1 = vpop.f32.mrb[21].mxu1 }
 0x222   : > { %v1070_v56 = vpop.f32.mrb[22].mxu1 }
 0x223   : > { %v1071_v45 = vpop.f32.mrb[23].mxu1  ;;  %v3701_v56 = vld [vmem:[%s4893_s4 + $0x10] sm:$0xff]  }
 0x224   : > { %v4549_v45 = vld [vmem:[%s4891_s2 + $0x64] ss:$16 sps:$4 sm:$0xff]  }
 0x226   : > { %v3773_v58 = vpop.eup %3772 }
 0x227   : > { %v3775_v48 = vpop.eup %3774  ;;  %v1109_v57 = vadd.f32 1.0, %v3773_v58  ;;  %v4554_v58 = vld [vmem:[%s4891_s2 + $0x60] ss:$16 sps:$4 sm:$0xff]  }
 0x228   : > { %v1108_v5 = vadd.f32 1.0, %v3775_v48  ;;  %v3705_v48 = vld [vmem:[%s4893_s4 + $0x18] sm:$0xff]  }
 0x229   : > { %3776 = vrcp.f32 %v1109_v57  ;;  %v4570_v57 = vld [vmem:[%s4891_s2 + $0x80] ss:$16 sps:$4 sm:$0xff]  }
 0x22a   : > { %3778 = vrcp.f32 %v1108_v5  ;;  %v4586_v5 = vld [vmem:[%s4891_s2 + $0xa4] ss:$16 sps:$4 sm:$0xff]  }
 0x22b   : > { %v919_v60 = vpop.f32.mrb[8].mxu0 }
 0x22c   : > { %v1067_v6 = vadd.f32 %v1066_v63, %v919_v60  ;;  %v921_v7 = vpop.f32.mrb[9].mxu0  ;;  %v4533_v63 = vld [vmem:[%s4891_s2 + $0x44] ss:$16 sps:$4 sm:$0xff]  }
 0x22d   : > { %v1069_v8 = vadd.f32 %v1068_v1, %v921_v7  ;;  %v923_v9 = vpop.f32.mrb[10].mxu0  ;;  %v4538_v1 = vld [vmem:[%s4891_s2 + $0x40] ss:$16 sps:$4 sm:$0xff]   ;;  %v3713_v7 = vld [vmem:[%s4893_s4 + $0x28] sm:$0xff]  }
 0x22e   : > { %v1097_v10 = vadd.f32 %v1086_v61, %v1067_v6  ;;  %v924_v11 = vpop.f32.mrb[11].mxu0  ;;  %v4565_v61 = vld [vmem:[%s4891_s2 + $0x84] ss:$16 sps:$4 sm:$0xff]  }
 0x22f   : > { %v1098_v12 = vadd.f32 %v1090_v0, %v1069_v8  ;;  %v3709_v60 = vld [vmem:[%s4893_s4 + $0x20] sm:$0xff]  }
 0x230   : > { %v3213_v13 = vmul.f32 -1.442695, %v1097_v10  ;;  %v4581_v0 = vld [vmem:[%s4891_s2 + $0xa0] ss:$16 sps:$4 sm:$0xff]   ;;  %v4591_v6 = vld [vmem:[%s4891_s2 + $0xc4] ss:$16 sps:$4 sm:$0xff]  }
 0x231   : > { %3780 = vtanh.f32 %v1098_v12  ;;  %v4602_v8 = vld [vmem:[%s4891_s2 + $0xc0] ss:$16 sps:$4 sm:$0xff]   ;;  %v4608_v9 = vld [vmem:[%s4891_s2 + $0xe4] ss:$16 sps:$4 sm:$0xff]  }
 0x232   : > { %3782 = vpow2.f32 %v3213_v13  ;;  %v3717_v10 = vld [vmem:[%s4893_s4 + $0x30] sm:$0xff]   ;;  %v3721_v13 = vld [vmem:[%s4893_s4 + $0x38] sm:$0xff]  }
 0x233   : > { %v3777_v14 = vpop.eup %3776  ;;  %v4618_v11 = vld [vmem:[%s4891_s2 + $0xe0] ss:$16 sps:$4 sm:$0xff]   ;;  %v4624_v12 = vld [vmem:[%s4890_s1 + $0x4] ss:$16 sps:$4 sm:$0xff]  }
 0x234   : > { %v3779_v15 = vpop.eup %3778  ;;  %v1118_v20 = vmul.f32 %v3777_v14, %v4267_v55 }
 0x23b   : > { %v3781_v17 = vpop.eup %3780 }
 0x23c   : > { %v3783_v18 = vpop.eup %3782  ;;  %v1119_v21 = vmul.f32 %v3781_v17, %v3779_v15 }
 0x23d   : > { %v1110_v22 = vadd.f32 1.0, %v3783_v18 }
 0x23e   : > { %v4383_v23 = vadd.f32 %v1119_v21, %v1118_v20 }
 0x23f   : > { %3784 = vrcp.f32 %v1110_v22 }
 0x240   : > { %3786 = vtanh.f32 %v4383_v23 }
 0x249   : > { %v3785_v24 = vpop.eup %3784 }
 0x24a   : > { %v3787_v25 = vpop.eup %3786 }
 0x24b   : > { %v1122_v26 = vmul.f32 %v3787_v25, %v3785_v24 }
 0x24d   : > { %v1255_v27 = vpack.c.bf16 %v1122_v26, %v1122_v26  ;;  %vm1123_vm4 = vcmp.gt.f32.partialorder %v1122_v26, 0.0  ;;  %v1124_v29 = vmul.f32 0.2, %v1122_v26 }
 0x24f   : > { %1481 = vmatmul.mubr.bf16.vlgmr.msra.gmra.mrb[12].mxu0 %v1255_v27  ;;  %v1125_v55 = vsel %vm1123_vm4, %v1122_v26, %v1124_v29  ;;  %v1677_v26 = vld [vmem:[%s4892_s3] sm:$0xf] }
 0x250   : > { %1596 = vmatpush1.bf16.msra.mxu0 %v4114_v35  ;;  %v1126_v33 = vpack.c.bf16 %v1125_v55, %v1125_v55  ;;  %1627 = vmatprep.mubr.bf16.mxu0 %v4912_v59  ;;  %v4411_v35 = vld [vmem:[%s4891_s2 + $0x4c] ss:$16 sps:$4 sm:$0xff]   ;;  %v1686_v55 = vrot.slane %v1677_v26, %v4918_v31 }
 0x251   : > { %1597 = vmatprep.subr.bf16.mxu0 %v4126_v38  ;;  %v4419_v38 = vld [vmem:[%s4891_s2 + $0x48] ss:$16 sps:$4 sm:$0xff]  }
 0x252   : > { %3496 = vmatmul.mubr.bf16.vlgmr.msra.gmra.mrb[24].mxu1 %v1126_v33 }
 0x253   : > { %1490 = vmatpush1.bf16.msra.mxu1 %v4389_v30  ;;  %1521 = vmatprep.mubr.bf16.mxu1 %v4912_v59 }
 0x254   : > { %1598 = vmatpush1.bf16.msra.mxu0 %v4139_v40  ;;  %1491 = vmatprep.subr.bf16.mxu1 %v4395_v62  ;;  %v3225_v40 = vld [vmem:[%s4150_s30 + $0x2] sm:$0x1] }
 0x255   : > { %3270 = vmatprep.subr.msk.bf16.mxu0 %vm374_vm0, %v4144_v41  ;;  %v4435_v41 = vld [vmem:[%s4891_s2 + $0x68] ss:$16 sps:$4 sm:$0xff]  }
 0x257   : > { %1492 = vmatpush1.bf16.msra.mxu1 %v4403_v37 }
 0x258   : > { %1600 = vmatpush1.bf16.msra.mxu0 %v4161_v44  ;;  %1493 = vmatprep.subr.bf16.mxu1 %v4411_v35  ;;  %v4441_v44 = vld [vmem:[%s4891_s2 + $0x8c] ss:$16 sps:$4 sm:$0xff]  }
 0x259   : > { %1636 = vmatprep.subr.bf16.mxu0 %v4155_v43  ;;  %v4450_v43 = vld [vmem:[%s4891_s2 + $0x88] ss:$16 sps:$4 sm:$0xff]  }
 0x25b   : > { %1494 = vmatpush1.bf16.msra.mxu1 %v4419_v38  ;;  %3271 = vmatmul.mubr.msk.bf16.vlgmr.msra.gmra.mrb[16].mxu0 %vm370_vm1, %v3225_v40 }
 0x25c   : > { %1495 = vmatprep.subr.bf16.mxu1 %v4427_v54  ;;  %1637 = vmatpush1.bf16.msra.mxu0 %v4167_v46  ;;  %v4465_v46 = vld [vmem:[%s4891_s2 + $0xa8] ss:$16 sps:$4 sm:$0xff]  }
 0x25d   : > { %1638 = vmatprep.subr.bf16.mxu0 %v4172_v47  ;;  %1668 = vmatprep.mubr.bf16.mxu0 %v4912_v59  ;;  %v4471_v47 = vld [vmem:[%s4891_s2 + $0xcc] ss:$16 sps:$4 sm:$0xff]  }
 0x25f   : > { %1496 = vmatpush1.bf16.msra.mxu1 %v4435_v41 }
 0x260   : > { %1497 = vmatprep.subr.bf16.mxu1 %v4441_v44  ;;  %1639 = vmatpush1.bf16.msra.mxu0 %v4182_v49  ;;  %v4479_v49 = vld [vmem:[%s4891_s2 + $0xc8] ss:$16 sps:$4 sm:$0xff]  }
 0x261   : > { %3272 = vmatprep.subr.msk.bf16.mxu0 %vm374_vm0, %v4188_v50  ;;  %v4486_v50 = vld [vmem:[%s4891_s2 + $0xec] ss:$16 sps:$4 sm:$0xff]  }
 0x263   : > { %1498 = vmatpush1.bf16.msra.mxu1 %v4450_v43 }
 0x264   : > { %1499 = vmatprep.subr.bf16.mxu1 %v4456_v39  ;;  %1641 = vmatpush1.bf16.msra.mxu0 %v4194_v52  ;;  %v4494_v52 = vld [vmem:[%s4891_s2 + $0xe8] ss:$16 sps:$4 sm:$0xff]  }
 0x265   : > { %3499 = vmatprep.subr.bf16.mxu0 %v4913_v3 }
 0x267   : > { %1500 = vmatpush1.bf16.msra.mxu1 %v4465_v46  ;;  %3273 = vmatmul.mubr.msk.bf16.vlgmr.msra.gmra.mrb[20].mxu0 %vm370_vm1, %v3225_v40 }
 0x268   : > { %1501 = vmatprep.subr.bf16.mxu1 %v4471_v47  ;;  %3515 = vmatprep.mubr.msk.bf16.mxu0 %vm3870_vm2, %v4913_v3 }
 0x269   : > { %3500 = vmatpush3.bf16.msra.mxu0 %v3693_v51 }
 0x26a   : > { %3501 = vmatprep.subr.bf16.mxu0 %v4913_v3 }
 0x26b   : > { %1502 = vmatpush1.bf16.msra.mxu1 %v4479_v49 }
 0x26c   : > { %1503 = vmatprep.subr.bf16.mxu1 %v4486_v50 }
 0x26d   : > { %3502 = vmatpush3.bf16.msra.mxu0 %v3697_v34 }
 0x26e   : > { %3503 = vmatprep.subr.bf16.mxu0 %v4913_v3 }
 0x26f   : > { %1504 = vmatpush1.bf16.msra.mxu1 %v4494_v52 }
 0x270   : > { %2052 = vmatprep.subr.bf16.mxu1 %v4502_v4 }
 0x271   : > { %3504 = vmatpush3.bf16.msra.mxu0 %v3701_v56 }
 0x272   : > { %1522 = vmatmul.mubr.bf16.vlgmr.msra.gmra.mrb[28].mxu1 %v1255_v27  ;;  %3505 = vmatprep.subr.bf16.mxu0 %v4913_v3  ;;  %v1682_v27 = vrot.slane %v1677_v26, %v4917_v28 }
 0x273   : > { %2084 = vmatprep.mubr.bf16.mxu1 %v4912_v59  ;;  %2053 = vmatpush1.bf16.msra.mxu1 %v4507_v42 }
 0x274   : > { %2054 = vmatprep.subr.bf16.mxu1 %v4517_v53 }
 0x275   : > { %3506 = vmatpush3.bf16.msra.mxu0 %v3705_v48 }
 0x276   : > { %3507 = vmatprep.subr.bf16.mxu0 %v4913_v3 }
 0x277   : > { %2055 = vmatpush1.bf16.msra.mxu1 %v4522_v2 }
 0x278   : > { %2056 = vmatprep.subr.bf16.mxu1 %v4533_v63 }
 0x279   : > { %3508 = vmatpush3.bf16.msra.mxu0 %v3709_v60 }
 0x27a   : > { %3509 = vmatprep.subr.bf16.mxu0 %v4913_v3 }
 0x27b   : > { %2057 = vmatpush1.bf16.msra.mxu1 %v4538_v1 }
 0x27c   : > { %2058 = vmatprep.subr.bf16.mxu1 %v4549_v45 }
 0x27d   : > { %3510 = vmatpush3.bf16.msra.mxu0 %v3713_v7 }
 0x27e   : > { %3511 = vmatprep.subr.bf16.mxu0 %v4913_v3 }
 0x27f   : > { %2059 = vmatpush1.bf16.msra.mxu1 %v4554_v58 }
 0x280   : > { %2060 = vmatprep.subr.bf16.mxu1 %v4565_v61 }
 0x281   : > { %3512 = vmatpush3.bf16.msra.mxu0 %v3717_v10 }
 0x282   : > { %3513 = vmatprep.subr.bf16.mxu0 %v4913_v3 }
 0x283   : > { %2061 = vmatpush1.bf16.msra.mxu1 %v4570_v57 }
 0x284   : > { %2062 = vmatprep.subr.bf16.mxu1 %v4586_v5 }
 0x285   : > { %3514 = vmatpush3.bf16.msra.mxu0 %v3721_v13 }
 0x286   : > { %2093 = vmatprep.subr.bf16.mxu0 %v4359_v16 }
 0x287   : > { %2063 = vmatpush1.bf16.msra.mxu1 %v4581_v0 }
 0x288   : > { %2064 = vmatprep.subr.bf16.mxu1 %v4591_v6 }
 0x28b   : > { %2065 = vmatpush1.bf16.msra.mxu1 %v4602_v8 }
 0x28c   : > { %2066 = vmatprep.subr.bf16.mxu1 %v4608_v9 }
 0x28f   : > { %2067 = vmatpush1.bf16.msra.mxu1 %v4618_v11 }
 0x290   : > { %2199 = vmatprep.subr.bf16.mxu1 %v4624_v12 }
 0x322   : > { %v1482_v14 = vpop.f32.mrb[12].mxu0 }
 0x323   : > { %v1484_v15 = vpop.f32.mrb[13].mxu0 }
 0x324   : > { %v1486_v17 = vpop.f32.mrb[14].mxu0 }
 0x325   : > { %v1232_v18 = vpop.f32.mrb[24].mxu1  ;;  %v1487_v20 = vpop.f32.mrb[15].mxu0 }
 0x326   : > { %v1233_v21 = vadd.f32 %v4365_v19, %v1232_v18  ;;  %v3497_v22 = vpop.f32.mrb[25].mxu1 }
 0x327   : > { %v1235_v24 = vpop.f32.mrb[26].mxu1 }
 0x328   : > { %3788 = vtanh.f32 %v1233_v21  ;;  %v3498_v25 = vpop.f32.mrb[27].mxu1 }
 0x32e   : > { %v1629_v29 = vpop.f32.mrb[16].mxu0 }
 0x32f   : > { %v1630_v33 = vadd.f32 %v1629_v29, %v1482_v14  ;;  %v1631_v40 = vpop.f32.mrb[17].mxu0  ;;  %v1690_v14 = vrot.slane %v1677_v26, %v4260_v32 }
 0x330   : > { %v1632_v51 = vadd.f32 %v1631_v40, %v1484_v15  ;;  %v1633_v34 = vpop.f32.mrb[18].mxu0 }
 0x331   : > { %v1699_v56 = vadd.f32 %v1682_v27, %v1630_v33  ;;  %v1634_v48 = vpop.f32.mrb[19].mxu0  ;;  %v1694_v27 = vrot.slane %v1677_v26, %v4262_v36 }
 0x332   : > { %v3789_v60 = vpop.eup %3788  ;;  %v1700_v7 = vadd.f32 %v1686_v55, %v1632_v51 }
 0x333   : > { %3224 = vst [vmem:[%s4377_s16 + $0x2] sm:$0x3] %v3789_v60  ;;  %v3274_v13 = vmul.f32 -1.442695, %v1699_v56 }
 0x334   : > { %v3275_v10 = vmul.f32 -1.442695, %v1700_v7 }
 0x336   : > { %3790 = vpow2.f32 %v3275_v10 }
 0x337   : > { %3792 = vpow2.f32 %v3274_v13 }
 0x33a   : > { %v1670_v17 = vpop.f32.mrb[20].mxu0 }
 0x33b   : > { %v1672_v18 = vpop.f32.mrb[21].mxu0 }
 0x33c   : > { %v1674_v20 = vpop.f32.mrb[22].mxu0 }
 0x33d   : > { %v1675_v21 = vpop.f32.mrb[23].mxu0 }
 0x340   : > { %v3791_v22 = vpop.eup %3790 }
 0x341   : > { %v3793_v24 = vpop.eup %3792  ;;  %v1713_v25 = vadd.f32 1.0, %v3791_v22 }
 0x342   : > { %v1712_v29 = vadd.f32 1.0, %v3793_v24 }
 0x343   : > { %3794 = vrcp.f32 %v1713_v25  ;;  %v4649_v25 = vld [vmem:[%s4890_s1] ss:$16 sps:$4 sm:$0xff]  }
 0x344   : > { %3796 = vrcp.f32 %v1712_v29  ;;  %v1857_v29 = vld [vmem:[%s4890_s1 + $0x40] sm:$0xff] }
 0x345   : > { %v1523_v15 = vpop.f32.mrb[28].mxu1 }
 0x346   : > { %v1671_v33 = vadd.f32 %v1670_v17, %v1523_v15  ;;  %v1525_v55 = vpop.f32.mrb[29].mxu1 }
 0x347   : > { %v1673_v40 = vadd.f32 %v1672_v18, %v1525_v55  ;;  %v1527_v51 = vpop.f32.mrb[30].mxu1 }
 0x348   : > { %v1701_v34 = vadd.f32 %v1690_v14, %v1671_v33  ;;  %v1528_v56 = vpop.f32.mrb[31].mxu1  ;;  %v4667_v51 = vcombine.high %v1857_v29, %v1857_v29 }
 0x349   : > { %v1702_v48 = vadd.f32 %v1694_v27, %v1673_v40  ;;  %v4663_v40 = vld [vmem:[%s4890_s1 + $0x20] ss:$16 sps:$4 sm:$0xff]  }
 0x34a   : > { %v3276_v60 = vmul.f32 -1.442695, %v1701_v34  ;;  %v3329_v34 = vcombine.low %v1857_v29, %v1857_v29 }
 0x34b   : > { %3798 = vtanh.f32 %v1702_v48  ;;  %v4681_v48 = vld [vmem:[%s4890_s1 + $0xc] ss:$16 sps:$4 sm:$0xff]  }
 0x34c   : > { %3800 = vpow2.f32 %v3276_v60  ;;  %v4676_v56 = vsel %vm374_vm0, %v3329_v34, 0  ;;  %v3288_v60 = vld [vmem:[%s4150_s30 + $0x3] sm:$0x1] }
 0x34d   : > { %v3795_v7 = vpop.eup %3794 }
 0x34e   : > { %v3797_v10 = vpop.eup %3796  ;;  %v1722_v21 = vmul.f32 %v3795_v7, %v4383_v23  ;;  %v4654_v23 = vld [vmem:[%s4890_s1 + $0x24] ss:$16 sps:$4 sm:$0xff]   ;;  %v4690_v7 = vld [vmem:[%s4890_s1 + $0x8] ss:$16 sps:$4 sm:$0xff]  }
 0x355   : > { %v3799_v13 = vpop.eup %3798 }
 0x356   : > { %v3801_v20 = vpop.eup %3800  ;;  %v1723_v26 = vmul.f32 %v3799_v13, %v3797_v10  ;;  %v4696_v10 = vld [vmem:[%s4890_s1 + $0x2c] ss:$16 sps:$4 sm:$0xff]  }
 0x357   : > { %v1714_v22 = vadd.f32 1.0, %v3801_v20  ;;  %v1858_v13 = vld [vmem:[%s4890_s1 + $0x48] sm:$0xff] }
 0x358   : > { %v4643_v17 = vadd.f32 %v1723_v26, %v1722_v21  ;;  %v4708_v20 = vld [vmem:[%s4890_s1 + $0x28] ss:$16 sps:$4 sm:$0xff]   ;;  %v4711_v21 = vcombine.high %v1858_v13, %v1858_v13  ;;  %v3331_v26 = vcombine.low %v1858_v13, %v1858_v13 }
 0x359   : > { %3802 = vrcp.f32 %v1714_v22 }
 0x35a   : > { %3804 = vtanh.f32 %v4643_v17  ;;  %v4720_v22 = vsel %vm374_vm0, %v3331_v26, 0 }
 0x363   : > { %v3803_v18 = vpop.eup %3802 }
 0x364   : > { %v3805_v24 = vpop.eup %3804 }
 0x365   : > { %v1726_v14 = vmul.f32 %v3805_v24, %v3803_v18  ;;  %v2281_v18 = vld [vmem:[%s4892_s3] sm:$0xf] }
 0x366   : > { %v2286_v24 = vrot.slane %v2281_v18, %v4917_v28 }
 0x367   : > { %v1859_v15 = vpack.c.bf16 %v1726_v14, %v1726_v14  ;;  %vm1727_vm5 = vcmp.gt.f32.partialorder %v1726_v14, 0.0  ;;  %v1728_v27 = vmul.f32 0.2, %v1726_v14 }
 0x369   : > { %2085 = vmatmul.mubr.bf16.vlgmr.msra.gmra.mrb[32].mxu1 %v1859_v15  ;;  %v1729_v33 = vsel %vm1727_vm5, %v1726_v14, %v1728_v27 }
 0x36a   : > { %2200 = vmatpush1.bf16.msra.mxu1 %v4649_v25  ;;  %v1730_v55 = vpack.c.bf16 %v1729_v33, %v1729_v33  ;;  %2231 = vmatprep.mubr.bf16.mxu1 %v4912_v59 }
 0x36b   : > { %2201 = vmatprep.subr.bf16.mxu1 %v4654_v23 }
 0x36c   : > { %3516 = vmatmul.mubr.bf16.vlgmr.msra.gmra.mrb[24].mxu0 %v1730_v55 }
 0x36d   : > { %2094 = vmatpush1.bf16.msra.mxu0 %v4389_v30  ;;  %2125 = vmatprep.mubr.bf16.mxu0 %v4912_v59 }
 0x36e   : > { %2202 = vmatpush1.bf16.msra.mxu1 %v4663_v40  ;;  %2095 = vmatprep.subr.bf16.mxu0 %v4395_v62 }
 0x36f   : > { %3333 = vmatprep.subr.msk.bf16.mxu1 %vm374_vm0, %v4667_v51 }
 0x371   : > { %2096 = vmatpush1.bf16.msra.mxu0 %v4403_v37 }
 0x372   : > { %2204 = vmatpush1.bf16.msra.mxu1 %v4676_v56  ;;  %2097 = vmatprep.subr.bf16.mxu0 %v4411_v35 }
 0x373   : > { %2240 = vmatprep.subr.bf16.mxu1 %v4681_v48 }
 0x375   : > { %2098 = vmatpush1.bf16.msra.mxu0 %v4419_v38  ;;  %3334 = vmatmul.mubr.msk.bf16.vlgmr.msra.gmra.mrb[36].mxu1 %vm370_vm1, %v3288_v60 }
 0x376   : > { %2099 = vmatprep.subr.bf16.mxu0 %v4427_v54  ;;  %2241 = vmatpush1.bf16.msra.mxu1 %v4690_v7 }
 0x377   : > { %2242 = vmatprep.subr.bf16.mxu1 %v4696_v10  ;;  %2272 = vmatprep.mubr.bf16.mxu1 %v4912_v59 }
 0x379   : > { %2100 = vmatpush1.bf16.msra.mxu0 %v4435_v41 }
 0x37a   : > { %2101 = vmatprep.subr.bf16.mxu0 %v4441_v44  ;;  %2243 = vmatpush1.bf16.msra.mxu1 %v4708_v20 }
 0x37b   : > { %3335 = vmatprep.subr.msk.bf16.mxu1 %vm374_vm0, %v4711_v21 }
 0x37d   : > { %2102 = vmatpush1.bf16.msra.mxu0 %v4450_v43 }
 0x37e   : > { %2103 = vmatprep.subr.bf16.mxu0 %v4456_v39  ;;  %2245 = vmatpush1.bf16.msra.mxu1 %v4720_v22 }
 0x37f   : > { %3519 = vmatprep.subr.bf16.mxu1 %v4913_v3 }
 0x381   : > { %2104 = vmatpush1.bf16.msra.mxu0 %v4465_v46  ;;  %3336 = vmatmul.mubr.msk.bf16.vlgmr.msra.gmra.mrb[40].mxu1 %vm370_vm1, %v3288_v60 }
 0x382   : > { %2105 = vmatprep.subr.bf16.mxu0 %v4471_v47  ;;  %3535 = vmatprep.mubr.msk.bf16.mxu1 %vm3870_vm2, %v4913_v3 }
 0x385   : > { %2106 = vmatpush1.bf16.msra.mxu0 %v4479_v49 }
 0x386   : > { %2107 = vmatprep.subr.bf16.mxu0 %v4486_v50 }
 0x389   : > { %2108 = vmatpush1.bf16.msra.mxu0 %v4494_v52 }
 0x38a   : > { %2656 = vmatprep.subr.bf16.mxu0 %v4502_v4  ;;  %v3738_v4 = vld [vmem:[%s4893_s4] sm:$0xff]  }
 0x38b   : > { %3520 = vmatpush3.bf16.msra.mxu1 %v3738_v4 }
 0x38c   : > { %2126 = vmatmul.mubr.bf16.vlgmr.msra.gmra.mrb[28].mxu0 %v1859_v15  ;;  %3521 = vmatprep.subr.bf16.mxu1 %v4913_v3 }
 0x38d   : > { %2657 = vmatpush1.bf16.msra.mxu0 %v4507_v42  ;;  %2688 = vmatprep.mubr.bf16.mxu0 %v4912_v59  ;;  %v3739_v42 = vld [vmem:[%s4893_s4 + $0x8] sm:$0xff]  }
 0x38e   : > { %2658 = vmatprep.subr.bf16.mxu0 %v4517_v53  ;;  %v3740_v53 = vld [vmem:[%s4893_s4 + $0x10] sm:$0xff]  }
 0x38f   : > { %3522 = vmatpush3.bf16.msra.mxu1 %v3739_v42 }
 0x390   : > { %3523 = vmatprep.subr.bf16.mxu1 %v4913_v3 }
 0x391   : > { %2659 = vmatpush1.bf16.msra.mxu0 %v4522_v2  ;;  %v3741_v2 = vld [vmem:[%s4893_s4 + $0x18] sm:$0xff]  }
 0x392   : > { %2660 = vmatprep.subr.bf16.mxu0 %v4533_v63  ;;  %v3742_v63 = vld [vmem:[%s4893_s4 + $0x20] sm:$0xff]  }
 0x393   : > { %3524 = vmatpush3.bf16.msra.mxu1 %v3740_v53 }
 0x394   : > { %3525 = vmatprep.subr.bf16.mxu1 %v4913_v3 }
 0x395   : > { %2661 = vmatpush1.bf16.msra.mxu0 %v4538_v1  ;;  %v3743_v1 = vld [vmem:[%s4893_s4 + $0x28] sm:$0xff]  }
 0x396   : > { %2662 = vmatprep.subr.bf16.mxu0 %v4549_v45  ;;  %v3744_v45 = vld [vmem:[%s4893_s4 + $0x30] sm:$0xff]  }
 0x397   : > { %3526 = vmatpush3.bf16.msra.mxu1 %v3741_v2 }
 0x398   : > { %3527 = vmatprep.subr.bf16.mxu1 %v4913_v3 }
 0x399   : > { %2663 = vmatpush1.bf16.msra.mxu0 %v4554_v58  ;;  %v3745_v58 = vld [vmem:[%s4893_s4 + $0x38] sm:$0xff]  }
 0x39a   : > { %2664 = vmatprep.subr.bf16.mxu0 %v4565_v61 }
 0x39b   : > { %3528 = vmatpush3.bf16.msra.mxu1 %v3742_v63 }
 0x39c   : > { %3529 = vmatprep.subr.bf16.mxu1 %v4913_v3 }
 0x39d   : > { %2665 = vmatpush1.bf16.msra.mxu0 %v4570_v57 }
 0x39e   : > { %2666 = vmatprep.subr.bf16.mxu0 %v4586_v5 }
 0x39f   : > { %3530 = vmatpush3.bf16.msra.mxu1 %v3743_v1 }
 0x3a0   : > { %3531 = vmatprep.subr.bf16.mxu1 %v4913_v3 }
 0x3a1   : > { %2667 = vmatpush1.bf16.msra.mxu0 %v4581_v0 }
 0x3a2   : > { %2668 = vmatprep.subr.bf16.mxu0 %v4591_v6 }
 0x3a3   : > { %3532 = vmatpush3.bf16.msra.mxu1 %v3744_v45  ;;  %v2294_v45 = vrot.slane %v2281_v18, %v4260_v32 }
 0x3a4   : > { %3533 = vmatprep.subr.bf16.mxu1 %v4913_v3 }
 0x3a5   : > { %2669 = vmatpush1.bf16.msra.mxu0 %v4602_v8 }
 0x3a6   : > { %2670 = vmatprep.subr.bf16.mxu0 %v4608_v9 }
 0x3a7   : > { %3534 = vmatpush3.bf16.msra.mxu1 %v3745_v58 }
 0x3a8   : > { %2697 = vmatprep.subr.bf16.mxu1 %v4359_v16  ;;  %v2290_v16 = vrot.slane %v2281_v18, %v4918_v31 }
 0x3a9   : > { %2671 = vmatpush1.bf16.msra.mxu0 %v4618_v11 }
 0x3aa   : > { %2803 = vmatprep.subr.bf16.mxu0 %v4624_v12 }
 0x43c   : > { %v2086_v61 = vpop.f32.mrb[32].mxu1 }
 0x43d   : > { %v2088_v57 = vpop.f32.mrb[33].mxu1 }
 0x43e   : > { %v2090_v0 = vpop.f32.mrb[34].mxu1 }
 0x43f   : > { %v1836_v5 = vpop.f32.mrb[24].mxu0  ;;  %v2091_v6 = vpop.f32.mrb[35].mxu1 }
 0x440   : > { %v1837_v8 = vadd.f32 %v4365_v19, %v1836_v5  ;;  %v3517_v9 = vpop.f32.mrb[25].mxu0 }
 0x441   : > { %v1839_v11 = vpop.f32.mrb[26].mxu0 }
 0x442   : > { %3806 = vtanh.f32 %v1837_v8  ;;  %v3518_v12 = vpop.f32.mrb[27].mxu0 }
 0x448   : > { %v2233_v14 = vpop.f32.mrb[36].mxu1 }
 0x449   : > { %v2234_v15 = vadd.f32 %v2233_v14, %v2086_v61  ;;  %v2235_v27 = vpop.f32.mrb[37].mxu1 }
 0x44a   : > { %v2236_v29 = vadd.f32 %v2235_v27, %v2088_v57  ;;  %v2237_v33 = vpop.f32.mrb[38].mxu1  ;;  %v2298_v57 = vrot.slane %v2281_v18, %v4262_v36 }
 0x44b   : > { %v2303_v55 = vadd.f32 %v2286_v24, %v2234_v15  ;;  %v2238_v19 = vpop.f32.mrb[39].mxu1 }
 0x44c   : > { %v3807_v34 = vpop.eup %3806  ;;  %v2304_v60 = vadd.f32 %v2290_v16, %v2236_v29 }
 0x44d   : > { %3287 = vst [vmem:[%s4377_s16 + $0x4] sm:$0x3] %v3807_v34  ;;  %v3337_v26 = vmul.f32 -1.442695, %v2303_v55 }
 0x44e   : > { %v3338_v13 = vmul.f32 -1.442695, %v2304_v60 }
 0x450   : > { %3808 = vpow2.f32 %v3338_v13 }
 0x451   : > { %3810 = vpow2.f32 %v3337_v26 }
 0x454   : > { %v2274_v4 = vpop.f32.mrb[40].mxu1 }
 0x455   : > { %v2276_v42 = vpop.f32.mrb[41].mxu1 }
 0x456   : > { %v2278_v53 = vpop.f32.mrb[42].mxu1 }
 0x457   : > { %v2279_v2 = vpop.f32.mrb[43].mxu1 }
 0x45a   : > { %v3809_v63 = vpop.eup %3808 }
 0x45b   : > { %v3811_v1 = vpop.eup %3810  ;;  %v2317_v58 = vadd.f32 1.0, %v3809_v63 }
 0x45c   : > { %v2316_v0 = vadd.f32 1.0, %v3811_v1 }
 0x45d   : > { %3812 = vrcp.f32 %v2317_v58 }
 0x45e   : > { %3814 = vrcp.f32 %v2316_v0 }
 0x45f   : > { %v2127_v61 = vpop.f32.mrb[28].mxu0 }
 0x460   : > { %v2275_v5 = vadd.f32 %v2274_v4, %v2127_v61  ;;  %v2129_v6 = vpop.f32.mrb[29].mxu0 }
 0x461   : > { %v2277_v8 = vadd.f32 %v2276_v42, %v2129_v6  ;;  %v2131_v9 = vpop.f32.mrb[30].mxu0 }
 0x462   : > { %v2305_v11 = vadd.f32 %v2294_v45, %v2275_v5  ;;  %v2132_v12 = vpop.f32.mrb[31].mxu0 }
 0x463   : > { %v2306_v24 = vadd.f32 %v2298_v57, %v2277_v8 }
 0x464   : > { %v3339_v14 = vmul.f32 -1.442695, %v2305_v11 }
 0x465   : > { %3816 = vtanh.f32 %v2306_v24 }
 0x466   : > { %3818 = vpow2.f32 %v3339_v14 }
 0x467   : > { %v3813_v16 = vpop.eup %3812 }
 0x468   : > { %v3815_v15 = vpop.eup %3814  ;;  %v2326_v33 = vmul.f32 %v3813_v16, %v4643_v17  ;;  %v3351_v17 = vld [vmem:[%s4150_s30 + $0x4] sm:$0x1] }
 0x46f   : > { %v3817_v27 = vpop.eup %3816 }
 0x470   : > { %v3819_v29 = vpop.eup %3818  ;;  %v2327_v18 = vmul.f32 %v3817_v27, %v3815_v15 }
 0x471   : > { %v2318_v55 = vadd.f32 1.0, %v3819_v29 }
 0x472   : > { %v4794_v19 = vadd.f32 %v2327_v18, %v2326_v33 }
 0x473   : > { %3820 = vrcp.f32 %v2318_v55 }
 0x474   : > { %3822 = vtanh.f32 %v4794_v19 }
 0x47d   : > { %v3821_v34 = vpop.eup %3820 }
 0x47e   : > { %v3823_v60 = vpop.eup %3822 }
 0x47f   : > { %v2330_v13 = vmul.f32 %v3823_v60, %v3821_v34 }
 0x481   : > { %v2463_v26 = vpack.c.bf16 %v2330_v13, %v2330_v13  ;;  %vm2331_vm6 = vcmp.gt.f32.partialorder %v2330_v13, 0.0  ;;  %v2332_v4 = vmul.f32 0.2, %v2330_v13 }
 0x483   : > { %2689 = vmatmul.mubr.bf16.vlgmr.msra.gmra.mrb[32].mxu0 %v2463_v26  ;;  %v2333_v42 = vsel %vm2331_vm6, %v2330_v13, %v2332_v4 }
 0x484   : > { %2804 = vmatpush1.bf16.msra.mxu0 %v4649_v25  ;;  %v2334_v53 = vpack.c.bf16 %v2333_v42, %v2333_v42  ;;  %2835 = vmatprep.mubr.bf16.mxu0 %v4912_v59 }
 0x485   : > { %2805 = vmatprep.subr.bf16.mxu0 %v4654_v23 }
 0x486   : > { %3536 = vmatmul.mubr.bf16.vlgmr.msra.gmra.mrb[44].mxu1 %v2334_v53 }
 0x487   : > { %2698 = vmatpush1.bf16.msra.mxu1 %v4389_v30  ;;  %2729 = vmatprep.mubr.bf16.mxu1 %v4912_v59  ;;  %v3747_v30 = vld [vmem:[%s4893_s4 + $0x8] sm:$0xff]  }
 0x488   : > { %2806 = vmatpush1.bf16.msra.mxu0 %v4663_v40  ;;  %2699 = vmatprep.subr.bf16.mxu1 %v4395_v62  ;;  %v3748_v62 = vld [vmem:[%s4893_s4 + $0x10] sm:$0xff]  }
 0x489   : > { %3396 = vmatprep.subr.msk.bf16.mxu0 %vm374_vm0, %v4667_v51 }
 0x48b   : > { %2700 = vmatpush1.bf16.msra.mxu1 %v4403_v37  ;;  %v3749_v37 = vld [vmem:[%s4893_s4 + $0x18] sm:$0xff]  }
 0x48c   : > { %2808 = vmatpush1.bf16.msra.mxu0 %v4676_v56  ;;  %2701 = vmatprep.subr.bf16.mxu1 %v4411_v35  ;;  %v3750_v35 = vld [vmem:[%s4893_s4 + $0x20] sm:$0xff]  }
 0x48d   : > { %2844 = vmatprep.subr.bf16.mxu0 %v4681_v48 }
 0x48f   : > { %2702 = vmatpush1.bf16.msra.mxu1 %v4419_v38  ;;  %3397 = vmatmul.mubr.msk.bf16.vlgmr.msra.gmra.mrb[36].mxu0 %vm370_vm1, %v3351_v17  ;;  %v3751_v38 = vld [vmem:[%s4893_s4 + $0x28] sm:$0xff]  }
 0x490   : > { %2703 = vmatprep.subr.bf16.mxu1 %v4427_v54  ;;  %2845 = vmatpush1.bf16.msra.mxu0 %v4690_v7  ;;  %v3752_v54 = vld [vmem:[%s4893_s4 + $0x30] sm:$0xff]  }
 0x491   : > { %2846 = vmatprep.subr.bf16.mxu0 %v4696_v10  ;;  %2876 = vmatprep.mubr.bf16.mxu0 %v4912_v59  ;;  %v3746_v59 = vld [vmem:[%s4893_s4] sm:$0xff]  }
 0x493   : > { %2704 = vmatpush1.bf16.msra.mxu1 %v4435_v41  ;;  %v3753_v41 = vld [vmem:[%s4893_s4 + $0x38] sm:$0xff]  }
 0x494   : > { %2705 = vmatprep.subr.bf16.mxu1 %v4441_v44  ;;  %2847 = vmatpush1.bf16.msra.mxu0 %v4708_v20 }
 0x495   : > { %3398 = vmatprep.subr.msk.bf16.mxu0 %vm374_vm0, %v4711_v21 }
 0x497   : > { %2706 = vmatpush1.bf16.msra.mxu1 %v4450_v43 }
 0x498   : > { %2707 = vmatprep.subr.bf16.mxu1 %v4456_v39  ;;  %2849 = vmatpush1.bf16.msra.mxu0 %v4720_v22  ;;  %v4868_v39 = vld [vmem:[%s4894_s5] ss:$0 sm:$0xff] }
 0x499   : > { %3539 = vmatprep.subr.bf16.mxu0 %v4913_v3 }
 0x49b   : > { %2708 = vmatpush1.bf16.msra.mxu1 %v4465_v46  ;;  %3399 = vmatmul.mubr.msk.bf16.vlgmr.msra.gmra.mrb[40].mxu0 %vm370_vm1, %v3351_v17 }
 0x49c   : > { %2709 = vmatprep.subr.bf16.mxu1 %v4471_v47  ;;  %3555 = vmatprep.mubr.msk.bf16.mxu0 %vm3870_vm2, %v4913_v3 }
 0x49d   : > { %3540 = vmatpush3.bf16.msra.mxu0 %v3746_v59 }
 0x49e   : > { %3541 = vmatprep.subr.bf16.mxu0 %v4913_v3 }
 0x49f   : > { %2710 = vmatpush1.bf16.msra.mxu1 %v4479_v49 }
 0x4a0   : > { %2711 = vmatprep.subr.bf16.mxu1 %v4486_v50 }
 0x4a1   : > { %3542 = vmatpush3.bf16.msra.mxu0 %v3747_v30 }
 0x4a2   : > { %3543 = vmatprep.subr.bf16.mxu0 %v4913_v3 }
 0x4a3   : > { %2712 = vmatpush1.bf16.msra.mxu1 %v4494_v52 }
 0x4a5   : > { %3544 = vmatpush3.bf16.msra.mxu0 %v3748_v62 }
 0x4a6   : > { %2730 = vmatmul.mubr.bf16.vlgmr.msra.gmra.mrb[48].mxu1 %v2463_v26  ;;  %3545 = vmatprep.subr.bf16.mxu0 %v4913_v3 }
 0x4a9   : > { %3546 = vmatpush3.bf16.msra.mxu0 %v3749_v37 }
 0x4aa   : > { %3547 = vmatprep.subr.bf16.mxu0 %v4913_v3 }
 0x4ad   : > { %3548 = vmatpush3.bf16.msra.mxu0 %v3750_v35 }
 0x4ae   : > { %3549 = vmatprep.subr.bf16.mxu0 %v4913_v3 }
 0x4b1   : > { %3550 = vmatpush3.bf16.msra.mxu0 %v3751_v38 }
 0x4b2   : > { %3551 = vmatprep.subr.bf16.mxu0 %v4913_v3 }
 0x4b5   : > { %3552 = vmatpush3.bf16.msra.mxu0 %v3752_v54 }
 0x4b6   : > { %3553 = vmatprep.subr.bf16.mxu0 %v4913_v3  ;;  %v2885_v3 = vld [vmem:[%s4892_s3] sm:$0xf] }
 0x4b7   : > { %v2890_v40 = vrot.slane %v2885_v3, %v4917_v28  ;;  %v2894_v56 = vrot.slane %v2885_v3, %v4918_v31  ;;  %v2898_v31 = vrot.slane %v2885_v3, %v4260_v32  ;;  %v2902_v9 = vrot.slane %v2885_v3, %v4262_v36 }
 0x4b9   : > { %3554 = vmatpush3.bf16.msra.mxu0 %v3753_v41 }
 0x556   : > { %v2690_v44 = vpop.f32.mrb[32].mxu0 }
 0x557   : > { %v2692_v43 = vpop.f32.mrb[33].mxu0 }
 0x558   : > { %v2694_v46 = vpop.f32.mrb[34].mxu0 }
 0x559   : > { %v2440_v47 = vpop.f32.mrb[44].mxu1  ;;  %v2695_v49 = vpop.f32.mrb[35].mxu0 }
 0x55a   : > { %v2441_v50 = vadd.f32 %v4868_v39, %v2440_v47  ;;  %v3537_v52 = vpop.f32.mrb[45].mxu1 }
 0x55b   : > { %v2443_v25 = vpop.f32.mrb[46].mxu1 }
 0x55c   : > { %3824 = vtanh.f32 %v2441_v50  ;;  %v3538_v23 = vpop.f32.mrb[47].mxu1 }
 0x562   : > { %v2837_v51 = vpop.f32.mrb[36].mxu0 }
 0x563   : > { %v2838_v48 = vadd.f32 %v2837_v51, %v2690_v44  ;;  %v2839_v7 = vpop.f32.mrb[37].mxu0 }
 0x564   : > { %v2840_v10 = vadd.f32 %v2839_v7, %v2692_v43  ;;  %v2841_v20 = vpop.f32.mrb[38].mxu0 }
 0x565   : > { %v2907_v21 = vadd.f32 %v2890_v40, %v2838_v48  ;;  %v2842_v22 = vpop.f32.mrb[39].mxu0 }
 0x566   : > { %v3825_v2 = vpop.eup %3824  ;;  %v2908_v63 = vadd.f32 %v2894_v56, %v2840_v10 }
 0x567   : > { %3350 = vst [vmem:[%s4377_s16 + $0x6] sm:$0x3] %v3825_v2  ;;  %v3400_v45 = vmul.f32 -1.442695, %v2907_v21 }
 0x568   : > { %v3401_v1 = vmul.f32 -1.442695, %v2908_v63 }
 0x56a   : > { %3826 = vpow2.f32 %v3401_v1 }
 0x56b   : > { %3828 = vpow2.f32 %v3400_v45 }
 0x56e   : > { %v2878_v58 = vpop.f32.mrb[40].mxu0 }
 0x56f   : > { %v2880_v61 = vpop.f32.mrb[41].mxu0 }
 0x570   : > { %v2882_v57 = vpop.f32.mrb[42].mxu0 }
 0x571   : > { %v2883_v28 = vpop.f32.mrb[43].mxu0 }
 0x574   : > { %v3827_v0 = vpop.eup %3826 }
 0x575   : > { %v3829_v5 = vpop.eup %3828  ;;  %v2921_v6 = vadd.f32 1.0, %v3827_v0 }
 0x576   : > { %v2920_v11 = vadd.f32 1.0, %v3829_v5 }
 0x577   : > { %3830 = vrcp.f32 %v2921_v6 }
 0x578   : > { %3832 = vrcp.f32 %v2920_v11 }
 0x579   : > { %v2731_v8 = vpop.f32.mrb[48].mxu1 }
 0x57a   : > { %v2879_v12 = vadd.f32 %v2878_v58, %v2731_v8  ;;  %v2733_v24 = vpop.f32.mrb[49].mxu1 }
 0x57b   : > { %v2881_v14 = vadd.f32 %v2880_v61, %v2733_v24  ;;  %v2735_v16 = vpop.f32.mrb[50].mxu1 }
 0x57c   : > { %v2909_v15 = vadd.f32 %v2898_v31, %v2879_v12  ;;  %v2736_v27 = vpop.f32.mrb[51].mxu1 }
 0x57d   : > { %v2910_v29 = vadd.f32 %v2902_v9, %v2881_v14 }
 0x57e   : > { %v3402_v33 = vmul.f32 -1.442695, %v2909_v15 }
 0x57f   : > { %3834 = vtanh.f32 %v2910_v29 }
 0x580   : > { %3836 = vpow2.f32 %v3402_v33 }
 0x581   : > { %v3831_v18 = vpop.eup %3830 }
 0x582   : > { %v3833_v55 = vpop.eup %3832  ;;  %v2930_v60 = vmul.f32 %v3831_v18, %v4794_v19 }
 0x589   : > { %v3835_v32 = vpop.eup %3834 }
 0x58a   : > { %v3837_v34 = vpop.eup %3836  ;;  %v2931_v36 = vmul.f32 %v3835_v32, %v3833_v55 }
 0x58b   : > { %v2922_v13 = vadd.f32 1.0, %v3837_v34 }
 0x58c   : > { %v2932_v0 = vadd.f32 %v2931_v36, %v2930_v60  }
 0x58d   : > { %3838 = vrcp.f32 %v2922_v13 }
 0x58e   : > { %3840 = vtanh.f32 %v2932_v0 }
 0x597   : > { %v3839_v26 = vpop.eup %3838 }
 0x598   : > { %v3841_v4 = vpop.eup %3840 }
 0x599   : > { %v2934_v1 = vmul.f32 %v3841_v4, %v3839_v26  }
 0x59b   : > { %vm2935_vm7 = vcmp.gt.f32.partialorder %v2934_v1, 0.0  ;;  %v2936_v42 = vmul.f32 0.2, %v2934_v1 }
 0x59d   : > { %v2937_v53 = vsel %vm2935_vm7, %v2934_v1, %v2936_v42 }
 0x59e   : > { %v2938_v17 = vpack.c.bf16 %v2937_v53, %v2937_v53 }
 0x5a0   : > { %3556 = vmatmul.mubr.bf16.vlgmr.msra.gmra.mrb[44].mxu0 %v2938_v17 }
 0x673   : > { %v3044_v59 = vpop.f32.mrb[44].mxu0 }
 0x674   : > { %v3045_v30 = vadd.f32 %v4868_v39, %v3044_v59  ;;  %v3557_v62 = vpop.f32.mrb[45].mxu0 }
 0x675   : > { %v3047_v37 = vpop.f32.mrb[46].mxu0 }
 0x676   : > { %3842 = vtanh.f32 %v3045_v30  ;;  %v3558_v19 = vpop.f32.mrb[47].mxu0 }
 0x67b   :  { %28 = sbr.rel (!%p26_p0) target bundleno = 1 (0x1), region = 61 }
 0x680   : > { %v3843_v35 = vpop.eup %3842 }
 0x681   : > { %3413 = vst [vmem:[%s4377_s16 + $0x8] sm:$0x3] %v3843_v35 }

// kernel: generator_forward.2
= control target key start
LH: loop header
LB: loop body
LE: loop exit
PB: predicated region body
PF: predicated region fallthrough
CT: control target
= control target key end

     0   :  { %v11898_v1 = vmov 0   ;;  %vm133_vm0 = vcmask 1043456   ;;  %vm129_vm1 = vcmask 326656   ;;  %v11899_v21 = vmov 0.0   ;;  %s16078_s1 = inlined_call_operand.vmem [shape: bf16[40,640], index: 1, kind: input, shape index: {}]   ;;  %s16079_s3 = inlined_call_operand.vmem [shape: bf16[640,4000], index: 3, kind: input, shape index: {}]   ;;  %s16080_s0 = inlined_call_operand.vmem [shape: bf16[2,40], index: 0, kind: input, shape index: {}]   ;;  %s16081_s2 = inlined_call_operand.vmem [shape: f32[1,640], index: 2, kind: input, shape index: {}]   ;;  %s16082_s4 = inlined_call_operand.vmem [shape: f32[1,4000], index: 4, kind: input, shape index: {}]   ;;  %s16083_s5 = inlined_call_operand.vmem [shape: f32[2,4000], index: 5, kind: output, shape index: {}]  }
   0x1   :  { %v11876_v0 = vld [vmem:[%s16078_s1 + $0x4] ss:$20 sps:$4 sm:$0xff]   ;;  %181 = vmatprep.mubr.bf16.mxu0 %v11898_v1  ;;  %222 = vmatprep.mubr.bf16.mxu1 %v11898_v1  ;;  %v11878_v2 = vld [vmem:[%s16078_s1] ss:$20 sps:$4 sm:$0xff]   ;;  %v11881_v5 = vld [vmem:[%s16078_s1 + $0x28] ss:$20 sps:$4 sm:$0xff]  }
   0x2   :  { %149 = vmatprep.subr.bf16.mxu0 %v11876_v0  ;;  %v11879_v3 = vld [vmem:[%s16078_s1 + $0x2c] ss:$20 sps:$4 sm:$0xff]   ;;  %v34_v4 = vld [vmem:[%s16078_s1 + $0x50] sm:$0xff]  ;;  %v11886_v9 = vld [vmem:[%s16078_s1 + $0x8] ss:$20 sps:$4 sm:$0xff]   ;;  %vm11900_vm2 = vmmov 0  }
   0x3   :  { %150 = vmatpush1.bf16.msra.mxu0 %v11878_v2  ;;  %v10409_v6 = vcombine.high %v34_v4, %v34_v4  ;;  %v10408_v7 = vcombine.low %v34_v4, %v34_v4  ;;  %v11884_v8 = vld [vmem:[%s16078_s1 + $0xc] ss:$20 sps:$4 sm:$0xff]   ;;  %v11887_v10 = vld [vmem:[%s16078_s1 + $0x34] ss:$20 sps:$4 sm:$0xff]   ;;  %v35_v11 = vld [vmem:[%s16078_s1 + $0x58] sm:$0xff] }
   0x4   :  { %151 = vmatprep.subr.bf16.mxu0 %v11879_v3  ;;  %190 = vmatprep.subr.bf16.mxu1 %v11884_v8  ;;  %v11889_v12 = vld [vmem:[%s16078_s1 + $0x30] ss:$20 sps:$4 sm:$0xff]   ;;  %v10411_v14 = vcombine.high %v35_v11, %v35_v11  ;;  %v10410_v15 = vcombine.low %v35_v11, %v35_v11  ;;  %v21_v18 = vld [vmem:[%s16080_s0] sm:$0x1]  ;;  %v11893_v25 = vld [vmem:[%s16078_s1 + $0x38] ss:$20 sps:$4 sm:$0xff]  }
   0x5   :  { %191 = vmatpush1.bf16.msra.mxu1 %v11886_v9  ;;  %v135_v13 = vsel %vm133_vm0, %v10408_v7, 0  ;;  %v291_v16 = vld [vmem:[%s16079_s3] sm:$0xff]  ;;  %v292_v28 = vld [vmem:[%s16079_s3 + $0x8] sm:$0xff] }
   0x6   :  { %192 = vmatprep.subr.bf16.mxu1 %v11887_v10  ;;  %v307_v17 = vld [vmem:[%s16079_s3 + $0x80] sm:$0xff]  ;;  %v141_v20 = vsel %vm133_vm0, %v10410_v15, 0  ;;  %v308_v30 = vld [vmem:[%s16079_s3 + $0x88] sm:$0xff] }
   0x7   :  { %152 = vmatpush1.bf16.msra.mxu0 %v11881_v5  ;;  %v11892_v19 = vld [vmem:[%s16078_s1 + $0x10] ss:$20 sps:$4 sm:$0xff]   ;;  %v10419_v22 = vcombine.high %v291_v16, %v307_v17  ;;  %v10418_v26 = vcombine.low %v291_v16, %v307_v17  ;;  %v11894_v27 = vld [vmem:[%s16078_s1 + $0x60] ss:$0 sps:$4 sm:$0xff]   ;;  %v10421_v35 = vcombine.high %v292_v28, %v308_v30  ;;  %v324_v36 = vld [vmem:[%s16079_s3 + $0x108] sm:$0xff]  ;;  %v10420_v41 = vcombine.low %v292_v28, %v308_v30 }
   0x8   :  { %10413 = vmatprep.subr.msk.bf16.mxu0 %vm133_vm0, %v10409_v6  ;;  %v323_v23 = vld [vmem:[%s16079_s3 + $0x100] sm:$0xff]  ;;  %v147_v34 = vsel %vm133_vm0, %v11894_v27, 0  ;;  %v340_v38 = vld [vmem:[%s16079_s3 + $0x188] sm:$0xff] }
   0x9   :  { %193 = vmatpush1.bf16.msra.mxu1 %v11889_v12  ;;  %v339_v24 = vld [vmem:[%s16079_s3 + $0x180] sm:$0xff]  ;;  %v10453_v43 = vcombine.high %v324_v36, %v340_v38  ;;  %v356_v44 = vld [vmem:[%s16079_s3 + $0x208] sm:$0xff]  ;;  %v10452_v49 = vcombine.low %v324_v36, %v340_v38 }
   0xa   :  { %10415 = vmatprep.subr.msk.bf16.mxu1 %vm133_vm0, %v10411_v14  ;;  %v10451_v29 = vcombine.high %v323_v23, %v339_v24  ;;  %v355_v31 = vld [vmem:[%s16079_s3 + $0x200] sm:$0xff]  ;;  %v10450_v33 = vcombine.low %v323_v23, %v339_v24  ;;  %v372_v46 = vld [vmem:[%s16079_s3 + $0x288] sm:$0xff] }
   0xb   :  { %154 = vmatpush1.bf16.msra.mxu0 %v135_v13  ;;  %v371_v32 = vld [vmem:[%s16079_s3 + $0x280] sm:$0xff]  ;;  %v10485_v51 = vcombine.high %v356_v44, %v372_v46  ;;  %v388_v52 = vld [vmem:[%s16079_s3 + $0x308] sm:$0xff]  ;;  %v10484_v57 = vcombine.low %v356_v44, %v372_v46 }
   0xc   :  { %11702 = vmatprep.subr.bf16.mxu0 %v11899_v21  ;;  %v10483_v37 = vcombine.high %v355_v31, %v371_v32  ;;  %v387_v39 = vld [vmem:[%s16079_s3 + $0x300] sm:$0xff]  ;;  %v10482_v42 = vcombine.low %v355_v31, %v371_v32  ;;  %v404_v54 = vld [vmem:[%s16079_s3 + $0x388] sm:$0xff] }
   0xd   :  { %195 = vmatpush1.bf16.msra.mxu1 %v141_v20  ;;  %v403_v40 = vld [vmem:[%s16079_s3 + $0x380] sm:$0xff]  ;;  %v10517_v59 = vcombine.high %v388_v52, %v404_v54  ;;  %v420_v60 = vld [vmem:[%s16079_s3 + $0x408] sm:$0xff]  ;;  %v10516_v2 = vcombine.low %v388_v52, %v404_v54 }
   0xe   :  { %10414 = vmatmul.mubr.msk.bf16.vlgmr.msra.gmra.mrb[0].mxu0 %vm129_vm1, %v21_v18  ;;  %8139 = vmatprep.subr.bf16.mxu1 %v10419_v22  ;;  %v10515_v45 = vcombine.high %v387_v39, %v403_v40  ;;  %v419_v47 = vld [vmem:[%s16079_s3 + $0x400] sm:$0xff]  ;;  %v10514_v50 = vcombine.low %v387_v39, %v403_v40  ;;  %v436_v62 = vld [vmem:[%s16079_s3 + $0x488] sm:$0xff] }
   0xf   :  { %11703 = vmatpush3.bf16.msra.mxu0 %v11892_v19  ;;  %11708 = vmatprep.mubr.msk.bf16.mxu0 %vm11900_vm2, %v11899_v21  ;;  %v435_v48 = vld [vmem:[%s16079_s3 + $0x480] sm:$0xff]  ;;  %v10549_v4 = vcombine.high %v420_v60, %v436_v62  ;;  %v452_v5 = vld [vmem:[%s16079_s3 + $0x508] sm:$0xff]  ;;  %v10548_v10 = vcombine.low %v420_v60, %v436_v62 }
  0x10   :  { %11704 = vmatprep.subr.bf16.mxu0 %v11899_v21  ;;  %10416 = vmatmul.mubr.msk.bf16.vlgmr.msra.gmra.mrb[0].mxu1 %vm129_vm1, %v21_v18  ;;  %v10547_v53 = vcombine.high %v419_v47, %v435_v48  ;;  %v451_v55 = vld [vmem:[%s16079_s3 + $0x500] sm:$0xff]  ;;  %v10546_v58 = vcombine.low %v419_v47, %v435_v48  ;;  %v468_v7 = vld [vmem:[%s16079_s3 + $0x588] sm:$0xff] }
  0x11   :  { %8140 = vmatpush1.bf16.msra.mxu1 %v10418_v26  ;;  %v467_v56 = vld [vmem:[%s16079_s3 + $0x580] sm:$0xff]  ;;  %v10581_v12 = vcombine.high %v452_v5, %v468_v7  ;;  %v484_v13 = vld [vmem:[%s16079_s3 + $0x608] sm:$0xff] }
  0x12   :  { %8141 = vmatprep.subr.bf16.mxu1 %v10451_v29  ;;  %v10579_v61 = vcombine.high %v451_v55, %v467_v56  ;;  %v483_v63 = vld [vmem:[%s16079_s3 + $0x600] sm:$0xff]  ;;  %v10578_v3 = vcombine.low %v451_v55, %v467_v56  ;;  %v500_v15 = vld [vmem:[%s16079_s3 + $0x688] sm:$0xff] }
  0x13   :  { %11705 = vmatpush3.bf16.msra.mxu0 %v11893_v25  ;;  %v499_v0 = vld [vmem:[%s16079_s3 + $0x680] sm:$0xff]  ;;  %v10613_v20 = vcombine.high %v484_v13, %v500_v15  ;;  %v532_v23 = vld [vmem:[%s16079_s3 + $0x788] sm:$0xff]  ;;  %v10612_v26 = vcombine.low %v484_v13, %v500_v15 }
  0x14   :  { %11706 = vmatprep.subr.bf16.mxu0 %v11899_v21  ;;  %v10611_v6 = vcombine.high %v483_v63, %v499_v0  ;;  %v515_v8 = vld [vmem:[%s16079_s3 + $0x700] sm:$0xff]  ;;  %v10610_v11 = vcombine.low %v483_v63, %v499_v0  ;;  %v516_v21 = vld [vmem:[%s16079_s3 + $0x708] sm:$0xff] }
  0x15   :  { %8142 = vmatpush1.bf16.msra.mxu1 %v10450_v33  ;;  %v531_v9 = vld [vmem:[%s16079_s3 + $0x780] sm:$0xff]  ;;  %v10645_v28 = vcombine.high %v516_v21, %v532_v23  ;;  %v548_v29 = vld [vmem:[%s16079_s3 + $0x808] sm:$0xff] }
  0x16   :  { %8143 = vmatprep.subr.bf16.mxu1 %v10483_v37  ;;  %v10643_v14 = vcombine.high %v515_v8, %v531_v9  ;;  %v547_v16 = vld [vmem:[%s16079_s3 + $0x800] sm:$0xff]  ;;  %v10642_v19 = vcombine.low %v515_v8, %v531_v9  ;;  %v564_v31 = vld [vmem:[%s16079_s3 + $0x888] sm:$0xff] }
  0x17   :  { %11707 = vmatpush3.bf16.msra.mxu0 %v147_v34  ;;  %v563_v17 = vld [vmem:[%s16079_s3 + $0x880] sm:$0xff]  ;;  %v10644_v34 = vcombine.low %v516_v21, %v532_v23  ;;  %v10677_v36 = vcombine.high %v548_v29, %v564_v31  ;;  %v580_v37 = vld [vmem:[%s16079_s3 + $0x908] sm:$0xff] }
  0x18   :  { %8262 = vmatprep.subr.bf16.mxu0 %v10421_v35  ;;  %v10675_v22 = vcombine.high %v547_v16, %v563_v17  ;;  %v579_v24 = vld [vmem:[%s16079_s3 + $0x900] sm:$0xff]  ;;  %v10674_v27 = vcombine.low %v547_v16, %v563_v17  ;;  %v596_v39 = vld [vmem:[%s16079_s3 + $0x988] sm:$0xff] }
  0x19   :  { %8144 = vmatpush1.bf16.msra.mxu1 %v10482_v42  ;;  %v595_v25 = vld [vmem:[%s16079_s3 + $0x980] sm:$0xff]  ;;  %v10676_v42 = vcombine.low %v548_v29, %v564_v31  ;;  %v10709_v44 = vcombine.high %v580_v37, %v596_v39  ;;  %v628_v47 = vld [vmem:[%s16079_s3 + $0xa88] sm:$0xff] }
  0x1a   :  { %11709 = vmatmul.mubr.msk.bf16.vlgmr.msra.gmra.mrb[4].mxu0 %vm129_vm1, %v21_v18  ;;  %8145 = vmatprep.subr.bf16.mxu1 %v10515_v45  ;;  %v10580_v18 = vcombine.low %v452_v5, %v468_v7  ;;  %v10707_v30 = vcombine.high %v579_v24, %v595_v25  ;;  %v611_v32 = vld [vmem:[%s16079_s3 + $0xa00] sm:$0xff]  ;;  %v10706_v35 = vcombine.low %v579_v24, %v595_v25  ;;  %v612_v45 = vld [vmem:[%s16079_s3 + $0xa08] sm:$0xff] }
  0x1b   :  { %8263 = vmatpush1.bf16.msra.mxu0 %v10420_v41  ;;  %v627_v33 = vld [vmem:[%s16079_s3 + $0xa80] sm:$0xff]  ;;  %v10741_v52 = vcombine.high %v612_v45, %v628_v47  ;;  %v660_v55 = vld [vmem:[%s16079_s3 + $0xb88] sm:$0xff] }
  0x1c   :  { %8264 = vmatprep.subr.bf16.mxu0 %v10453_v43  ;;  %v10739_v38 = vcombine.high %v611_v32, %v627_v33  ;;  %v643_v40 = vld [vmem:[%s16079_s3 + $0xb00] sm:$0xff]  ;;  %v10738_v43 = vcombine.low %v611_v32, %v627_v33  ;;  %v676_v62 = vld [vmem:[%s16079_s3 + $0xc08] sm:$0xff]  ;;  %v39_v33 = vlaneseq }
  0x1d   :  { %8146 = vmatpush1.bf16.msra.mxu1 %v10514_v50  ;;  %v659_v41 = vld [vmem:[%s16079_s3 + $0xb80] sm:$0xff]  ;;  %v10708_v50 = vcombine.low %v580_v37, %v596_v39  ;;  %v692_v63 = vld [vmem:[%s16079_s3 + $0xc88] sm:$0xff] }
  0x1e   :  { %8147 = vmatprep.subr.bf16.mxu1 %v10547_v53  ;;  %v10771_v46 = vcombine.high %v643_v40, %v659_v41  ;;  %v675_v48 = vld [vmem:[%s16079_s3 + $0xc00] sm:$0xff]  ;;  %v644_v53 = vld [vmem:[%s16079_s3 + $0xb08] sm:$0xff] }
  0x1f   :  { %8265 = vmatpush1.bf16.msra.mxu0 %v10452_v49  ;;  %v691_v49 = vld [vmem:[%s16079_s3 + $0xc80] sm:$0xff]  ;;  %v10773_v60 = vcombine.high %v644_v53, %v660_v55  ;;  %v10772_v0 = vcombine.low %v644_v53, %v660_v55  ;;  %v724_v5 = vld [vmem:[%s16079_s3 + $0xd88] sm:$0xff] }
  0x20   :  { %8266 = vmatprep.subr.bf16.mxu0 %v10485_v51  ;;  %v10770_v51 = vcombine.low %v643_v40, %v659_v41  ;;  %v10803_v54 = vcombine.high %v675_v48, %v691_v49  ;;  %v707_v56 = vld [vmem:[%s16079_s3 + $0xd00] sm:$0xff]  ;;  %v756_v13 = vld [vmem:[%s16079_s3 + $0xe88] sm:$0xff] }
  0x21   :  { %8148 = vmatpush1.bf16.msra.mxu1 %v10546_v58  ;;  %v10740_v58 = vcombine.low %v612_v45, %v628_v47  ;;  %v739_v9 = vld [vmem:[%s16079_s3 + $0xe00] sm:$0xff]  ;;  %v788_v21 = vld [vmem:[%s16079_s3 + $0xf88] sm:$0xff] }
  0x22   :  { %8149 = vmatprep.subr.bf16.mxu1 %v10579_v61  ;;  %v771_v17 = vld [vmem:[%s16079_s3 + $0xf00] sm:$0xff]  ;;  %v820_v29 = vld [vmem:[%s16079_s3 + $0x1088] sm:$0xff] }
  0x23   :  { %8267 = vmatpush1.bf16.msra.mxu0 %v10484_v57  ;;  %v723_v57 = vld [vmem:[%s16079_s3 + $0xd80] sm:$0xff]  ;;  %v852_v55 = vld [vmem:[%s16079_s3 + $0x1188] sm:$0xff] }
  0x24   :  { %8268 = vmatprep.subr.bf16.mxu0 %v10517_v59  ;;  %v10802_v59 = vcombine.low %v675_v48, %v691_v49  ;;  %v10835_v61 = vcombine.high %v707_v56, %v723_v57  ;;  %v803_v25 = vld [vmem:[%s16079_s3 + $0x1000] sm:$0xff] }
  0x25   :  { %8150 = vmatpush1.bf16.msra.mxu1 %v10578_v3  ;;  %v10805_v3 = vcombine.high %v676_v62, %v692_v63 }
  0x26   :  { %8151 = vmatprep.subr.bf16.mxu1 %v10611_v6  ;;  %v10804_v6 = vcombine.low %v676_v62, %v692_v63 }
  0x27   :  { %8269 = vmatpush1.bf16.msra.mxu0 %v10516_v2  ;;  %v10834_v2 = vcombine.low %v707_v56, %v723_v57 }
  0x28   :  { %8270 = vmatprep.subr.bf16.mxu0 %v10549_v4  ;;  %v708_v4 = vld [vmem:[%s16079_s3 + $0xd08] sm:$0xff] }
  0x29   :  { %8152 = vmatpush1.bf16.msra.mxu1 %v10610_v11  ;;  %v10837_v7 = vcombine.high %v708_v4, %v724_v5  ;;  %v10836_v8 = vcombine.low %v708_v4, %v724_v5  ;;  %v740_v11 = vld [vmem:[%s16079_s3 + $0xe08] sm:$0xff]  ;;  %v883_v4 = vld [vmem:[%s16079_s3 + $0x1280] sm:$0xff] }
  0x2a   :  { %8153 = vmatprep.subr.bf16.mxu1 %v10643_v14  ;;  %v10868_v15 = vcombine.low %v740_v11, %v756_v13  ;;  %v10869_v16 = vcombine.high %v740_v11, %v756_v13  ;;  %v868_v5 = vld [vmem:[%s16079_s3 + $0x1208] sm:$0xff]  ;;  %v899_v13 = vld [vmem:[%s16079_s3 + $0x1300] sm:$0xff] }
  0x2b   :  { %8271 = vmatpush1.bf16.msra.mxu0 %v10548_v10  ;;  %v755_v10 = vld [vmem:[%s16079_s3 + $0xe80] sm:$0xff] }
  0x2c   :  { %8272 = vmatprep.subr.bf16.mxu0 %v10581_v12  ;;  %v10867_v12 = vcombine.high %v739_v9, %v755_v10  ;;  %v10866_v14 = vcombine.low %v739_v9, %v755_v10 }
  0x2d   :  { %8154 = vmatpush1.bf16.msra.mxu1 %v10642_v19  ;;  %v772_v19 = vld [vmem:[%s16079_s3 + $0xf08] sm:$0xff] }
  0x2e   :  { %8155 = vmatprep.subr.bf16.mxu1 %v10675_v22  ;;  %v10900_v23 = vcombine.low %v772_v19, %v788_v21  ;;  %v10901_v24 = vcombine.high %v772_v19, %v788_v21 }
  0x2f   :  { %8273 = vmatpush1.bf16.msra.mxu0 %v10580_v18  ;;  %v787_v18 = vld [vmem:[%s16079_s3 + $0xf80] sm:$0xff] }
  0x30   :  { %8274 = vmatprep.subr.bf16.mxu0 %v10613_v20  ;;  %v10899_v20 = vcombine.high %v771_v17, %v787_v18  ;;  %v10898_v22 = vcombine.low %v771_v17, %v787_v18  ;;  %v916_v17 = vld [vmem:[%s16079_s3 + $0x1388] sm:$0xff] }
  0x31   :  { %8156 = vmatpush1.bf16.msra.mxu1 %v10674_v27  ;;  %v804_v27 = vld [vmem:[%s16079_s3 + $0x1008] sm:$0xff] }
  0x32   :  { %8157 = vmatprep.subr.bf16.mxu1 %v10707_v30  ;;  %v10932_v31 = vcombine.low %v804_v27, %v820_v29  ;;  %v10933_v32 = vcombine.high %v804_v27, %v820_v29  ;;  %v932_v27 = vld [vmem:[%s16079_s3 + $0x1408] sm:$0xff] }
  0x33   :  { %8275 = vmatpush1.bf16.msra.mxu0 %v10612_v26  ;;  %v819_v26 = vld [vmem:[%s16079_s3 + $0x1080] sm:$0xff] }
  0x34   :  { %8276 = vmatprep.subr.bf16.mxu0 %v10645_v28  ;;  %v10931_v28 = vcombine.high %v803_v25, %v819_v26  ;;  %v10930_v30 = vcombine.low %v803_v25, %v819_v26  ;;  %v931_v25 = vld [vmem:[%s16079_s3 + $0x1400] sm:$0xff] }
  0x35   :  { %8158 = vmatpush1.bf16.msra.mxu1 %v10706_v35  ;;  %v947_v26 = vld [vmem:[%s16079_s3 + $0x1480] sm:$0xff] }
  0x36   :  { %8159 = vmatprep.subr.bf16.mxu1 %v10739_v38 }
  0x37   :  { %8277 = vmatpush1.bf16.msra.mxu0 %v10644_v34  ;;  %v12188_v34 = vshrl.u32 %v39_v33, 7  ;;  %v963_v33 = vld [vmem:[%s16079_s3 + $0x1500] sm:$0xff] }
  0x38   :  { %8278 = vmatprep.subr.bf16.mxu0 %v10677_v36  ;;  %v12196_v36 = vld [vmem:[%s16081_s2] sm:$0x1f] }
  0x39   :  { %8160 = vmatpush1.bf16.msra.mxu1 %v10738_v43  ;;  %v12191_v35 = vsub.s32 0, %v12188_v34  ;;  %v12199_v37 = vsub.s32 1, %v12188_v34  ;;  %v12206_v40 = vsub.s32 3, %v12188_v34 }
  0x3a   :  { %8161 = vmatprep.subr.bf16.mxu1 %v10771_v46 }
  0x3b   :  { %8279 = vmatpush1.bf16.msra.mxu0 %v10676_v42  ;;  %v42_v38 = vrot.slane %v12196_v36, %v12191_v35  ;;  %v46_v39 = vrot.slane %v12196_v36, %v12199_v37  ;;  %v54_v46 = vrot.slane %v12196_v36, %v12206_v40 }
  0x3c   :  { %8280 = vmatprep.subr.bf16.mxu0 %v10709_v44 }
  0x3d   :  { %8162 = vmatpush1.bf16.msra.mxu1 %v10770_v51  ;;  %v851_v51 = vld [vmem:[%s16079_s3 + $0x1180] sm:$0xff] }
  0x3e   :  { %8163 = vmatprep.subr.bf16.mxu1 %v10803_v54  ;;  %v836_v54 = vld [vmem:[%s16079_s3 + $0x1108] sm:$0xff] }
  0x3f   :  { %8281 = vmatpush1.bf16.msra.mxu0 %v10708_v50  ;;  %v835_v50 = vld [vmem:[%s16079_s3 + $0x1100] sm:$0xff]  ;;  %v10964_v9 = vcombine.low %v836_v54, %v852_v55 }
  0x40   :  { %8282 = vmatprep.subr.bf16.mxu0 %v10741_v52 }
  0x41   :  { %8164 = vmatpush1.bf16.msra.mxu1 %v10802_v59 }
  0x42   :  { %8165 = vmatprep.subr.bf16.mxu1 %v10835_v61  ;;  %v10963_v61 = vcombine.high %v835_v50, %v851_v51 }
  0x43   :  { %8283 = vmatpush1.bf16.msra.mxu0 %v10740_v58 }
  0x44   :  { %8284 = vmatprep.subr.bf16.mxu0 %v10773_v60 }
  0x45   :  { %8166 = vmatpush1.bf16.msra.mxu1 %v10834_v2  ;;  %v867_v2 = vld [vmem:[%s16079_s3 + $0x1200] sm:$0xff] }
  0x46   :  { %8167 = vmatprep.subr.bf16.mxu1 %v10867_v12  ;;  %v10995_v11 = vcombine.high %v867_v2, %v883_v4 }
  0x47   :  { %8285 = vmatpush1.bf16.msra.mxu0 %v10772_v0  ;;  %v10965_v0 = vcombine.high %v836_v54, %v852_v55  ;;  %v1027_v55 = vld [vmem:[%s16079_s3 + $0x1700] sm:$0xff] }
  0x48   :  { %8286 = vmatprep.subr.bf16.mxu0 %v10805_v3 }
  0x49   :  { %8168 = vmatpush1.bf16.msra.mxu1 %v10866_v14 }
  0x4a   :  { %8169 = vmatprep.subr.bf16.mxu1 %v10899_v20  ;;  %v10994_v20 = vcombine.low %v867_v2, %v883_v4  ;;  %v1059_v2 = vld [vmem:[%s16079_s3 + $0x1800] sm:$0xff]  ;;  %v1060_v4 = vld [vmem:[%s16079_s3 + $0x1808] sm:$0xff] }
  0x4b   :  { %8287 = vmatpush1.bf16.msra.mxu0 %v10804_v6  ;;  %v884_v6 = vld [vmem:[%s16079_s3 + $0x1288] sm:$0xff] }
  0x4c   :  { %8288 = vmatprep.subr.bf16.mxu0 %v10837_v7  ;;  %v10997_v12 = vcombine.high %v868_v5, %v884_v6  ;;  %v10996_v21 = vcombine.low %v868_v5, %v884_v6  ;;  %v1076_v5 = vld [vmem:[%s16079_s3 + $0x1888] sm:$0xff] }
  0x4d   :  { %8170 = vmatpush1.bf16.msra.mxu1 %v10898_v22 }
  0x4e   :  { %8180 = vmatprep.subr.bf16.mxu1 %v10931_v28  ;;  %v948_v28 = vld [vmem:[%s16079_s3 + $0x1488] sm:$0xff] }
  0x4f   :  { %8289 = vmatpush1.bf16.msra.mxu0 %v10836_v8  ;;  %v10962_v8 = vcombine.low %v835_v50, %v851_v51 }
  0x50   :  { %8290 = vmatprep.subr.bf16.mxu0 %v10869_v16  ;;  %v900_v16 = vld [vmem:[%s16079_s3 + $0x1308] sm:$0xff] }
  0x53   :  { %8291 = vmatpush1.bf16.msra.mxu0 %v10868_v15  ;;  %v915_v15 = vld [vmem:[%s16079_s3 + $0x1380] sm:$0xff] }
  0x54   :  { %8292 = vmatprep.subr.bf16.mxu0 %v10901_v24  ;;  %v11029_v24 = vcombine.high %v900_v16, %v916_v17  ;;  %v11026_v29 = vcombine.low %v899_v13, %v915_v15 }
  0x57   :  { %8293 = vmatpush1.bf16.msra.mxu0 %v10900_v23  ;;  %v11027_v23 = vcombine.high %v899_v13, %v915_v15  ;;  %v1092_v13 = vld [vmem:[%s16079_s3 + $0x1908] sm:$0xff] }
  0x58   :  { %8303 = vmatprep.subr.bf16.mxu0 %v10933_v32  ;;  %v11061_v32 = vcombine.high %v932_v27, %v948_v28  ;;  %v1108_v15 = vld [vmem:[%s16079_s3 + $0x1988] sm:$0xff] }
  0xe1   :  { %v183_v41 = vpop.f32.mrb[0].mxu0 }
  0xe2   :  { %v184_v42 = vadd.f32 %v183_v41, %v42_v38  ;;  %v185_v43 = vpop.f32.mrb[1].mxu0  ;;  %v979_v38 = vld [vmem:[%s16079_s3 + $0x1580] sm:$0xff]  ;;  %v980_v41 = vld [vmem:[%s16079_s3 + $0x1588] sm:$0xff] }
  0xe3   :  { %v186_v44 = vadd.f32 %v185_v43, %v46_v39  ;;  %v187_v45 = vpop.f32.mrb[2].mxu0  ;;  %v12216_v52 = vpop.f32.mrb[0].mxu1  ;;  %v964_v39 = vld [vmem:[%s16079_s3 + $0x1508] sm:$0xff]  ;;  %v11060_v43 = vcombine.low %v932_v27, %v948_v28  ;;  %v11090_v50 = vcombine.low %v963_v33, %v979_v38  ;;  %v1155_v28 = vld [vmem:[%s16079_s3 + $0x1b00] sm:$0xff] }
  0xe4   :  { %vm271_vm3 = vcmp.gt.f32.partialorder %v184_v42, 0.0  ;;  %v276_v47 = vmul.f32 0.2, %v184_v42  ;;  %v188_v48 = vpop.f32.mrb[3].mxu0  ;;  %v226_v56 = vpop.f32.mrb[1].mxu1  ;;  %v11093_v45 = vcombine.high %v964_v39, %v980_v41  ;;  %v11092_v51 = vcombine.low %v964_v39, %v980_v41  ;;  %v1187_v41 = vld [vmem:[%s16079_s3 + $0x1c00] sm:$0xff] }
  0xe5   :  { %vm272_vm4 = vcmp.gt.f32.partialorder %v186_v44, 0.0  ;;  %v277_v49 = vmul.f32 0.2, %v186_v44  ;;  %v227_v58 = vadd.f32 %v226_v56, %v54_v46  ;;  %v228_v59 = vpop.f32.mrb[2].mxu1  ;;  %v995_v46 = vld [vmem:[%s16079_s3 + $0x1600] sm:$0xff]  ;;  %v996_v48 = vld [vmem:[%s16079_s3 + $0x1608] sm:$0xff] }
  0xe6   :  { %v281_v53 = vsel %vm271_vm3, %v184_v42, %v276_v47  ;;  %v229_v62 = vpop.f32.mrb[3].mxu1  ;;  %v11058_v42 = vcombine.low %v931_v25, %v947_v26  ;;  %v1011_v47 = vld [vmem:[%s16079_s3 + $0x1680] sm:$0xff] }
  0xe7   :  { %v282_v57 = vsel %vm272_vm4, %v186_v44, %v277_v49  ;;  %v12226_v63 = vpack.c.bf16 %v281_v53, %v281_v53  ;;  %vm274_vm5 = vcmp.gt.f32.partialorder %v227_v58, 0.0  ;;  %v279_v3 = vmul.f32 0.2, %v227_v58  ;;  %v1012_v49 = vld [vmem:[%s16079_s3 + $0x1688] sm:$0xff]  ;;  %v1043_v56 = vld [vmem:[%s16079_s3 + $0x1780] sm:$0xff] }
  0xe8   :  { %v12224_v60 = vpack.c.bf16 %v282_v57, %v282_v57  ;;  %v11091_v44 = vcombine.high %v963_v33, %v979_v38  ;;  %v11123_v53 = vcombine.high %v995_v46, %v1011_v47  ;;  %v11125_v54 = vcombine.high %v996_v48, %v1012_v49  ;;  %v1028_v57 = vld [vmem:[%s16079_s3 + $0x1708] sm:$0xff] }
  0xe9   :  { %v284_v7 = vsel %vm274_vm5, %v227_v58, %v279_v3  ;;  %v1044_v58 = vld [vmem:[%s16079_s3 + $0x1788] sm:$0xff]  ;;  %v11122_v59 = vcombine.low %v995_v46, %v1011_v47  ;;  %v11155_v62 = vcombine.high %v1027_v55, %v1043_v56  ;;  %v1075_v3 = vld [vmem:[%s16079_s3 + $0x1880] sm:$0xff]  ;;  %v11154_v6 = vcombine.low %v1027_v55, %v1043_v56 }
  0xea   :  { %8171 = vmatprep.mubr.bf16.mxu1 %v12224_v60  ;;  %8294 = vmatprep.mubr.bf16.mxu0 %v12224_v60  ;;  %v12244_v10 = vpack.c.bf16 %v284_v7, %v284_v7  ;;  %v11156_v7 = vcombine.low %v1028_v57, %v1044_v58 }
  0xeb   :  { %8172 = vmatmul.mubr.bf16.vlgmr.msra.gmra.mrb[4].mxu1 %v12226_v63  ;;  %8295 = vmatmul.mubr.bf16.vlgmr.msra.gmra.mrb[8].mxu0 %v12226_v63 }
  0xec   :  { %8181 = vmatpush1.bf16.msra.mxu1 %v10930_v30  ;;  %8304 = vmatpush1.bf16.msra.mxu0 %v10932_v31  ;;  %v11028_v30 = vcombine.low %v900_v16, %v916_v17  ;;  %v11059_v31 = vcombine.high %v931_v25, %v947_v26  ;;  %v11186_v16 = vcombine.low %v1059_v2, %v1075_v3 }
  0xed   :  { %8182 = vmatprep.subr.bf16.mxu1 %v10963_v61  ;;  %8305 = vmatprep.subr.bf16.mxu0 %v10965_v0  ;;  %v12249_v14 = vpop.f32.mrb[4].mxu0  ;;  %v11124_v61 = vcombine.low %v996_v48, %v1012_v49  ;;  %v11157_v0 = vcombine.high %v1028_v57, %v1044_v58  ;;  %v11188_v17 = vcombine.low %v1060_v4, %v1076_v5  ;;  %v1219_v49 = vld [vmem:[%s16079_s3 + $0x1d00] sm:$0xff] }
  0xee   :  { %8212 = vmatprep.mubr.bf16.mxu1 %v12244_v10  ;;  %8335 = vmatprep.mubr.bf16.mxu0 %v12244_v10  ;;  %v11710_v18 = vpop.f32.mrb[5].mxu0  ;;  %v11220_v25 = vcombine.low %v1092_v13, %v1108_v15 }
  0xef   :  { %v268_v19 = vpop.f32.mrb[6].mxu0 }
  0xf0   :  { %8183 = vmatpush1.bf16.msra.mxu1 %v10962_v8  ;;  %8306 = vmatpush1.bf16.msra.mxu0 %v10964_v9  ;;  %v11711_v22 = vpop.f32.mrb[7].mxu0  ;;  %v11187_v8 = vcombine.high %v1059_v2, %v1075_v3  ;;  %v11189_v9 = vcombine.high %v1060_v4, %v1076_v5  ;;  %v11221_v19 = vcombine.high %v1092_v13, %v1108_v15  ;;  %v1268_v2 = vld [vmem:[%s16079_s3 + $0x1e88] sm:$0xff] }
  0xf1   :  { %8184 = vmatprep.subr.bf16.mxu1 %v10995_v11  ;;  %8307 = vmatprep.subr.bf16.mxu0 %v10997_v12  ;;  %v1091_v11 = vld [vmem:[%s16079_s3 + $0x1900] sm:$0xff]  ;;  %v1124_v22 = vld [vmem:[%s16079_s3 + $0x1a08] sm:$0xff] }
  0xf2   :  { %v1107_v12 = vld [vmem:[%s16079_s3 + $0x1980] sm:$0xff] }
  0xf3   :  { %v11219_v18 = vcombine.high %v1091_v11, %v1107_v12 }
  0xf4   :  { %8185 = vmatpush1.bf16.msra.mxu1 %v10994_v20  ;;  %8308 = vmatpush1.bf16.msra.mxu0 %v10996_v21  ;;  %v1123_v20 = vld [vmem:[%s16079_s3 + $0x1a00] sm:$0xff] }
  0xf5   :  { %8186 = vmatprep.subr.bf16.mxu1 %v11027_v23  ;;  %8309 = vmatprep.subr.bf16.mxu0 %v11029_v24  ;;  %v1139_v21 = vld [vmem:[%s16079_s3 + $0x1a80] sm:$0xff]  ;;  %v1140_v23 = vld [vmem:[%s16079_s3 + $0x1a88] sm:$0xff]  ;;  %v11218_v24 = vcombine.low %v1091_v11, %v1107_v12 }
  0xf6   :  { %v11251_v26 = vcombine.high %v1123_v20, %v1139_v21  ;;  %v11253_v27 = vcombine.high %v1124_v22, %v1140_v23  ;;  %v11252_v33 = vcombine.low %v1124_v22, %v1140_v23  ;;  %v1284_v11 = vld [vmem:[%s16079_s3 + $0x1f08] sm:$0xff] }
  0xf7   :  { %v1300_v12 = vld [vmem:[%s16079_s3 + $0x1f88] sm:$0xff] }
  0xf8   :  { %8187 = vmatpush1.bf16.msra.mxu1 %v11026_v29  ;;  %8310 = vmatpush1.bf16.msra.mxu0 %v11028_v30  ;;  %v1171_v29 = vld [vmem:[%s16079_s3 + $0x1b80] sm:$0xff]  ;;  %v1156_v30 = vld [vmem:[%s16079_s3 + $0x1b08] sm:$0xff]  ;;  %v11412_v23 = vcombine.low %v1284_v11, %v1300_v12 }
  0xf9   :  { %8188 = vmatprep.subr.bf16.mxu1 %v11059_v31  ;;  %8311 = vmatprep.subr.bf16.mxu0 %v11061_v32  ;;  %v1172_v31 = vld [vmem:[%s16079_s3 + $0x1b88] sm:$0xff]  ;;  %v11250_v32 = vcombine.low %v1123_v20, %v1139_v21  ;;  %v11283_v38 = vcombine.high %v1155_v28, %v1171_v29 }
  0xfa   :  { %v11285_v39 = vcombine.high %v1156_v30, %v1172_v31  ;;  %v11284_v46 = vcombine.low %v1156_v30, %v1172_v31  ;;  %v1316_v20 = vld [vmem:[%s16079_s3 + $0x2008] sm:$0xff] }
  0xfb   :  { %v1332_v21 = vld [vmem:[%s16079_s3 + $0x2088] sm:$0xff] }
  0xfc   :  { %8189 = vmatpush1.bf16.msra.mxu1 %v11058_v42  ;;  %8312 = vmatpush1.bf16.msra.mxu0 %v11060_v43  ;;  %v1203_v42 = vld [vmem:[%s16079_s3 + $0x1c80] sm:$0xff]  ;;  %v1188_v43 = vld [vmem:[%s16079_s3 + $0x1c08] sm:$0xff] }
  0xfd   :  { %8190 = vmatprep.subr.bf16.mxu1 %v11091_v44  ;;  %8313 = vmatprep.subr.bf16.mxu0 %v11093_v45  ;;  %v1204_v44 = vld [vmem:[%s16079_s3 + $0x1c88] sm:$0xff]  ;;  %v11282_v45 = vcombine.low %v1155_v28, %v1171_v29  ;;  %v11315_v47 = vcombine.high %v1187_v41, %v1203_v42  ;;  %v11314_v55 = vcombine.low %v1187_v41, %v1203_v42  ;;  %v1363_v28 = vld [vmem:[%s16079_s3 + $0x2180] sm:$0xff] }
  0xfe   :  { %v11317_v48 = vcombine.high %v1188_v43, %v1204_v44  ;;  %v11316_v56 = vcombine.low %v1188_v43, %v1204_v44  ;;  %v1348_v29 = vld [vmem:[%s16079_s3 + $0x2108] sm:$0xff]  ;;  %v1379_v41 = vld [vmem:[%s16079_s3 + $0x2200] sm:$0xff] }
  0xff   :  { %v1364_v30 = vld [vmem:[%s16079_s3 + $0x2188] sm:$0xff]  ;;  %v1395_v42 = vld [vmem:[%s16079_s3 + $0x2280] sm:$0xff] }
 0x100   :  { %8191 = vmatpush1.bf16.msra.mxu1 %v11090_v50  ;;  %8314 = vmatpush1.bf16.msra.mxu0 %v11092_v51  ;;  %v12374_v50 = vsub.s32 2, %v12188_v34  ;;  %v1235_v51 = vld [vmem:[%s16079_s3 + $0x1d80] sm:$0xff]  ;;  %v1380_v43 = vld [vmem:[%s16079_s3 + $0x2208] sm:$0xff] }
 0x101   :  { %8192 = vmatprep.subr.bf16.mxu1 %v11123_v53  ;;  %8315 = vmatprep.subr.bf16.mxu0 %v11125_v54  ;;  %v1220_v53 = vld [vmem:[%s16079_s3 + $0x1d08] sm:$0xff]  ;;  %v11347_v57 = vcombine.high %v1219_v49, %v1235_v51  ;;  %v11346_v3 = vcombine.low %v1219_v49, %v1235_v51  ;;  %v1411_v49 = vld [vmem:[%s16079_s3 + $0x2300] sm:$0xff] }
 0x102   :  { %v1236_v54 = vld [vmem:[%s16079_s3 + $0x1d88] sm:$0xff]  ;;  %v1427_v51 = vld [vmem:[%s16079_s3 + $0x2380] sm:$0xff] }
 0x103   :  { %v11349_v58 = vcombine.high %v1220_v53, %v1236_v54  ;;  %v11348_v4 = vcombine.low %v1220_v53, %v1236_v54  ;;  %v1396_v44 = vld [vmem:[%s16079_s3 + $0x2288] sm:$0xff] }
 0x104   :  { %8193 = vmatpush1.bf16.msra.mxu1 %v11122_v59  ;;  %8316 = vmatpush1.bf16.msra.mxu0 %v11124_v61  ;;  %v1251_v59 = vld [vmem:[%s16079_s3 + $0x1e00] sm:$0xff]  ;;  %v50_v61 = vrot.slane %v12196_v36, %v12374_v50  ;;  %v1412_v53 = vld [vmem:[%s16079_s3 + $0x2308] sm:$0xff] }
 0x105   :  { %8194 = vmatprep.subr.bf16.mxu1 %v11155_v62  ;;  %8317 = vmatprep.subr.bf16.mxu0 %v11157_v0  ;;  %v1267_v62 = vld [vmem:[%s16079_s3 + $0x1e80] sm:$0xff]  ;;  %v1252_v0 = vld [vmem:[%s16079_s3 + $0x1e08] sm:$0xff] }
 0x106   :  { %v11379_v5 = vcombine.high %v1251_v59, %v1267_v62  ;;  %v11378_v13 = vcombine.low %v1251_v59, %v1267_v62  ;;  %v11380_v15 = vcombine.low %v1252_v0, %v1268_v2  ;;  %v1428_v54 = vld [vmem:[%s16079_s3 + $0x2388] sm:$0xff]  ;;  %v1443_v59 = vld [vmem:[%s16079_s3 + $0x2400] sm:$0xff] }
 0x107   :  { %v1444_v62 = vld [vmem:[%s16079_s3 + $0x2408] sm:$0xff] }
 0x108   :  { %8195 = vmatpush1.bf16.msra.mxu1 %v11154_v6  ;;  %8318 = vmatpush1.bf16.msra.mxu0 %v11156_v7  ;;  %v11381_v6 = vcombine.high %v1252_v0, %v1268_v2  ;;  %v1283_v7 = vld [vmem:[%s16079_s3 + $0x1f00] sm:$0xff]  ;;  %v1460_v0 = vld [vmem:[%s16079_s3 + $0x2488] sm:$0xff]  ;;  %v11538_v2 = vcombine.low %v1411_v49, %v1427_v51 }
 0x109   :  { %8196 = vmatprep.subr.bf16.mxu1 %v11187_v8  ;;  %8319 = vmatprep.subr.bf16.mxu0 %v11189_v9  ;;  %v225_v8 = vadd.f32 %v12216_v52, %v50_v61  ;;  %v1299_v9 = vld [vmem:[%s16079_s3 + $0x1f80] sm:$0xff]  ;;  %v11413_v52 = vcombine.high %v1284_v11, %v1300_v12  ;;  %v1492_v11 = vld [vmem:[%s16079_s3 + $0x2588] sm:$0xff] }
 0x10a   :  { %v11410_v22 = vcombine.low %v1283_v7, %v1299_v9  ;;  %v1459_v61 = vld [vmem:[%s16079_s3 + $0x2480] sm:$0xff] }
 0x10b   :  { %vm273_vm6 = vcmp.gt.f32.partialorder %v225_v8, 0.0  ;;  %v11570_v12 = vcombine.low %v1443_v59, %v1459_v61 }
 0x10c   :  { %8197 = vmatpush1.bf16.msra.mxu1 %v11186_v16  ;;  %8320 = vmatpush1.bf16.msra.mxu0 %v11188_v17  ;;  %v11411_v16 = vcombine.high %v1283_v7, %v1299_v9  ;;  %v1315_v17 = vld [vmem:[%s16079_s3 + $0x2000] sm:$0xff]  ;;  %v1476_v9 = vld [vmem:[%s16079_s3 + $0x2508] sm:$0xff] }
 0x10d   :  { %8198 = vmatprep.subr.bf16.mxu1 %v11219_v18  ;;  %8321 = vmatprep.subr.bf16.mxu0 %v11221_v19  ;;  %v278_v18 = vmul.f32 0.2, %v225_v8  ;;  %v1331_v19 = vld [vmem:[%s16079_s3 + $0x2080] sm:$0xff] }
 0x10e   :  { %v11442_v31 = vcombine.low %v1315_v17, %v1331_v19  ;;  %v1475_v7 = vld [vmem:[%s16079_s3 + $0x2500] sm:$0xff] }
 0x110   :  { %8199 = vmatpush1.bf16.msra.mxu1 %v11218_v24  ;;  %8322 = vmatpush1.bf16.msra.mxu0 %v11220_v25  ;;  %v11443_v24 = vcombine.high %v1315_v17, %v1331_v19  ;;  %v11445_v25 = vcombine.high %v1316_v20, %v1332_v21  ;;  %v1507_v17 = vld [vmem:[%s16079_s3 + $0x2600] sm:$0xff]  ;;  %v1508_v19 = vld [vmem:[%s16079_s3 + $0x2608] sm:$0xff] }
 0x111   :  { %8200 = vmatprep.subr.bf16.mxu1 %v11251_v26  ;;  %8323 = vmatprep.subr.bf16.mxu0 %v11253_v27  ;;  %v1347_v26 = vld [vmem:[%s16079_s3 + $0x2100] sm:$0xff]  ;;  %v283_v27 = vsel %vm273_vm6, %v225_v8, %v278_v18 }
 0x112   :  { %v1491_v8 = vld [vmem:[%s16079_s3 + $0x2580] sm:$0xff] }
 0x113   :  { %v1523_v18 = vld [vmem:[%s16079_s3 + $0x2680] sm:$0xff] }
 0x114   :  { %8201 = vmatpush1.bf16.msra.mxu1 %v11250_v32  ;;  %8324 = vmatpush1.bf16.msra.mxu0 %v11252_v33  ;;  %v11444_v32 = vcombine.low %v1316_v20, %v1332_v21  ;;  %v12436_v33 = vpack.c.bf16 %v283_v27, %v283_v27  ;;  %v11602_v20 = vcombine.low %v1475_v7, %v1491_v8  ;;  %v1540_v27 = vld [vmem:[%s16079_s3 + $0x2708] sm:$0xff] }
 0x115   :  { %8202 = vmatprep.subr.bf16.mxu1 %v11283_v38  ;;  %8325 = vmatprep.subr.bf16.mxu0 %v11285_v39  ;;  %v11475_v38 = vcombine.high %v1347_v26, %v1363_v28  ;;  %v11477_v39 = vcombine.high %v1348_v29, %v1364_v30  ;;  %v11604_v21 = vcombine.low %v1476_v9, %v1492_v11 }
 0x118   :  { %8203 = vmatpush1.bf16.msra.mxu1 %v11282_v45  ;;  %8326 = vmatpush1.bf16.msra.mxu0 %v11284_v46  ;;  %v11474_v45 = vcombine.low %v1347_v26, %v1363_v28  ;;  %v11476_v46 = vcombine.low %v1348_v29, %v1364_v30  ;;  %v1555_v26 = vld [vmem:[%s16079_s3 + $0x2780] sm:$0xff]  ;;  %v11634_v29 = vcombine.low %v1507_v17, %v1523_v18 }
 0x119   :  { %8204 = vmatprep.subr.bf16.mxu1 %v11315_v47  ;;  %8327 = vmatprep.subr.bf16.mxu0 %v11317_v48  ;;  %v11507_v47 = vcombine.high %v1379_v41, %v1395_v42  ;;  %v11509_v48 = vcombine.high %v1380_v43, %v1396_v44 }
 0x11c   :  { %8205 = vmatpush1.bf16.msra.mxu1 %v11314_v55  ;;  %8328 = vmatpush1.bf16.msra.mxu0 %v11316_v56  ;;  %v11506_v55 = vcombine.low %v1379_v41, %v1395_v42  ;;  %v11508_v56 = vcombine.low %v1380_v43, %v1396_v44  ;;  %v294_v41 = vld [vmem:[%s16079_s3 + $0x18] sm:$0xff] }
 0x11d   :  { %8206 = vmatprep.subr.bf16.mxu1 %v11347_v57  ;;  %8329 = vmatprep.subr.bf16.mxu0 %v11349_v58  ;;  %v11539_v57 = vcombine.high %v1411_v49, %v1427_v51  ;;  %v11541_v58 = vcombine.high %v1412_v53, %v1428_v54  ;;  %v310_v42 = vld [vmem:[%s16079_s3 + $0x98] sm:$0xff]  ;;  %v341_v51 = vld [vmem:[%s16079_s3 + $0x190] sm:$0xff] }
 0x120   :  { %8207 = vmatpush1.bf16.msra.mxu1 %v11346_v3  ;;  %8330 = vmatpush1.bf16.msra.mxu0 %v11348_v4  ;;  %v11540_v3 = vcombine.low %v1412_v53, %v1428_v54  ;;  %v12479_v4 = vsub.s32 4, %v12188_v34  ;;  %v326_v53 = vld [vmem:[%s16079_s3 + $0x118] sm:$0xff] }
 0x121   :  { %8208 = vmatprep.subr.bf16.mxu1 %v11379_v5  ;;  %8331 = vmatprep.subr.bf16.mxu0 %v11381_v6  ;;  %v11571_v5 = vcombine.high %v1443_v59, %v1459_v61  ;;  %v11573_v6 = vcombine.high %v1444_v62, %v1460_v0  ;;  %v342_v54 = vld [vmem:[%s16079_s3 + $0x198] sm:$0xff]  ;;  %v357_v59 = vld [vmem:[%s16079_s3 + $0x210] sm:$0xff] }
 0x122   :  { %v373_v61 = vld [vmem:[%s16079_s3 + $0x290] sm:$0xff] }
 0x124   :  { %8209 = vmatpush1.bf16.msra.mxu1 %v11378_v13  ;;  %8332 = vmatpush1.bf16.msra.mxu0 %v11380_v15  ;;  %v11572_v13 = vcombine.low %v1444_v62, %v1460_v0  ;;  %v58_v15 = vrot.slane %v12196_v36, %v12479_v4  ;;  %v1524_v36 = vld [vmem:[%s16079_s3 + $0x2688] sm:$0xff]  ;;  %v358_v62 = vld [vmem:[%s16079_s3 + $0x218] sm:$0xff] }
 0x125   :  { %8210 = vmatprep.subr.bf16.mxu1 %v11411_v16  ;;  %8333 = vmatprep.subr.bf16.mxu0 %v11413_v52  ;;  %v11603_v16 = vcombine.high %v1475_v7, %v1491_v8  ;;  %v11605_v52 = vcombine.high %v1476_v9, %v1492_v11  ;;  %v11636_v30 = vcombine.low %v1508_v19, %v1524_v36  ;;  %v374_v0 = vld [vmem:[%s16079_s3 + $0x298] sm:$0xff]  ;;  %v389_v7 = vld [vmem:[%s16079_s3 + $0x310] sm:$0xff] }
 0x126   :  { %v405_v8 = vld [vmem:[%s16079_s3 + $0x390] sm:$0xff]  ;;  %v390_v9 = vld [vmem:[%s16079_s3 + $0x318] sm:$0xff] }
 0x127   :  { %v406_v11 = vld [vmem:[%s16079_s3 + $0x398] sm:$0xff] }
 0x128   :  { %8211 = vmatpush1.bf16.msra.mxu1 %v11410_v22  ;;  %8334 = vmatpush1.bf16.msra.mxu0 %v11412_v23  ;;  %v266_v22 = vadd.f32 %v12249_v14, %v58_v15  ;;  %v11635_v23 = vcombine.high %v1507_v17, %v1523_v18  ;;  %v1556_v14 = vld [vmem:[%s16079_s3 + $0x2788] sm:$0xff]  ;;  %v10519_v15 = vcombine.high %v389_v7, %v405_v8  ;;  %v437_v17 = vld [vmem:[%s16079_s3 + $0x490] sm:$0xff]  ;;  %v422_v18 = vld [vmem:[%s16079_s3 + $0x418] sm:$0xff] }
 0x129   :  { %8221 = vmatprep.subr.bf16.mxu1 %v11443_v24  ;;  %8344 = vmatprep.subr.bf16.mxu0 %v11445_v25  ;;  %v11637_v24 = vcombine.high %v1508_v19, %v1524_v36  ;;  %v1539_v25 = vld [vmem:[%s16079_s3 + $0x2700] sm:$0xff]  ;;  %v438_v19 = vld [vmem:[%s16079_s3 + $0x498] sm:$0xff]  ;;  %v10518_v36 = vcombine.low %v389_v7, %v405_v8 }
 0x12a   :  { %v280_v28 = vmul.f32 0.2, %v266_v22  ;;  %vm275_vm7 = vcmp.gt.f32.partialorder %v266_v22, 0.0  ;;  %v11666_v44 = vcombine.low %v1539_v25, %v1555_v26 }
 0x12b   :  { %8213 = vmatmul.mubr.bf16.vlgmr.msra.gmra.mrb[4].mxu1 %v12436_v33  ;;  %8336 = vmatmul.mubr.bf16.vlgmr.msra.gmra.mrb[8].mxu0 %v12436_v33 }
 0x12c   :  { %8222 = vmatpush1.bf16.msra.mxu1 %v11442_v31  ;;  %8345 = vmatpush1.bf16.msra.mxu0 %v11444_v32  ;;  %v11667_v31 = vcombine.high %v1539_v25, %v1555_v26  ;;  %v11669_v32 = vcombine.high %v1540_v27, %v1556_v14  ;;  %v285_v43 = vsel %vm275_vm7, %v266_v22, %v280_v28  ;;  %v454_v25 = vld [vmem:[%s16079_s3 + $0x518] sm:$0xff] }
 0x12d   :  { %8223 = vmatprep.subr.bf16.mxu1 %v11475_v38  ;;  %8346 = vmatprep.subr.bf16.mxu0 %v11477_v39  ;;  %v293_v38 = vld [vmem:[%s16079_s3 + $0x10] sm:$0xff]  ;;  %v12535_v49 = vpack.c.bf16 %v285_v43, %v285_v43  ;;  %v10553_v22 = vcombine.high %v422_v18, %v438_v19  ;;  %v470_v26 = vld [vmem:[%s16079_s3 + $0x598] sm:$0xff] }
 0x12e   :  { %8253 = vmatprep.mubr.bf16.mxu1 %v11898_v1  ;;  %8376 = vmatprep.mubr.bf16.mxu0 %v11898_v1  ;;  %v309_v39 = vld [vmem:[%s16079_s3 + $0x90] sm:$0xff] }
 0x130   :  { %8224 = vmatpush1.bf16.msra.mxu1 %v11474_v45  ;;  %8347 = vmatpush1.bf16.msra.mxu0 %v11476_v46  ;;  %v11668_v45 = vcombine.low %v1540_v27, %v1556_v14  ;;  %v10423_v46 = vcombine.high %v293_v38, %v309_v39  ;;  %v10552_v14 = vcombine.low %v422_v18, %v438_v19 }
 0x131   :  { %8225 = vmatprep.subr.bf16.mxu1 %v11507_v47  ;;  %8348 = vmatprep.subr.bf16.mxu0 %v11509_v48  ;;  %v10425_v47 = vcombine.high %v294_v41, %v310_v42  ;;  %v325_v48 = vld [vmem:[%s16079_s3 + $0x110] sm:$0xff] }
 0x134   :  { %8226 = vmatpush1.bf16.msra.mxu1 %v11506_v55  ;;  %8349 = vmatpush1.bf16.msra.mxu0 %v11508_v56  ;;  %v10422_v55 = vcombine.low %v293_v38, %v309_v39  ;;  %v10424_v56 = vcombine.low %v294_v41, %v310_v42  ;;  %v502_v38 = vld [vmem:[%s16079_s3 + $0x698] sm:$0xff]  ;;  %v10584_v41 = vcombine.low %v454_v25, %v470_v26 }
 0x135   :  { %8227 = vmatprep.subr.bf16.mxu1 %v11539_v57  ;;  %8350 = vmatprep.subr.bf16.mxu0 %v11541_v58  ;;  %v10455_v57 = vcombine.high %v325_v48, %v341_v51  ;;  %v10457_v58 = vcombine.high %v326_v53, %v342_v54 }
 0x138   :  { %8228 = vmatpush1.bf16.msra.mxu1 %v11538_v2  ;;  %8351 = vmatpush1.bf16.msra.mxu0 %v11540_v3  ;;  %v10454_v2 = vcombine.low %v325_v48, %v341_v51  ;;  %v10456_v3 = vcombine.low %v326_v53, %v342_v54 }
 0x139   :  { %8229 = vmatprep.subr.bf16.mxu1 %v11571_v5  ;;  %8352 = vmatprep.subr.bf16.mxu0 %v11573_v6  ;;  %v10487_v5 = vcombine.high %v357_v59, %v373_v61  ;;  %v10489_v6 = vcombine.high %v358_v62, %v374_v0 }
 0x13c   :  { %8230 = vmatpush1.bf16.msra.mxu1 %v11570_v12  ;;  %8353 = vmatpush1.bf16.msra.mxu0 %v11572_v13  ;;  %v10486_v12 = vcombine.low %v357_v59, %v373_v61  ;;  %v10488_v13 = vcombine.low %v358_v62, %v374_v0 }
 0x13d   :  { %8231 = vmatprep.subr.bf16.mxu1 %v11603_v16  ;;  %8354 = vmatprep.subr.bf16.mxu0 %v11605_v52  ;;  %v10521_v16 = vcombine.high %v390_v9, %v406_v11  ;;  %v421_v52 = vld [vmem:[%s16079_s3 + $0x410] sm:$0xff] }
 0x13e   :  { %v10550_v27 = vcombine.low %v421_v52, %v437_v17 }
 0x140   :  { %8232 = vmatpush1.bf16.msra.mxu1 %v11602_v20  ;;  %8355 = vmatpush1.bf16.msra.mxu0 %v11604_v21  ;;  %v10520_v20 = vcombine.low %v390_v9, %v406_v11  ;;  %v10551_v21 = vcombine.high %v421_v52, %v437_v17 }
 0x141   :  { %8233 = vmatprep.subr.bf16.mxu1 %v11635_v23  ;;  %8356 = vmatprep.subr.bf16.mxu0 %v11637_v24  ;;  %v453_v23 = vld [vmem:[%s16079_s3 + $0x510] sm:$0xff] }
 0x142   :  { %v469_v24 = vld [vmem:[%s16079_s3 + $0x590] sm:$0xff] }
 0x143   :  { %v10583_v28 = vcombine.high %v453_v23, %v469_v24  ;;  %v10582_v39 = vcombine.low %v453_v23, %v469_v24 }
 0x144   :  { %8234 = vmatpush1.bf16.msra.mxu1 %v11634_v29  ;;  %8357 = vmatpush1.bf16.msra.mxu0 %v11636_v30  ;;  %v10585_v29 = vcombine.high %v454_v25, %v470_v26  ;;  %v485_v30 = vld [vmem:[%s16079_s3 + $0x610] sm:$0xff] }
 0x145   :  { %8235 = vmatprep.subr.bf16.mxu1 %v11667_v31  ;;  %8358 = vmatprep.subr.bf16.mxu0 %v11669_v32  ;;  %v501_v31 = vld [vmem:[%s16079_s3 + $0x690] sm:$0xff]  ;;  %v486_v32 = vld [vmem:[%s16079_s3 + $0x618] sm:$0xff] }
 0x146   :  { %v10615_v42 = vcombine.high %v485_v30, %v501_v31  ;;  %v10617_v43 = vcombine.high %v486_v32, %v502_v38  ;;  %v10614_v48 = vcombine.low %v485_v30, %v501_v31  ;;  %v10616_v51 = vcombine.low %v486_v32, %v502_v38 }
 0x148   :  { %8236 = vmatpush1.bf16.msra.mxu1 %v11666_v44  ;;  %8359 = vmatpush1.bf16.msra.mxu0 %v11668_v45  ;;  %v517_v44 = vld [vmem:[%s16079_s3 + $0x710] sm:$0xff] }
 0x149   :  { %8385 = vmatprep.subr.bf16.mxu1 %v10423_v46  ;;  %8508 = vmatprep.subr.bf16.mxu0 %v10425_v47  ;;  %v533_v45 = vld [vmem:[%s16079_s3 + $0x790] sm:$0xff]  ;;  %v518_v46 = vld [vmem:[%s16079_s3 + $0x718] sm:$0xff] }
 0x14a   :  { %v534_v47 = vld [vmem:[%s16079_s3 + $0x798] sm:$0xff]  ;;  %v10647_v53 = vcombine.high %v517_v44, %v533_v45  ;;  %v10646_v59 = vcombine.low %v517_v44, %v533_v45 }
 0x14b   :  { %8254 = vmatmul.mubr.bf16.vlgmr.msra.gmra.mrb[4].mxu1 %v12535_v49  ;;  %8377 = vmatmul.mubr.bf16.vlgmr.msra.gmra.mrb[8].mxu0 %v12535_v49  ;;  %v10649_v54 = vcombine.high %v518_v46, %v534_v47  ;;  %v10648_v61 = vcombine.low %v518_v46, %v534_v47 }
 0x14c   :  { %8386 = vmatpush1.bf16.msra.mxu1 %v10422_v55  ;;  %8417 = vmatprep.mubr.bf16.mxu1 %v12224_v60  ;;  %v549_v55 = vld [vmem:[%s16079_s3 + $0x810] sm:$0xff] }
 0x14d   :  { %8509 = vmatpush1.bf16.msra.mxu0 %v10424_v56  ;;  %8540 = vmatprep.mubr.bf16.mxu0 %v12224_v60  ;;  %v565_v56 = vld [vmem:[%s16079_s3 + $0x890] sm:$0xff] }
 0x14e   :  { %8387 = vmatprep.subr.bf16.mxu1 %v10455_v57  ;;  %8510 = vmatprep.subr.bf16.mxu0 %v10457_v58  ;;  %v550_v57 = vld [vmem:[%s16079_s3 + $0x818] sm:$0xff]  ;;  %v10679_v62 = vcombine.high %v549_v55, %v565_v56  ;;  %v10678_v7 = vcombine.low %v549_v55, %v565_v56 }
 0x14f   :  { %v566_v58 = vld [vmem:[%s16079_s3 + $0x898] sm:$0xff] }
 0x150   :  { %8388 = vmatpush1.bf16.msra.mxu1 %v10454_v2  ;;  %v10681_v0 = vcombine.high %v550_v57, %v566_v58  ;;  %v581_v2 = vld [vmem:[%s16079_s3 + $0x910] sm:$0xff]  ;;  %v10680_v8 = vcombine.low %v550_v57, %v566_v58 }
 0x151   :  { %8511 = vmatpush1.bf16.msra.mxu0 %v10456_v3  ;;  %8389 = vmatprep.subr.bf16.mxu1 %v10487_v5  ;;  %v597_v3 = vld [vmem:[%s16079_s3 + $0x990] sm:$0xff]  ;;  %v582_v5 = vld [vmem:[%s16079_s3 + $0x918] sm:$0xff] }
 0x152   :  { %8512 = vmatprep.subr.bf16.mxu0 %v10489_v6  ;;  %v598_v6 = vld [vmem:[%s16079_s3 + $0x998] sm:$0xff]  ;;  %v10711_v9 = vcombine.high %v581_v2, %v597_v3  ;;  %v10710_v52 = vcombine.low %v581_v2, %v597_v3 }
 0x153   :  { %v10713_v11 = vcombine.high %v582_v5, %v598_v6  ;;  %v10712_v17 = vcombine.low %v582_v5, %v598_v6 }
 0x154   :  { %8390 = vmatpush1.bf16.msra.mxu1 %v10486_v12  ;;  %v613_v12 = vld [vmem:[%s16079_s3 + $0xa10] sm:$0xff] }
 0x155   :  { %8513 = vmatpush1.bf16.msra.mxu0 %v10488_v13  ;;  %8391 = vmatprep.subr.bf16.mxu1 %v10519_v15  ;;  %v629_v13 = vld [vmem:[%s16079_s3 + $0xa90] sm:$0xff]  ;;  %v614_v15 = vld [vmem:[%s16079_s3 + $0xa18] sm:$0xff] }
 0x156   :  { %8514 = vmatprep.subr.bf16.mxu0 %v10521_v16  ;;  %v630_v16 = vld [vmem:[%s16079_s3 + $0xa98] sm:$0xff]  ;;  %v10743_v18 = vcombine.high %v613_v12, %v629_v13  ;;  %v10742_v23 = vcombine.low %v613_v12, %v629_v13 }
 0x157   :  { %v10745_v19 = vcombine.high %v614_v15, %v630_v16  ;;  %v10744_v24 = vcombine.low %v614_v15, %v630_v16 }
 0x158   :  { %8392 = vmatpush1.bf16.msra.mxu1 %v10518_v36  ;;  %v645_v36 = vld [vmem:[%s16079_s3 + $0xb10] sm:$0xff] }
 0x159   :  { %8515 = vmatpush1.bf16.msra.mxu0 %v10520_v20  ;;  %8393 = vmatprep.subr.bf16.mxu1 %v10551_v21  ;;  %v661_v20 = vld [vmem:[%s16079_s3 + $0xb90] sm:$0xff]  ;;  %v646_v21 = vld [vmem:[%s16079_s3 + $0xb18] sm:$0xff] }
 0x15a   :  { %8516 = vmatprep.subr.bf16.mxu0 %v10553_v22  ;;  %v662_v22 = vld [vmem:[%s16079_s3 + $0xb98] sm:$0xff]  ;;  %v10775_v25 = vcombine.high %v645_v36, %v661_v20  ;;  %v10774_v30 = vcombine.low %v645_v36, %v661_v20 }
 0x15b   :  { %v10777_v26 = vcombine.high %v646_v21, %v662_v22  ;;  %v10776_v31 = vcombine.low %v646_v21, %v662_v22  ;;  %v854_v36 = vld [vmem:[%s16079_s3 + $0x1198] sm:$0xff]  ;;  %v869_v22 = vld [vmem:[%s16079_s3 + $0x1210] sm:$0xff] }
 0x15c   :  { %8394 = vmatpush1.bf16.msra.mxu1 %v10550_v27  ;;  %v677_v27 = vld [vmem:[%s16079_s3 + $0xc10] sm:$0xff] }
 0x15d   :  { %8517 = vmatpush1.bf16.msra.mxu0 %v10552_v14  ;;  %8395 = vmatprep.subr.bf16.mxu1 %v10583_v28  ;;  %v693_v14 = vld [vmem:[%s16079_s3 + $0xc90] sm:$0xff]  ;;  %v678_v28 = vld [vmem:[%s16079_s3 + $0xc18] sm:$0xff] }
 0x15e   :  { %8518 = vmatprep.subr.bf16.mxu0 %v10585_v29  ;;  %v694_v29 = vld [vmem:[%s16079_s3 + $0xc98] sm:$0xff]  ;;  %v10807_v32 = vcombine.high %v677_v27, %v693_v14  ;;  %v10806_v44 = vcombine.low %v677_v27, %v693_v14 }
 0x15f   :  { %v10809_v38 = vcombine.high %v678_v28, %v694_v29  ;;  %v10808_v45 = vcombine.low %v678_v28, %v694_v29 }
 0x160   :  { %8396 = vmatpush1.bf16.msra.mxu1 %v10582_v39  ;;  %v709_v39 = vld [vmem:[%s16079_s3 + $0xd10] sm:$0xff] }
 0x161   :  { %8519 = vmatpush1.bf16.msra.mxu0 %v10584_v41  ;;  %8397 = vmatprep.subr.bf16.mxu1 %v10615_v42  ;;  %v725_v41 = vld [vmem:[%s16079_s3 + $0xd90] sm:$0xff]  ;;  %v710_v42 = vld [vmem:[%s16079_s3 + $0xd18] sm:$0xff] }
 0x162   :  { %8520 = vmatprep.subr.bf16.mxu0 %v10617_v43  ;;  %v726_v43 = vld [vmem:[%s16079_s3 + $0xd98] sm:$0xff]  ;;  %v10839_v46 = vcombine.high %v709_v39, %v725_v41  ;;  %v10838_v55 = vcombine.low %v709_v39, %v725_v41 }
 0x163   :  { %v10841_v47 = vcombine.high %v710_v42, %v726_v43  ;;  %v10840_v56 = vcombine.low %v710_v42, %v726_v43 }
 0x164   :  { %8398 = vmatpush1.bf16.msra.mxu1 %v10614_v48  ;;  %v741_v48 = vld [vmem:[%s16079_s3 + $0xe10] sm:$0xff] }
 0x165   :  { %8521 = vmatpush1.bf16.msra.mxu0 %v10616_v51  ;;  %8399 = vmatprep.subr.bf16.mxu1 %v10647_v53  ;;  %v757_v51 = vld [vmem:[%s16079_s3 + $0xe90] sm:$0xff]  ;;  %v742_v53 = vld [vmem:[%s16079_s3 + $0xe18] sm:$0xff] }
 0x166   :  { %8522 = vmatprep.subr.bf16.mxu0 %v10649_v54  ;;  %v758_v54 = vld [vmem:[%s16079_s3 + $0xe98] sm:$0xff]  ;;  %v10871_v57 = vcombine.high %v741_v48, %v757_v51  ;;  %v10870_v2 = vcombine.low %v741_v48, %v757_v51 }
 0x167   :  { %v10873_v58 = vcombine.high %v742_v53, %v758_v54  ;;  %v10872_v3 = vcombine.low %v742_v53, %v758_v54 }
 0x168   :  { %8400 = vmatpush1.bf16.msra.mxu1 %v10646_v59  ;;  %v773_v59 = vld [vmem:[%s16079_s3 + $0xf10] sm:$0xff] }
 0x169   :  { %8523 = vmatpush1.bf16.msra.mxu0 %v10648_v61  ;;  %8401 = vmatprep.subr.bf16.mxu1 %v10679_v62  ;;  %v789_v61 = vld [vmem:[%s16079_s3 + $0xf90] sm:$0xff]  ;;  %v774_v62 = vld [vmem:[%s16079_s3 + $0xf18] sm:$0xff] }
 0x16a   :  { %8524 = vmatprep.subr.bf16.mxu0 %v10681_v0  ;;  %v790_v0 = vld [vmem:[%s16079_s3 + $0xf98] sm:$0xff]  ;;  %v10903_v5 = vcombine.high %v773_v59, %v789_v61  ;;  %v10902_v12 = vcombine.low %v773_v59, %v789_v61 }
 0x16b   :  { %v10905_v6 = vcombine.high %v774_v62, %v790_v0  ;;  %v10904_v13 = vcombine.low %v774_v62, %v790_v0 }
 0x16c   :  { %8402 = vmatpush1.bf16.msra.mxu1 %v10678_v7  ;;  %v805_v7 = vld [vmem:[%s16079_s3 + $0x1010] sm:$0xff] }
 0x16d   :  { %8525 = vmatpush1.bf16.msra.mxu0 %v10680_v8  ;;  %8403 = vmatprep.subr.bf16.mxu1 %v10711_v9  ;;  %v821_v8 = vld [vmem:[%s16079_s3 + $0x1090] sm:$0xff]  ;;  %v806_v9 = vld [vmem:[%s16079_s3 + $0x1018] sm:$0xff] }
 0x16e   :  { %8526 = vmatprep.subr.bf16.mxu0 %v10713_v11  ;;  %v822_v11 = vld [vmem:[%s16079_s3 + $0x1098] sm:$0xff]  ;;  %v10935_v15 = vcombine.high %v805_v7, %v821_v8 }
 0x16f   :  { %v10937_v16 = vcombine.high %v806_v9, %v822_v11  ;;  %v10936_v20 = vcombine.low %v806_v9, %v822_v11 }
 0x170   :  { %8404 = vmatpush1.bf16.msra.mxu1 %v10710_v52  ;;  %v837_v52 = vld [vmem:[%s16079_s3 + $0x1110] sm:$0xff] }
 0x171   :  { %8527 = vmatpush1.bf16.msra.mxu0 %v10712_v17  ;;  %8405 = vmatprep.subr.bf16.mxu1 %v10743_v18  ;;  %v853_v17 = vld [vmem:[%s16079_s3 + $0x1190] sm:$0xff]  ;;  %v10934_v18 = vcombine.low %v805_v7, %v821_v8 }
 0x172   :  { %8528 = vmatprep.subr.bf16.mxu0 %v10745_v19  ;;  %v838_v19 = vld [vmem:[%s16079_s3 + $0x1118] sm:$0xff]  ;;  %v10967_v21 = vcombine.high %v837_v52, %v853_v17  ;;  %v10966_v27 = vcombine.low %v837_v52, %v853_v17 }
 0x173   :  { %v10968_v14 = vcombine.low %v838_v19, %v854_v36 }
 0x174   :  { %8406 = vmatpush1.bf16.msra.mxu1 %v10742_v23  ;;  %v885_v23 = vld [vmem:[%s16079_s3 + $0x1290] sm:$0xff] }
 0x175   :  { %8529 = vmatpush1.bf16.msra.mxu0 %v10744_v24  ;;  %8407 = vmatprep.subr.bf16.mxu1 %v10775_v25  ;;  %v10969_v24 = vcombine.high %v838_v19, %v854_v36  ;;  %v870_v25 = vld [vmem:[%s16079_s3 + $0x1218] sm:$0xff]  ;;  %v10999_v28 = vcombine.high %v869_v22, %v885_v23  ;;  %v10998_v39 = vcombine.low %v869_v22, %v885_v23  ;;  %v1061_v36 = vld [vmem:[%s16079_s3 + $0x1810] sm:$0xff] }
 0x176   :  { %8530 = vmatprep.subr.bf16.mxu0 %v10777_v26  ;;  %v886_v26 = vld [vmem:[%s16079_s3 + $0x1298] sm:$0xff] }
 0x177   :  { %v11001_v29 = vcombine.high %v870_v25, %v886_v26  ;;  %v11000_v41 = vcombine.low %v870_v25, %v886_v26  ;;  %v1078_v22 = vld [vmem:[%s16079_s3 + $0x1898] sm:$0xff] }
 0x178   :  { %8408 = vmatpush1.bf16.msra.mxu1 %v10774_v30  ;;  %v901_v30 = vld [vmem:[%s16079_s3 + $0x1310] sm:$0xff] }
 0x179   :  { %8531 = vmatpush1.bf16.msra.mxu0 %v10776_v31  ;;  %8409 = vmatprep.subr.bf16.mxu1 %v10807_v32  ;;  %v917_v31 = vld [vmem:[%s16079_s3 + $0x1390] sm:$0xff]  ;;  %v902_v32 = vld [vmem:[%s16079_s3 + $0x1318] sm:$0xff] }
 0x17a   :  { %8532 = vmatprep.subr.bf16.mxu0 %v10809_v38  ;;  %v918_v38 = vld [vmem:[%s16079_s3 + $0x1398] sm:$0xff]  ;;  %v11031_v42 = vcombine.high %v901_v30, %v917_v31  ;;  %v11030_v48 = vcombine.low %v901_v30, %v917_v31 }
 0x17b   :  { %v11033_v43 = vcombine.high %v902_v32, %v918_v38  ;;  %v11032_v51 = vcombine.low %v902_v32, %v918_v38 }
 0x17c   :  { %8410 = vmatpush1.bf16.msra.mxu1 %v10806_v44  ;;  %v933_v44 = vld [vmem:[%s16079_s3 + $0x1410] sm:$0xff] }
 0x17d   :  { %8533 = vmatpush1.bf16.msra.mxu0 %v10808_v45  ;;  %8411 = vmatprep.subr.bf16.mxu1 %v10839_v46  ;;  %v949_v45 = vld [vmem:[%s16079_s3 + $0x1490] sm:$0xff]  ;;  %v934_v46 = vld [vmem:[%s16079_s3 + $0x1418] sm:$0xff] }
 0x17e   :  { %8534 = vmatprep.subr.bf16.mxu0 %v10841_v47  ;;  %v950_v47 = vld [vmem:[%s16079_s3 + $0x1498] sm:$0xff]  ;;  %v11063_v53 = vcombine.high %v933_v44, %v949_v45  ;;  %v11062_v59 = vcombine.low %v933_v44, %v949_v45 }
 0x17f   :  { %v11065_v54 = vcombine.high %v934_v46, %v950_v47  ;;  %v11064_v61 = vcombine.low %v934_v46, %v950_v47 }
 0x180   :  { %8412 = vmatpush1.bf16.msra.mxu1 %v10838_v55  ;;  %v965_v55 = vld [vmem:[%s16079_s3 + $0x1510] sm:$0xff] }
 0x181   :  { %8535 = vmatpush1.bf16.msra.mxu0 %v10840_v56  ;;  %8413 = vmatprep.subr.bf16.mxu1 %v10871_v57  ;;  %v981_v56 = vld [vmem:[%s16079_s3 + $0x1590] sm:$0xff]  ;;  %v966_v57 = vld [vmem:[%s16079_s3 + $0x1518] sm:$0xff] }
 0x182   :  { %8536 = vmatprep.subr.bf16.mxu0 %v10873_v58  ;;  %v982_v58 = vld [vmem:[%s16079_s3 + $0x1598] sm:$0xff]  ;;  %v11095_v62 = vcombine.high %v965_v55, %v981_v56  ;;  %v11094_v7 = vcombine.low %v965_v55, %v981_v56 }
 0x183   :  { %v11097_v0 = vcombine.high %v966_v57, %v982_v58  ;;  %v11096_v8 = vcombine.low %v966_v57, %v982_v58 }
 0x184   :  { %8414 = vmatpush1.bf16.msra.mxu1 %v10870_v2  ;;  %v997_v2 = vld [vmem:[%s16079_s3 + $0x1610] sm:$0xff] }
 0x185   :  { %8537 = vmatpush1.bf16.msra.mxu0 %v10872_v3  ;;  %8415 = vmatprep.subr.bf16.mxu1 %v10903_v5  ;;  %v1013_v3 = vld [vmem:[%s16079_s3 + $0x1690] sm:$0xff]  ;;  %v998_v5 = vld [vmem:[%s16079_s3 + $0x1618] sm:$0xff] }
 0x186   :  { %8538 = vmatprep.subr.bf16.mxu0 %v10905_v6  ;;  %v1014_v6 = vld [vmem:[%s16079_s3 + $0x1698] sm:$0xff]  ;;  %v11127_v9 = vcombine.high %v997_v2, %v1013_v3  ;;  %v11126_v52 = vcombine.low %v997_v2, %v1013_v3 }
 0x187   :  { %v11129_v11 = vcombine.high %v998_v5, %v1014_v6  ;;  %v11128_v17 = vcombine.low %v998_v5, %v1014_v6 }
 0x188   :  { %8416 = vmatpush1.bf16.msra.mxu1 %v10902_v12  ;;  %v1029_v12 = vld [vmem:[%s16079_s3 + $0x1710] sm:$0xff] }
 0x189   :  { %8539 = vmatpush1.bf16.msra.mxu0 %v10904_v13  ;;  %8426 = vmatprep.subr.bf16.mxu1 %v10935_v15  ;;  %v1045_v13 = vld [vmem:[%s16079_s3 + $0x1790] sm:$0xff]  ;;  %v1030_v15 = vld [vmem:[%s16079_s3 + $0x1718] sm:$0xff] }
 0x18a   :  { %8549 = vmatprep.subr.bf16.mxu0 %v10937_v16  ;;  %v1046_v16 = vld [vmem:[%s16079_s3 + $0x1798] sm:$0xff]  ;;  %v11158_v23 = vcombine.low %v1029_v12, %v1045_v13 }
 0x18b   :  { %8418 = vmatmul.mubr.bf16.vlgmr.msra.gmra.mrb[8].mxu1 %v12226_v63  ;;  %v11161_v19 = vcombine.high %v1030_v15, %v1046_v16 }
 0x18c   :  { %8541 = vmatmul.mubr.bf16.vlgmr.msra.gmra.mrb[12].mxu0 %v12226_v63  ;;  %8427 = vmatpush1.bf16.msra.mxu1 %v10934_v18  ;;  %v11159_v18 = vcombine.high %v1029_v12, %v1045_v13 }
 0x18d   :  { %8458 = vmatprep.mubr.bf16.mxu1 %v12244_v10  ;;  %8550 = vmatpush1.bf16.msra.mxu0 %v10936_v20  ;;  %v1077_v20 = vld [vmem:[%s16079_s3 + $0x1890] sm:$0xff] }
 0x18e   :  { %8581 = vmatprep.mubr.bf16.mxu0 %v12244_v10  ;;  %8428 = vmatprep.subr.bf16.mxu1 %v10967_v21  ;;  %v1062_v21 = vld [vmem:[%s16079_s3 + $0x1818] sm:$0xff]  ;;  %v11191_v25 = vcombine.high %v1061_v36, %v1077_v20  ;;  %v11190_v30 = vcombine.low %v1061_v36, %v1077_v20 }
 0x18f   :  { %8551 = vmatprep.subr.bf16.mxu0 %v10969_v24  ;;  %v11160_v24 = vcombine.low %v1030_v15, %v1046_v16  ;;  %v11193_v26 = vcombine.high %v1062_v21, %v1078_v22  ;;  %v11192_v31 = vcombine.low %v1062_v21, %v1078_v22 }
 0x190   :  { %8429 = vmatpush1.bf16.msra.mxu1 %v10966_v27  ;;  %v1093_v27 = vld [vmem:[%s16079_s3 + $0x1910] sm:$0xff] }
 0x191   :  { %8552 = vmatpush1.bf16.msra.mxu0 %v10968_v14  ;;  %8430 = vmatprep.subr.bf16.mxu1 %v10999_v28  ;;  %v1109_v14 = vld [vmem:[%s16079_s3 + $0x1990] sm:$0xff]  ;;  %v1094_v28 = vld [vmem:[%s16079_s3 + $0x1918] sm:$0xff] }
 0x192   :  { %8553 = vmatprep.subr.bf16.mxu0 %v11001_v29  ;;  %v1110_v29 = vld [vmem:[%s16079_s3 + $0x1998] sm:$0xff]  ;;  %v11223_v32 = vcombine.high %v1093_v27, %v1109_v14  ;;  %v11222_v44 = vcombine.low %v1093_v27, %v1109_v14 }
 0x193   :  { %v11225_v38 = vcombine.high %v1094_v28, %v1110_v29  ;;  %v11224_v45 = vcombine.low %v1094_v28, %v1110_v29 }
 0x194   :  { %8431 = vmatpush1.bf16.msra.mxu1 %v10998_v39  ;;  %v1125_v39 = vld [vmem:[%s16079_s3 + $0x1a10] sm:$0xff] }
 0x195   :  { %8554 = vmatpush1.bf16.msra.mxu0 %v11000_v41  ;;  %8432 = vmatprep.subr.bf16.mxu1 %v11031_v42  ;;  %v1141_v41 = vld [vmem:[%s16079_s3 + $0x1a90] sm:$0xff]  ;;  %v1126_v42 = vld [vmem:[%s16079_s3 + $0x1a18] sm:$0xff] }
 0x196   :  { %8555 = vmatprep.subr.bf16.mxu0 %v11033_v43  ;;  %v1142_v43 = vld [vmem:[%s16079_s3 + $0x1a98] sm:$0xff]  ;;  %v11255_v46 = vcombine.high %v1125_v39, %v1141_v41  ;;  %v11254_v55 = vcombine.low %v1125_v39, %v1141_v41 }
 0x197   :  { %v11257_v47 = vcombine.high %v1126_v42, %v1142_v43  ;;  %v11256_v56 = vcombine.low %v1126_v42, %v1142_v43 }
 0x198   :  { %8433 = vmatpush1.bf16.msra.mxu1 %v11030_v48  ;;  %v1157_v48 = vld [vmem:[%s16079_s3 + $0x1b10] sm:$0xff] }
 0x199   :  { %8556 = vmatpush1.bf16.msra.mxu0 %v11032_v51  ;;  %8434 = vmatprep.subr.bf16.mxu1 %v11063_v53  ;;  %v1173_v51 = vld [vmem:[%s16079_s3 + $0x1b90] sm:$0xff]  ;;  %v1158_v53 = vld [vmem:[%s16079_s3 + $0x1b18] sm:$0xff] }
 0x19a   :  { %8557 = vmatprep.subr.bf16.mxu0 %v11065_v54  ;;  %v1174_v54 = vld [vmem:[%s16079_s3 + $0x1b98] sm:$0xff]  ;;  %v11287_v57 = vcombine.high %v1157_v48, %v1173_v51  ;;  %v11286_v2 = vcombine.low %v1157_v48, %v1173_v51 }
 0x19b   :  { %v11289_v58 = vcombine.high %v1158_v53, %v1174_v54  ;;  %v11288_v3 = vcombine.low %v1158_v53, %v1174_v54 }
 0x19c   :  { %8435 = vmatpush1.bf16.msra.mxu1 %v11062_v59  ;;  %v1189_v59 = vld [vmem:[%s16079_s3 + $0x1c10] sm:$0xff] }
 0x19d   :  { %8558 = vmatpush1.bf16.msra.mxu0 %v11064_v61  ;;  %8436 = vmatprep.subr.bf16.mxu1 %v11095_v62  ;;  %v1205_v61 = vld [vmem:[%s16079_s3 + $0x1c90] sm:$0xff]  ;;  %v1190_v62 = vld [vmem:[%s16079_s3 + $0x1c18] sm:$0xff] }
 0x19e   :  { %8559 = vmatprep.subr.bf16.mxu0 %v11097_v0  ;;  %v1206_v0 = vld [vmem:[%s16079_s3 + $0x1c98] sm:$0xff]  ;;  %v11319_v5 = vcombine.high %v1189_v59, %v1205_v61  ;;  %v11318_v12 = vcombine.low %v1189_v59, %v1205_v61 }
 0x19f   :  { %v11321_v6 = vcombine.high %v1190_v62, %v1206_v0  ;;  %v11320_v13 = vcombine.low %v1190_v62, %v1206_v0 }
 0x1a0   :  { %8437 = vmatpush1.bf16.msra.mxu1 %v11094_v7  ;;  %v1221_v7 = vld [vmem:[%s16079_s3 + $0x1d10] sm:$0xff] }
 0x1a1   :  { %8560 = vmatpush1.bf16.msra.mxu0 %v11096_v8  ;;  %8438 = vmatprep.subr.bf16.mxu1 %v11127_v9  ;;  %v1237_v8 = vld [vmem:[%s16079_s3 + $0x1d90] sm:$0xff]  ;;  %v1222_v9 = vld [vmem:[%s16079_s3 + $0x1d18] sm:$0xff] }
 0x1a2   :  { %8561 = vmatprep.subr.bf16.mxu0 %v11129_v11  ;;  %v1238_v11 = vld [vmem:[%s16079_s3 + $0x1d98] sm:$0xff]  ;;  %v11351_v15 = vcombine.high %v1221_v7, %v1237_v8  ;;  %v11350_v36 = vcombine.low %v1221_v7, %v1237_v8 }
 0x1a3   :  { %v11353_v16 = vcombine.high %v1222_v9, %v1238_v11  ;;  %v11352_v20 = vcombine.low %v1222_v9, %v1238_v11 }
 0x1a4   :  { %8439 = vmatpush1.bf16.msra.mxu1 %v11126_v52  ;;  %v1253_v52 = vld [vmem:[%s16079_s3 + $0x1e10] sm:$0xff] }
 0x1a5   :  { %8562 = vmatpush1.bf16.msra.mxu0 %v11128_v17  ;;  %8440 = vmatprep.subr.bf16.mxu1 %v11159_v18  ;;  %v1269_v17 = vld [vmem:[%s16079_s3 + $0x1e90] sm:$0xff]  ;;  %v1254_v18 = vld [vmem:[%s16079_s3 + $0x1e18] sm:$0xff] }
 0x1a6   :  { %8563 = vmatprep.subr.bf16.mxu0 %v11161_v19  ;;  %v1270_v19 = vld [vmem:[%s16079_s3 + $0x1e98] sm:$0xff]  ;;  %v11383_v21 = vcombine.high %v1253_v52, %v1269_v17  ;;  %v11382_v27 = vcombine.low %v1253_v52, %v1269_v17 }
 0x1a7   :  { %v11385_v22 = vcombine.high %v1254_v18, %v1270_v19  ;;  %v11384_v14 = vcombine.low %v1254_v18, %v1270_v19 }
 0x1a8   :  { %8441 = vmatpush1.bf16.msra.mxu1 %v11158_v23  ;;  %v1285_v23 = vld [vmem:[%s16079_s3 + $0x1f10] sm:$0xff] }
 0x1a9   :  { %8564 = vmatpush1.bf16.msra.mxu0 %v11160_v24  ;;  %8442 = vmatprep.subr.bf16.mxu1 %v11191_v25  ;;  %v1301_v24 = vld [vmem:[%s16079_s3 + $0x1f90] sm:$0xff]  ;;  %v1286_v25 = vld [vmem:[%s16079_s3 + $0x1f18] sm:$0xff] }
 0x1aa   :  { %8565 = vmatprep.subr.bf16.mxu0 %v11193_v26  ;;  %v1302_v26 = vld [vmem:[%s16079_s3 + $0x1f98] sm:$0xff]  ;;  %v11415_v28 = vcombine.high %v1285_v23, %v1301_v24  ;;  %v11414_v39 = vcombine.low %v1285_v23, %v1301_v24 }
 0x1ab   :  { %v11417_v29 = vcombine.high %v1286_v25, %v1302_v26  ;;  %v11416_v41 = vcombine.low %v1286_v25, %v1302_v26 }
 0x1ac   :  { %8443 = vmatpush1.bf16.msra.mxu1 %v11190_v30  ;;  %v1317_v30 = vld [vmem:[%s16079_s3 + $0x2010] sm:$0xff] }
 0x1ad   :  { %8566 = vmatpush1.bf16.msra.mxu0 %v11192_v31  ;;  %8444 = vmatprep.subr.bf16.mxu1 %v11223_v32  ;;  %v1333_v31 = vld [vmem:[%s16079_s3 + $0x2090] sm:$0xff]  ;;  %v1318_v32 = vld [vmem:[%s16079_s3 + $0x2018] sm:$0xff] }
 0x1ae   :  { %8567 = vmatprep.subr.bf16.mxu0 %v11225_v38  ;;  %v1334_v38 = vld [vmem:[%s16079_s3 + $0x2098] sm:$0xff]  ;;  %v11447_v42 = vcombine.high %v1317_v30, %v1333_v31  ;;  %v11446_v48 = vcombine.low %v1317_v30, %v1333_v31 }
 0x1af   :  { %v11449_v43 = vcombine.high %v1318_v32, %v1334_v38  ;;  %v11448_v51 = vcombine.low %v1318_v32, %v1334_v38 }
 0x1b0   :  { %8445 = vmatpush1.bf16.msra.mxu1 %v11222_v44  ;;  %v1349_v44 = vld [vmem:[%s16079_s3 + $0x2110] sm:$0xff] }
 0x1b1   :  { %8568 = vmatpush1.bf16.msra.mxu0 %v11224_v45  ;;  %8446 = vmatprep.subr.bf16.mxu1 %v11255_v46  ;;  %v1365_v45 = vld [vmem:[%s16079_s3 + $0x2190] sm:$0xff]  ;;  %v1350_v46 = vld [vmem:[%s16079_s3 + $0x2118] sm:$0xff] }
 0x1b2   :  { %8569 = vmatprep.subr.bf16.mxu0 %v11257_v47  ;;  %v1366_v47 = vld [vmem:[%s16079_s3 + $0x2198] sm:$0xff]  ;;  %v11479_v53 = vcombine.high %v1349_v44, %v1365_v45  ;;  %v11478_v59 = vcombine.low %v1349_v44, %v1365_v45 }
 0x1b3   :  { %v11481_v54 = vcombine.high %v1350_v46, %v1366_v47  ;;  %v11480_v61 = vcombine.low %v1350_v46, %v1366_v47 }
 0x1b4   :  { %8447 = vmatpush1.bf16.msra.mxu1 %v11254_v55  ;;  %v1381_v55 = vld [vmem:[%s16079_s3 + $0x2210] sm:$0xff] }
 0x1b5   :  { %8570 = vmatpush1.bf16.msra.mxu0 %v11256_v56  ;;  %8448 = vmatprep.subr.bf16.mxu1 %v11287_v57  ;;  %v1397_v56 = vld [vmem:[%s16079_s3 + $0x2290] sm:$0xff]  ;;  %v1382_v57 = vld [vmem:[%s16079_s3 + $0x2218] sm:$0xff] }
 0x1b6   :  { %8571 = vmatprep.subr.bf16.mxu0 %v11289_v58  ;;  %v1398_v58 = vld [vmem:[%s16079_s3 + $0x2298] sm:$0xff]  ;;  %v11511_v62 = vcombine.high %v1381_v55, %v1397_v56  ;;  %v11510_v7 = vcombine.low %v1381_v55, %v1397_v56 }
 0x1b7   :  { %v11513_v0 = vcombine.high %v1382_v57, %v1398_v58  ;;  %v11512_v8 = vcombine.low %v1382_v57, %v1398_v58 }
 0x1b8   :  { %8449 = vmatpush1.bf16.msra.mxu1 %v11286_v2  ;;  %v1413_v2 = vld [vmem:[%s16079_s3 + $0x2310] sm:$0xff] }
 0x1b9   :  { %8572 = vmatpush1.bf16.msra.mxu0 %v11288_v3  ;;  %8450 = vmatprep.subr.bf16.mxu1 %v11319_v5  ;;  %v1429_v3 = vld [vmem:[%s16079_s3 + $0x2390] sm:$0xff]  ;;  %v1414_v5 = vld [vmem:[%s16079_s3 + $0x2318] sm:$0xff] }
 0x1ba   :  { %8573 = vmatprep.subr.bf16.mxu0 %v11321_v6  ;;  %v1430_v6 = vld [vmem:[%s16079_s3 + $0x2398] sm:$0xff]  ;;  %v11543_v9 = vcombine.high %v1413_v2, %v1429_v3  ;;  %v11542_v52 = vcombine.low %v1413_v2, %v1429_v3  ;;  %v344_v2 = vld [vmem:[%s16079_s3 + $0x1a8] sm:$0xff] }
 0x1bb   :  { %v11545_v11 = vcombine.high %v1414_v5, %v1430_v6  ;;  %v11544_v17 = vcombine.low %v1414_v5, %v1430_v6  ;;  %v359_v6 = vld [vmem:[%s16079_s3 + $0x220] sm:$0xff] }
 0x1bc   :  { %8451 = vmatpush1.bf16.msra.mxu1 %v11318_v12  ;;  %v1445_v12 = vld [vmem:[%s16079_s3 + $0x2410] sm:$0xff] }
 0x1bd   :  { %8574 = vmatpush1.bf16.msra.mxu0 %v11320_v13  ;;  %8452 = vmatprep.subr.bf16.mxu1 %v11351_v15  ;;  %v1461_v13 = vld [vmem:[%s16079_s3 + $0x2490] sm:$0xff]  ;;  %v1446_v15 = vld [vmem:[%s16079_s3 + $0x2418] sm:$0xff] }
 0x1be   :  { %8575 = vmatprep.subr.bf16.mxu0 %v11353_v16  ;;  %v1462_v16 = vld [vmem:[%s16079_s3 + $0x2498] sm:$0xff]  ;;  %v11575_v18 = vcombine.high %v1445_v12, %v1461_v13  ;;  %v11574_v23 = vcombine.low %v1445_v12, %v1461_v13 }
 0x1bf   :  { %v11577_v19 = vcombine.high %v1446_v15, %v1462_v16  ;;  %v11576_v24 = vcombine.low %v1446_v15, %v1462_v16 }
 0x1c0   :  { %8453 = vmatpush1.bf16.msra.mxu1 %v11350_v36  ;;  %v1477_v36 = vld [vmem:[%s16079_s3 + $0x2510] sm:$0xff] }
 0x1c1   :  { %8576 = vmatpush1.bf16.msra.mxu0 %v11352_v20  ;;  %8454 = vmatprep.subr.bf16.mxu1 %v11383_v21  ;;  %v1493_v20 = vld [vmem:[%s16079_s3 + $0x2590] sm:$0xff]  ;;  %v1478_v21 = vld [vmem:[%s16079_s3 + $0x2518] sm:$0xff] }
 0x1c2   :  { %8577 = vmatprep.subr.bf16.mxu0 %v11385_v22  ;;  %v1494_v22 = vld [vmem:[%s16079_s3 + $0x2598] sm:$0xff]  ;;  %v11607_v25 = vcombine.high %v1477_v36, %v1493_v20  ;;  %v11606_v30 = vcombine.low %v1477_v36, %v1493_v20 }
 0x1c3   :  { %v11609_v26 = vcombine.high %v1478_v21, %v1494_v22  ;;  %v11608_v31 = vcombine.low %v1478_v21, %v1494_v22 }
 0x1c4   :  { %8455 = vmatpush1.bf16.msra.mxu1 %v11382_v27  ;;  %v1509_v27 = vld [vmem:[%s16079_s3 + $0x2610] sm:$0xff] }
 0x1c5   :  { %8578 = vmatpush1.bf16.msra.mxu0 %v11384_v14  ;;  %8456 = vmatprep.subr.bf16.mxu1 %v11415_v28  ;;  %v1525_v14 = vld [vmem:[%s16079_s3 + $0x2690] sm:$0xff]  ;;  %v1510_v28 = vld [vmem:[%s16079_s3 + $0x2618] sm:$0xff] }
 0x1c6   :  { %8579 = vmatprep.subr.bf16.mxu0 %v11417_v29  ;;  %v1526_v29 = vld [vmem:[%s16079_s3 + $0x2698] sm:$0xff]  ;;  %v11639_v32 = vcombine.high %v1509_v27, %v1525_v14  ;;  %v11638_v44 = vcombine.low %v1509_v27, %v1525_v14 }
 0x1c7   :  { %v11641_v38 = vcombine.high %v1510_v28, %v1526_v29  ;;  %v11640_v45 = vcombine.low %v1510_v28, %v1526_v29 }
 0x1c8   :  { %8457 = vmatpush1.bf16.msra.mxu1 %v11414_v39  ;;  %v1541_v39 = vld [vmem:[%s16079_s3 + $0x2710] sm:$0xff] }
 0x1c9   :  { %8580 = vmatpush1.bf16.msra.mxu0 %v11416_v41  ;;  %8467 = vmatprep.subr.bf16.mxu1 %v11447_v42  ;;  %v1557_v41 = vld [vmem:[%s16079_s3 + $0x2790] sm:$0xff]  ;;  %v1542_v42 = vld [vmem:[%s16079_s3 + $0x2718] sm:$0xff] }
 0x1ca   :  { %8590 = vmatprep.subr.bf16.mxu0 %v11449_v43  ;;  %v1558_v43 = vld [vmem:[%s16079_s3 + $0x2798] sm:$0xff]  ;;  %v11671_v46 = vcombine.high %v1541_v39, %v1557_v41  ;;  %v11670_v55 = vcombine.low %v1541_v39, %v1557_v41 }
 0x1cb   :  { %8459 = vmatmul.mubr.bf16.vlgmr.msra.gmra.mrb[8].mxu1 %v12436_v33  ;;  %v11673_v47 = vcombine.high %v1542_v42, %v1558_v43  ;;  %v11672_v56 = vcombine.low %v1542_v42, %v1558_v43 }
 0x1cc   :  { %8582 = vmatmul.mubr.bf16.vlgmr.msra.gmra.mrb[12].mxu0 %v12436_v33  ;;  %8468 = vmatpush1.bf16.msra.mxu1 %v11446_v48  ;;  %v295_v48 = vld [vmem:[%s16079_s3 + $0x20] sm:$0xff] }
 0x1cd   :  { %8591 = vmatpush1.bf16.msra.mxu0 %v11448_v51  ;;  %8469 = vmatprep.subr.bf16.mxu1 %v11479_v53  ;;  %v311_v51 = vld [vmem:[%s16079_s3 + $0xa0] sm:$0xff]  ;;  %v296_v53 = vld [vmem:[%s16079_s3 + $0x28] sm:$0xff] }
 0x1ce   :  { %8592 = vmatprep.subr.bf16.mxu0 %v11481_v54  ;;  %8499 = vmatprep.mubr.bf16.mxu1 %v11898_v1  ;;  %v312_v54 = vld [vmem:[%s16079_s3 + $0xa8] sm:$0xff]  ;;  %v10427_v57 = vcombine.high %v295_v48, %v311_v51 }
 0x1cf   :  { %8622 = vmatprep.mubr.bf16.mxu0 %v11898_v1  ;;  %v10429_v58 = vcombine.high %v296_v53, %v312_v54  ;;  %v10428_v3 = vcombine.low %v296_v53, %v312_v54 }
 0x1d0   :  { %8470 = vmatpush1.bf16.msra.mxu1 %v11478_v59  ;;  %v327_v59 = vld [vmem:[%s16079_s3 + $0x120] sm:$0xff] }
 0x1d1   :  { %8593 = vmatpush1.bf16.msra.mxu0 %v11480_v61  ;;  %8471 = vmatprep.subr.bf16.mxu1 %v11511_v62  ;;  %v343_v61 = vld [vmem:[%s16079_s3 + $0x1a0] sm:$0xff]  ;;  %v10426_v62 = vcombine.low %v295_v48, %v311_v51 }
 0x1d2   :  { %8594 = vmatprep.subr.bf16.mxu0 %v11513_v0  ;;  %v328_v0 = vld [vmem:[%s16079_s3 + $0x128] sm:$0xff]  ;;  %v10459_v5 = vcombine.high %v327_v59, %v343_v61  ;;  %v10458_v12 = vcombine.low %v327_v59, %v343_v61 }
 0x1d3   :  { %v10460_v13 = vcombine.low %v328_v0, %v344_v2 }
 0x1d4   :  { %8472 = vmatpush1.bf16.msra.mxu1 %v11510_v7  ;;  %v375_v7 = vld [vmem:[%s16079_s3 + $0x2a0] sm:$0xff] }
 0x1d5   :  { %8595 = vmatpush1.bf16.msra.mxu0 %v11512_v8  ;;  %8473 = vmatprep.subr.bf16.mxu1 %v11543_v9  ;;  %v10461_v8 = vcombine.high %v328_v0, %v344_v2  ;;  %v360_v9 = vld [vmem:[%s16079_s3 + $0x228] sm:$0xff]  ;;  %v10491_v15 = vcombine.high %v359_v6, %v375_v7  ;;  %v10490_v36 = vcombine.low %v359_v6, %v375_v7  ;;  %v551_v2 = vld [vmem:[%s16079_s3 + $0x820] sm:$0xff] }
 0x1d6   :  { %8596 = vmatprep.subr.bf16.mxu0 %v11545_v11  ;;  %v376_v11 = vld [vmem:[%s16079_s3 + $0x2a8] sm:$0xff] }
 0x1d7   :  { %v10493_v16 = vcombine.high %v360_v9, %v376_v11  ;;  %v10492_v20 = vcombine.low %v360_v9, %v376_v11  ;;  %v568_v6 = vld [vmem:[%s16079_s3 + $0x8a8] sm:$0xff] }
 0x1d8   :  { %8474 = vmatpush1.bf16.msra.mxu1 %v11542_v52  ;;  %v391_v52 = vld [vmem:[%s16079_s3 + $0x320] sm:$0xff] }
 0x1d9   :  { %8597 = vmatpush1.bf16.msra.mxu0 %v11544_v17  ;;  %8475 = vmatprep.subr.bf16.mxu1 %v11575_v18  ;;  %v407_v17 = vld [vmem:[%s16079_s3 + $0x3a0] sm:$0xff]  ;;  %v392_v18 = vld [vmem:[%s16079_s3 + $0x328] sm:$0xff] }
 0x1da   :  { %8598 = vmatprep.subr.bf16.mxu0 %v11577_v19  ;;  %v408_v19 = vld [vmem:[%s16079_s3 + $0x3a8] sm:$0xff]  ;;  %v10523_v21 = vcombine.high %v391_v52, %v407_v17  ;;  %v10522_v27 = vcombine.low %v391_v52, %v407_v17 }
 0x1db   :  { %v10525_v22 = vcombine.high %v392_v18, %v408_v19  ;;  %v10524_v14 = vcombine.low %v392_v18, %v408_v19 }
 0x1dc   :  { %8476 = vmatpush1.bf16.msra.mxu1 %v11574_v23  ;;  %v423_v23 = vld [vmem:[%s16079_s3 + $0x420] sm:$0xff] }
 0x1dd   :  { %8599 = vmatpush1.bf16.msra.mxu0 %v11576_v24  ;;  %8477 = vmatprep.subr.bf16.mxu1 %v11607_v25  ;;  %v439_v24 = vld [vmem:[%s16079_s3 + $0x4a0] sm:$0xff]  ;;  %v424_v25 = vld [vmem:[%s16079_s3 + $0x428] sm:$0xff] }
 0x1de   :  { %8600 = vmatprep.subr.bf16.mxu0 %v11609_v26  ;;  %v440_v26 = vld [vmem:[%s16079_s3 + $0x4a8] sm:$0xff]  ;;  %v10555_v28 = vcombine.high %v423_v23, %v439_v24  ;;  %v10554_v39 = vcombine.low %v423_v23, %v439_v24 }
 0x1df   :  { %v10557_v29 = vcombine.high %v424_v25, %v440_v26  ;;  %v10556_v41 = vcombine.low %v424_v25, %v440_v26 }
 0x1e0   :  { %8478 = vmatpush1.bf16.msra.mxu1 %v11606_v30  ;;  %v455_v30 = vld [vmem:[%s16079_s3 + $0x520] sm:$0xff] }
 0x1e1   :  { %8601 = vmatpush1.bf16.msra.mxu0 %v11608_v31  ;;  %8479 = vmatprep.subr.bf16.mxu1 %v11639_v32  ;;  %v471_v31 = vld [vmem:[%s16079_s3 + $0x5a0] sm:$0xff]  ;;  %v456_v32 = vld [vmem:[%s16079_s3 + $0x528] sm:$0xff] }
 0x1e2   :  { %8602 = vmatprep.subr.bf16.mxu0 %v11641_v38  ;;  %v472_v38 = vld [vmem:[%s16079_s3 + $0x5a8] sm:$0xff]  ;;  %v10587_v42 = vcombine.high %v455_v30, %v471_v31  ;;  %v10586_v48 = vcombine.low %v455_v30, %v471_v31 }
 0x1e3   :  { %v10589_v43 = vcombine.high %v456_v32, %v472_v38  ;;  %v10588_v51 = vcombine.low %v456_v32, %v472_v38 }
 0x1e4   :  { %8480 = vmatpush1.bf16.msra.mxu1 %v11638_v44  ;;  %v487_v44 = vld [vmem:[%s16079_s3 + $0x620] sm:$0xff] }
 0x1e5   :  { %8603 = vmatpush1.bf16.msra.mxu0 %v11640_v45  ;;  %8481 = vmatprep.subr.bf16.mxu1 %v11671_v46  ;;  %v503_v45 = vld [vmem:[%s16079_s3 + $0x6a0] sm:$0xff]  ;;  %v488_v46 = vld [vmem:[%s16079_s3 + $0x628] sm:$0xff] }
 0x1e6   :  { %8604 = vmatprep.subr.bf16.mxu0 %v11673_v47  ;;  %v504_v47 = vld [vmem:[%s16079_s3 + $0x6a8] sm:$0xff]  ;;  %v10619_v53 = vcombine.high %v487_v44, %v503_v45  ;;  %v10618_v59 = vcombine.low %v487_v44, %v503_v45 }
 0x1e7   :  { %v10621_v54 = vcombine.high %v488_v46, %v504_v47  ;;  %v10620_v61 = vcombine.low %v488_v46, %v504_v47 }
 0x1e8   :  { %8482 = vmatpush1.bf16.msra.mxu1 %v11670_v55  ;;  %v519_v55 = vld [vmem:[%s16079_s3 + $0x720] sm:$0xff] }
 0x1e9   :  { %8605 = vmatpush1.bf16.msra.mxu0 %v11672_v56  ;;  %8631 = vmatprep.subr.bf16.mxu1 %v10427_v57  ;;  %v535_v56 = vld [vmem:[%s16079_s3 + $0x7a0] sm:$0xff]  ;;  %v520_v57 = vld [vmem:[%s16079_s3 + $0x728] sm:$0xff] }
 0x1ea   :  { %8754 = vmatprep.subr.bf16.mxu0 %v10429_v58  ;;  %v536_v58 = vld [vmem:[%s16079_s3 + $0x7a8] sm:$0xff]  ;;  %v10650_v7 = vcombine.low %v519_v55, %v535_v56 }
 0x1eb   :  { %8500 = vmatmul.mubr.bf16.vlgmr.msra.gmra.mrb[8].mxu1 %v12535_v49  ;;  %v10653_v0 = vcombine.high %v520_v57, %v536_v58 }
 0x1ec   :  { %8623 = vmatmul.mubr.bf16.vlgmr.msra.gmra.mrb[12].mxu0 %v12535_v49  ;;  %8632 = vmatpush1.bf16.msra.mxu1 %v10426_v62  ;;  %v10651_v62 = vcombine.high %v519_v55, %v535_v56  ;;  %v1571_v56 = vld [vmem:[%s16082_s4] sm:$0xff] }
 0x1ed   :  { %8663 = vmatprep.mubr.bf16.mxu1 %v12224_v60  ;;  %8755 = vmatpush1.bf16.msra.mxu0 %v10428_v3  ;;  %v567_v3 = vld [vmem:[%s16079_s3 + $0x8a0] sm:$0xff] }
 0x1ee   :  { %8786 = vmatprep.mubr.bf16.mxu0 %v12224_v60  ;;  %8633 = vmatprep.subr.bf16.mxu1 %v10459_v5  ;;  %v552_v5 = vld [vmem:[%s16079_s3 + $0x828] sm:$0xff]  ;;  %v10683_v9 = vcombine.high %v551_v2, %v567_v3  ;;  %v10682_v52 = vcombine.low %v551_v2, %v567_v3  ;;  %v1590_v2 = vrot.slane %v1571_v56, %v12374_v50  ;;  %v11901_v3 = vmov 1983009808  }
 0x1ef   :  { %8756 = vmatprep.subr.bf16.mxu0 %v10461_v8  ;;  %v10652_v8 = vcombine.low %v520_v57, %v536_v58  ;;  %v10685_v11 = vcombine.high %v552_v5, %v568_v6  ;;  %v10684_v17 = vcombine.low %v552_v5, %v568_v6  ;;  %v10238_v5 = vunpack.c.l.s4 %v11901_v3  ;;  %v744_v6 = vld [vmem:[%s16079_s3 + $0xe28] sm:$0xff]  ;;  %v839_v3 = vld [vmem:[%s16079_s3 + $0x1120] sm:$0xff] }
 0x1f0   :  { %8634 = vmatpush1.bf16.msra.mxu1 %v10458_v12  ;;  %v583_v12 = vld [vmem:[%s16079_s3 + $0x920] sm:$0xff] }
 0x1f1   :  { %8757 = vmatpush1.bf16.msra.mxu0 %v10460_v13  ;;  %8635 = vmatprep.subr.bf16.mxu1 %v10491_v15  ;;  %v599_v13 = vld [vmem:[%s16079_s3 + $0x9a0] sm:$0xff]  ;;  %v584_v15 = vld [vmem:[%s16079_s3 + $0x928] sm:$0xff] }
 0x1f2   :  { %8758 = vmatprep.subr.bf16.mxu0 %v10493_v16  ;;  %v600_v16 = vld [vmem:[%s16079_s3 + $0x9a8] sm:$0xff]  ;;  %v10715_v18 = vcombine.high %v583_v12, %v599_v13  ;;  %v10714_v23 = vcombine.low %v583_v12, %v599_v13  ;;  %v13208_v12 = vld [vmem:[%s16079_s3 + $0xf20] sm:$0xff] }
 0x1f3   :  { %v10717_v19 = vcombine.high %v584_v15, %v600_v16  ;;  %v10716_v24 = vcombine.low %v584_v15, %v600_v16  ;;  %v791_v16 = vld [vmem:[%s16079_s3 + $0xfa0] sm:$0xff] }
 0x1f4   :  { %8636 = vmatpush1.bf16.msra.mxu1 %v10490_v36  ;;  %v615_v36 = vld [vmem:[%s16079_s3 + $0xa20] sm:$0xff] }
 0x1f5   :  { %8759 = vmatpush1.bf16.msra.mxu0 %v10492_v20  ;;  %8637 = vmatprep.subr.bf16.mxu1 %v10523_v21  ;;  %v631_v20 = vld [vmem:[%s16079_s3 + $0xaa0] sm:$0xff]  ;;  %v616_v21 = vld [vmem:[%s16079_s3 + $0xa28] sm:$0xff] }
 0x1f6   :  { %8760 = vmatprep.subr.bf16.mxu0 %v10525_v22  ;;  %v632_v22 = vld [vmem:[%s16079_s3 + $0xaa8] sm:$0xff]  ;;  %v10747_v25 = vcombine.high %v615_v36, %v631_v20  ;;  %v10746_v30 = vcombine.low %v615_v36, %v631_v20 }
 0x1f7   :  { %v10749_v26 = vcombine.high %v616_v21, %v632_v22  ;;  %v10748_v31 = vcombine.low %v616_v21, %v632_v22 }
 0x1f8   :  { %8638 = vmatpush1.bf16.msra.mxu1 %v10522_v27  ;;  %v647_v27 = vld [vmem:[%s16079_s3 + $0xb20] sm:$0xff] }
 0x1f9   :  { %8761 = vmatpush1.bf16.msra.mxu0 %v10524_v14  ;;  %8639 = vmatprep.subr.bf16.mxu1 %v10555_v28  ;;  %v663_v14 = vld [vmem:[%s16079_s3 + $0xba0] sm:$0xff]  ;;  %v648_v28 = vld [vmem:[%s16079_s3 + $0xb28] sm:$0xff] }
 0x1fa   :  { %8762 = vmatprep.subr.bf16.mxu0 %v10557_v29  ;;  %v664_v29 = vld [vmem:[%s16079_s3 + $0xba8] sm:$0xff]  ;;  %v10779_v32 = vcombine.high %v647_v27, %v663_v14  ;;  %v10778_v44 = vcombine.low %v647_v27, %v663_v14 }
 0x1fb   :  { %v10781_v38 = vcombine.high %v648_v28, %v664_v29  ;;  %v10780_v45 = vcombine.low %v648_v28, %v664_v29 }
 0x1fc   :  { %8640 = vmatpush1.bf16.msra.mxu1 %v10554_v39  ;;  %v679_v39 = vld [vmem:[%s16079_s3 + $0xc20] sm:$0xff] }
 0x1fd   :  { %8763 = vmatpush1.bf16.msra.mxu0 %v10556_v41  ;;  %8641 = vmatprep.subr.bf16.mxu1 %v10587_v42  ;;  %v695_v41 = vld [vmem:[%s16079_s3 + $0xca0] sm:$0xff]  ;;  %v680_v42 = vld [vmem:[%s16079_s3 + $0xc28] sm:$0xff] }
 0x1fe   :  { %8764 = vmatprep.subr.bf16.mxu0 %v10589_v43  ;;  %v696_v43 = vld [vmem:[%s16079_s3 + $0xca8] sm:$0xff]  ;;  %v10811_v46 = vcombine.high %v679_v39, %v695_v41  ;;  %v10810_v55 = vcombine.low %v679_v39, %v695_v41 }
 0x1ff   :  { %v10813_v47 = vcombine.high %v680_v42, %v696_v43  ;;  %v10812_v57 = vcombine.low %v680_v42, %v696_v43 }
 0x200   :  { %8642 = vmatpush1.bf16.msra.mxu1 %v10586_v48  ;;  %v711_v48 = vld [vmem:[%s16079_s3 + $0xd20] sm:$0xff] }
 0x201   :  { %8765 = vmatpush1.bf16.msra.mxu0 %v10588_v51  ;;  %8643 = vmatprep.subr.bf16.mxu1 %v10619_v53  ;;  %v727_v51 = vld [vmem:[%s16079_s3 + $0xda0] sm:$0xff]  ;;  %v712_v53 = vld [vmem:[%s16079_s3 + $0xd28] sm:$0xff] }
 0x202   :  { %8766 = vmatprep.subr.bf16.mxu0 %v10621_v54  ;;  %v728_v54 = vld [vmem:[%s16079_s3 + $0xda8] sm:$0xff]  ;;  %v10843_v58 = vcombine.high %v711_v48, %v727_v51 }
 0x203   :  { %v10844_v13 = vcombine.low %v712_v53, %v728_v54 }
 0x204   :  { %8644 = vmatpush1.bf16.msra.mxu1 %v10618_v59  ;;  %v10845_v59 = vcombine.high %v712_v53, %v728_v54  ;;  %v824_v53 = vld [vmem:[%s16079_s3 + $0x10a8] sm:$0xff] }
 0x205   :  { %8767 = vmatpush1.bf16.msra.mxu0 %v10620_v61  ;;  %8645 = vmatprep.subr.bf16.mxu1 %v10651_v62  ;;  %v743_v61 = vld [vmem:[%s16079_s3 + $0xe20] sm:$0xff] }
 0x206   :  { %8768 = vmatprep.subr.bf16.mxu0 %v10653_v0  ;;  %v759_v62 = vld [vmem:[%s16079_s3 + $0xea0] sm:$0xff]  ;;  %v1582_v0 = vrot.slane %v1571_v56, %v12191_v35 }
 0x207   :  { %v10875_v15 = vcombine.high %v743_v61, %v759_v62  ;;  %v10874_v36 = vcombine.low %v743_v61, %v759_v62 }
 0x208   :  { %8646 = vmatpush1.bf16.msra.mxu1 %v10650_v7  ;;  %v760_v7 = vld [vmem:[%s16079_s3 + $0xea8] sm:$0xff] }
 0x209   :  { %8769 = vmatpush1.bf16.msra.mxu0 %v10652_v8  ;;  %8647 = vmatprep.subr.bf16.mxu1 %v10683_v9  ;;  %v1586_v8 = vrot.slane %v1571_v56, %v12199_v37  ;;  %v1594_v9 = vrot.slane %v1571_v56, %v12206_v40  ;;  %v10877_v20 = vcombine.high %v744_v6, %v760_v7 }
 0x20a   :  { %8770 = vmatprep.subr.bf16.mxu0 %v10685_v11  ;;  %v10842_v11 = vcombine.low %v711_v48, %v727_v51  ;;  %v808_v51 = vld [vmem:[%s16079_s3 + $0x1028] sm:$0xff]  ;;  %v10906_v56 = vcombine.low %v13208_v12, %v791_v16 }
 0x20b   :  { %v10941_v62 = vcombine.high %v808_v51, %v824_v53 }
 0x20c   :  { %8648 = vmatpush1.bf16.msra.mxu1 %v10682_v52  ;;  %v776_v52 = vld [vmem:[%s16079_s3 + $0xf28] sm:$0xff] }
 0x20d   :  { %8771 = vmatpush1.bf16.msra.mxu0 %v10684_v17  ;;  %8649 = vmatprep.subr.bf16.mxu1 %v10715_v18  ;;  %v792_v17 = vld [vmem:[%s16079_s3 + $0xfa8] sm:$0xff] }
 0x20e   :  { %8772 = vmatprep.subr.bf16.mxu0 %v10717_v19 }
 0x210   :  { %8650 = vmatpush1.bf16.msra.mxu1 %v10714_v23 }
 0x211   :  { %8773 = vmatpush1.bf16.msra.mxu0 %v10716_v24  ;;  %8651 = vmatprep.subr.bf16.mxu1 %v10747_v25  ;;  %v10239_v24 = vunpack.c.0.s8 %v10238_v5  ;;  %v855_v5 = vld [vmem:[%s16079_s3 + $0x11a0] sm:$0xff] }
 0x212   :  { %8774 = vmatprep.subr.bf16.mxu0 %v10749_v26  ;;  %v10876_v26 = vcombine.low %v744_v6, %v760_v7  ;;  %v840_v7 = vld [vmem:[%s16079_s3 + $0x1128] sm:$0xff] }
 0x214   :  { %8652 = vmatpush1.bf16.msra.mxu1 %v10746_v30  ;;  %v10907_v30 = vcombine.high %v13208_v12, %v791_v16  ;;  %v10971_v12 = vcombine.high %v839_v3, %v855_v5 }
 0x215   :  { %8775 = vmatpush1.bf16.msra.mxu0 %v10748_v31  ;;  %8653 = vmatprep.subr.bf16.mxu1 %v10779_v32  ;;  %v10909_v31 = vcombine.high %v776_v52, %v792_v17  ;;  %v807_v32 = vld [vmem:[%s16079_s3 + $0x1020] sm:$0xff] }
 0x216   :  { %8776 = vmatprep.subr.bf16.mxu0 %v10781_v38  ;;  %v823_v38 = vld [vmem:[%s16079_s3 + $0x10a0] sm:$0xff] }
 0x217   :  { %v10939_v61 = vcombine.high %v807_v32, %v823_v38  ;;  %v10938_v6 = vcombine.low %v807_v32, %v823_v38 }
 0x218   :  { %8654 = vmatpush1.bf16.msra.mxu1 %v10778_v44 }
 0x219   :  { %8777 = vmatpush1.bf16.msra.mxu0 %v10780_v45  ;;  %8655 = vmatprep.subr.bf16.mxu1 %v10811_v46  ;;  %v13227_v46 = vsub.s32 %v10239_v24, %v12188_v34  ;;  %v920_v24 = vld [vmem:[%s16079_s3 + $0x13a8] sm:$0xff] }
 0x21a   :  { %8778 = vmatprep.subr.bf16.mxu0 %v10813_v47 }
 0x21c   :  { %8656 = vmatpush1.bf16.msra.mxu1 %v10810_v55 }
 0x21d   :  { %8779 = vmatpush1.bf16.msra.mxu0 %v10812_v57  ;;  %8657 = vmatprep.subr.bf16.mxu1 %v10843_v58  ;;  %v10908_v57 = vcombine.low %v776_v52, %v792_v17  ;;  %v872_v52 = vld [vmem:[%s16079_s3 + $0x1228] sm:$0xff] }
 0x21e   :  { %v8255_v18 = vpop.f32.mrb[4].mxu1  ;;  %v8378_v19 = vpop.f32.mrb[8].mxu0  ;;  %8780 = vmatprep.subr.bf16.mxu0 %v10845_v59  ;;  %v888_v17 = vld [vmem:[%s16079_s3 + $0x12a8] sm:$0xff] }
 0x21f   :  { %v11712_v21 = vadd.f32 %v8255_v18, %v1582_v0  ;;  %v11714_v22 = vadd.f32 %v8378_v19, %v1590_v2  ;;  %v8257_v23 = vpop.f32.mrb[5].mxu1  ;;  %v8380_v25 = vpop.f32.mrb[9].mxu0  ;;  %v10970_v18 = vcombine.low %v839_v3, %v855_v5  ;;  %v1032_v3 = vld [vmem:[%s16079_s3 + $0x1728] sm:$0xff] }
 0x220   :  { %v11713_v27 = vadd.f32 %v8257_v23, %v1586_v8  ;;  %v11715_v14 = vadd.f32 %v8380_v25, %v1594_v9  ;;  %v8259_v28 = vpop.f32.mrb[6].mxu1  ;;  %v8382_v29 = vpop.f32.mrb[10].mxu0  ;;  %8658 = vmatpush1.bf16.msra.mxu1 %v10842_v11  ;;  %v856_v8 = vld [vmem:[%s16079_s3 + $0x11a8] sm:$0xff]  ;;  %v10940_v11 = vcombine.low %v808_v51, %v824_v53 }
 0x221   :  { %vm10107_vm8 = vcmp.gt.f32.partialorder %v11712_v21, 0.0  ;;  %v10139_v39 = vmul.f32 0.2, %v11712_v21  ;;  %vm10109_vm9 = vcmp.gt.f32.partialorder %v11714_v22, 0.0  ;;  %v10141_v41 = vmul.f32 0.2, %v11714_v22  ;;  %8781 = vmatpush1.bf16.msra.mxu0 %v10844_v13  ;;  %8659 = vmatprep.subr.bf16.mxu1 %v10875_v15 }
 0x222   :  { %vm10108_vm10 = vcmp.gt.f32.partialorder %v11713_v27, 0.0  ;;  %v10140_v42 = vmul.f32 0.2, %v11713_v27  ;;  %vm10110_vm11 = vcmp.gt.f32.partialorder %v11715_v14, 0.0  ;;  %v10142_v43 = vmul.f32 0.2, %v11715_v14  ;;  %8782 = vmatprep.subr.bf16.mxu0 %v10877_v20 }
 0x223   :  { %v10171_v44 = vsel %vm10107_vm8, %v11712_v21, %v10139_v39  ;;  %v10173_v45 = vsel %vm10109_vm9, %v11714_v22, %v10141_v41  ;;  %v8260_v47 = vpop.f32.mrb[7].mxu1  ;;  %v8383_v48 = vpop.f32.mrb[11].mxu0  ;;  %v871_v13 = vld [vmem:[%s16079_s3 + $0x1220] sm:$0xff]  ;;  %v10973_v16 = vcombine.high %v840_v7, %v856_v8  ;;  %v10972_v19 = vcombine.low %v840_v7, %v856_v8  ;;  %v904_v23 = vld [vmem:[%s16079_s3 + $0x1328] sm:$0xff] }
 0x224   :  { %v10172_v54 = vsel %vm10108_vm10, %v11713_v27, %v10140_v42  ;;  %v10174_v55 = vsel %vm10110_vm11, %v11715_v14, %v10142_v43  ;;  %8660 = vmatpush1.bf16.msra.mxu1 %v10874_v36  ;;  %v887_v15 = vld [vmem:[%s16079_s3 + $0x12a0] sm:$0xff]  ;;  %v11005_v20 = vcombine.high %v872_v52, %v888_v17  ;;  %v11037_v14 = vcombine.high %v904_v23, %v920_v24  ;;  %v1048_v5 = vld [vmem:[%s16079_s3 + $0x17a8] sm:$0xff] }
 0x225   :  { %v10235_v58 = vcombine.low %v10171_v44, %v10172_v54  ;;  %v10236_v59 = vcombine.low %v10173_v45, %v10174_v55  ;;  %8783 = vmatpush1.bf16.msra.mxu0 %v10876_v26  ;;  %8661 = vmatprep.subr.bf16.mxu1 %v10907_v30  ;;  %v11003_v36 = vcombine.high %v871_v13, %v887_v15  ;;  %v903_v21 = vld [vmem:[%s16079_s3 + $0x1320] sm:$0xff]  ;;  %v936_v30 = vld [vmem:[%s16079_s3 + $0x1428] sm:$0xff] }
 0x226   :  { %8784 = vmatprep.subr.bf16.mxu0 %v10909_v31  ;;  %v919_v22 = vld [vmem:[%s16079_s3 + $0x13a0] sm:$0xff]  ;;  %v11002_v25 = vcombine.low %v871_v13, %v887_v15  ;;  %v11004_v26 = vcombine.low %v872_v52, %v888_v17  ;;  %v952_v31 = vld [vmem:[%s16079_s3 + $0x14a8] sm:$0xff]  ;;  %v11036_v38 = vcombine.low %v904_v23, %v920_v24  ;;  %v11164_v52 = vcombine.low %v1032_v3, %v1048_v5 }
 0x227   :  { %v10243_v0 = vrot.slane %v10235_v58, %v13227_v46  ;;  %v10250_v2 = vrot.slane %v10236_v59, %v13227_v46  ;;  %v11035_v27 = vcombine.high %v903_v21, %v919_v22  ;;  %v935_v28 = vld [vmem:[%s16079_s3 + $0x1420] sm:$0xff]  ;;  %v11034_v32 = vcombine.low %v903_v21, %v919_v22  ;;  %v968_v44 = vld [vmem:[%s16079_s3 + $0x1528] sm:$0xff] }
 0x228   :  { %8662 = vmatpush1.bf16.msra.mxu1 %v10906_v56  ;;  %v951_v29 = vld [vmem:[%s16079_s3 + $0x14a0] sm:$0xff]  ;;  %v11069_v41 = vcombine.high %v936_v30, %v952_v31  ;;  %v984_v45 = vld [vmem:[%s16079_s3 + $0x15a8] sm:$0xff]  ;;  %v11068_v48 = vcombine.low %v936_v30, %v952_v31 }
 0x229   :  { %v10251_v9 = vcombine.low %v10243_v0, %v10250_v2  ;;  %8785 = vmatpush1.bf16.msra.mxu0 %v10908_v57  ;;  %8672 = vmatprep.subr.bf16.mxu1 %v10939_v61  ;;  %v11067_v39 = vcombine.high %v935_v28, %v951_v29  ;;  %v967_v42 = vld [vmem:[%s16079_s3 + $0x1520] sm:$0xff]  ;;  %v11066_v47 = vcombine.low %v935_v28, %v951_v29  ;;  %v1000_v56 = vld [vmem:[%s16079_s3 + $0x1628] sm:$0xff] }
 0x22a   :  { %8795 = vmatprep.subr.bf16.mxu0 %v10941_v62  ;;  %v983_v43 = vld [vmem:[%s16079_s3 + $0x15a0] sm:$0xff]  ;;  %v11101_v53 = vcombine.high %v968_v44, %v984_v45  ;;  %v1016_v57 = vld [vmem:[%s16079_s3 + $0x16a8] sm:$0xff]  ;;  %v11100_v59 = vcombine.low %v968_v44, %v984_v45 }
 0x22b   :  { %10379 = vst [vmem:[%s16083_s5] sm:$0xff] %v10251_v9  ;;  %8664 = vmatmul.mubr.bf16.vlgmr.msra.gmra.mrb[12].mxu1 %v12226_v63  ;;  %v11099_v51 = vcombine.high %v967_v42, %v983_v43  ;;  %v999_v54 = vld [vmem:[%s16079_s3 + $0x1620] sm:$0xff]  ;;  %v11098_v58 = vcombine.low %v967_v42, %v983_v43  ;;  %v11133_v62 = vcombine.high %v1000_v56, %v1016_v57  ;;  %v1064_v13 = vld [vmem:[%s16079_s3 + $0x1828] sm:$0xff] }
 0x22c   :  { %8787 = vmatmul.mubr.bf16.vlgmr.msra.gmra.mrb[16].mxu0 %v12226_v63  ;;  %8673 = vmatpush1.bf16.msra.mxu1 %v10938_v6  ;;  %v1015_v55 = vld [vmem:[%s16079_s3 + $0x16a0] sm:$0xff]  ;;  %v11132_v7 = vcombine.low %v1000_v56, %v1016_v57  ;;  %v11165_v9 = vcombine.high %v1032_v3, %v1048_v5  ;;  %v1080_v15 = vld [vmem:[%s16079_s3 + $0x18a8] sm:$0xff] }
 0x22d   :  { %8704 = vmatprep.mubr.bf16.mxu1 %v12244_v10  ;;  %8796 = vmatpush1.bf16.msra.mxu0 %v10940_v11  ;;  %v11131_v61 = vcombine.high %v999_v54, %v1015_v55  ;;  %v1031_v0 = vld [vmem:[%s16079_s3 + $0x1720] sm:$0xff]  ;;  %v11130_v6 = vcombine.low %v999_v54, %v1015_v55  ;;  %v1112_v21 = vld [vmem:[%s16079_s3 + $0x19a8] sm:$0xff]  ;;  %v11196_v23 = vcombine.low %v1064_v13, %v1080_v15 }
 0x22e   :  { %8827 = vmatprep.mubr.bf16.mxu0 %v12244_v10  ;;  %8674 = vmatprep.subr.bf16.mxu1 %v10971_v12  ;;  %v1047_v2 = vld [vmem:[%s16079_s3 + $0x17a0] sm:$0xff]  ;;  %v1144_v28 = vld [vmem:[%s16079_s3 + $0x1aa8] sm:$0xff] }
 0x22f   :  { %8797 = vmatprep.subr.bf16.mxu0 %v10973_v16  ;;  %v11163_v8 = vcombine.high %v1031_v0, %v1047_v2  ;;  %v1063_v11 = vld [vmem:[%s16079_s3 + $0x1820] sm:$0xff]  ;;  %v11162_v16 = vcombine.low %v1031_v0, %v1047_v2  ;;  %v1176_v42 = vld [vmem:[%s16079_s3 + $0x1ba8] sm:$0xff] }
 0x230   :  { %8675 = vmatpush1.bf16.msra.mxu1 %v10970_v18  ;;  %v1079_v12 = vld [vmem:[%s16079_s3 + $0x18a0] sm:$0xff]  ;;  %v11197_v18 = vcombine.high %v1064_v13, %v1080_v15  ;;  %v1208_v54 = vld [vmem:[%s16079_s3 + $0x1ca8] sm:$0xff] }
 0x231   :  { %8798 = vmatpush1.bf16.msra.mxu0 %v10972_v19  ;;  %8676 = vmatprep.subr.bf16.mxu1 %v11003_v36  ;;  %v11195_v17 = vcombine.high %v1063_v11, %v1079_v12  ;;  %v1095_v19 = vld [vmem:[%s16079_s3 + $0x1920] sm:$0xff]  ;;  %v11194_v22 = vcombine.low %v1063_v11, %v1079_v12  ;;  %v1240_v0 = vld [vmem:[%s16079_s3 + $0x1da8] sm:$0xff] }
 0x232   :  { %8799 = vmatprep.subr.bf16.mxu0 %v11005_v20  ;;  %v1111_v36 = vld [vmem:[%s16079_s3 + $0x19a0] sm:$0xff]  ;;  %v1096_v20 = vld [vmem:[%s16079_s3 + $0x1928] sm:$0xff] }
 0x233   :  { %v11227_v24 = vcombine.high %v1095_v19, %v1111_v36  ;;  %v11226_v29 = vcombine.low %v1095_v19, %v1111_v36  ;;  %v11228_v30 = vcombine.low %v1096_v20, %v1112_v21  ;;  %v1272_v11 = vld [vmem:[%s16079_s3 + $0x1ea8] sm:$0xff] }
 0x234   :  { %8677 = vmatpush1.bf16.msra.mxu1 %v11002_v25  ;;  %v11229_v25 = vcombine.high %v1096_v20, %v1112_v21  ;;  %v1304_v19 = vld [vmem:[%s16079_s3 + $0x1fa8] sm:$0xff] }
 0x235   :  { %8800 = vmatpush1.bf16.msra.mxu0 %v11004_v26  ;;  %8678 = vmatprep.subr.bf16.mxu1 %v11035_v27  ;;  %v1127_v26 = vld [vmem:[%s16079_s3 + $0x1a20] sm:$0xff] }
 0x236   :  { %8801 = vmatprep.subr.bf16.mxu0 %v11037_v14  ;;  %v1143_v27 = vld [vmem:[%s16079_s3 + $0x1aa0] sm:$0xff]  ;;  %v1128_v14 = vld [vmem:[%s16079_s3 + $0x1a28] sm:$0xff] }
 0x237   :  { %v11259_v31 = vcombine.high %v1127_v26, %v1143_v27  ;;  %v11258_v43 = vcombine.low %v1127_v26, %v1143_v27  ;;  %v11260_v44 = vcombine.low %v1128_v14, %v1144_v28  ;;  %v1336_v26 = vld [vmem:[%s16079_s3 + $0x20a8] sm:$0xff] }
 0x238   :  { %8679 = vmatpush1.bf16.msra.mxu1 %v11034_v32  ;;  %v11261_v32 = vcombine.high %v1128_v14, %v1144_v28 }
 0x239   :  { %8802 = vmatpush1.bf16.msra.mxu0 %v11036_v38  ;;  %8680 = vmatprep.subr.bf16.mxu1 %v11067_v39  ;;  %v1159_v38 = vld [vmem:[%s16079_s3 + $0x1b20] sm:$0xff] }
 0x23a   :  { %8803 = vmatprep.subr.bf16.mxu0 %v11069_v41  ;;  %v1175_v39 = vld [vmem:[%s16079_s3 + $0x1ba0] sm:$0xff]  ;;  %v1160_v41 = vld [vmem:[%s16079_s3 + $0x1b28] sm:$0xff] }
 0x23b   :  { %v11291_v45 = vcombine.high %v1159_v38, %v1175_v39  ;;  %v11290_v55 = vcombine.low %v1159_v38, %v1175_v39  ;;  %v11292_v56 = vcombine.low %v1160_v41, %v1176_v42  ;;  %v1368_v38 = vld [vmem:[%s16079_s3 + $0x21a8] sm:$0xff] }
 0x23c   :  { %8681 = vmatpush1.bf16.msra.mxu1 %v11066_v47  ;;  %v11293_v47 = vcombine.high %v1160_v41, %v1176_v42 }
 0x23d   :  { %8804 = vmatpush1.bf16.msra.mxu0 %v11068_v48  ;;  %8682 = vmatprep.subr.bf16.mxu1 %v11099_v51  ;;  %v1191_v48 = vld [vmem:[%s16079_s3 + $0x1c20] sm:$0xff] }
 0x23e   :  { %8805 = vmatprep.subr.bf16.mxu0 %v11101_v53  ;;  %v1207_v51 = vld [vmem:[%s16079_s3 + $0x1ca0] sm:$0xff]  ;;  %v1192_v53 = vld [vmem:[%s16079_s3 + $0x1c28] sm:$0xff] }
 0x23f   :  { %v11323_v57 = vcombine.high %v1191_v48, %v1207_v51  ;;  %v11322_v2 = vcombine.low %v1191_v48, %v1207_v51  ;;  %v11324_v3 = vcombine.low %v1192_v53, %v1208_v54  ;;  %v1400_v48 = vld [vmem:[%s16079_s3 + $0x22a8] sm:$0xff] }
 0x240   :  { %8683 = vmatpush1.bf16.msra.mxu1 %v11098_v58  ;;  %v11325_v58 = vcombine.high %v1192_v53, %v1208_v54 }
 0x241   :  { %8806 = vmatpush1.bf16.msra.mxu0 %v11100_v59  ;;  %8684 = vmatprep.subr.bf16.mxu1 %v11131_v61  ;;  %v1223_v59 = vld [vmem:[%s16079_s3 + $0x1d20] sm:$0xff] }
 0x242   :  { %8807 = vmatprep.subr.bf16.mxu0 %v11133_v62  ;;  %v1239_v61 = vld [vmem:[%s16079_s3 + $0x1da0] sm:$0xff]  ;;  %v1224_v62 = vld [vmem:[%s16079_s3 + $0x1d28] sm:$0xff] }
 0x243   :  { %v11355_v5 = vcombine.high %v1223_v59, %v1239_v61  ;;  %v11354_v12 = vcombine.low %v1223_v59, %v1239_v61  ;;  %v11356_v13 = vcombine.low %v1224_v62, %v1240_v0  ;;  %v1432_v59 = vld [vmem:[%s16079_s3 + $0x23a8] sm:$0xff] }
 0x244   :  { %8685 = vmatpush1.bf16.msra.mxu1 %v11130_v6  ;;  %v11357_v6 = vcombine.high %v1224_v62, %v1240_v0 }
 0x245   :  { %8808 = vmatpush1.bf16.msra.mxu0 %v11132_v7  ;;  %8686 = vmatprep.subr.bf16.mxu1 %v11163_v8  ;;  %v1255_v7 = vld [vmem:[%s16079_s3 + $0x1e20] sm:$0xff] }
 0x246   :  { %8809 = vmatprep.subr.bf16.mxu0 %v11165_v9  ;;  %v1271_v8 = vld [vmem:[%s16079_s3 + $0x1ea0] sm:$0xff]  ;;  %v1256_v9 = vld [vmem:[%s16079_s3 + $0x1e28] sm:$0xff] }
 0x247   :  { %v11387_v15 = vcombine.high %v1255_v7, %v1271_v8  ;;  %v11386_v36 = vcombine.low %v1255_v7, %v1271_v8  ;;  %v11388_v20 = vcombine.low %v1256_v9, %v1272_v11  ;;  %v1464_v7 = vld [vmem:[%s16079_s3 + $0x24a8] sm:$0xff] }
 0x248   :  { %8687 = vmatpush1.bf16.msra.mxu1 %v11162_v16  ;;  %v11389_v16 = vcombine.high %v1256_v9, %v1272_v11 }
 0x249   :  { %8810 = vmatpush1.bf16.msra.mxu0 %v11164_v52  ;;  %8688 = vmatprep.subr.bf16.mxu1 %v11195_v17  ;;  %v1287_v52 = vld [vmem:[%s16079_s3 + $0x1f20] sm:$0xff] }
 0x24a   :  { %8811 = vmatprep.subr.bf16.mxu0 %v11197_v18  ;;  %v1303_v17 = vld [vmem:[%s16079_s3 + $0x1fa0] sm:$0xff]  ;;  %v1288_v18 = vld [vmem:[%s16079_s3 + $0x1f28] sm:$0xff] }
 0x24b   :  { %v11419_v21 = vcombine.high %v1287_v52, %v1303_v17  ;;  %v11418_v27 = vcombine.low %v1287_v52, %v1303_v17  ;;  %v11420_v14 = vcombine.low %v1288_v18, %v1304_v19  ;;  %v1496_v52 = vld [vmem:[%s16079_s3 + $0x25a8] sm:$0xff] }
 0x24c   :  { %8689 = vmatpush1.bf16.msra.mxu1 %v11194_v22  ;;  %v11421_v22 = vcombine.high %v1288_v18, %v1304_v19 }
 0x24d   :  { %8812 = vmatpush1.bf16.msra.mxu0 %v11196_v23  ;;  %8690 = vmatprep.subr.bf16.mxu1 %v11227_v24  ;;  %v1319_v23 = vld [vmem:[%s16079_s3 + $0x2020] sm:$0xff] }
 0x24e   :  { %8813 = vmatprep.subr.bf16.mxu0 %v11229_v25  ;;  %v1335_v24 = vld [vmem:[%s16079_s3 + $0x20a0] sm:$0xff]  ;;  %v1320_v25 = vld [vmem:[%s16079_s3 + $0x2028] sm:$0xff] }
 0x24f   :  { %v11451_v28 = vcombine.high %v1319_v23, %v1335_v24  ;;  %v11450_v39 = vcombine.low %v1319_v23, %v1335_v24  ;;  %v11452_v41 = vcombine.low %v1320_v25, %v1336_v26  ;;  %v1528_v23 = vld [vmem:[%s16079_s3 + $0x26a8] sm:$0xff] }
 0x250   :  { %8691 = vmatpush1.bf16.msra.mxu1 %v11226_v29  ;;  %v11453_v29 = vcombine.high %v1320_v25, %v1336_v26 }
 0x251   :  { %8814 = vmatpush1.bf16.msra.mxu0 %v11228_v30  ;;  %8692 = vmatprep.subr.bf16.mxu1 %v11259_v31  ;;  %v1351_v30 = vld [vmem:[%s16079_s3 + $0x2120] sm:$0xff] }
 0x252   :  { %8815 = vmatprep.subr.bf16.mxu0 %v11261_v32  ;;  %v1367_v31 = vld [vmem:[%s16079_s3 + $0x21a0] sm:$0xff]  ;;  %v1352_v32 = vld [vmem:[%s16079_s3 + $0x2128] sm:$0xff] }
 0x253   :  { %v11483_v42 = vcombine.high %v1351_v30, %v1367_v31  ;;  %v11482_v51 = vcombine.low %v1351_v30, %v1367_v31  ;;  %v11484_v53 = vcombine.low %v1352_v32, %v1368_v38  ;;  %v1560_v30 = vld [vmem:[%s16079_s3 + $0x27a8] sm:$0xff] }
 0x254   :  { %8693 = vmatpush1.bf16.msra.mxu1 %v11258_v43  ;;  %v11485_v43 = vcombine.high %v1352_v32, %v1368_v38 }
 0x255   :  { %8816 = vmatpush1.bf16.msra.mxu0 %v11260_v44  ;;  %8694 = vmatprep.subr.bf16.mxu1 %v11291_v45  ;;  %v1383_v44 = vld [vmem:[%s16079_s3 + $0x2220] sm:$0xff] }
 0x256   :  { %8817 = vmatprep.subr.bf16.mxu0 %v11293_v47  ;;  %v1399_v45 = vld [vmem:[%s16079_s3 + $0x22a0] sm:$0xff]  ;;  %v1384_v47 = vld [vmem:[%s16079_s3 + $0x2228] sm:$0xff] }
 0x257   :  { %v11515_v54 = vcombine.high %v1383_v44, %v1399_v45  ;;  %v11514_v61 = vcombine.low %v1383_v44, %v1399_v45  ;;  %v11516_v62 = vcombine.low %v1384_v47, %v1400_v48  ;;  %v314_v44 = vld [vmem:[%s16079_s3 + $0xb8] sm:$0xff] }
 0x258   :  { %8695 = vmatpush1.bf16.msra.mxu1 %v11290_v55  ;;  %v11517_v55 = vcombine.high %v1384_v47, %v1400_v48 }
 0x259   :  { %8818 = vmatpush1.bf16.msra.mxu0 %v11292_v56  ;;  %8696 = vmatprep.subr.bf16.mxu1 %v11323_v57  ;;  %v1415_v56 = vld [vmem:[%s16079_s3 + $0x2320] sm:$0xff] }
 0x25a   :  { %8819 = vmatprep.subr.bf16.mxu0 %v11325_v58  ;;  %v1431_v57 = vld [vmem:[%s16079_s3 + $0x23a0] sm:$0xff]  ;;  %v1416_v58 = vld [vmem:[%s16079_s3 + $0x2328] sm:$0xff] }
 0x25b   :  { %v11547_v0 = vcombine.high %v1415_v56, %v1431_v57  ;;  %v11546_v8 = vcombine.low %v1415_v56, %v1431_v57  ;;  %v11548_v9 = vcombine.low %v1416_v58, %v1432_v59  ;;  %v330_v56 = vld [vmem:[%s16079_s3 + $0x138] sm:$0xff] }
 0x25c   :  { %8697 = vmatpush1.bf16.msra.mxu1 %v11322_v2  ;;  %v11549_v2 = vcombine.high %v1416_v58, %v1432_v59  ;;  %v346_v57 = vld [vmem:[%s16079_s3 + $0x1b8] sm:$0xff] }
 0x25d   :  { %8820 = vmatpush1.bf16.msra.mxu0 %v11324_v3  ;;  %8698 = vmatprep.subr.bf16.mxu1 %v11355_v5  ;;  %v1447_v3 = vld [vmem:[%s16079_s3 + $0x2420] sm:$0xff] }
 0x25e   :  { %8821 = vmatprep.subr.bf16.mxu0 %v11357_v6  ;;  %v1463_v5 = vld [vmem:[%s16079_s3 + $0x24a0] sm:$0xff]  ;;  %v1448_v6 = vld [vmem:[%s16079_s3 + $0x2428] sm:$0xff] }
 0x25f   :  { %v11579_v11 = vcombine.high %v1447_v3, %v1463_v5  ;;  %v11578_v17 = vcombine.low %v1447_v3, %v1463_v5  ;;  %v11580_v18 = vcombine.low %v1448_v6, %v1464_v7  ;;  %v378_v3 = vld [vmem:[%s16079_s3 + $0x2b8] sm:$0xff] }
 0x260   :  { %8699 = vmatpush1.bf16.msra.mxu1 %v11354_v12  ;;  %v11581_v12 = vcombine.high %v1448_v6, %v1464_v7  ;;  %v10464_v6 = vcombine.low %v330_v56, %v346_v57 }
 0x261   :  { %8822 = vmatpush1.bf16.msra.mxu0 %v11356_v13  ;;  %8700 = vmatprep.subr.bf16.mxu1 %v11387_v15  ;;  %v1479_v13 = vld [vmem:[%s16079_s3 + $0x2520] sm:$0xff] }
 0x262   :  { %8823 = vmatprep.subr.bf16.mxu0 %v11389_v16  ;;  %v1495_v15 = vld [vmem:[%s16079_s3 + $0x25a0] sm:$0xff]  ;;  %v1480_v16 = vld [vmem:[%s16079_s3 + $0x2528] sm:$0xff] }
 0x263   :  { %v11611_v19 = vcombine.high %v1479_v13, %v1495_v15  ;;  %v11610_v24 = vcombine.low %v1479_v13, %v1495_v15  ;;  %v11612_v25 = vcombine.low %v1480_v16, %v1496_v52  ;;  %v410_v13 = vld [vmem:[%s16079_s3 + $0x3b8] sm:$0xff] }
 0x264   :  { %8701 = vmatpush1.bf16.msra.mxu1 %v11386_v36  ;;  %v11613_v36 = vcombine.high %v1480_v16, %v1496_v52 }
 0x265   :  { %8824 = vmatpush1.bf16.msra.mxu0 %v11388_v20  ;;  %8702 = vmatprep.subr.bf16.mxu1 %v11419_v21  ;;  %v1511_v20 = vld [vmem:[%s16079_s3 + $0x2620] sm:$0xff] }
 0x266   :  { %8825 = vmatprep.subr.bf16.mxu0 %v11421_v22  ;;  %v1527_v21 = vld [vmem:[%s16079_s3 + $0x26a0] sm:$0xff]  ;;  %v1512_v22 = vld [vmem:[%s16079_s3 + $0x2628] sm:$0xff] }
 0x267   :  { %v11643_v26 = vcombine.high %v1511_v20, %v1527_v21  ;;  %v11642_v31 = vcombine.low %v1511_v20, %v1527_v21  ;;  %v11644_v32 = vcombine.low %v1512_v22, %v1528_v23  ;;  %v442_v20 = vld [vmem:[%s16079_s3 + $0x4b8] sm:$0xff] }
 0x268   :  { %8703 = vmatpush1.bf16.msra.mxu1 %v11418_v27  ;;  %v11645_v27 = vcombine.high %v1512_v22, %v1528_v23 }
 0x269   :  { %8826 = vmatpush1.bf16.msra.mxu0 %v11420_v14  ;;  %8713 = vmatprep.subr.bf16.mxu1 %v11451_v28  ;;  %v1543_v14 = vld [vmem:[%s16079_s3 + $0x2720] sm:$0xff] }
 0x26a   :  { %8836 = vmatprep.subr.bf16.mxu0 %v11453_v29  ;;  %v1559_v28 = vld [vmem:[%s16079_s3 + $0x27a0] sm:$0xff]  ;;  %v1544_v29 = vld [vmem:[%s16079_s3 + $0x2728] sm:$0xff] }
 0x26b   :  { %8705 = vmatmul.mubr.bf16.vlgmr.msra.gmra.mrb[12].mxu1 %v12436_v33  ;;  %v11675_v38 = vcombine.high %v1543_v14, %v1559_v28  ;;  %v11674_v45 = vcombine.low %v1543_v14, %v1559_v28  ;;  %v11676_v47 = vcombine.low %v1544_v29, %v1560_v30  ;;  %v474_v14 = vld [vmem:[%s16079_s3 + $0x5b8] sm:$0xff] }
 0x26c   :  { %8828 = vmatmul.mubr.bf16.vlgmr.msra.gmra.mrb[16].mxu0 %v12436_v33  ;;  %8714 = vmatpush1.bf16.msra.mxu1 %v11450_v39  ;;  %v11677_v39 = vcombine.high %v1544_v29, %v1560_v30 }
 0x26d   :  { %8837 = vmatpush1.bf16.msra.mxu0 %v11452_v41  ;;  %8715 = vmatprep.subr.bf16.mxu1 %v11483_v42  ;;  %v297_v41 = vld [vmem:[%s16079_s3 + $0x30] sm:$0xff] }
 0x26e   :  { %8838 = vmatprep.subr.bf16.mxu0 %v11485_v43  ;;  %8745 = vmatprep.mubr.bf16.mxu1 %v11898_v1  ;;  %v313_v42 = vld [vmem:[%s16079_s3 + $0xb0] sm:$0xff]  ;;  %v298_v43 = vld [vmem:[%s16079_s3 + $0x38] sm:$0xff] }
 0x26f   :  { %8868 = vmatprep.mubr.bf16.mxu0 %v11898_v1  ;;  %v10431_v48 = vcombine.high %v297_v41, %v313_v42  ;;  %v10432_v58 = vcombine.low %v298_v43, %v314_v44 }
 0x270   :  { %8716 = vmatpush1.bf16.msra.mxu1 %v11482_v51  ;;  %v10433_v51 = vcombine.high %v298_v43, %v314_v44 }
 0x271   :  { %8839 = vmatpush1.bf16.msra.mxu0 %v11484_v53  ;;  %8717 = vmatprep.subr.bf16.mxu1 %v11515_v54  ;;  %v329_v53 = vld [vmem:[%s16079_s3 + $0x130] sm:$0xff] }
 0x272   :  { %8840 = vmatprep.subr.bf16.mxu0 %v11517_v55  ;;  %v345_v54 = vld [vmem:[%s16079_s3 + $0x1b0] sm:$0xff]  ;;  %v10430_v55 = vcombine.low %v297_v41, %v313_v42  ;;  %v506_v41 = vld [vmem:[%s16079_s3 + $0x6b8] sm:$0xff] }
 0x273   :  { %v10463_v59 = vcombine.high %v329_v53, %v345_v54  ;;  %v10462_v5 = vcombine.low %v329_v53, %v345_v54  ;;  %v538_v53 = vld [vmem:[%s16079_s3 + $0x7b8] sm:$0xff] }
 0x274   :  { %8718 = vmatpush1.bf16.msra.mxu1 %v11514_v61  ;;  %v361_v61 = vld [vmem:[%s16079_s3 + $0x230] sm:$0xff] }
 0x275   :  { %8841 = vmatpush1.bf16.msra.mxu0 %v11516_v62  ;;  %8719 = vmatprep.subr.bf16.mxu1 %v11547_v0  ;;  %v377_v62 = vld [vmem:[%s16079_s3 + $0x2b0] sm:$0xff]  ;;  %v10465_v0 = vcombine.high %v330_v56, %v346_v57 }
 0x276   :  { %8842 = vmatprep.subr.bf16.mxu0 %v11549_v2  ;;  %v362_v2 = vld [vmem:[%s16079_s3 + $0x238] sm:$0xff]  ;;  %v10495_v7 = vcombine.high %v361_v61, %v377_v62  ;;  %v10494_v15 = vcombine.low %v361_v61, %v377_v62 }
 0x277   :  { %v10496_v16 = vcombine.low %v362_v2, %v378_v3  ;;  %v554_v61 = vld [vmem:[%s16079_s3 + $0x838] sm:$0xff] }
 0x278   :  { %8720 = vmatpush1.bf16.msra.mxu1 %v11546_v8  ;;  %v10497_v8 = vcombine.high %v362_v2, %v378_v3  ;;  %v570_v62 = vld [vmem:[%s16079_s3 + $0x8b8] sm:$0xff] }
 0x279   :  { %8843 = vmatpush1.bf16.msra.mxu0 %v11548_v9  ;;  %8721 = vmatprep.subr.bf16.mxu1 %v11579_v11  ;;  %v393_v9 = vld [vmem:[%s16079_s3 + $0x330] sm:$0xff] }
 0x27a   :  { %8844 = vmatprep.subr.bf16.mxu0 %v11581_v12  ;;  %v409_v11 = vld [vmem:[%s16079_s3 + $0x3b0] sm:$0xff]  ;;  %v394_v12 = vld [vmem:[%s16079_s3 + $0x338] sm:$0xff] }
 0x27b   :  { %v10527_v52 = vcombine.high %v393_v9, %v409_v11  ;;  %v10526_v21 = vcombine.low %v393_v9, %v409_v11  ;;  %v10528_v22 = vcombine.low %v394_v12, %v410_v13  ;;  %v602_v9 = vld [vmem:[%s16079_s3 + $0x9b8] sm:$0xff] }
 0x27c   :  { %8722 = vmatpush1.bf16.msra.mxu1 %v11578_v17  ;;  %v10529_v17 = vcombine.high %v394_v12, %v410_v13  ;;  %v10688_v12 = vcombine.low %v554_v61, %v570_v62 }
 0x27d   :  { %8845 = vmatpush1.bf16.msra.mxu0 %v11580_v18  ;;  %8723 = vmatprep.subr.bf16.mxu1 %v11611_v19  ;;  %v425_v18 = vld [vmem:[%s16079_s3 + $0x430] sm:$0xff] }
 0x27e   :  { %8846 = vmatprep.subr.bf16.mxu0 %v11613_v36  ;;  %v441_v19 = vld [vmem:[%s16079_s3 + $0x4b0] sm:$0xff]  ;;  %v426_v36 = vld [vmem:[%s16079_s3 + $0x438] sm:$0xff] }
 0x27f   :  { %v10559_v23 = vcombine.high %v425_v18, %v441_v19  ;;  %v10558_v28 = vcombine.low %v425_v18, %v441_v19  ;;  %v10560_v29 = vcombine.low %v426_v36, %v442_v20  ;;  %v634_v18 = vld [vmem:[%s16079_s3 + $0xab8] sm:$0xff] }
 0x280   :  { %8724 = vmatpush1.bf16.msra.mxu1 %v11610_v24  ;;  %v10561_v24 = vcombine.high %v426_v36, %v442_v20 }
 0x281   :  { %8847 = vmatpush1.bf16.msra.mxu0 %v11612_v25  ;;  %8725 = vmatprep.subr.bf16.mxu1 %v11643_v26  ;;  %v457_v25 = vld [vmem:[%s16079_s3 + $0x530] sm:$0xff] }
 0x282   :  { %8848 = vmatprep.subr.bf16.mxu0 %v11645_v27  ;;  %v473_v26 = vld [vmem:[%s16079_s3 + $0x5b0] sm:$0xff]  ;;  %v458_v27 = vld [vmem:[%s16079_s3 + $0x538] sm:$0xff] }
 0x283   :  { %v10591_v30 = vcombine.high %v457_v25, %v473_v26  ;;  %v10590_v42 = vcombine.low %v457_v25, %v473_v26  ;;  %v10592_v43 = vcombine.low %v458_v27, %v474_v14  ;;  %v666_v25 = vld [vmem:[%s16079_s3 + $0xbb8] sm:$0xff] }
 0x284   :  { %8726 = vmatpush1.bf16.msra.mxu1 %v11642_v31  ;;  %v10593_v31 = vcombine.high %v458_v27, %v474_v14 }
 0x285   :  { %8849 = vmatpush1.bf16.msra.mxu0 %v11644_v32  ;;  %8727 = vmatprep.subr.bf16.mxu1 %v11675_v38  ;;  %v489_v32 = vld [vmem:[%s16079_s3 + $0x630] sm:$0xff] }
 0x286   :  { %8850 = vmatprep.subr.bf16.mxu0 %v11677_v39  ;;  %v505_v38 = vld [vmem:[%s16079_s3 + $0x6b0] sm:$0xff]  ;;  %v490_v39 = vld [vmem:[%s16079_s3 + $0x638] sm:$0xff] }
 0x287   :  { %v10623_v44 = vcombine.high %v489_v32, %v505_v38  ;;  %v10622_v54 = vcombine.low %v489_v32, %v505_v38  ;;  %v698_v32 = vld [vmem:[%s16079_s3 + $0xcb8] sm:$0xff] }
 0x288   :  { %8728 = vmatpush1.bf16.msra.mxu1 %v11674_v45  ;;  %v10625_v45 = vcombine.high %v490_v39, %v506_v41 }
 0x289   :  { %8851 = vmatpush1.bf16.msra.mxu0 %v11676_v47  ;;  %8877 = vmatprep.subr.bf16.mxu1 %v10431_v48  ;;  %v521_v47 = vld [vmem:[%s16079_s3 + $0x730] sm:$0xff] }
 0x28a   :  { %9000 = vmatprep.subr.bf16.mxu0 %v10433_v51  ;;  %v537_v48 = vld [vmem:[%s16079_s3 + $0x7b0] sm:$0xff]  ;;  %v522_v51 = vld [vmem:[%s16079_s3 + $0x738] sm:$0xff] }
 0x28b   :  { %8746 = vmatmul.mubr.bf16.vlgmr.msra.gmra.mrb[12].mxu1 %v12535_v49  ;;  %v10655_v56 = vcombine.high %v521_v47, %v537_v48  ;;  %v10657_v57 = vcombine.high %v522_v51, %v538_v53  ;;  %v10656_v2 = vcombine.low %v522_v51, %v538_v53  ;;  %v13698_v51 = vsub.s32 6, %v12188_v34 }
 0x28c   :  { %8869 = vmatmul.mubr.bf16.vlgmr.msra.gmra.mrb[16].mxu0 %v12535_v49  ;;  %8878 = vmatpush1.bf16.msra.mxu1 %v10430_v55  ;;  %v10624_v55 = vcombine.low %v490_v39, %v506_v41  ;;  %v13701_v53 = vsub.s32 5, %v12188_v34 }
 0x28d   :  { %8909 = vmatprep.mubr.bf16.mxu1 %v12224_v60  ;;  %9001 = vmatpush1.bf16.msra.mxu0 %v10432_v58  ;;  %v553_v58 = vld [vmem:[%s16079_s3 + $0x830] sm:$0xff] }
 0x28e   :  { %9032 = vmatprep.mubr.bf16.mxu0 %v12224_v60  ;;  %8879 = vmatprep.subr.bf16.mxu1 %v10463_v59  ;;  %v569_v59 = vld [vmem:[%s16079_s3 + $0x8b0] sm:$0xff] }
 0x28f   :  { %9002 = vmatprep.subr.bf16.mxu0 %v10465_v0  ;;  %v10654_v0 = vcombine.low %v521_v47, %v537_v48  ;;  %v10687_v3 = vcombine.high %v553_v58, %v569_v59  ;;  %v10686_v11 = vcombine.low %v553_v58, %v569_v59  ;;  %v730_v47 = vld [vmem:[%s16079_s3 + $0xdb8] sm:$0xff]  ;;  %v745_v58 = vld [vmem:[%s16079_s3 + $0xe30] sm:$0xff] }
 0x290   :  { %8880 = vmatpush1.bf16.msra.mxu1 %v10462_v5  ;;  %v10689_v5 = vcombine.high %v554_v61, %v570_v62  ;;  %v761_v59 = vld [vmem:[%s16079_s3 + $0xeb0] sm:$0xff]  ;;  %v11895_v61 = vld [vmem:[%s16082_s4] sm:$0xff] }
 0x291   :  { %9003 = vmatpush1.bf16.msra.mxu0 %v10464_v6  ;;  %8881 = vmatprep.subr.bf16.mxu1 %v10495_v7  ;;  %v585_v6 = vld [vmem:[%s16079_s3 + $0x930] sm:$0xff]  ;;  %v1598_v62 = vrot.slane %v11895_v61, %v12479_v4 }
 0x292   :  { %9004 = vmatprep.subr.bf16.mxu0 %v10497_v8  ;;  %v601_v7 = vld [vmem:[%s16079_s3 + $0x9b0] sm:$0xff]  ;;  %v586_v8 = vld [vmem:[%s16079_s3 + $0x938] sm:$0xff] }
 0x293   :  { %v10719_v13 = vcombine.high %v585_v6, %v601_v7  ;;  %v10718_v19 = vcombine.low %v585_v6, %v601_v7  ;;  %v10720_v36 = vcombine.low %v586_v8, %v602_v9 }
 0x294   :  { %8882 = vmatpush1.bf16.msra.mxu1 %v10494_v15  ;;  %v10721_v15 = vcombine.high %v586_v8, %v602_v9  ;;  %v10879_v8 = vcombine.high %v745_v58, %v761_v59  ;;  %v777_v9 = vld [vmem:[%s16079_s3 + $0xf30] sm:$0xff] }
 0x295   :  { %9005 = vmatpush1.bf16.msra.mxu0 %v10496_v16  ;;  %8883 = vmatprep.subr.bf16.mxu1 %v10527_v52  ;;  %v617_v16 = vld [vmem:[%s16079_s3 + $0xa30] sm:$0xff] }
 0x296   :  { %9006 = vmatprep.subr.bf16.mxu0 %v10529_v17  ;;  %v633_v52 = vld [vmem:[%s16079_s3 + $0xab0] sm:$0xff]  ;;  %v618_v17 = vld [vmem:[%s16079_s3 + $0xa38] sm:$0xff] }
 0x297   :  { %v10751_v20 = vcombine.high %v617_v16, %v633_v52  ;;  %v10750_v26 = vcombine.low %v617_v16, %v633_v52  ;;  %v10752_v27 = vcombine.low %v618_v17, %v634_v18  ;;  %v794_v16 = vld [vmem:[%s16079_s3 + $0xfb8] sm:$0xff] }
 0x298   :  { %8884 = vmatpush1.bf16.msra.mxu1 %v10526_v21  ;;  %v10753_v21 = vcombine.high %v618_v17, %v634_v18 }
 0x299   :  { %9007 = vmatpush1.bf16.msra.mxu0 %v10528_v22  ;;  %8885 = vmatprep.subr.bf16.mxu1 %v10559_v23  ;;  %v649_v22 = vld [vmem:[%s16079_s3 + $0xb30] sm:$0xff] }
 0x29a   :  { %9008 = vmatprep.subr.bf16.mxu0 %v10561_v24  ;;  %v665_v23 = vld [vmem:[%s16079_s3 + $0xbb0] sm:$0xff]  ;;  %v650_v24 = vld [vmem:[%s16079_s3 + $0xb38] sm:$0xff] }
 0x29b   :  { %v10783_v14 = vcombine.high %v649_v22, %v665_v23  ;;  %v10782_v38 = vcombine.low %v649_v22, %v665_v23  ;;  %v10784_v39 = vcombine.low %v650_v24, %v666_v25 }
 0x29c   :  { %8886 = vmatpush1.bf16.msra.mxu1 %v10558_v28  ;;  %v10785_v28 = vcombine.high %v650_v24, %v666_v25  ;;  %v809_v25 = vld [vmem:[%s16079_s3 + $0x1030] sm:$0xff] }
 0x29d   :  { %9009 = vmatpush1.bf16.msra.mxu0 %v10560_v29  ;;  %8887 = vmatprep.subr.bf16.mxu1 %v10591_v30  ;;  %v681_v29 = vld [vmem:[%s16079_s3 + $0xc30] sm:$0xff] }
 0x29e   :  { %9010 = vmatprep.subr.bf16.mxu0 %v10593_v31  ;;  %v697_v30 = vld [vmem:[%s16079_s3 + $0xcb0] sm:$0xff]  ;;  %v682_v31 = vld [vmem:[%s16079_s3 + $0xc38] sm:$0xff] }
 0x29f   :  { %v10815_v41 = vcombine.high %v681_v29, %v697_v30  ;;  %v10814_v48 = vcombine.low %v681_v29, %v697_v30  ;;  %v825_v30 = vld [vmem:[%s16079_s3 + $0x10b0] sm:$0xff] }
 0x2a0   :  { %8888 = vmatpush1.bf16.msra.mxu1 %v10590_v42  ;;  %v10817_v42 = vcombine.high %v682_v31, %v698_v32 }
 0x2a1   :  { %9011 = vmatpush1.bf16.msra.mxu0 %v10592_v43  ;;  %8889 = vmatprep.subr.bf16.mxu1 %v10623_v44  ;;  %v713_v43 = vld [vmem:[%s16079_s3 + $0xd30] sm:$0xff] }
 0x2a2   :  { %9012 = vmatprep.subr.bf16.mxu0 %v10625_v45  ;;  %v729_v44 = vld [vmem:[%s16079_s3 + $0xdb0] sm:$0xff]  ;;  %v714_v45 = vld [vmem:[%s16079_s3 + $0xd38] sm:$0xff] }
 0x2a3   :  { %v10848_v7 = vcombine.low %v714_v45, %v730_v47 }
 0x2a4   :  { %8890 = vmatpush1.bf16.msra.mxu1 %v10622_v54  ;;  %v10816_v54 = vcombine.low %v682_v31, %v698_v32 }
 0x2a5   :  { %9013 = vmatpush1.bf16.msra.mxu0 %v10624_v55  ;;  %8891 = vmatprep.subr.bf16.mxu1 %v10655_v56  ;;  %v13704_v55 = vsub.s32 7, %v12188_v34  ;;  %v10847_v56 = vcombine.high %v713_v43, %v729_v44  ;;  %v746_v34 = vld [vmem:[%s16079_s3 + $0xe38] sm:$0xff] }
 0x2a6   :  { %9014 = vmatprep.subr.bf16.mxu0 %v10657_v57  ;;  %v10849_v57 = vcombine.high %v714_v45, %v730_v47 }
 0x2a7   :  { %v1610_v6 = vrot.slane %v11895_v61, %v13704_v55 }
 0x2a8   :  { %8892 = vmatpush1.bf16.msra.mxu1 %v10654_v0  ;;  %v762_v0 = vld [vmem:[%s16079_s3 + $0xeb8] sm:$0xff] }
 0x2a9   :  { %9015 = vmatpush1.bf16.msra.mxu0 %v10656_v2  ;;  %8893 = vmatprep.subr.bf16.mxu1 %v10687_v3  ;;  %v1606_v2 = vrot.slane %v11895_v61, %v13698_v51  ;;  %v1602_v3 = vrot.slane %v11895_v61, %v13701_v53  ;;  %v10880_v23 = vcombine.low %v746_v34, %v762_v0 }
 0x2aa   :  { %9016 = vmatprep.subr.bf16.mxu0 %v10689_v5  ;;  %v10846_v5 = vcombine.low %v713_v43, %v729_v44  ;;  %v826_v43 = vld [vmem:[%s16079_s3 + $0x10b8] sm:$0xff] }
 0x2ac   :  { %8894 = vmatpush1.bf16.msra.mxu1 %v10686_v11  ;;  %v793_v11 = vld [vmem:[%s16079_s3 + $0xfb0] sm:$0xff] }
 0x2ad   :  { %9017 = vmatpush1.bf16.msra.mxu0 %v10688_v12  ;;  %8895 = vmatprep.subr.bf16.mxu1 %v10719_v13  ;;  %v10881_v13 = vcombine.high %v746_v34, %v762_v0  ;;  %v10911_v24 = vcombine.high %v777_v9, %v793_v11  ;;  %v10910_v47 = vcombine.low %v777_v9, %v793_v11  ;;  %v857_v34 = vld [vmem:[%s16079_s3 + $0x11b0] sm:$0xff] }
 0x2ae   :  { %9018 = vmatprep.subr.bf16.mxu0 %v10721_v15  ;;  %v778_v15 = vld [vmem:[%s16079_s3 + $0xf38] sm:$0xff]  ;;  %v873_v9 = vld [vmem:[%s16079_s3 + $0x1230] sm:$0xff] }
 0x2af   :  { %v10913_v29 = vcombine.high %v778_v15, %v794_v16  ;;  %v889_v11 = vld [vmem:[%s16079_s3 + $0x12b0] sm:$0xff] }
 0x2b0   :  { %8896 = vmatpush1.bf16.msra.mxu1 %v10718_v19  ;;  %v10878_v19 = vcombine.low %v745_v58, %v761_v59 }
 0x2b1   :  { %9019 = vmatpush1.bf16.msra.mxu0 %v10720_v36  ;;  %8897 = vmatprep.subr.bf16.mxu1 %v10751_v20 }
 0x2b2   :  { %9020 = vmatprep.subr.bf16.mxu0 %v10753_v21 }
 0x2b4   :  { %8898 = vmatpush1.bf16.msra.mxu1 %v10750_v26 }
 0x2b5   :  { %9021 = vmatpush1.bf16.msra.mxu0 %v10752_v27  ;;  %8899 = vmatprep.subr.bf16.mxu1 %v10783_v14 }
 0x2b6   :  { %9022 = vmatprep.subr.bf16.mxu0 %v10785_v28 }
 0x2b8   :  { %8900 = vmatpush1.bf16.msra.mxu1 %v10782_v38 }
 0x2b9   :  { %9023 = vmatpush1.bf16.msra.mxu0 %v10784_v39  ;;  %8901 = vmatprep.subr.bf16.mxu1 %v10815_v41 }
 0x2ba   :  { %9024 = vmatprep.subr.bf16.mxu0 %v10817_v42  ;;  %v810_v42 = vld [vmem:[%s16079_s3 + $0x1038] sm:$0xff] }
 0x2bb   :  { %v10945_v59 = vcombine.high %v810_v42, %v826_v43 }
 0x2bc   :  { %8902 = vmatpush1.bf16.msra.mxu1 %v10814_v48  ;;  %v10912_v48 = vcombine.low %v778_v15, %v794_v16  ;;  %v890_v15 = vld [vmem:[%s16079_s3 + $0x12b8] sm:$0xff] }
 0x2bd   :  { %9025 = vmatpush1.bf16.msra.mxu0 %v10816_v54  ;;  %8903 = vmatprep.subr.bf16.mxu1 %v10847_v56 }
 0x2be   :  { %v8501_v12 = vpop.f32.mrb[8].mxu1  ;;  %9026 = vmatprep.subr.bf16.mxu0 %v10849_v57  ;;  %v10943_v57 = vcombine.high %v809_v25, %v825_v30 }
 0x2bf   :  { %v11716_v52 = vadd.f32 %v8501_v12, %v1598_v62  ;;  %v8624_v17 = vpop.f32.mrb[12].mxu0  ;;  %v8503_v18 = vpop.f32.mrb[9].mxu1  ;;  %v841_v62 = vld [vmem:[%s16079_s3 + $0x1130] sm:$0xff] }
 0x2c0   :  { %v11718_v36 = vadd.f32 %v8624_v17, %v1606_v2  ;;  %v11717_v20 = vadd.f32 %v8503_v18, %v1602_v3  ;;  %v8626_v21 = vpop.f32.mrb[13].mxu0  ;;  %v8505_v22 = vpop.f32.mrb[10].mxu1  ;;  %8904 = vmatpush1.bf16.msra.mxu1 %v10846_v5  ;;  %v10942_v2 = vcombine.low %v809_v25, %v825_v30  ;;  %v842_v3 = vld [vmem:[%s16079_s3 + $0x1138] sm:$0xff]  ;;  %v10974_v16 = vcombine.low %v841_v62, %v857_v34 }
 0x2c1   :  { %vm10111_vm12 = vcmp.gt.f32.partialorder %v11716_v52, 0.0  ;;  %v10143_v26 = vmul.f32 0.2, %v11716_v52  ;;  %v11719_v27 = vadd.f32 %v8626_v21, %v1610_v6  ;;  %v8628_v14 = vpop.f32.mrb[14].mxu0  ;;  %9027 = vmatpush1.bf16.msra.mxu0 %v10848_v7  ;;  %v8506_v28 = vpop.f32.mrb[11].mxu1  ;;  %8905 = vmatprep.subr.bf16.mxu1 %v10879_v8  ;;  %v858_v5 = vld [vmem:[%s16079_s3 + $0x11b8] sm:$0xff]  ;;  %v10944_v6 = vcombine.low %v810_v42, %v826_v43 }
 0x2c2   :  { %vm10113_vm13 = vcmp.gt.f32.partialorder %v11718_v36, 0.0  ;;  %v10145_v31 = vmul.f32 0.2, %v11718_v36  ;;  %vm10112_vm14 = vcmp.gt.f32.partialorder %v11717_v20, 0.0  ;;  %v10144_v32 = vmul.f32 0.2, %v11717_v20  ;;  %9028 = vmatprep.subr.bf16.mxu0 %v10881_v13 }
 0x2c3   :  { %v10175_v38 = vsel %vm10111_vm12, %v11716_v52, %v10143_v26  ;;  %vm10114_vm15 = vcmp.gt.f32.partialorder %v11719_v27, 0.0  ;;  %v10146_v39 = vmul.f32 0.2, %v11719_v27  ;;  %v8629_v41 = vpop.f32.mrb[15].mxu0  ;;  %v10975_v8 = vcombine.high %v841_v62, %v857_v34  ;;  %v874_v13 = vld [vmem:[%s16079_s3 + $0x1238] sm:$0xff]  ;;  %v937_v26 = vld [vmem:[%s16079_s3 + $0x1430] sm:$0xff] }
 0x2c4   :  { %v10177_v44 = vsel %vm10113_vm13, %v11718_v36, %v10145_v31  ;;  %v10176_v45 = vsel %vm10112_vm14, %v11717_v20, %v10144_v32  ;;  %8906 = vmatpush1.bf16.msra.mxu1 %v10878_v19  ;;  %v10977_v12 = vcombine.high %v842_v3, %v858_v5  ;;  %v10976_v52 = vcombine.low %v842_v3, %v858_v5  ;;  %v905_v19 = vld [vmem:[%s16079_s3 + $0x1330] sm:$0xff]  ;;  %v906_v20 = vld [vmem:[%s16079_s3 + $0x1338] sm:$0xff] }
 0x2c5   :  { %v10252_v54 = vcombine.low %v10175_v38, %v10176_v45  ;;  %v10178_v56 = vsel %vm10114_vm15, %v11719_v27, %v10146_v39  ;;  %9029 = vmatpush1.bf16.msra.mxu0 %v10880_v23  ;;  %8907 = vmatprep.subr.bf16.mxu1 %v10911_v24  ;;  %v11007_v17 = vcombine.high %v873_v9, %v889_v11  ;;  %v921_v36 = vld [vmem:[%s16079_s3 + $0x13b0] sm:$0xff]  ;;  %v922_v21 = vld [vmem:[%s16079_s3 + $0x13b8] sm:$0xff] }
 0x2c6   :  { %v10253_v58 = vcombine.low %v10177_v44, %v10178_v56  ;;  %9030 = vmatprep.subr.bf16.mxu0 %v10913_v29  ;;  %v11009_v18 = vcombine.high %v874_v13, %v890_v15  ;;  %v11006_v22 = vcombine.low %v873_v9, %v889_v11  ;;  %v11008_v23 = vcombine.low %v874_v13, %v890_v15  ;;  %v953_v27 = vld [vmem:[%s16079_s3 + $0x14b0] sm:$0xff]  ;;  %v938_v14 = vld [vmem:[%s16079_s3 + $0x1438] sm:$0xff] }
 0x2c7   :  { %v10260_v61 = vrot.slane %v10252_v54, %v13227_v46  ;;  %v11039_v24 = vcombine.high %v905_v19, %v921_v36  ;;  %v11041_v25 = vcombine.high %v906_v20, %v922_v21  ;;  %v954_v28 = vld [vmem:[%s16079_s3 + $0x14b8] sm:$0xff]  ;;  %v11038_v29 = vcombine.low %v905_v19, %v921_v36  ;;  %v969_v38 = vld [vmem:[%s16079_s3 + $0x1530] sm:$0xff] }
 0x2c8   :  { %v10267_v0 = vrot.slane %v10253_v58, %v13227_v46  ;;  %8908 = vmatpush1.bf16.msra.mxu1 %v10910_v47  ;;  %v11040_v30 = vcombine.low %v906_v20, %v922_v21  ;;  %v11071_v31 = vcombine.high %v937_v26, %v953_v27  ;;  %v11073_v32 = vcombine.high %v938_v14, %v954_v28  ;;  %v985_v39 = vld [vmem:[%s16079_s3 + $0x15b0] sm:$0xff]  ;;  %v970_v41 = vld [vmem:[%s16079_s3 + $0x1538] sm:$0xff] }
 0x2c9   :  { %9031 = vmatpush1.bf16.msra.mxu0 %v10912_v48  ;;  %8918 = vmatprep.subr.bf16.mxu1 %v10943_v57  ;;  %v986_v42 = vld [vmem:[%s16079_s3 + $0x15b8] sm:$0xff]  ;;  %v11070_v43 = vcombine.low %v937_v26, %v953_v27  ;;  %v11072_v44 = vcombine.low %v938_v14, %v954_v28  ;;  %v11103_v45 = vcombine.high %v969_v38, %v985_v39  ;;  %v1001_v48 = vld [vmem:[%s16079_s3 + $0x1630] sm:$0xff] }
 0x2ca   :  { %v10268_v7 = vcombine.low %v10260_v61, %v10267_v0  ;;  %9041 = vmatprep.subr.bf16.mxu0 %v10945_v59  ;;  %v11105_v47 = vcombine.high %v970_v41, %v986_v42  ;;  %v1017_v54 = vld [vmem:[%s16079_s3 + $0x16b0] sm:$0xff]  ;;  %v1002_v56 = vld [vmem:[%s16079_s3 + $0x1638] sm:$0xff]  ;;  %v11102_v58 = vcombine.low %v969_v38, %v985_v39  ;;  %v11104_v59 = vcombine.low %v970_v41, %v986_v42 }
 0x2cb   :  { %8910 = vmatmul.mubr.bf16.vlgmr.msra.gmra.mrb[16].mxu1 %v12226_v63  ;;  %v1018_v57 = vld [vmem:[%s16079_s3 + $0x16b8] sm:$0xff]  ;;  %v11135_v61 = vcombine.high %v1001_v48, %v1017_v54  ;;  %v1033_v34 = vld [vmem:[%s16079_s3 + $0x1730] sm:$0xff]  ;;  %v11134_v5 = vcombine.low %v1001_v48, %v1017_v54 }
 0x2cc   :  { %10380 = vst [vmem:[%s16083_s5 + $0x8] sm:$0xff] %v10268_v7  ;;  %9033 = vmatmul.mubr.bf16.vlgmr.msra.gmra.mrb[20].mxu0 %v12226_v63  ;;  %8919 = vmatpush1.bf16.msra.mxu1 %v10942_v2  ;;  %v11137_v62 = vcombine.high %v1002_v56, %v1018_v57  ;;  %v1049_v0 = vld [vmem:[%s16079_s3 + $0x17b0] sm:$0xff]  ;;  %v1034_v2 = vld [vmem:[%s16079_s3 + $0x1738] sm:$0xff] }
 0x2cd   :  { %8950 = vmatprep.mubr.bf16.mxu1 %v12244_v10  ;;  %9042 = vmatpush1.bf16.msra.mxu0 %v10944_v6  ;;  %v1050_v3 = vld [vmem:[%s16079_s3 + $0x17b8] sm:$0xff]  ;;  %v11136_v6 = vcombine.low %v1002_v56, %v1018_v57  ;;  %v11167_v7 = vcombine.high %v1033_v34, %v1049_v0  ;;  %v1065_v9 = vld [vmem:[%s16079_s3 + $0x1830] sm:$0xff]  ;;  %v11166_v15 = vcombine.low %v1033_v34, %v1049_v0 }
 0x2ce   :  { %9073 = vmatprep.mubr.bf16.mxu0 %v12244_v10  ;;  %8920 = vmatprep.subr.bf16.mxu1 %v10975_v8  ;;  %v11169_v8 = vcombine.high %v1034_v2, %v1050_v3  ;;  %v1081_v11 = vld [vmem:[%s16079_s3 + $0x18b0] sm:$0xff]  ;;  %v1082_v13 = vld [vmem:[%s16079_s3 + $0x18b8] sm:$0xff] }
 0x2cf   :  { %9043 = vmatprep.subr.bf16.mxu0 %v10977_v12  ;;  %v1066_v12 = vld [vmem:[%s16079_s3 + $0x1838] sm:$0xff]  ;;  %v1113_v19 = vld [vmem:[%s16079_s3 + $0x19b0] sm:$0xff]  ;;  %v11198_v21 = vcombine.low %v1065_v9, %v1081_v11 }
 0x2d0   :  { %8921 = vmatpush1.bf16.msra.mxu1 %v10974_v16  ;;  %v11168_v16 = vcombine.low %v1034_v2, %v1050_v3  ;;  %v1098_v36 = vld [vmem:[%s16079_s3 + $0x1938] sm:$0xff]  ;;  %v1145_v26 = vld [vmem:[%s16079_s3 + $0x1ab0] sm:$0xff] }
 0x2d1   :  { %9044 = vmatpush1.bf16.msra.mxu0 %v10976_v52  ;;  %8922 = vmatprep.subr.bf16.mxu1 %v11007_v17  ;;  %v11199_v52 = vcombine.high %v1065_v9, %v1081_v11  ;;  %v11201_v17 = vcombine.high %v1066_v12, %v1082_v13  ;;  %v1114_v20 = vld [vmem:[%s16079_s3 + $0x19b8] sm:$0xff]  ;;  %v1177_v38 = vld [vmem:[%s16079_s3 + $0x1bb0] sm:$0xff] }
 0x2d2   :  { %9045 = vmatprep.subr.bf16.mxu0 %v11009_v18  ;;  %v1097_v18 = vld [vmem:[%s16079_s3 + $0x1930] sm:$0xff]  ;;  %v1130_v27 = vld [vmem:[%s16079_s3 + $0x1a38] sm:$0xff] }
 0x2d3   :  { %v1146_v14 = vld [vmem:[%s16079_s3 + $0x1ab8] sm:$0xff]  ;;  %v11230_v28 = vcombine.low %v1097_v18, %v1113_v19  ;;  %v1209_v48 = vld [vmem:[%s16079_s3 + $0x1cb0] sm:$0xff] }
 0x2d4   :  { %8923 = vmatpush1.bf16.msra.mxu1 %v11006_v22  ;;  %v11200_v22 = vcombine.low %v1066_v12, %v1082_v13  ;;  %v1162_v39 = vld [vmem:[%s16079_s3 + $0x1b38] sm:$0xff]  ;;  %v1241_v34 = vld [vmem:[%s16079_s3 + $0x1db0] sm:$0xff] }
 0x2d5   :  { %9046 = vmatpush1.bf16.msra.mxu0 %v11008_v23  ;;  %8924 = vmatprep.subr.bf16.mxu1 %v11039_v24  ;;  %v11231_v23 = vcombine.high %v1097_v18, %v1113_v19  ;;  %v11233_v24 = vcombine.high %v1098_v36, %v1114_v20  ;;  %v1178_v41 = vld [vmem:[%s16079_s3 + $0x1bb8] sm:$0xff]  ;;  %v1273_v9 = vld [vmem:[%s16079_s3 + $0x1eb0] sm:$0xff] }
 0x2d6   :  { %9047 = vmatprep.subr.bf16.mxu0 %v11041_v25  ;;  %v1129_v25 = vld [vmem:[%s16079_s3 + $0x1a30] sm:$0xff]  ;;  %v1194_v54 = vld [vmem:[%s16079_s3 + $0x1c38] sm:$0xff] }
 0x2d7   :  { %v11262_v42 = vcombine.low %v1129_v25, %v1145_v26  ;;  %v1210_v56 = vld [vmem:[%s16079_s3 + $0x1cb8] sm:$0xff]  ;;  %v1305_v18 = vld [vmem:[%s16079_s3 + $0x1fb0] sm:$0xff] }
 0x2d8   :  { %8925 = vmatpush1.bf16.msra.mxu1 %v11038_v29  ;;  %v11232_v29 = vcombine.low %v1098_v36, %v1114_v20  ;;  %v1226_v0 = vld [vmem:[%s16079_s3 + $0x1d38] sm:$0xff] }
 0x2d9   :  { %9048 = vmatpush1.bf16.msra.mxu0 %v11040_v30  ;;  %8926 = vmatprep.subr.bf16.mxu1 %v11071_v31  ;;  %v11263_v30 = vcombine.high %v1129_v25, %v1145_v26  ;;  %v11265_v31 = vcombine.high %v1130_v27, %v1146_v14  ;;  %v1242_v2 = vld [vmem:[%s16079_s3 + $0x1db8] sm:$0xff]  ;;  %v1337_v25 = vld [vmem:[%s16079_s3 + $0x20b0] sm:$0xff] }
 0x2da   :  { %9049 = vmatprep.subr.bf16.mxu0 %v11073_v32  ;;  %v1161_v32 = vld [vmem:[%s16079_s3 + $0x1b30] sm:$0xff]  ;;  %v1258_v11 = vld [vmem:[%s16079_s3 + $0x1e38] sm:$0xff] }
 0x2db   :  { %v11294_v57 = vcombine.low %v1161_v32, %v1177_v38  ;;  %v1274_v12 = vld [vmem:[%s16079_s3 + $0x1eb8] sm:$0xff] }
 0x2dc   :  { %8927 = vmatpush1.bf16.msra.mxu1 %v11070_v43  ;;  %v11264_v43 = vcombine.low %v1130_v27, %v1146_v14  ;;  %v1290_v19 = vld [vmem:[%s16079_s3 + $0x1f38] sm:$0xff] }
 0x2dd   :  { %9050 = vmatpush1.bf16.msra.mxu0 %v11072_v44  ;;  %8928 = vmatprep.subr.bf16.mxu1 %v11103_v45  ;;  %v11295_v44 = vcombine.high %v1161_v32, %v1177_v38  ;;  %v11297_v45 = vcombine.high %v1162_v39, %v1178_v41  ;;  %v1306_v36 = vld [vmem:[%s16079_s3 + $0x1fb8] sm:$0xff]  ;;  %v1369_v32 = vld [vmem:[%s16079_s3 + $0x21b0] sm:$0xff] }
 0x2de   :  { %9051 = vmatprep.subr.bf16.mxu0 %v11105_v47  ;;  %v1193_v47 = vld [vmem:[%s16079_s3 + $0x1c30] sm:$0xff]  ;;  %v1322_v26 = vld [vmem:[%s16079_s3 + $0x2038] sm:$0xff] }
 0x2df   :  { %v11326_v3 = vcombine.low %v1193_v47, %v1209_v48  ;;  %v1338_v27 = vld [vmem:[%s16079_s3 + $0x20b8] sm:$0xff] }
 0x2e0   :  { %8929 = vmatpush1.bf16.msra.mxu1 %v11102_v58  ;;  %v11296_v58 = vcombine.low %v1162_v39, %v1178_v41  ;;  %v1354_v38 = vld [vmem:[%s16079_s3 + $0x2138] sm:$0xff] }
 0x2e1   :  { %9052 = vmatpush1.bf16.msra.mxu0 %v11104_v59  ;;  %8930 = vmatprep.subr.bf16.mxu1 %v11135_v61  ;;  %v11327_v59 = vcombine.high %v1193_v47, %v1209_v48  ;;  %v11329_v61 = vcombine.high %v1194_v54, %v1210_v56  ;;  %v1370_v39 = vld [vmem:[%s16079_s3 + $0x21b8] sm:$0xff]  ;;  %v1401_v47 = vld [vmem:[%s16079_s3 + $0x22b0] sm:$0xff] }
 0x2e2   :  { %9053 = vmatprep.subr.bf16.mxu0 %v11137_v62  ;;  %v1225_v62 = vld [vmem:[%s16079_s3 + $0x1d30] sm:$0xff]  ;;  %v1386_v48 = vld [vmem:[%s16079_s3 + $0x2238] sm:$0xff] }
 0x2e3   :  { %v11358_v13 = vcombine.low %v1225_v62, %v1241_v34 }
 0x2e4   :  { %8931 = vmatpush1.bf16.msra.mxu1 %v11134_v5  ;;  %v11328_v5 = vcombine.low %v1194_v54, %v1210_v56  ;;  %v1402_v54 = vld [vmem:[%s16079_s3 + $0x22b8] sm:$0xff] }
 0x2e5   :  { %9054 = vmatpush1.bf16.msra.mxu0 %v11136_v6  ;;  %8932 = vmatprep.subr.bf16.mxu1 %v11167_v7  ;;  %v11359_v6 = vcombine.high %v1225_v62, %v1241_v34  ;;  %v11361_v7 = vcombine.high %v1226_v0, %v1242_v2  ;;  %v1433_v62 = vld [vmem:[%s16079_s3 + $0x23b0] sm:$0xff]  ;;  %v1418_v34 = vld [vmem:[%s16079_s3 + $0x2338] sm:$0xff] }
 0x2e6   :  { %9055 = vmatprep.subr.bf16.mxu0 %v11169_v8  ;;  %v1257_v8 = vld [vmem:[%s16079_s3 + $0x1e30] sm:$0xff] }
 0x2e7   :  { %v11390_v20 = vcombine.low %v1257_v8, %v1273_v9 }
 0x2e8   :  { %8933 = vmatpush1.bf16.msra.mxu1 %v11166_v15  ;;  %v11360_v15 = vcombine.low %v1226_v0, %v1242_v2  ;;  %v1434_v0 = vld [vmem:[%s16079_s3 + $0x23b8] sm:$0xff] }
 0x2e9   :  { %9056 = vmatpush1.bf16.msra.mxu0 %v11168_v16  ;;  %8934 = vmatprep.subr.bf16.mxu1 %v11199_v52  ;;  %v11391_v16 = vcombine.high %v1257_v8, %v1273_v9  ;;  %v11393_v52 = vcombine.high %v1258_v11, %v1274_v12  ;;  %v1465_v8 = vld [vmem:[%s16079_s3 + $0x24b0] sm:$0xff]  ;;  %v1450_v9 = vld [vmem:[%s16079_s3 + $0x2438] sm:$0xff] }
 0x2ea   :  { %9057 = vmatprep.subr.bf16.mxu0 %v11201_v17  ;;  %v1289_v17 = vld [vmem:[%s16079_s3 + $0x1f30] sm:$0xff] }
 0x2eb   :  { %v11422_v14 = vcombine.low %v1289_v17, %v1305_v18 }
 0x2ec   :  { %8935 = vmatpush1.bf16.msra.mxu1 %v11198_v21  ;;  %v11392_v21 = vcombine.low %v1258_v11, %v1274_v12  ;;  %v1466_v11 = vld [vmem:[%s16079_s3 + $0x24b8] sm:$0xff] }
 0x2ed   :  { %9058 = vmatpush1.bf16.msra.mxu0 %v11200_v22  ;;  %8936 = vmatprep.subr.bf16.mxu1 %v11231_v23  ;;  %v11423_v22 = vcombine.high %v1289_v17, %v1305_v18  ;;  %v11425_v23 = vcombine.high %v1290_v19, %v1306_v36  ;;  %v1497_v17 = vld [vmem:[%s16079_s3 + $0x25b0] sm:$0xff]  ;;  %v1482_v18 = vld [vmem:[%s16079_s3 + $0x2538] sm:$0xff] }
 0x2ee   :  { %9059 = vmatprep.subr.bf16.mxu0 %v11233_v24  ;;  %v1321_v24 = vld [vmem:[%s16079_s3 + $0x2030] sm:$0xff] }
 0x2ef   :  { %v11454_v41 = vcombine.low %v1321_v24, %v1337_v25 }
 0x2f0   :  { %8937 = vmatpush1.bf16.msra.mxu1 %v11230_v28  ;;  %v11424_v28 = vcombine.low %v1290_v19, %v1306_v36  ;;  %v1498_v19 = vld [vmem:[%s16079_s3 + $0x25b8] sm:$0xff] }
 0x2f1   :  { %9060 = vmatpush1.bf16.msra.mxu0 %v11232_v29  ;;  %8938 = vmatprep.subr.bf16.mxu1 %v11263_v30  ;;  %v11455_v29 = vcombine.high %v1321_v24, %v1337_v25  ;;  %v11457_v30 = vcombine.high %v1322_v26, %v1338_v27  ;;  %v1529_v24 = vld [vmem:[%s16079_s3 + $0x26b0] sm:$0xff]  ;;  %v1514_v25 = vld [vmem:[%s16079_s3 + $0x2638] sm:$0xff] }
 0x2f2   :  { %9061 = vmatprep.subr.bf16.mxu0 %v11265_v31  ;;  %v1353_v31 = vld [vmem:[%s16079_s3 + $0x2130] sm:$0xff] }
 0x2f3   :  { %v11486_v56 = vcombine.low %v1353_v31, %v1369_v32 }
 0x2f4   :  { %8939 = vmatpush1.bf16.msra.mxu1 %v11262_v42  ;;  %v11456_v42 = vcombine.low %v1322_v26, %v1338_v27  ;;  %v1530_v26 = vld [vmem:[%s16079_s3 + $0x26b8] sm:$0xff] }
 0x2f5   :  { %9062 = vmatpush1.bf16.msra.mxu0 %v11264_v43  ;;  %8940 = vmatprep.subr.bf16.mxu1 %v11295_v44  ;;  %v11487_v43 = vcombine.high %v1353_v31, %v1369_v32  ;;  %v11489_v44 = vcombine.high %v1354_v38, %v1370_v39  ;;  %v1561_v31 = vld [vmem:[%s16079_s3 + $0x27b0] sm:$0xff]  ;;  %v1546_v32 = vld [vmem:[%s16079_s3 + $0x2738] sm:$0xff] }
 0x2f6   :  { %9063 = vmatprep.subr.bf16.mxu0 %v11297_v45  ;;  %v1385_v45 = vld [vmem:[%s16079_s3 + $0x2230] sm:$0xff] }
 0x2f7   :  { %v11518_v2 = vcombine.low %v1385_v45, %v1401_v47 }
 0x2f8   :  { %8941 = vmatpush1.bf16.msra.mxu1 %v11294_v57  ;;  %v11488_v57 = vcombine.low %v1354_v38, %v1370_v39  ;;  %v1562_v38 = vld [vmem:[%s16079_s3 + $0x27b8] sm:$0xff] }
 0x2f9   :  { %9064 = vmatpush1.bf16.msra.mxu0 %v11296_v58  ;;  %8942 = vmatprep.subr.bf16.mxu1 %v11327_v59  ;;  %v11519_v58 = vcombine.high %v1385_v45, %v1401_v47  ;;  %v11521_v59 = vcombine.high %v1386_v48, %v1402_v54  ;;  %v315_v45 = vld [vmem:[%s16079_s3 + $0xc0] sm:$0xff]  ;;  %v300_v47 = vld [vmem:[%s16079_s3 + $0x48] sm:$0xff] }
 0x2fa   :  { %9065 = vmatprep.subr.bf16.mxu0 %v11329_v61  ;;  %v1417_v61 = vld [vmem:[%s16079_s3 + $0x2330] sm:$0xff] }
 0x2fb   :  { %v11550_v12 = vcombine.low %v1417_v61, %v1433_v62 }
 0x2fc   :  { %8943 = vmatpush1.bf16.msra.mxu1 %v11326_v3  ;;  %v11520_v3 = vcombine.low %v1386_v48, %v1402_v54  ;;  %v316_v48 = vld [vmem:[%s16079_s3 + $0xc8] sm:$0xff] }
 0x2fd   :  { %9066 = vmatpush1.bf16.msra.mxu0 %v11328_v5  ;;  %8944 = vmatprep.subr.bf16.mxu1 %v11359_v6  ;;  %v11551_v5 = vcombine.high %v1417_v61, %v1433_v62  ;;  %v11553_v6 = vcombine.high %v1418_v34, %v1434_v0  ;;  %v347_v61 = vld [vmem:[%s16079_s3 + $0x1c0] sm:$0xff] }
 0x2fe   :  { %9067 = vmatprep.subr.bf16.mxu0 %v11361_v7  ;;  %v1449_v7 = vld [vmem:[%s16079_s3 + $0x2430] sm:$0xff] }
 0x2ff   :  { %v11582_v36 = vcombine.low %v1449_v7, %v1465_v8 }
 0x300   :  { %8945 = vmatpush1.bf16.msra.mxu1 %v11358_v13  ;;  %v11552_v13 = vcombine.low %v1418_v34, %v1434_v0  ;;  %v332_v34 = vld [vmem:[%s16079_s3 + $0x148] sm:$0xff] }
 0x301   :  { %9068 = vmatpush1.bf16.msra.mxu0 %v11360_v15  ;;  %8946 = vmatprep.subr.bf16.mxu1 %v11391_v16  ;;  %v11583_v15 = vcombine.high %v1449_v7, %v1465_v8  ;;  %v11585_v16 = vcombine.high %v1450_v9, %v1466_v11  ;;  %v348_v0 = vld [vmem:[%s16079_s3 + $0x1c8] sm:$0xff] }
 0x302   :  { %9069 = vmatprep.subr.bf16.mxu0 %v11393_v52  ;;  %v1481_v52 = vld [vmem:[%s16079_s3 + $0x2530] sm:$0xff]  ;;  %v10469_v7 = vcombine.high %v332_v34, %v348_v0  ;;  %v364_v8 = vld [vmem:[%s16079_s3 + $0x248] sm:$0xff] }
 0x303   :  { %v11614_v27 = vcombine.low %v1481_v52, %v1497_v17 }
 0x304   :  { %8947 = vmatpush1.bf16.msra.mxu1 %v11390_v20  ;;  %v11584_v20 = vcombine.low %v1450_v9, %v1466_v11  ;;  %v380_v9 = vld [vmem:[%s16079_s3 + $0x2c8] sm:$0xff] }
 0x305   :  { %9070 = vmatpush1.bf16.msra.mxu0 %v11392_v21  ;;  %8948 = vmatprep.subr.bf16.mxu1 %v11423_v22  ;;  %v11615_v21 = vcombine.high %v1481_v52, %v1497_v17  ;;  %v11617_v22 = vcombine.high %v1482_v18, %v1498_v19  ;;  %v411_v52 = vld [vmem:[%s16079_s3 + $0x3c0] sm:$0xff]  ;;  %v396_v17 = vld [vmem:[%s16079_s3 + $0x348] sm:$0xff] }
 0x306   :  { %9071 = vmatprep.subr.bf16.mxu0 %v11425_v23  ;;  %v1513_v23 = vld [vmem:[%s16079_s3 + $0x2630] sm:$0xff] }
 0x307   :  { %v11646_v39 = vcombine.low %v1513_v23, %v1529_v24 }
 0x308   :  { %8949 = vmatpush1.bf16.msra.mxu1 %v11422_v14  ;;  %v11616_v14 = vcombine.low %v1482_v18, %v1498_v19  ;;  %v412_v18 = vld [vmem:[%s16079_s3 + $0x3c8] sm:$0xff] }
 0x309   :  { %9072 = vmatpush1.bf16.msra.mxu0 %v11424_v28  ;;  %8959 = vmatprep.subr.bf16.mxu1 %v11455_v29  ;;  %v11647_v28 = vcombine.high %v1513_v23, %v1529_v24  ;;  %v11649_v29 = vcombine.high %v1514_v25, %v1530_v26  ;;  %v443_v23 = vld [vmem:[%s16079_s3 + $0x4c0] sm:$0xff]  ;;  %v428_v24 = vld [vmem:[%s16079_s3 + $0x448] sm:$0xff] }
 0x30a   :  { %9082 = vmatprep.subr.bf16.mxu0 %v11457_v30  ;;  %v1545_v30 = vld [vmem:[%s16079_s3 + $0x2730] sm:$0xff] }
 0x30b   :  { %8951 = vmatmul.mubr.bf16.vlgmr.msra.gmra.mrb[16].mxu1 %v12436_v33  ;;  %v11678_v54 = vcombine.low %v1545_v30, %v1561_v31 }
 0x30c   :  { %9074 = vmatmul.mubr.bf16.vlgmr.msra.gmra.mrb[20].mxu0 %v12436_v33  ;;  %8960 = vmatpush1.bf16.msra.mxu1 %v11454_v41  ;;  %v11648_v41 = vcombine.low %v1514_v25, %v1530_v26  ;;  %v444_v25 = vld [vmem:[%s16079_s3 + $0x4c8] sm:$0xff] }
 0x30d   :  { %9083 = vmatpush1.bf16.msra.mxu0 %v11456_v42  ;;  %8961 = vmatprep.subr.bf16.mxu1 %v11487_v43  ;;  %v11679_v42 = vcombine.high %v1545_v30, %v1561_v31  ;;  %v11681_v43 = vcombine.high %v1546_v32, %v1562_v38  ;;  %v475_v30 = vld [vmem:[%s16079_s3 + $0x5c0] sm:$0xff]  ;;  %v460_v31 = vld [vmem:[%s16079_s3 + $0x548] sm:$0xff] }
 0x30e   :  { %9084 = vmatprep.subr.bf16.mxu0 %v11489_v44  ;;  %8991 = vmatprep.mubr.bf16.mxu1 %v11898_v1  ;;  %v299_v44 = vld [vmem:[%s16079_s3 + $0x40] sm:$0xff] }
 0x30f   :  { %9114 = vmatprep.mubr.bf16.mxu0 %v11898_v1  ;;  %v10434_v62 = vcombine.low %v299_v44, %v315_v45 }
 0x310   :  { %8962 = vmatpush1.bf16.msra.mxu1 %v11486_v56  ;;  %v11680_v56 = vcombine.low %v1546_v32, %v1562_v38  ;;  %v476_v32 = vld [vmem:[%s16079_s3 + $0x5c8] sm:$0xff] }
 0x311   :  { %9085 = vmatpush1.bf16.msra.mxu0 %v11488_v57  ;;  %8963 = vmatprep.subr.bf16.mxu1 %v11519_v58  ;;  %v10435_v57 = vcombine.high %v299_v44, %v315_v45  ;;  %v10437_v58 = vcombine.high %v300_v47, %v316_v48  ;;  %v507_v44 = vld [vmem:[%s16079_s3 + $0x6c0] sm:$0xff]  ;;  %v492_v45 = vld [vmem:[%s16079_s3 + $0x648] sm:$0xff] }
 0x312   :  { %9086 = vmatprep.subr.bf16.mxu0 %v11521_v59  ;;  %v331_v59 = vld [vmem:[%s16079_s3 + $0x140] sm:$0xff] }
 0x313   :  { %v10466_v11 = vcombine.low %v331_v59, %v347_v61 }
 0x314   :  { %8964 = vmatpush1.bf16.msra.mxu1 %v11518_v2  ;;  %v10436_v2 = vcombine.low %v300_v47, %v316_v48  ;;  %v508_v47 = vld [vmem:[%s16079_s3 + $0x6c8] sm:$0xff] }
 0x315   :  { %9087 = vmatpush1.bf16.msra.mxu0 %v11520_v3  ;;  %8965 = vmatprep.subr.bf16.mxu1 %v11551_v5  ;;  %v10467_v3 = vcombine.high %v331_v59, %v347_v61  ;;  %v363_v5 = vld [vmem:[%s16079_s3 + $0x240] sm:$0xff]  ;;  %v524_v61 = vld [vmem:[%s16079_s3 + $0x748] sm:$0xff] }
 0x316   :  { %9088 = vmatprep.subr.bf16.mxu0 %v11553_v6  ;;  %v379_v6 = vld [vmem:[%s16079_s3 + $0x2c0] sm:$0xff] }
 0x317   :  { %v10498_v19 = vcombine.low %v363_v5, %v379_v6  ;;  %v539_v59 = vld [vmem:[%s16079_s3 + $0x7c0] sm:$0xff] }
 0x318   :  { %8966 = vmatpush1.bf16.msra.mxu1 %v11550_v12  ;;  %v10468_v12 = vcombine.low %v332_v34, %v348_v0  ;;  %v10628_v0 = vcombine.low %v492_v45, %v508_v47 }
 0x319   :  { %9089 = vmatpush1.bf16.msra.mxu0 %v11552_v13  ;;  %8967 = vmatprep.subr.bf16.mxu1 %v11583_v15  ;;  %v10499_v13 = vcombine.high %v363_v5, %v379_v6  ;;  %v10501_v15 = vcombine.high %v364_v8, %v380_v9  ;;  %v555_v5 = vld [vmem:[%s16079_s3 + $0x840] sm:$0xff] }
 0x31a   :  { %9090 = vmatprep.subr.bf16.mxu0 %v11585_v16  ;;  %v395_v16 = vld [vmem:[%s16079_s3 + $0x340] sm:$0xff] }
 0x31b   :  { %v10530_v26 = vcombine.low %v395_v16, %v411_v52  ;;  %v571_v6 = vld [vmem:[%s16079_s3 + $0x8c0] sm:$0xff] }
 0x31c   :  { %8968 = vmatpush1.bf16.msra.mxu1 %v11582_v36  ;;  %v10500_v36 = vcombine.low %v364_v8, %v380_v9  ;;  %v572_v8 = vld [vmem:[%s16079_s3 + $0x8c8] sm:$0xff] }
 0x31d   :  { %9091 = vmatpush1.bf16.msra.mxu0 %v11584_v20  ;;  %8969 = vmatprep.subr.bf16.mxu1 %v11615_v21  ;;  %v10531_v20 = vcombine.high %v395_v16, %v411_v52  ;;  %v10533_v21 = vcombine.high %v396_v17, %v412_v18  ;;  %v603_v16 = vld [vmem:[%s16079_s3 + $0x9c0] sm:$0xff]  ;;  %v588_v52 = vld [vmem:[%s16079_s3 + $0x948] sm:$0xff] }
 0x31e   :  { %9092 = vmatprep.subr.bf16.mxu0 %v11617_v22  ;;  %v427_v22 = vld [vmem:[%s16079_s3 + $0x440] sm:$0xff] }
 0x31f   :  { %v10562_v38 = vcombine.low %v427_v22, %v443_v23 }
 0x320   :  { %8970 = vmatpush1.bf16.msra.mxu1 %v11614_v27  ;;  %v10532_v27 = vcombine.low %v396_v17, %v412_v18  ;;  %v604_v17 = vld [vmem:[%s16079_s3 + $0x9c8] sm:$0xff]  ;;  %v10690_v18 = vcombine.low %v555_v5, %v571_v6 }
 0x321   :  { %9093 = vmatpush1.bf16.msra.mxu0 %v11616_v14  ;;  %8971 = vmatprep.subr.bf16.mxu1 %v11647_v28  ;;  %v10563_v14 = vcombine.high %v427_v22, %v443_v23  ;;  %v10565_v28 = vcombine.high %v428_v24, %v444_v25  ;;  %v635_v22 = vld [vmem:[%s16079_s3 + $0xac0] sm:$0xff]  ;;  %v620_v23 = vld [vmem:[%s16079_s3 + $0xa48] sm:$0xff] }
 0x322   :  { %9094 = vmatprep.subr.bf16.mxu0 %v11649_v29  ;;  %v459_v29 = vld [vmem:[%s16079_s3 + $0x540] sm:$0xff] }
 0x323   :  { %v10594_v48 = vcombine.low %v459_v29, %v475_v30 }
 0x324   :  { %8972 = vmatpush1.bf16.msra.mxu1 %v11646_v39  ;;  %v10564_v39 = vcombine.low %v428_v24, %v444_v25  ;;  %v636_v24 = vld [vmem:[%s16079_s3 + $0xac8] sm:$0xff] }
 0x325   :  { %9095 = vmatpush1.bf16.msra.mxu0 %v11648_v41  ;;  %8973 = vmatprep.subr.bf16.mxu1 %v11679_v42  ;;  %v10595_v41 = vcombine.high %v459_v29, %v475_v30  ;;  %v10597_v42 = vcombine.high %v460_v31, %v476_v32  ;;  %v667_v29 = vld [vmem:[%s16079_s3 + $0xbc0] sm:$0xff]  ;;  %v652_v30 = vld [vmem:[%s16079_s3 + $0xb48] sm:$0xff] }
 0x326   :  { %9096 = vmatprep.subr.bf16.mxu0 %v11681_v43  ;;  %v491_v43 = vld [vmem:[%s16079_s3 + $0x640] sm:$0xff] }
 0x327   :  { %v10626_v34 = vcombine.low %v491_v43, %v507_v44 }
 0x328   :  { %8974 = vmatpush1.bf16.msra.mxu1 %v11678_v54  ;;  %v10596_v54 = vcombine.low %v460_v31, %v476_v32  ;;  %v668_v31 = vld [vmem:[%s16079_s3 + $0xbc8] sm:$0xff] }
 0x329   :  { %9097 = vmatpush1.bf16.msra.mxu0 %v11680_v56  ;;  %9123 = vmatprep.subr.bf16.mxu1 %v10435_v57  ;;  %v10627_v56 = vcombine.high %v491_v43, %v507_v44  ;;  %v10629_v57 = vcombine.high %v492_v45, %v508_v47  ;;  %v699_v43 = vld [vmem:[%s16079_s3 + $0xcc0] sm:$0xff]  ;;  %v684_v44 = vld [vmem:[%s16079_s3 + $0xc48] sm:$0xff] }
 0x32a   :  { %9246 = vmatprep.subr.bf16.mxu0 %v10437_v58  ;;  %v523_v58 = vld [vmem:[%s16079_s3 + $0x740] sm:$0xff]  ;;  %v700_v45 = vld [vmem:[%s16079_s3 + $0xcc8] sm:$0xff] }
 0x32b   :  { %8992 = vmatmul.mubr.bf16.vlgmr.msra.gmra.mrb[16].mxu1 %v12535_v49  ;;  %v10658_v9 = vcombine.low %v523_v58, %v539_v59 }
 0x32c   :  { %9115 = vmatmul.mubr.bf16.vlgmr.msra.gmra.mrb[20].mxu0 %v12535_v49  ;;  %9124 = vmatpush1.bf16.msra.mxu1 %v10434_v62  ;;  %v540_v62 = vld [vmem:[%s16079_s3 + $0x7c8] sm:$0xff] }
 0x32d   :  { %9155 = vmatprep.mubr.bf16.mxu1 %v12224_v60  ;;  %9247 = vmatpush1.bf16.msra.mxu0 %v10436_v2  ;;  %v10659_v2 = vcombine.high %v523_v58, %v539_v59  ;;  %v731_v58 = vld [vmem:[%s16079_s3 + $0xdc0] sm:$0xff]  ;;  %v716_v59 = vld [vmem:[%s16079_s3 + $0xd48] sm:$0xff] }
 0x32e   :  { %9278 = vmatprep.mubr.bf16.mxu0 %v12224_v60  ;;  %9125 = vmatprep.subr.bf16.mxu1 %v10467_v3  ;;  %v10661_v3 = vcombine.high %v524_v61, %v540_v62 }
 0x32f   :  { %9248 = vmatprep.subr.bf16.mxu0 %v10469_v7  ;;  %v556_v7 = vld [vmem:[%s16079_s3 + $0x848] sm:$0xff] }
 0x330   :  { %9126 = vmatpush1.bf16.msra.mxu1 %v10466_v11  ;;  %v10660_v11 = vcombine.low %v524_v61, %v540_v62  ;;  %v732_v61 = vld [vmem:[%s16079_s3 + $0xdc8] sm:$0xff] }
 0x331   :  { %9249 = vmatpush1.bf16.msra.mxu0 %v10468_v12  ;;  %9127 = vmatprep.subr.bf16.mxu1 %v10499_v13  ;;  %v10691_v12 = vcombine.high %v555_v5, %v571_v6  ;;  %v10693_v13 = vcombine.high %v556_v7, %v572_v8  ;;  %v747_v5 = vld [vmem:[%s16079_s3 + $0xe40] sm:$0xff] }
 0x332   :  { %9250 = vmatprep.subr.bf16.mxu0 %v10501_v15  ;;  %v587_v15 = vld [vmem:[%s16079_s3 + $0x940] sm:$0xff] }
 0x333   :  { %v10722_v25 = vcombine.low %v587_v15, %v603_v16  ;;  %v763_v6 = vld [vmem:[%s16079_s3 + $0xec0] sm:$0xff] }
 0x334   :  { %9128 = vmatpush1.bf16.msra.mxu1 %v10498_v19  ;;  %v10692_v19 = vcombine.low %v556_v7, %v572_v8  ;;  %v748_v8 = vld [vmem:[%s16079_s3 + $0xe48] sm:$0xff] }
 0x335   :  { %9251 = vmatpush1.bf16.msra.mxu0 %v10500_v36  ;;  %9129 = vmatprep.subr.bf16.mxu1 %v10531_v20  ;;  %v10723_v36 = vcombine.high %v587_v15, %v603_v16  ;;  %v10725_v20 = vcombine.high %v588_v52, %v604_v17  ;;  %v10852_v16 = vcombine.low %v716_v59, %v732_v61 }
 0x336   :  { %9252 = vmatprep.subr.bf16.mxu0 %v10533_v21  ;;  %v619_v21 = vld [vmem:[%s16079_s3 + $0xa40] sm:$0xff] }
 0x337   :  { %v10754_v32 = vcombine.low %v619_v21, %v635_v22 }
 0x338   :  { %9130 = vmatpush1.bf16.msra.mxu1 %v10530_v26  ;;  %v10724_v26 = vcombine.low %v588_v52, %v604_v17  ;;  %v10883_v52 = vcombine.high %v747_v5, %v763_v6  ;;  %v779_v17 = vld [vmem:[%s16079_s3 + $0xf40] sm:$0xff] }
 0x339   :  { %9253 = vmatpush1.bf16.msra.mxu0 %v10532_v27  ;;  %9131 = vmatprep.subr.bf16.mxu1 %v10563_v14  ;;  %v10755_v27 = vcombine.high %v619_v21, %v635_v22  ;;  %v10757_v14 = vcombine.high %v620_v23, %v636_v24  ;;  %v796_v21 = vld [vmem:[%s16079_s3 + $0xfc8] sm:$0xff] }
 0x33a   :  { %9254 = vmatprep.subr.bf16.mxu0 %v10565_v28  ;;  %v651_v28 = vld [vmem:[%s16079_s3 + $0xb40] sm:$0xff] }
 0x33b   :  { %v10786_v47 = vcombine.low %v651_v28, %v667_v29 }
 0x33c   :  { %9132 = vmatpush1.bf16.msra.mxu1 %v10562_v38  ;;  %v10756_v38 = vcombine.low %v620_v23, %v636_v24 }
 0x33d   :  { %9255 = vmatpush1.bf16.msra.mxu0 %v10564_v39  ;;  %9133 = vmatprep.subr.bf16.mxu1 %v10595_v41  ;;  %v10787_v39 = vcombine.high %v651_v28, %v667_v29  ;;  %v10789_v41 = vcombine.high %v652_v30, %v668_v31 }
 0x33e   :  { %9256 = vmatprep.subr.bf16.mxu0 %v10597_v42  ;;  %v683_v42 = vld [vmem:[%s16079_s3 + $0xc40] sm:$0xff] }
 0x33f   :  { %v10818_v62 = vcombine.low %v683_v42, %v699_v43 }
 0x340   :  { %9134 = vmatpush1.bf16.msra.mxu1 %v10594_v48  ;;  %v10788_v48 = vcombine.low %v652_v30, %v668_v31  ;;  %v811_v31 = vld [vmem:[%s16079_s3 + $0x1040] sm:$0xff] }
 0x341   :  { %9257 = vmatpush1.bf16.msra.mxu0 %v10596_v54  ;;  %9135 = vmatprep.subr.bf16.mxu1 %v10627_v56  ;;  %v10819_v54 = vcombine.high %v683_v42, %v699_v43  ;;  %v10821_v56 = vcombine.high %v684_v44, %v700_v45  ;;  %v827_v43 = vld [vmem:[%s16079_s3 + $0x10c0] sm:$0xff] }
 0x342   :  { %9258 = vmatprep.subr.bf16.mxu0 %v10629_v57  ;;  %v715_v57 = vld [vmem:[%s16079_s3 + $0xd40] sm:$0xff] }
 0x344   :  { %9136 = vmatpush1.bf16.msra.mxu1 %v10626_v34  ;;  %v1572_v34 = vld [vmem:[%s16082_s4 + $0x8] sm:$0xff] }
 0x345   :  { %9259 = vmatpush1.bf16.msra.mxu0 %v10628_v0  ;;  %9137 = vmatprep.subr.bf16.mxu1 %v10659_v2  ;;  %v10820_v0 = vcombine.low %v684_v44, %v700_v45  ;;  %v10851_v2 = vcombine.high %v715_v57, %v731_v58  ;;  %v1614_v7 = vrot.slane %v1572_v34, %v12191_v35 }
 0x346   :  { %9260 = vmatprep.subr.bf16.mxu0 %v10661_v3  ;;  %v10853_v3 = vcombine.high %v716_v59, %v732_v61  ;;  %v1626_v15 = vrot.slane %v1572_v34, %v12206_v40 }
 0x348   :  { %9138 = vmatpush1.bf16.msra.mxu1 %v10658_v9  ;;  %v764_v9 = vld [vmem:[%s16079_s3 + $0xec8] sm:$0xff] }
 0x349   :  { %9261 = vmatpush1.bf16.msra.mxu0 %v10660_v11  ;;  %9139 = vmatprep.subr.bf16.mxu1 %v10691_v12  ;;  %v1622_v11 = vrot.slane %v1572_v34, %v12374_v50  ;;  %v1618_v12 = vrot.slane %v1572_v34, %v12199_v37  ;;  %v10884_v29 = vcombine.low %v748_v8, %v764_v9 }
 0x34a   :  { %9262 = vmatprep.subr.bf16.mxu0 %v10693_v13  ;;  %v10850_v13 = vcombine.low %v715_v57, %v731_v58  ;;  %v828_v57 = vld [vmem:[%s16079_s3 + $0x10c8] sm:$0xff] }
 0x34c   :  { %9140 = vmatpush1.bf16.msra.mxu1 %v10690_v18  ;;  %v795_v18 = vld [vmem:[%s16079_s3 + $0xfc0] sm:$0xff] }
 0x34d   :  { %9263 = vmatpush1.bf16.msra.mxu0 %v10692_v19  ;;  %9141 = vmatprep.subr.bf16.mxu1 %v10723_v36  ;;  %v10885_v36 = vcombine.high %v748_v8, %v764_v9  ;;  %v10915_v30 = vcombine.high %v779_v17, %v795_v18  ;;  %v10914_v61 = vcombine.low %v779_v17, %v795_v18  ;;  %v859_v8 = vld [vmem:[%s16079_s3 + $0x11c0] sm:$0xff] }
 0x34e   :  { %9264 = vmatprep.subr.bf16.mxu0 %v10725_v20  ;;  %v780_v20 = vld [vmem:[%s16079_s3 + $0xf48] sm:$0xff]  ;;  %v875_v17 = vld [vmem:[%s16079_s3 + $0x1240] sm:$0xff] }
 0x34f   :  { %v10917_v42 = vcombine.high %v780_v20, %v796_v21  ;;  %v891_v18 = vld [vmem:[%s16079_s3 + $0x12c0] sm:$0xff] }
 0x350   :  { %9142 = vmatpush1.bf16.msra.mxu1 %v10722_v25  ;;  %v10882_v25 = vcombine.low %v747_v5, %v763_v6 }
 0x351   :  { %9265 = vmatpush1.bf16.msra.mxu0 %v10724_v26  ;;  %9143 = vmatprep.subr.bf16.mxu1 %v10755_v27 }
 0x352   :  { %9266 = vmatprep.subr.bf16.mxu0 %v10757_v14 }
 0x354   :  { %9144 = vmatpush1.bf16.msra.mxu1 %v10754_v32 }
 0x355   :  { %9267 = vmatpush1.bf16.msra.mxu0 %v10756_v38  ;;  %9145 = vmatprep.subr.bf16.mxu1 %v10787_v39 }
 0x356   :  { %9268 = vmatprep.subr.bf16.mxu0 %v10789_v41 }
 0x358   :  { %9146 = vmatpush1.bf16.msra.mxu1 %v10786_v47 }
 0x359   :  { %9269 = vmatpush1.bf16.msra.mxu0 %v10788_v48  ;;  %9147 = vmatprep.subr.bf16.mxu1 %v10819_v54 }
 0x35a   :  { %9270 = vmatprep.subr.bf16.mxu0 %v10821_v56  ;;  %v812_v56 = vld [vmem:[%s16079_s3 + $0x1048] sm:$0xff] }
 0x35b   :  { %v10949_v5 = vcombine.high %v812_v56, %v828_v57 }
 0x35c   :  { %9148 = vmatpush1.bf16.msra.mxu1 %v10818_v62  ;;  %v10916_v62 = vcombine.low %v780_v20, %v796_v21  ;;  %v892_v20 = vld [vmem:[%s16079_s3 + $0x12c8] sm:$0xff] }
 0x35d   :  { %9271 = vmatpush1.bf16.msra.mxu0 %v10820_v0  ;;  %9149 = vmatprep.subr.bf16.mxu1 %v10851_v2  ;;  %v10947_v2 = vcombine.high %v811_v31, %v827_v43 }
 0x35e   :  { %v8747_v19 = vpop.f32.mrb[12].mxu1  ;;  %9272 = vmatprep.subr.bf16.mxu0 %v10853_v3 }
 0x35f   :  { %v11720_v22 = vadd.f32 %v8747_v19, %v1614_v7  ;;  %v8870_v23 = vpop.f32.mrb[16].mxu0  ;;  %v8749_v24 = vpop.f32.mrb[13].mxu1  ;;  %v843_v7 = vld [vmem:[%s16079_s3 + $0x1140] sm:$0xff] }
 0x360   :  { %v11722_v26 = vadd.f32 %v8870_v23, %v1622_v11  ;;  %v11721_v27 = vadd.f32 %v8749_v24, %v1618_v12  ;;  %v8872_v14 = vpop.f32.mrb[17].mxu0  ;;  %v8751_v28 = vpop.f32.mrb[14].mxu1  ;;  %9150 = vmatpush1.bf16.msra.mxu1 %v10850_v13  ;;  %v10946_v11 = vcombine.low %v811_v31, %v827_v43  ;;  %v844_v12 = vld [vmem:[%s16079_s3 + $0x1148] sm:$0xff]  ;;  %v10978_v21 = vcombine.low %v843_v7, %v859_v8 }
 0x361   :  { %vm10115_vm0 = vcmp.gt.f32.partialorder %v11720_v22, 0.0  ;;  %v10147_v32 = vmul.f32 0.2, %v11720_v22  ;;  %v11723_v38 = vadd.f32 %v8872_v14, %v1626_v15  ;;  %v8874_v39 = vpop.f32.mrb[18].mxu0  ;;  %9273 = vmatpush1.bf16.msra.mxu0 %v10852_v16  ;;  %v8752_v41 = vpop.f32.mrb[15].mxu1  ;;  %9151 = vmatprep.subr.bf16.mxu1 %v10883_v52  ;;  %v860_v13 = vld [vmem:[%s16079_s3 + $0x11c8] sm:$0xff]  ;;  %v10948_v15 = vcombine.low %v812_v56, %v828_v57 }
 0x362   :  { %vm10117_vm1 = vcmp.gt.f32.partialorder %v11722_v26, 0.0  ;;  %v10149_v44 = vmul.f32 0.2, %v11722_v26  ;;  %vm10116_vm2 = vcmp.gt.f32.partialorder %v11721_v27, 0.0  ;;  %v10148_v45 = vmul.f32 0.2, %v11721_v27  ;;  %9274 = vmatprep.subr.bf16.mxu0 %v10885_v36 }
 0x363   :  { %v10179_v47 = vsel %vm10115_vm0, %v11720_v22, %v10147_v32  ;;  %vm10118_vm3 = vcmp.gt.f32.partialorder %v11723_v38, 0.0  ;;  %v10150_v48 = vmul.f32 0.2, %v11723_v38  ;;  %v8875_v54 = vpop.f32.mrb[19].mxu0  ;;  %v10979_v52 = vcombine.high %v843_v7, %v859_v8  ;;  %v876_v36 = vld [vmem:[%s16079_s3 + $0x1248] sm:$0xff]  ;;  %v939_v32 = vld [vmem:[%s16079_s3 + $0x1440] sm:$0xff] }
 0x364   :  { %v10181_v58 = vsel %vm10117_vm1, %v11722_v26, %v10149_v44  ;;  %v10180_v59 = vsel %vm10116_vm2, %v11721_v27, %v10148_v45  ;;  %9152 = vmatpush1.bf16.msra.mxu1 %v10882_v25  ;;  %v10981_v19 = vcombine.high %v844_v12, %v860_v13  ;;  %v10980_v22 = vcombine.low %v844_v12, %v860_v13  ;;  %v907_v25 = vld [vmem:[%s16079_s3 + $0x1340] sm:$0xff]  ;;  %v908_v27 = vld [vmem:[%s16079_s3 + $0x1348] sm:$0xff] }
 0x365   :  { %v10269_v34 = vcombine.low %v10179_v47, %v10180_v59  ;;  %v10182_v0 = vsel %vm10118_vm3, %v11723_v38, %v10150_v48  ;;  %9275 = vmatpush1.bf16.msra.mxu0 %v10884_v29  ;;  %9153 = vmatprep.subr.bf16.mxu1 %v10915_v30  ;;  %v11011_v23 = vcombine.high %v875_v17, %v891_v18  ;;  %v923_v26 = vld [vmem:[%s16079_s3 + $0x13c0] sm:$0xff]  ;;  %v924_v14 = vld [vmem:[%s16079_s3 + $0x13c8] sm:$0xff] }
 0x366   :  { %v10270_v3 = vcombine.low %v10181_v58, %v10182_v0  ;;  %9276 = vmatprep.subr.bf16.mxu0 %v10917_v42  ;;  %v11013_v24 = vcombine.high %v876_v36, %v892_v20  ;;  %v11010_v28 = vcombine.low %v875_v17, %v891_v18  ;;  %v11012_v29 = vcombine.low %v876_v36, %v892_v20  ;;  %v955_v38 = vld [vmem:[%s16079_s3 + $0x14c0] sm:$0xff]  ;;  %v940_v39 = vld [vmem:[%s16079_s3 + $0x1448] sm:$0xff] }
 0x367   :  { %v10277_v6 = vrot.slane %v10269_v34, %v13227_v46  ;;  %v11043_v30 = vcombine.high %v907_v25, %v923_v26  ;;  %v11045_v31 = vcombine.high %v908_v27, %v924_v14  ;;  %v956_v41 = vld [vmem:[%s16079_s3 + $0x14c8] sm:$0xff]  ;;  %v11042_v42 = vcombine.low %v907_v25, %v923_v26  ;;  %v971_v47 = vld [vmem:[%s16079_s3 + $0x1540] sm:$0xff] }
 0x368   :  { %v10284_v9 = vrot.slane %v10270_v3, %v13227_v46  ;;  %9154 = vmatpush1.bf16.msra.mxu1 %v10914_v61  ;;  %v11044_v43 = vcombine.low %v908_v27, %v924_v14  ;;  %v11075_v44 = vcombine.high %v939_v32, %v955_v38  ;;  %v11077_v45 = vcombine.high %v940_v39, %v956_v41  ;;  %v987_v48 = vld [vmem:[%s16079_s3 + $0x15c0] sm:$0xff]  ;;  %v972_v54 = vld [vmem:[%s16079_s3 + $0x1548] sm:$0xff] }
 0x369   :  { %9277 = vmatpush1.bf16.msra.mxu0 %v10916_v62  ;;  %9164 = vmatprep.subr.bf16.mxu1 %v10947_v2  ;;  %v988_v56 = vld [vmem:[%s16079_s3 + $0x15c8] sm:$0xff]  ;;  %v11074_v57 = vcombine.low %v939_v32, %v955_v38  ;;  %v11076_v58 = vcombine.low %v940_v39, %v956_v41  ;;  %v11107_v59 = vcombine.high %v971_v47, %v987_v48  ;;  %v1003_v62 = vld [vmem:[%s16079_s3 + $0x1640] sm:$0xff] }
 0x36a   :  { %v10285_v16 = vcombine.low %v10277_v6, %v10284_v9  ;;  %9287 = vmatprep.subr.bf16.mxu0 %v10949_v5  ;;  %v11109_v61 = vcombine.high %v972_v54, %v988_v56  ;;  %v1019_v34 = vld [vmem:[%s16079_s3 + $0x16c0] sm:$0xff]  ;;  %v1004_v0 = vld [vmem:[%s16079_s3 + $0x1648] sm:$0xff]  ;;  %v11106_v3 = vcombine.low %v971_v47, %v987_v48  ;;  %v11108_v5 = vcombine.low %v972_v54, %v988_v56 }
 0x36b   :  { %9156 = vmatmul.mubr.bf16.vlgmr.msra.gmra.mrb[20].mxu1 %v12226_v63  ;;  %v1020_v2 = vld [vmem:[%s16079_s3 + $0x16c8] sm:$0xff]  ;;  %v11139_v6 = vcombine.high %v1003_v62, %v1019_v34  ;;  %v1035_v8 = vld [vmem:[%s16079_s3 + $0x1740] sm:$0xff]  ;;  %v11138_v13 = vcombine.low %v1003_v62, %v1019_v34 }
 0x36c   :  { %10381 = vst [vmem:[%s16083_s5 + $0x10] sm:$0xff] %v10285_v16  ;;  %9279 = vmatmul.mubr.bf16.vlgmr.msra.gmra.mrb[24].mxu0 %v12226_v63  ;;  %9165 = vmatpush1.bf16.msra.mxu1 %v10946_v11  ;;  %v11141_v7 = vcombine.high %v1004_v0, %v1020_v2  ;;  %v1051_v9 = vld [vmem:[%s16079_s3 + $0x17c0] sm:$0xff]  ;;  %v1036_v11 = vld [vmem:[%s16079_s3 + $0x1748] sm:$0xff] }
 0x36d   :  { %9196 = vmatprep.mubr.bf16.mxu1 %v12244_v10  ;;  %9288 = vmatpush1.bf16.msra.mxu0 %v10948_v15  ;;  %v1052_v12 = vld [vmem:[%s16079_s3 + $0x17c8] sm:$0xff]  ;;  %v11140_v15 = vcombine.low %v1004_v0, %v1020_v2  ;;  %v11171_v16 = vcombine.high %v1035_v8, %v1051_v9  ;;  %v1067_v17 = vld [vmem:[%s16079_s3 + $0x1840] sm:$0xff]  ;;  %v11170_v20 = vcombine.low %v1035_v8, %v1051_v9 }
 0x36e   :  { %9319 = vmatprep.mubr.bf16.mxu0 %v12244_v10  ;;  %9166 = vmatprep.subr.bf16.mxu1 %v10979_v52  ;;  %v11173_v52 = vcombine.high %v1036_v11, %v1052_v12  ;;  %v1083_v18 = vld [vmem:[%s16079_s3 + $0x18c0] sm:$0xff]  ;;  %v1084_v36 = vld [vmem:[%s16079_s3 + $0x18c8] sm:$0xff] }
 0x36f   :  { %9289 = vmatprep.subr.bf16.mxu0 %v10981_v19  ;;  %v1068_v19 = vld [vmem:[%s16079_s3 + $0x1848] sm:$0xff]  ;;  %v1115_v25 = vld [vmem:[%s16079_s3 + $0x19c0] sm:$0xff]  ;;  %v11202_v14 = vcombine.low %v1067_v17, %v1083_v18 }
 0x370   :  { %9167 = vmatpush1.bf16.msra.mxu1 %v10978_v21  ;;  %v11172_v21 = vcombine.low %v1036_v11, %v1052_v12  ;;  %v1100_v26 = vld [vmem:[%s16079_s3 + $0x1948] sm:$0xff]  ;;  %v1147_v32 = vld [vmem:[%s16079_s3 + $0x1ac0] sm:$0xff] }
 0x371   :  { %9290 = vmatpush1.bf16.msra.mxu0 %v10980_v22  ;;  %9168 = vmatprep.subr.bf16.mxu1 %v11011_v23  ;;  %v11203_v22 = vcombine.high %v1067_v17, %v1083_v18  ;;  %v11205_v23 = vcombine.high %v1068_v19, %v1084_v36  ;;  %v1116_v27 = vld [vmem:[%s16079_s3 + $0x19c8] sm:$0xff]  ;;  %v1179_v47 = vld [vmem:[%s16079_s3 + $0x1bc0] sm:$0xff] }
 0x372   :  { %9291 = vmatprep.subr.bf16.mxu0 %v11013_v24  ;;  %v1099_v24 = vld [vmem:[%s16079_s3 + $0x1940] sm:$0xff]  ;;  %v1132_v38 = vld [vmem:[%s16079_s3 + $0x1a48] sm:$0xff] }
 0x373   :  { %v1148_v39 = vld [vmem:[%s16079_s3 + $0x1ac8] sm:$0xff]  ;;  %v11234_v41 = vcombine.low %v1099_v24, %v1115_v25  ;;  %v1211_v62 = vld [vmem:[%s16079_s3 + $0x1cc0] sm:$0xff] }
 0x374   :  { %9169 = vmatpush1.bf16.msra.mxu1 %v11010_v28  ;;  %v11204_v28 = vcombine.low %v1068_v19, %v1084_v36  ;;  %v1164_v48 = vld [vmem:[%s16079_s3 + $0x1b48] sm:$0xff]  ;;  %v1243_v8 = vld [vmem:[%s16079_s3 + $0x1dc0] sm:$0xff] }
 0x375   :  { %9292 = vmatpush1.bf16.msra.mxu0 %v11012_v29  ;;  %9170 = vmatprep.subr.bf16.mxu1 %v11043_v30  ;;  %v11235_v29 = vcombine.high %v1099_v24, %v1115_v25  ;;  %v11237_v30 = vcombine.high %v1100_v26, %v1116_v27  ;;  %v1180_v54 = vld [vmem:[%s16079_s3 + $0x1bc8] sm:$0xff]  ;;  %v1275_v17 = vld [vmem:[%s16079_s3 + $0x1ec0] sm:$0xff] }
 0x376   :  { %9293 = vmatprep.subr.bf16.mxu0 %v11045_v31  ;;  %v1131_v31 = vld [vmem:[%s16079_s3 + $0x1a40] sm:$0xff]  ;;  %v1196_v34 = vld [vmem:[%s16079_s3 + $0x1c48] sm:$0xff] }
 0x377   :  { %v11266_v56 = vcombine.low %v1131_v31, %v1147_v32  ;;  %v1212_v0 = vld [vmem:[%s16079_s3 + $0x1cc8] sm:$0xff]  ;;  %v1307_v24 = vld [vmem:[%s16079_s3 + $0x1fc0] sm:$0xff] }
 0x378   :  { %9171 = vmatpush1.bf16.msra.mxu1 %v11042_v42  ;;  %v11236_v42 = vcombine.low %v1100_v26, %v1116_v27  ;;  %v1228_v9 = vld [vmem:[%s16079_s3 + $0x1d48] sm:$0xff] }
 0x379   :  { %9294 = vmatpush1.bf16.msra.mxu0 %v11044_v43  ;;  %9172 = vmatprep.subr.bf16.mxu1 %v11075_v44  ;;  %v11267_v43 = vcombine.high %v1131_v31, %v1147_v32  ;;  %v11269_v44 = vcombine.high %v1132_v38, %v1148_v39  ;;  %v1244_v11 = vld [vmem:[%s16079_s3 + $0x1dc8] sm:$0xff]  ;;  %v1339_v31 = vld [vmem:[%s16079_s3 + $0x20c0] sm:$0xff] }
 0x37a   :  { %9295 = vmatprep.subr.bf16.mxu0 %v11077_v45  ;;  %v1163_v45 = vld [vmem:[%s16079_s3 + $0x1b40] sm:$0xff]  ;;  %v1260_v18 = vld [vmem:[%s16079_s3 + $0x1e48] sm:$0xff] }
 0x37b   :  { %v11298_v2 = vcombine.low %v1163_v45, %v1179_v47  ;;  %v1276_v19 = vld [vmem:[%s16079_s3 + $0x1ec8] sm:$0xff] }
 0x37c   :  { %9173 = vmatpush1.bf16.msra.mxu1 %v11074_v57  ;;  %v11268_v57 = vcombine.low %v1132_v38, %v1148_v39  ;;  %v1292_v25 = vld [vmem:[%s16079_s3 + $0x1f48] sm:$0xff] }
 0x37d   :  { %9296 = vmatpush1.bf16.msra.mxu0 %v11076_v58  ;;  %9174 = vmatprep.subr.bf16.mxu1 %v11107_v59  ;;  %v11299_v58 = vcombine.high %v1163_v45, %v1179_v47  ;;  %v11301_v59 = vcombine.high %v1164_v48, %v1180_v54  ;;  %v1308_v26 = vld [vmem:[%s16079_s3 + $0x1fc8] sm:$0xff]  ;;  %v1371_v45 = vld [vmem:[%s16079_s3 + $0x21c0] sm:$0xff] }
 0x37e   :  { %9297 = vmatprep.subr.bf16.mxu0 %v11109_v61  ;;  %v1195_v61 = vld [vmem:[%s16079_s3 + $0x1c40] sm:$0xff]  ;;  %v1324_v32 = vld [vmem:[%s16079_s3 + $0x2048] sm:$0xff] }
 0x37f   :  { %v11330_v12 = vcombine.low %v1195_v61, %v1211_v62  ;;  %v1340_v38 = vld [vmem:[%s16079_s3 + $0x20c8] sm:$0xff] }
 0x380   :  { %9175 = vmatpush1.bf16.msra.mxu1 %v11106_v3  ;;  %v11300_v3 = vcombine.low %v1164_v48, %v1180_v54  ;;  %v1356_v47 = vld [vmem:[%s16079_s3 + $0x2148] sm:$0xff] }
 0x381   :  { %9298 = vmatpush1.bf16.msra.mxu0 %v11108_v5  ;;  %9176 = vmatprep.subr.bf16.mxu1 %v11139_v6  ;;  %v11331_v5 = vcombine.high %v1195_v61, %v1211_v62  ;;  %v11333_v6 = vcombine.high %v1196_v34, %v1212_v0  ;;  %v1372_v48 = vld [vmem:[%s16079_s3 + $0x21c8] sm:$0xff]  ;;  %v1403_v61 = vld [vmem:[%s16079_s3 + $0x22c0] sm:$0xff] }
 0x382   :  { %9299 = vmatprep.subr.bf16.mxu0 %v11141_v7  ;;  %v1227_v7 = vld [vmem:[%s16079_s3 + $0x1d40] sm:$0xff]  ;;  %v1388_v62 = vld [vmem:[%s16079_s3 + $0x2248] sm:$0xff] }
 0x383   :  { %v11362_v36 = vcombine.low %v1227_v7, %v1243_v8 }
 0x384   :  { %9177 = vmatpush1.bf16.msra.mxu1 %v11138_v13  ;;  %v11332_v13 = vcombine.low %v1196_v34, %v1212_v0  ;;  %v1404_v34 = vld [vmem:[%s16079_s3 + $0x22c8] sm:$0xff] }
 0x385   :  { %9300 = vmatpush1.bf16.msra.mxu0 %v11140_v15  ;;  %9178 = vmatprep.subr.bf16.mxu1 %v11171_v16  ;;  %v11363_v15 = vcombine.high %v1227_v7, %v1243_v8  ;;  %v11365_v16 = vcombine.high %v1228_v9, %v1244_v11  ;;  %v1435_v7 = vld [vmem:[%s16079_s3 + $0x23c0] sm:$0xff]  ;;  %v1420_v8 = vld [vmem:[%s16079_s3 + $0x2348] sm:$0xff] }
 0x386   :  { %9301 = vmatprep.subr.bf16.mxu0 %v11173_v52  ;;  %v1259_v52 = vld [vmem:[%s16079_s3 + $0x1e40] sm:$0xff] }
 0x387   :  { %v11394_v27 = vcombine.low %v1259_v52, %v1275_v17 }
 0x388   :  { %9179 = vmatpush1.bf16.msra.mxu1 %v11170_v20  ;;  %v11364_v20 = vcombine.low %v1228_v9, %v1244_v11  ;;  %v1436_v9 = vld [vmem:[%s16079_s3 + $0x23c8] sm:$0xff] }
 0x389   :  { %9302 = vmatpush1.bf16.msra.mxu0 %v11172_v21  ;;  %9180 = vmatprep.subr.bf16.mxu1 %v11203_v22  ;;  %v11395_v21 = vcombine.high %v1259_v52, %v1275_v17  ;;  %v11397_v22 = vcombine.high %v1260_v18, %v1276_v19  ;;  %v1467_v52 = vld [vmem:[%s16079_s3 + $0x24c0] sm:$0xff]  ;;  %v1452_v17 = vld [vmem:[%s16079_s3 + $0x2448] sm:$0xff] }
 0x38a   :  { %9303 = vmatprep.subr.bf16.mxu0 %v11205_v23  ;;  %v1291_v23 = vld [vmem:[%s16079_s3 + $0x1f40] sm:$0xff] }
 0x38b   :  { %v11426_v39 = vcombine.low %v1291_v23, %v1307_v24 }
 0x38c   :  { %9181 = vmatpush1.bf16.msra.mxu1 %v11202_v14  ;;  %v11396_v14 = vcombine.low %v1260_v18, %v1276_v19  ;;  %v1468_v18 = vld [vmem:[%s16079_s3 + $0x24c8] sm:$0xff] }
 0x38d   :  { %9304 = vmatpush1.bf16.msra.mxu0 %v11204_v28  ;;  %9182 = vmatprep.subr.bf16.mxu1 %v11235_v29  ;;  %v11427_v28 = vcombine.high %v1291_v23, %v1307_v24  ;;  %v11429_v29 = vcombine.high %v1292_v25, %v1308_v26  ;;  %v1499_v23 = vld [vmem:[%s16079_s3 + $0x25c0] sm:$0xff]  ;;  %v1484_v24 = vld [vmem:[%s16079_s3 + $0x2548] sm:$0xff] }
 0x38e   :  { %9305 = vmatprep.subr.bf16.mxu0 %v11237_v30  ;;  %v1323_v30 = vld [vmem:[%s16079_s3 + $0x2040] sm:$0xff] }
 0x38f   :  { %v11458_v54 = vcombine.low %v1323_v30, %v1339_v31 }
 0x390   :  { %9183 = vmatpush1.bf16.msra.mxu1 %v11234_v41  ;;  %v11428_v41 = vcombine.low %v1292_v25, %v1308_v26  ;;  %v1500_v25 = vld [vmem:[%s16079_s3 + $0x25c8] sm:$0xff] }
 0x391   :  { %9306 = vmatpush1.bf16.msra.mxu0 %v11236_v42  ;;  %9184 = vmatprep.subr.bf16.mxu1 %v11267_v43  ;;  %v11459_v42 = vcombine.high %v1323_v30, %v1339_v31  ;;  %v11461_v43 = vcombine.high %v1324_v32, %v1340_v38  ;;  %v1531_v30 = vld [vmem:[%s16079_s3 + $0x26c0] sm:$0xff]  ;;  %v1516_v31 = vld [vmem:[%s16079_s3 + $0x2648] sm:$0xff] }
 0x392   :  { %9307 = vmatprep.subr.bf16.mxu0 %v11269_v44  ;;  %v1355_v44 = vld [vmem:[%s16079_s3 + $0x2140] sm:$0xff] }
 0x393   :  { %v11490_v0 = vcombine.low %v1355_v44, %v1371_v45 }
 0x394   :  { %9185 = vmatpush1.bf16.msra.mxu1 %v11266_v56  ;;  %v11460_v56 = vcombine.low %v1324_v32, %v1340_v38  ;;  %v1532_v32 = vld [vmem:[%s16079_s3 + $0x26c8] sm:$0xff] }
 0x395   :  { %9308 = vmatpush1.bf16.msra.mxu0 %v11268_v57  ;;  %9186 = vmatprep.subr.bf16.mxu1 %v11299_v58  ;;  %v11491_v57 = vcombine.high %v1355_v44, %v1371_v45  ;;  %v11493_v58 = vcombine.high %v1356_v47, %v1372_v48  ;;  %v1563_v44 = vld [vmem:[%s16079_s3 + $0x27c0] sm:$0xff]  ;;  %v1548_v45 = vld [vmem:[%s16079_s3 + $0x2748] sm:$0xff] }
 0x396   :  { %9309 = vmatprep.subr.bf16.mxu0 %v11301_v59  ;;  %v1387_v59 = vld [vmem:[%s16079_s3 + $0x2240] sm:$0xff] }
 0x397   :  { %v11522_v11 = vcombine.low %v1387_v59, %v1403_v61 }
 0x398   :  { %9187 = vmatpush1.bf16.msra.mxu1 %v11298_v2  ;;  %v11492_v2 = vcombine.low %v1356_v47, %v1372_v48  ;;  %v1564_v47 = vld [vmem:[%s16079_s3 + $0x27c8] sm:$0xff] }
 0x399   :  { %9310 = vmatpush1.bf16.msra.mxu0 %v11300_v3  ;;  %9188 = vmatprep.subr.bf16.mxu1 %v11331_v5  ;;  %v11523_v3 = vcombine.high %v1387_v59, %v1403_v61  ;;  %v11525_v5 = vcombine.high %v1388_v62, %v1404_v34  ;;  %v317_v59 = vld [vmem:[%s16079_s3 + $0xd0] sm:$0xff]  ;;  %v302_v61 = vld [vmem:[%s16079_s3 + $0x58] sm:$0xff] }
 0x39a   :  { %9311 = vmatprep.subr.bf16.mxu0 %v11333_v6  ;;  %v1419_v6 = vld [vmem:[%s16079_s3 + $0x2340] sm:$0xff] }
 0x39b   :  { %v11554_v19 = vcombine.low %v1419_v6, %v1435_v7 }
 0x39c   :  { %9189 = vmatpush1.bf16.msra.mxu1 %v11330_v12  ;;  %v11524_v12 = vcombine.low %v1388_v62, %v1404_v34  ;;  %v318_v62 = vld [vmem:[%s16079_s3 + $0xd8] sm:$0xff] }
 0x39d   :  { %9312 = vmatpush1.bf16.msra.mxu0 %v11332_v13  ;;  %9190 = vmatprep.subr.bf16.mxu1 %v11363_v15  ;;  %v11555_v13 = vcombine.high %v1419_v6, %v1435_v7  ;;  %v11557_v15 = vcombine.high %v1420_v8, %v1436_v9  ;;  %v349_v6 = vld [vmem:[%s16079_s3 + $0x1d0] sm:$0xff] }
 0x39e   :  { %9313 = vmatprep.subr.bf16.mxu0 %v11365_v16  ;;  %v1451_v16 = vld [vmem:[%s16079_s3 + $0x2440] sm:$0xff] }
 0x39f   :  { %v11586_v26 = vcombine.low %v1451_v16, %v1467_v52 }
 0x3a0   :  { %9191 = vmatpush1.bf16.msra.mxu1 %v11362_v36  ;;  %v11556_v36 = vcombine.low %v1420_v8, %v1436_v9  ;;  %v334_v8 = vld [vmem:[%s16079_s3 + $0x158] sm:$0xff] }
 0x3a1   :  { %9314 = vmatpush1.bf16.msra.mxu0 %v11364_v20  ;;  %9192 = vmatprep.subr.bf16.mxu1 %v11395_v21  ;;  %v11587_v20 = vcombine.high %v1451_v16, %v1467_v52  ;;  %v11589_v21 = vcombine.high %v1452_v17, %v1468_v18  ;;  %v350_v9 = vld [vmem:[%s16079_s3 + $0x1d8] sm:$0xff] }
 0x3a2   :  { %9315 = vmatprep.subr.bf16.mxu0 %v11397_v22  ;;  %v1483_v22 = vld [vmem:[%s16079_s3 + $0x2540] sm:$0xff]  ;;  %v10473_v16 = vcombine.high %v334_v8, %v350_v9  ;;  %v366_v52 = vld [vmem:[%s16079_s3 + $0x258] sm:$0xff] }
 0x3a3   :  { %v11618_v38 = vcombine.low %v1483_v22, %v1499_v23 }
 0x3a4   :  { %9193 = vmatpush1.bf16.msra.mxu1 %v11394_v27  ;;  %v11588_v27 = vcombine.low %v1452_v17, %v1468_v18  ;;  %v382_v17 = vld [vmem:[%s16079_s3 + $0x2d8] sm:$0xff] }
 0x3a5   :  { %9316 = vmatpush1.bf16.msra.mxu0 %v11396_v14  ;;  %9194 = vmatprep.subr.bf16.mxu1 %v11427_v28  ;;  %v11619_v14 = vcombine.high %v1483_v22, %v1499_v23  ;;  %v11621_v28 = vcombine.high %v1484_v24, %v1500_v25  ;;  %v413_v22 = vld [vmem:[%s16079_s3 + $0x3d0] sm:$0xff]  ;;  %v398_v23 = vld [vmem:[%s16079_s3 + $0x358] sm:$0xff] }
 0x3a6   :  { %9317 = vmatprep.subr.bf16.mxu0 %v11429_v29  ;;  %v1515_v29 = vld [vmem:[%s16079_s3 + $0x2640] sm:$0xff] }
 0x3a7   :  { %v11650_v48 = vcombine.low %v1515_v29, %v1531_v30 }
 0x3a8   :  { %9195 = vmatpush1.bf16.msra.mxu1 %v11426_v39  ;;  %v11620_v39 = vcombine.low %v1484_v24, %v1500_v25  ;;  %v414_v24 = vld [vmem:[%s16079_s3 + $0x3d8] sm:$0xff] }
 0x3a9   :  { %9318 = vmatpush1.bf16.msra.mxu0 %v11428_v41  ;;  %9205 = vmatprep.subr.bf16.mxu1 %v11459_v42  ;;  %v11651_v41 = vcombine.high %v1515_v29, %v1531_v30  ;;  %v11653_v42 = vcombine.high %v1516_v31, %v1532_v32  ;;  %v445_v29 = vld [vmem:[%s16079_s3 + $0x4d0] sm:$0xff]  ;;  %v430_v30 = vld [vmem:[%s16079_s3 + $0x458] sm:$0xff] }
 0x3aa   :  { %9328 = vmatprep.subr.bf16.mxu0 %v11461_v43  ;;  %v1547_v43 = vld [vmem:[%s16079_s3 + $0x2740] sm:$0xff] }
 0x3ab   :  { %9197 = vmatmul.mubr.bf16.vlgmr.msra.gmra.mrb[20].mxu1 %v12436_v33  ;;  %v11682_v34 = vcombine.low %v1547_v43, %v1563_v44 }
 0x3ac   :  { %9320 = vmatmul.mubr.bf16.vlgmr.msra.gmra.mrb[24].mxu0 %v12436_v33  ;;  %9206 = vmatpush1.bf16.msra.mxu1 %v11458_v54  ;;  %v11652_v54 = vcombine.low %v1516_v31, %v1532_v32  ;;  %v446_v31 = vld [vmem:[%s16079_s3 + $0x4d8] sm:$0xff] }
 0x3ad   :  { %9329 = vmatpush1.bf16.msra.mxu0 %v11460_v56  ;;  %9207 = vmatprep.subr.bf16.mxu1 %v11491_v57  ;;  %v11683_v56 = vcombine.high %v1547_v43, %v1563_v44  ;;  %v11685_v57 = vcombine.high %v1548_v45, %v1564_v47  ;;  %v477_v43 = vld [vmem:[%s16079_s3 + $0x5d0] sm:$0xff]  ;;  %v462_v44 = vld [vmem:[%s16079_s3 + $0x558] sm:$0xff] }
 0x3ae   :  { %9330 = vmatprep.subr.bf16.mxu0 %v11493_v58  ;;  %9237 = vmatprep.mubr.bf16.mxu1 %v11898_v1  ;;  %v301_v58 = vld [vmem:[%s16079_s3 + $0x50] sm:$0xff] }
 0x3af   :  { %9360 = vmatprep.mubr.bf16.mxu0 %v11898_v1  ;;  %v10438_v7 = vcombine.low %v301_v58, %v317_v59 }
 0x3b0   :  { %9208 = vmatpush1.bf16.msra.mxu1 %v11490_v0  ;;  %v11684_v0 = vcombine.low %v1548_v45, %v1564_v47  ;;  %v478_v45 = vld [vmem:[%s16079_s3 + $0x5d8] sm:$0xff] }
 0x3b1   :  { %9331 = vmatpush1.bf16.msra.mxu0 %v11492_v2  ;;  %9209 = vmatprep.subr.bf16.mxu1 %v11523_v3  ;;  %v10439_v2 = vcombine.high %v301_v58, %v317_v59  ;;  %v10441_v3 = vcombine.high %v302_v61, %v318_v62  ;;  %v509_v58 = vld [vmem:[%s16079_s3 + $0x6d0] sm:$0xff]  ;;  %v494_v59 = vld [vmem:[%s16079_s3 + $0x658] sm:$0xff] }
 0x3b2   :  { %9332 = vmatprep.subr.bf16.mxu0 %v11525_v5  ;;  %v333_v5 = vld [vmem:[%s16079_s3 + $0x150] sm:$0xff] }
 0x3b3   :  { %v10470_v18 = vcombine.low %v333_v5, %v349_v6 }
 0x3b4   :  { %9210 = vmatpush1.bf16.msra.mxu1 %v11522_v11  ;;  %v10440_v11 = vcombine.low %v302_v61, %v318_v62  ;;  %v510_v61 = vld [vmem:[%s16079_s3 + $0x6d8] sm:$0xff] }
 0x3b5   :  { %9333 = vmatpush1.bf16.msra.mxu0 %v11524_v12  ;;  %9211 = vmatprep.subr.bf16.mxu1 %v11555_v13  ;;  %v10471_v12 = vcombine.high %v333_v5, %v349_v6  ;;  %v365_v13 = vld [vmem:[%s16079_s3 + $0x250] sm:$0xff]  ;;  %v526_v6 = vld [vmem:[%s16079_s3 + $0x758] sm:$0xff] }
 0x3b6   :  { %9334 = vmatprep.subr.bf16.mxu0 %v11557_v15  ;;  %v381_v15 = vld [vmem:[%s16079_s3 + $0x2d0] sm:$0xff] }
 0x3b7   :  { %v10502_v25 = vcombine.low %v365_v13, %v381_v15  ;;  %v541_v5 = vld [vmem:[%s16079_s3 + $0x7d0] sm:$0xff] }
 0x3b8   :  { %9212 = vmatpush1.bf16.msra.mxu1 %v11554_v19  ;;  %v10472_v19 = vcombine.low %v334_v8, %v350_v9  ;;  %v10632_v9 = vcombine.low %v494_v59, %v510_v61 }
 0x3b9   :  { %9335 = vmatpush1.bf16.msra.mxu0 %v11556_v36  ;;  %9213 = vmatprep.subr.bf16.mxu1 %v11587_v20  ;;  %v10503_v36 = vcombine.high %v365_v13, %v381_v15  ;;  %v10505_v20 = vcombine.high %v366_v52, %v382_v17  ;;  %v557_v13 = vld [vmem:[%s16079_s3 + $0x850] sm:$0xff] }
 0x3ba   :  { %9336 = vmatprep.subr.bf16.mxu0 %v11589_v21  ;;  %v397_v21 = vld [vmem:[%s16079_s3 + $0x350] sm:$0xff] }
 0x3bb   :  { %v10534_v32 = vcombine.low %v397_v21, %v413_v22  ;;  %v573_v15 = vld [vmem:[%s16079_s3 + $0x8d0] sm:$0xff] }
 0x3bc   :  { %9214 = vmatpush1.bf16.msra.mxu1 %v11586_v26  ;;  %v10504_v26 = vcombine.low %v366_v52, %v382_v17  ;;  %v574_v52 = vld [vmem:[%s16079_s3 + $0x8d8] sm:$0xff] }
 0x3bd   :  { %9337 = vmatpush1.bf16.msra.mxu0 %v11588_v27  ;;  %9215 = vmatprep.subr.bf16.mxu1 %v11619_v14  ;;  %v10535_v27 = vcombine.high %v397_v21, %v413_v22  ;;  %v10537_v14 = vcombine.high %v398_v23, %v414_v24  ;;  %v605_v21 = vld [vmem:[%s16079_s3 + $0x9d0] sm:$0xff]  ;;  %v590_v22 = vld [vmem:[%s16079_s3 + $0x958] sm:$0xff] }
 0x3be   :  { %9338 = vmatprep.subr.bf16.mxu0 %v11621_v28  ;;  %v429_v28 = vld [vmem:[%s16079_s3 + $0x450] sm:$0xff] }
 0x3bf   :  { %v10566_v47 = vcombine.low %v429_v28, %v445_v29 }
 0x3c0   :  { %9216 = vmatpush1.bf16.msra.mxu1 %v11618_v38  ;;  %v10536_v38 = vcombine.low %v398_v23, %v414_v24  ;;  %v606_v23 = vld [vmem:[%s16079_s3 + $0x9d8] sm:$0xff]  ;;  %v10694_v24 = vcombine.low %v557_v13, %v573_v15 }
 0x3c1   :  { %9339 = vmatpush1.bf16.msra.mxu0 %v11620_v39  ;;  %9217 = vmatprep.subr.bf16.mxu1 %v11651_v41  ;;  %v10567_v39 = vcombine.high %v429_v28, %v445_v29  ;;  %v10569_v41 = vcombine.high %v430_v30, %v446_v31  ;;  %v637_v28 = vld [vmem:[%s16079_s3 + $0xad0] sm:$0xff]  ;;  %v622_v29 = vld [vmem:[%s16079_s3 + $0xa58] sm:$0xff] }
 0x3c2   :  { %9340 = vmatprep.subr.bf16.mxu0 %v11653_v42  ;;  %v461_v42 = vld [vmem:[%s16079_s3 + $0x550] sm:$0xff] }
 0x3c3   :  { %v10598_v62 = vcombine.low %v461_v42, %v477_v43 }
 0x3c4   :  { %9218 = vmatpush1.bf16.msra.mxu1 %v11650_v48  ;;  %v10568_v48 = vcombine.low %v430_v30, %v446_v31  ;;  %v638_v30 = vld [vmem:[%s16079_s3 + $0xad8] sm:$0xff] }
 0x3c5   :  { %9341 = vmatpush1.bf16.msra.mxu0 %v11652_v54  ;;  %9219 = vmatprep.subr.bf16.mxu1 %v11683_v56  ;;  %v10599_v54 = vcombine.high %v461_v42, %v477_v43  ;;  %v10601_v56 = vcombine.high %v462_v44, %v478_v45  ;;  %v669_v42 = vld [vmem:[%s16079_s3 + $0xbd0] sm:$0xff]  ;;  %v654_v43 = vld [vmem:[%s16079_s3 + $0xb58] sm:$0xff] }
 0x3c6   :  { %9342 = vmatprep.subr.bf16.mxu0 %v11685_v57  ;;  %v493_v57 = vld [vmem:[%s16079_s3 + $0x650] sm:$0xff] }
 0x3c7   :  { %v10630_v8 = vcombine.low %v493_v57, %v509_v58 }
 0x3c8   :  { %9220 = vmatpush1.bf16.msra.mxu1 %v11682_v34  ;;  %v10600_v34 = vcombine.low %v462_v44, %v478_v45  ;;  %v670_v44 = vld [vmem:[%s16079_s3 + $0xbd8] sm:$0xff] }
 0x3c9   :  { %9343 = vmatpush1.bf16.msra.mxu0 %v11684_v0  ;;  %9369 = vmatprep.subr.bf16.mxu1 %v10439_v2  ;;  %v10631_v0 = vcombine.high %v493_v57, %v509_v58  ;;  %v10633_v2 = vcombine.high %v494_v59, %v510_v61  ;;  %v701_v57 = vld [vmem:[%s16079_s3 + $0xcd0] sm:$0xff]  ;;  %v686_v58 = vld [vmem:[%s16079_s3 + $0xc58] sm:$0xff] }
 0x3ca   :  { %9492 = vmatprep.subr.bf16.mxu0 %v10441_v3  ;;  %v525_v3 = vld [vmem:[%s16079_s3 + $0x750] sm:$0xff]  ;;  %v702_v59 = vld [vmem:[%s16079_s3 + $0xcd8] sm:$0xff] }
 0x3cb   :  { %9238 = vmatmul.mubr.bf16.vlgmr.msra.gmra.mrb[20].mxu1 %v12535_v49  ;;  %v10662_v17 = vcombine.low %v525_v3, %v541_v5 }
 0x3cc   :  { %9361 = vmatmul.mubr.bf16.vlgmr.msra.gmra.mrb[24].mxu0 %v12535_v49  ;;  %9370 = vmatpush1.bf16.msra.mxu1 %v10438_v7  ;;  %v542_v7 = vld [vmem:[%s16079_s3 + $0x7d8] sm:$0xff] }
 0x3cd   :  { %9401 = vmatprep.mubr.bf16.mxu1 %v12224_v60  ;;  %9493 = vmatpush1.bf16.msra.mxu0 %v10440_v11  ;;  %v10663_v11 = vcombine.high %v525_v3, %v541_v5  ;;  %v733_v3 = vld [vmem:[%s16079_s3 + $0xdd0] sm:$0xff]  ;;  %v718_v5 = vld [vmem:[%s16079_s3 + $0xd58] sm:$0xff] }
 0x3ce   :  { %9524 = vmatprep.mubr.bf16.mxu0 %v12224_v60  ;;  %9371 = vmatprep.subr.bf16.mxu1 %v10471_v12  ;;  %v10665_v12 = vcombine.high %v526_v6, %v542_v7 }
 0x3cf   :  { %9494 = vmatprep.subr.bf16.mxu0 %v10473_v16  ;;  %v558_v16 = vld [vmem:[%s16079_s3 + $0x858] sm:$0xff] }
 0x3d0   :  { %9372 = vmatpush1.bf16.msra.mxu1 %v10470_v18  ;;  %v10664_v18 = vcombine.low %v526_v6, %v542_v7  ;;  %v734_v6 = vld [vmem:[%s16079_s3 + $0xdd8] sm:$0xff] }
 0x3d1   :  { %9495 = vmatpush1.bf16.msra.mxu0 %v10472_v19  ;;  %9373 = vmatprep.subr.bf16.mxu1 %v10503_v36  ;;  %v10695_v19 = vcombine.high %v557_v13, %v573_v15  ;;  %v10697_v36 = vcombine.high %v558_v16, %v574_v52  ;;  %v765_v13 = vld [vmem:[%s16079_s3 + $0xed0] sm:$0xff]  ;;  %v11896_v15 = vld [vmem:[%s16082_s4 + $0x8] sm:$0xff] }
 0x3d2   :  { %9496 = vmatprep.subr.bf16.mxu0 %v10505_v20  ;;  %v589_v20 = vld [vmem:[%s16079_s3 + $0x950] sm:$0xff] }
 0x3d3   :  { %v10726_v31 = vcombine.low %v589_v20, %v605_v21 }
 0x3d4   :  { %9374 = vmatpush1.bf16.msra.mxu1 %v10502_v25  ;;  %v10696_v25 = vcombine.low %v558_v16, %v574_v52  ;;  %v1630_v16 = vrot.slane %v11896_v15, %v12479_v4  ;;  %v750_v52 = vld [vmem:[%s16079_s3 + $0xe58] sm:$0xff] }
 0x3d5   :  { %9497 = vmatpush1.bf16.msra.mxu0 %v10504_v26  ;;  %9375 = vmatprep.subr.bf16.mxu1 %v10535_v27  ;;  %v10727_v26 = vcombine.high %v589_v20, %v605_v21  ;;  %v10729_v27 = vcombine.high %v590_v22, %v606_v23  ;;  %v1642_v20 = vrot.slane %v11896_v15, %v13704_v55 }
 0x3d6   :  { %9498 = vmatprep.subr.bf16.mxu0 %v10537_v14  ;;  %v621_v14 = vld [vmem:[%s16079_s3 + $0xa50] sm:$0xff]  ;;  %v10856_v21 = vcombine.low %v718_v5, %v734_v6 }
 0x3d7   :  { %v10758_v45 = vcombine.low %v621_v14, %v637_v28 }
 0x3d8   :  { %9376 = vmatpush1.bf16.msra.mxu1 %v10534_v32  ;;  %v10728_v32 = vcombine.low %v590_v22, %v606_v23  ;;  %v781_v23 = vld [vmem:[%s16079_s3 + $0xf50] sm:$0xff] }
 0x3d9   :  { %9499 = vmatpush1.bf16.msra.mxu0 %v10536_v38  ;;  %9377 = vmatprep.subr.bf16.mxu1 %v10567_v39  ;;  %v10759_v38 = vcombine.high %v621_v14, %v637_v28  ;;  %v10761_v39 = vcombine.high %v622_v29, %v638_v30  ;;  %v798_v14 = vld [vmem:[%s16079_s3 + $0xfd8] sm:$0xff] }
 0x3da   :  { %9500 = vmatprep.subr.bf16.mxu0 %v10569_v41  ;;  %v653_v41 = vld [vmem:[%s16079_s3 + $0xb50] sm:$0xff] }
 0x3db   :  { %v10790_v61 = vcombine.low %v653_v41, %v669_v42 }
 0x3dc   :  { %9378 = vmatpush1.bf16.msra.mxu1 %v10566_v47  ;;  %v10760_v47 = vcombine.low %v622_v29, %v638_v30 }
 0x3dd   :  { %9501 = vmatpush1.bf16.msra.mxu0 %v10568_v48  ;;  %9379 = vmatprep.subr.bf16.mxu1 %v10599_v54  ;;  %v10791_v48 = vcombine.high %v653_v41, %v669_v42  ;;  %v10793_v54 = vcombine.high %v654_v43, %v670_v44 }
 0x3de   :  { %9502 = vmatprep.subr.bf16.mxu0 %v10601_v56  ;;  %v685_v56 = vld [vmem:[%s16079_s3 + $0xc50] sm:$0xff] }
 0x3df   :  { %v10822_v7 = vcombine.low %v685_v56, %v701_v57 }
 0x3e0   :  { %9380 = vmatpush1.bf16.msra.mxu1 %v10598_v62  ;;  %v10792_v62 = vcombine.low %v654_v43, %v670_v44  ;;  %v813_v44 = vld [vmem:[%s16079_s3 + $0x1050] sm:$0xff] }
 0x3e1   :  { %9503 = vmatpush1.bf16.msra.mxu0 %v10600_v34  ;;  %9381 = vmatprep.subr.bf16.mxu1 %v10631_v0  ;;  %v10823_v34 = vcombine.high %v685_v56, %v701_v57  ;;  %v10825_v0 = vcombine.high %v686_v58, %v702_v59  ;;  %v829_v57 = vld [vmem:[%s16079_s3 + $0x10d0] sm:$0xff] }
 0x3e2   :  { %9504 = vmatprep.subr.bf16.mxu0 %v10633_v2  ;;  %v717_v2 = vld [vmem:[%s16079_s3 + $0xd50] sm:$0xff] }
 0x3e4   :  { %9382 = vmatpush1.bf16.msra.mxu1 %v10630_v8  ;;  %v10824_v8 = vcombine.low %v686_v58, %v702_v59 }
 0x3e5   :  { %9505 = vmatpush1.bf16.msra.mxu0 %v10632_v9  ;;  %9383 = vmatprep.subr.bf16.mxu1 %v10663_v11  ;;  %v10855_v9 = vcombine.high %v717_v2, %v733_v3  ;;  %v10857_v11 = vcombine.high %v718_v5, %v734_v6 }
 0x3e6   :  { %9506 = vmatprep.subr.bf16.mxu0 %v10665_v12  ;;  %v749_v12 = vld [vmem:[%s16079_s3 + $0xe50] sm:$0xff] }
 0x3e7   :  { %v10887_v22 = vcombine.high %v749_v12, %v765_v13 }
 0x3e8   :  { %9384 = vmatpush1.bf16.msra.mxu1 %v10662_v17  ;;  %v766_v17 = vld [vmem:[%s16079_s3 + $0xed8] sm:$0xff] }
 0x3e9   :  { %9507 = vmatpush1.bf16.msra.mxu0 %v10664_v18  ;;  %9385 = vmatprep.subr.bf16.mxu1 %v10695_v19  ;;  %v1638_v18 = vrot.slane %v11896_v15, %v13698_v51  ;;  %v1634_v19 = vrot.slane %v11896_v15, %v13701_v53  ;;  %v10888_v42 = vcombine.low %v750_v52, %v766_v17 }
 0x3ea   :  { %9508 = vmatprep.subr.bf16.mxu0 %v10697_v36  ;;  %v10854_v36 = vcombine.low %v717_v2, %v733_v3  ;;  %v830_v2 = vld [vmem:[%s16079_s3 + $0x10d8] sm:$0xff] }
 0x3ec   :  { %9386 = vmatpush1.bf16.msra.mxu1 %v10694_v24  ;;  %v797_v24 = vld [vmem:[%s16079_s3 + $0xfd0] sm:$0xff] }
 0x3ed   :  { %9509 = vmatpush1.bf16.msra.mxu0 %v10696_v25  ;;  %9387 = vmatprep.subr.bf16.mxu1 %v10727_v26  ;;  %v10889_v26 = vcombine.high %v750_v52, %v766_v17  ;;  %v10919_v43 = vcombine.high %v781_v23, %v797_v24  ;;  %v10918_v6 = vcombine.low %v781_v23, %v797_v24  ;;  %v861_v52 = vld [vmem:[%s16079_s3 + $0x11d0] sm:$0xff] }
 0x3ee   :  { %9510 = vmatprep.subr.bf16.mxu0 %v10729_v27  ;;  %v782_v27 = vld [vmem:[%s16079_s3 + $0xf58] sm:$0xff]  ;;  %v877_v23 = vld [vmem:[%s16079_s3 + $0x1250] sm:$0xff] }
 0x3ef   :  { %v10921_v56 = vcombine.high %v782_v27, %v798_v14  ;;  %v893_v24 = vld [vmem:[%s16079_s3 + $0x12d0] sm:$0xff] }
 0x3f0   :  { %9388 = vmatpush1.bf16.msra.mxu1 %v10726_v31  ;;  %v10886_v31 = vcombine.low %v749_v12, %v765_v13 }
 0x3f1   :  { %9511 = vmatpush1.bf16.msra.mxu0 %v10728_v32  ;;  %9389 = vmatprep.subr.bf16.mxu1 %v10759_v38 }
 0x3f2   :  { %9512 = vmatprep.subr.bf16.mxu0 %v10761_v39 }
 0x3f4   :  { %9390 = vmatpush1.bf16.msra.mxu1 %v10758_v45 }
 0x3f5   :  { %9513 = vmatpush1.bf16.msra.mxu0 %v10760_v47  ;;  %9391 = vmatprep.subr.bf16.mxu1 %v10791_v48 }
 0x3f6   :  { %9514 = vmatprep.subr.bf16.mxu0 %v10793_v54 }
 0x3f8   :  { %9392 = vmatpush1.bf16.msra.mxu1 %v10790_v61 }
 0x3f9   :  { %9515 = vmatpush1.bf16.msra.mxu0 %v10792_v62  ;;  %9393 = vmatprep.subr.bf16.mxu1 %v10823_v34 }
 0x3fa   :  { %9516 = vmatprep.subr.bf16.mxu0 %v10825_v0  ;;  %v814_v0 = vld [vmem:[%s16079_s3 + $0x1058] sm:$0xff] }
 0x3fb   :  { %v10953_v13 = vcombine.high %v814_v0, %v830_v2 }
 0x3fc   :  { %9394 = vmatpush1.bf16.msra.mxu1 %v10822_v7  ;;  %v10920_v7 = vcombine.low %v782_v27, %v798_v14  ;;  %v894_v27 = vld [vmem:[%s16079_s3 + $0x12d8] sm:$0xff] }
 0x3fd   :  { %9517 = vmatpush1.bf16.msra.mxu0 %v10824_v8  ;;  %9395 = vmatprep.subr.bf16.mxu1 %v10855_v9 }
 0x3fe   :  { %v8993_v25 = vpop.f32.mrb[16].mxu1  ;;  %9518 = vmatprep.subr.bf16.mxu0 %v10857_v11  ;;  %v10951_v11 = vcombine.high %v813_v44, %v829_v57 }
 0x3ff   :  { %v11724_v28 = vadd.f32 %v8993_v25, %v1630_v16  ;;  %v9116_v29 = vpop.f32.mrb[20].mxu0  ;;  %v8995_v30 = vpop.f32.mrb[17].mxu1  ;;  %v845_v16 = vld [vmem:[%s16079_s3 + $0x1150] sm:$0xff] }
 0x400   :  { %v11726_v32 = vadd.f32 %v9116_v29, %v1638_v18  ;;  %v11725_v38 = vadd.f32 %v8995_v30, %v1634_v19  ;;  %v9118_v39 = vpop.f32.mrb[21].mxu0  ;;  %v8997_v41 = vpop.f32.mrb[18].mxu1  ;;  %9396 = vmatpush1.bf16.msra.mxu1 %v10854_v36  ;;  %v10950_v18 = vcombine.low %v813_v44, %v829_v57  ;;  %v846_v19 = vld [vmem:[%s16079_s3 + $0x1158] sm:$0xff]  ;;  %v10982_v14 = vcombine.low %v845_v16, %v861_v52 }
 0x401   :  { %vm10119_vm4 = vcmp.gt.f32.partialorder %v11724_v28, 0.0  ;;  %v10151_v45 = vmul.f32 0.2, %v11724_v28  ;;  %v11727_v47 = vadd.f32 %v9118_v39, %v1642_v20  ;;  %v9120_v48 = vpop.f32.mrb[22].mxu0  ;;  %9519 = vmatpush1.bf16.msra.mxu0 %v10856_v21  ;;  %v8998_v54 = vpop.f32.mrb[19].mxu1  ;;  %9397 = vmatprep.subr.bf16.mxu1 %v10887_v22  ;;  %v862_v36 = vld [vmem:[%s16079_s3 + $0x11d8] sm:$0xff]  ;;  %v10952_v20 = vcombine.low %v814_v0, %v830_v2 }
 0x402   :  { %vm10121_vm5 = vcmp.gt.f32.partialorder %v11726_v32, 0.0  ;;  %v10153_v58 = vmul.f32 0.2, %v11726_v32  ;;  %vm10120_vm6 = vcmp.gt.f32.partialorder %v11725_v38, 0.0  ;;  %v10152_v59 = vmul.f32 0.2, %v11725_v38  ;;  %9520 = vmatprep.subr.bf16.mxu0 %v10889_v26 }
 0x403   :  { %v10183_v61 = vsel %vm10119_vm4, %v11724_v28, %v10151_v45  ;;  %vm10122_vm7 = vcmp.gt.f32.partialorder %v11727_v47, 0.0  ;;  %v10154_v62 = vmul.f32 0.2, %v11727_v47  ;;  %v9121_v34 = vpop.f32.mrb[23].mxu0  ;;  %v10983_v22 = vcombine.high %v845_v16, %v861_v52  ;;  %v878_v26 = vld [vmem:[%s16079_s3 + $0x1258] sm:$0xff]  ;;  %v941_v45 = vld [vmem:[%s16079_s3 + $0x1450] sm:$0xff] }
 0x404   :  { %v10185_v3 = vsel %vm10121_vm5, %v11726_v32, %v10153_v58  ;;  %v10184_v5 = vsel %vm10120_vm6, %v11725_v38, %v10152_v59  ;;  %9398 = vmatpush1.bf16.msra.mxu1 %v10886_v31  ;;  %v10985_v25 = vcombine.high %v846_v19, %v862_v36  ;;  %v10984_v28 = vcombine.low %v846_v19, %v862_v36  ;;  %v909_v31 = vld [vmem:[%s16079_s3 + $0x1350] sm:$0xff]  ;;  %v910_v38 = vld [vmem:[%s16079_s3 + $0x1358] sm:$0xff] }
 0x405   :  { %v10286_v8 = vcombine.low %v10183_v61, %v10184_v5  ;;  %v10186_v9 = vsel %vm10122_vm7, %v11727_v47, %v10154_v62  ;;  %9521 = vmatpush1.bf16.msra.mxu0 %v10888_v42  ;;  %9399 = vmatprep.subr.bf16.mxu1 %v10919_v43  ;;  %v11015_v29 = vcombine.high %v877_v23, %v893_v24  ;;  %v925_v32 = vld [vmem:[%s16079_s3 + $0x13d0] sm:$0xff]  ;;  %v926_v39 = vld [vmem:[%s16079_s3 + $0x13d8] sm:$0xff]  ;;  %vm10386_vm4 = vcmask 1041408  }
 0x406   :  { %v10287_v12 = vcombine.low %v10185_v3, %v10186_v9  ;;  %9522 = vmatprep.subr.bf16.mxu0 %v10921_v56  ;;  %v11017_v30 = vcombine.high %v878_v26, %v894_v27  ;;  %v11014_v41 = vcombine.low %v877_v23, %v893_v24  ;;  %v11016_v42 = vcombine.low %v878_v26, %v894_v27  ;;  %v957_v47 = vld [vmem:[%s16079_s3 + $0x14d0] sm:$0xff]  ;;  %v942_v48 = vld [vmem:[%s16079_s3 + $0x1458] sm:$0xff] }
 0x407   :  { %v10294_v15 = vrot.slane %v10286_v8, %v13227_v46  ;;  %v11047_v43 = vcombine.high %v909_v31, %v925_v32  ;;  %v11049_v44 = vcombine.high %v910_v38, %v926_v39  ;;  %v958_v54 = vld [vmem:[%s16079_s3 + $0x14d8] sm:$0xff]  ;;  %v11046_v56 = vcombine.low %v909_v31, %v925_v32  ;;  %v973_v61 = vld [vmem:[%s16079_s3 + $0x1550] sm:$0xff] }
 0x408   :  { %v10301_v17 = vrot.slane %v10287_v12, %v13227_v46  ;;  %9400 = vmatpush1.bf16.msra.mxu1 %v10918_v6  ;;  %v11048_v57 = vcombine.low %v910_v38, %v926_v39  ;;  %v11079_v58 = vcombine.high %v941_v45, %v957_v47  ;;  %v11081_v59 = vcombine.high %v942_v48, %v958_v54  ;;  %v989_v62 = vld [vmem:[%s16079_s3 + $0x15d0] sm:$0xff]  ;;  %v974_v34 = vld [vmem:[%s16079_s3 + $0x1558] sm:$0xff] }
 0x409   :  { %9523 = vmatpush1.bf16.msra.mxu0 %v10920_v7  ;;  %9410 = vmatprep.subr.bf16.mxu1 %v10951_v11  ;;  %v990_v0 = vld [vmem:[%s16079_s3 + $0x15d8] sm:$0xff]  ;;  %v11078_v2 = vcombine.low %v941_v45, %v957_v47  ;;  %v11080_v3 = vcombine.low %v942_v48, %v958_v54  ;;  %v11111_v5 = vcombine.high %v973_v61, %v989_v62  ;;  %v1005_v7 = vld [vmem:[%s16079_s3 + $0x1650] sm:$0xff]  ;;  %vm10387_vm5 = vcmask 1043458  }
 0x40a   :  { %v10302_v21 = vcombine.low %v10294_v15, %v10301_v17  ;;  %9533 = vmatprep.subr.bf16.mxu0 %v10953_v13  ;;  %v11113_v6 = vcombine.high %v974_v34, %v990_v0  ;;  %v1021_v8 = vld [vmem:[%s16079_s3 + $0x16d0] sm:$0xff]  ;;  %v1006_v9 = vld [vmem:[%s16079_s3 + $0x1658] sm:$0xff]  ;;  %v11110_v12 = vcombine.low %v973_v61, %v989_v62  ;;  %v11112_v13 = vcombine.low %v974_v34, %v990_v0 }
 0x40b   :  { %9402 = vmatmul.mubr.bf16.vlgmr.msra.gmra.mrb[24].mxu1 %v12226_v63  ;;  %v1022_v11 = vld [vmem:[%s16079_s3 + $0x16d8] sm:$0xff]  ;;  %v11143_v15 = vcombine.high %v1005_v7, %v1021_v8  ;;  %v1037_v52 = vld [vmem:[%s16079_s3 + $0x1750] sm:$0xff]  ;;  %v11142_v36 = vcombine.low %v1005_v7, %v1021_v8 }
 0x40c   :  { %10382 = vst [vmem:[%s16083_s5 + $0x18] sm:$0xff] %v10302_v21  ;;  %9525 = vmatmul.mubr.bf16.vlgmr.msra.gmra.mrb[28].mxu0 %v12226_v63  ;;  %9411 = vmatpush1.bf16.msra.mxu1 %v10950_v18  ;;  %v11145_v16 = vcombine.high %v1006_v9, %v1022_v11  ;;  %v1053_v17 = vld [vmem:[%s16079_s3 + $0x17d0] sm:$0xff]  ;;  %v1038_v18 = vld [vmem:[%s16079_s3 + $0x1758] sm:$0xff] }
 0x40d   :  { %9442 = vmatprep.mubr.bf16.mxu1 %v12244_v10  ;;  %9534 = vmatpush1.bf16.msra.mxu0 %v10952_v20  ;;  %v1054_v19 = vld [vmem:[%s16079_s3 + $0x17d8] sm:$0xff]  ;;  %v11144_v20 = vcombine.low %v1006_v9, %v1022_v11  ;;  %v11175_v21 = vcombine.high %v1037_v52, %v1053_v17  ;;  %v1069_v23 = vld [vmem:[%s16079_s3 + $0x1850] sm:$0xff]  ;;  %v11174_v27 = vcombine.low %v1037_v52, %v1053_v17 }
 0x40e   :  { %9565 = vmatprep.mubr.bf16.mxu0 %v12244_v10  ;;  %9412 = vmatprep.subr.bf16.mxu1 %v10983_v22  ;;  %v11177_v22 = vcombine.high %v1038_v18, %v1054_v19  ;;  %v1085_v24 = vld [vmem:[%s16079_s3 + $0x18d0] sm:$0xff]  ;;  %v1086_v26 = vld [vmem:[%s16079_s3 + $0x18d8] sm:$0xff] }
 0x40f   :  { %9535 = vmatprep.subr.bf16.mxu0 %v10985_v25  ;;  %v1070_v25 = vld [vmem:[%s16079_s3 + $0x1858] sm:$0xff]  ;;  %v1117_v31 = vld [vmem:[%s16079_s3 + $0x19d0] sm:$0xff]  ;;  %v11206_v39 = vcombine.low %v1069_v23, %v1085_v24 }
 0x410   :  { %9413 = vmatpush1.bf16.msra.mxu1 %v10982_v14  ;;  %v11176_v14 = vcombine.low %v1038_v18, %v1054_v19  ;;  %v1102_v32 = vld [vmem:[%s16079_s3 + $0x1958] sm:$0xff]  ;;  %v1149_v45 = vld [vmem:[%s16079_s3 + $0x1ad0] sm:$0xff] }
 0x411   :  { %9536 = vmatpush1.bf16.msra.mxu0 %v10984_v28  ;;  %9414 = vmatprep.subr.bf16.mxu1 %v11015_v29  ;;  %v11207_v28 = vcombine.high %v1069_v23, %v1085_v24  ;;  %v11209_v29 = vcombine.high %v1070_v25, %v1086_v26  ;;  %v1118_v38 = vld [vmem:[%s16079_s3 + $0x19d8] sm:$0xff]  ;;  %v1181_v61 = vld [vmem:[%s16079_s3 + $0x1bd0] sm:$0xff] }
 0x412   :  { %9537 = vmatprep.subr.bf16.mxu0 %v11017_v30  ;;  %v1101_v30 = vld [vmem:[%s16079_s3 + $0x1950] sm:$0xff]  ;;  %v1134_v47 = vld [vmem:[%s16079_s3 + $0x1a58] sm:$0xff] }
 0x413   :  { %v1150_v48 = vld [vmem:[%s16079_s3 + $0x1ad8] sm:$0xff]  ;;  %v11238_v54 = vcombine.low %v1101_v30, %v1117_v31  ;;  %v1213_v7 = vld [vmem:[%s16079_s3 + $0x1cd0] sm:$0xff] }
 0x414   :  { %9415 = vmatpush1.bf16.msra.mxu1 %v11014_v41  ;;  %v11208_v41 = vcombine.low %v1070_v25, %v1086_v26  ;;  %v1166_v62 = vld [vmem:[%s16079_s3 + $0x1b58] sm:$0xff]  ;;  %v1245_v52 = vld [vmem:[%s16079_s3 + $0x1dd0] sm:$0xff] }
 0x415   :  { %9538 = vmatpush1.bf16.msra.mxu0 %v11016_v42  ;;  %9416 = vmatprep.subr.bf16.mxu1 %v11047_v43  ;;  %v11239_v42 = vcombine.high %v1101_v30, %v1117_v31  ;;  %v11241_v43 = vcombine.high %v1102_v32, %v1118_v38  ;;  %v1182_v34 = vld [vmem:[%s16079_s3 + $0x1bd8] sm:$0xff]  ;;  %v1277_v23 = vld [vmem:[%s16079_s3 + $0x1ed0] sm:$0xff] }
 0x416   :  { %9539 = vmatprep.subr.bf16.mxu0 %v11049_v44  ;;  %v1133_v44 = vld [vmem:[%s16079_s3 + $0x1a50] sm:$0xff]  ;;  %v1198_v8 = vld [vmem:[%s16079_s3 + $0x1c58] sm:$0xff] }
 0x417   :  { %v11270_v0 = vcombine.low %v1133_v44, %v1149_v45  ;;  %v1214_v9 = vld [vmem:[%s16079_s3 + $0x1cd8] sm:$0xff]  ;;  %v1309_v30 = vld [vmem:[%s16079_s3 + $0x1fd0] sm:$0xff] }
 0x418   :  { %9417 = vmatpush1.bf16.msra.mxu1 %v11046_v56  ;;  %v11240_v56 = vcombine.low %v1102_v32, %v1118_v38  ;;  %v1230_v17 = vld [vmem:[%s16079_s3 + $0x1d58] sm:$0xff] }
 0x419   :  { %9540 = vmatpush1.bf16.msra.mxu0 %v11048_v57  ;;  %9418 = vmatprep.subr.bf16.mxu1 %v11079_v58  ;;  %v11271_v57 = vcombine.high %v1133_v44, %v1149_v45  ;;  %v11273_v58 = vcombine.high %v1134_v47, %v1150_v48  ;;  %v1246_v18 = vld [vmem:[%s16079_s3 + $0x1dd8] sm:$0xff]  ;;  %v1341_v44 = vld [vmem:[%s16079_s3 + $0x20d0] sm:$0xff] }
 0x41a   :  { %9541 = vmatprep.subr.bf16.mxu0 %v11081_v59  ;;  %v1165_v59 = vld [vmem:[%s16079_s3 + $0x1b50] sm:$0xff]  ;;  %v1262_v24 = vld [vmem:[%s16079_s3 + $0x1e58] sm:$0xff] }
 0x41b   :  { %v11302_v11 = vcombine.low %v1165_v59, %v1181_v61  ;;  %v1278_v25 = vld [vmem:[%s16079_s3 + $0x1ed8] sm:$0xff] }
 0x41c   :  { %9419 = vmatpush1.bf16.msra.mxu1 %v11078_v2  ;;  %v11272_v2 = vcombine.low %v1134_v47, %v1150_v48  ;;  %v1294_v31 = vld [vmem:[%s16079_s3 + $0x1f58] sm:$0xff] }
 0x41d   :  { %9542 = vmatpush1.bf16.msra.mxu0 %v11080_v3  ;;  %9420 = vmatprep.subr.bf16.mxu1 %v11111_v5  ;;  %v11303_v3 = vcombine.high %v1165_v59, %v1181_v61  ;;  %v11305_v5 = vcombine.high %v1166_v62, %v1182_v34  ;;  %v1310_v32 = vld [vmem:[%s16079_s3 + $0x1fd8] sm:$0xff]  ;;  %v1373_v59 = vld [vmem:[%s16079_s3 + $0x21d0] sm:$0xff] }
 0x41e   :  { %9543 = vmatprep.subr.bf16.mxu0 %v11113_v6  ;;  %v1197_v6 = vld [vmem:[%s16079_s3 + $0x1c50] sm:$0xff]  ;;  %v1326_v45 = vld [vmem:[%s16079_s3 + $0x2058] sm:$0xff] }
 0x41f   :  { %v11334_v19 = vcombine.low %v1197_v6, %v1213_v7  ;;  %v1342_v47 = vld [vmem:[%s16079_s3 + $0x20d8] sm:$0xff] }
 0x420   :  { %9421 = vmatpush1.bf16.msra.mxu1 %v11110_v12  ;;  %v11304_v12 = vcombine.low %v1166_v62, %v1182_v34  ;;  %v1358_v61 = vld [vmem:[%s16079_s3 + $0x2158] sm:$0xff] }
 0x421   :  { %9544 = vmatpush1.bf16.msra.mxu0 %v11112_v13  ;;  %9422 = vmatprep.subr.bf16.mxu1 %v11143_v15  ;;  %v11335_v13 = vcombine.high %v1197_v6, %v1213_v7  ;;  %v11337_v15 = vcombine.high %v1198_v8, %v1214_v9  ;;  %v1374_v62 = vld [vmem:[%s16079_s3 + $0x21d8] sm:$0xff]  ;;  %v1405_v6 = vld [vmem:[%s16079_s3 + $0x22d0] sm:$0xff] }
 0x422   :  { %9545 = vmatprep.subr.bf16.mxu0 %v11145_v16  ;;  %v1229_v16 = vld [vmem:[%s16079_s3 + $0x1d50] sm:$0xff]  ;;  %v1390_v7 = vld [vmem:[%s16079_s3 + $0x2258] sm:$0xff] }
 0x423   :  { %v11366_v26 = vcombine.low %v1229_v16, %v1245_v52 }
 0x424   :  { %9423 = vmatpush1.bf16.msra.mxu1 %v11142_v36  ;;  %v11336_v36 = vcombine.low %v1198_v8, %v1214_v9  ;;  %v1406_v8 = vld [vmem:[%s16079_s3 + $0x22d8] sm:$0xff] }
 0x425   :  { %9546 = vmatpush1.bf16.msra.mxu0 %v11144_v20  ;;  %9424 = vmatprep.subr.bf16.mxu1 %v11175_v21  ;;  %v11367_v20 = vcombine.high %v1229_v16, %v1245_v52  ;;  %v11369_v21 = vcombine.high %v1230_v17, %v1246_v18  ;;  %v1437_v16 = vld [vmem:[%s16079_s3 + $0x23d0] sm:$0xff]  ;;  %v1422_v52 = vld [vmem:[%s16079_s3 + $0x2358] sm:$0xff] }
 0x426   :  { %9547 = vmatprep.subr.bf16.mxu0 %v11177_v22  ;;  %v1261_v22 = vld [vmem:[%s16079_s3 + $0x1e50] sm:$0xff] }
 0x427   :  { %v11398_v38 = vcombine.low %v1261_v22, %v1277_v23 }
 0x428   :  { %9425 = vmatpush1.bf16.msra.mxu1 %v11174_v27  ;;  %v11368_v27 = vcombine.low %v1230_v17, %v1246_v18  ;;  %v1438_v17 = vld [vmem:[%s16079_s3 + $0x23d8] sm:$0xff] }
 0x429   :  { %9548 = vmatpush1.bf16.msra.mxu0 %v11176_v14  ;;  %9426 = vmatprep.subr.bf16.mxu1 %v11207_v28  ;;  %v11399_v14 = vcombine.high %v1261_v22, %v1277_v23  ;;  %v11401_v28 = vcombine.high %v1262_v24, %v1278_v25  ;;  %v1469_v22 = vld [vmem:[%s16079_s3 + $0x24d0] sm:$0xff]  ;;  %v1454_v23 = vld [vmem:[%s16079_s3 + $0x2458] sm:$0xff] }
 0x42a   :  { %9549 = vmatprep.subr.bf16.mxu0 %v11209_v29  ;;  %v1293_v29 = vld [vmem:[%s16079_s3 + $0x1f50] sm:$0xff] }
 0x42b   :  { %v11430_v48 = vcombine.low %v1293_v29, %v1309_v30 }
 0x42c   :  { %9427 = vmatpush1.bf16.msra.mxu1 %v11206_v39  ;;  %v11400_v39 = vcombine.low %v1262_v24, %v1278_v25  ;;  %v1470_v24 = vld [vmem:[%s16079_s3 + $0x24d8] sm:$0xff] }
 0x42d   :  { %9550 = vmatpush1.bf16.msra.mxu0 %v11208_v41  ;;  %9428 = vmatprep.subr.bf16.mxu1 %v11239_v42  ;;  %v11431_v41 = vcombine.high %v1293_v29, %v1309_v30  ;;  %v11433_v42 = vcombine.high %v1294_v31, %v1310_v32  ;;  %v1501_v29 = vld [vmem:[%s16079_s3 + $0x25d0] sm:$0xff]  ;;  %v1486_v30 = vld [vmem:[%s16079_s3 + $0x2558] sm:$0xff] }
 0x42e   :  { %9551 = vmatprep.subr.bf16.mxu0 %v11241_v43  ;;  %v1325_v43 = vld [vmem:[%s16079_s3 + $0x2050] sm:$0xff] }
 0x42f   :  { %v11462_v34 = vcombine.low %v1325_v43, %v1341_v44 }
 0x430   :  { %9429 = vmatpush1.bf16.msra.mxu1 %v11238_v54  ;;  %v11432_v54 = vcombine.low %v1294_v31, %v1310_v32  ;;  %v1502_v31 = vld [vmem:[%s16079_s3 + $0x25d8] sm:$0xff] }
 0x431   :  { %9552 = vmatpush1.bf16.msra.mxu0 %v11240_v56  ;;  %9430 = vmatprep.subr.bf16.mxu1 %v11271_v57  ;;  %v11463_v56 = vcombine.high %v1325_v43, %v1341_v44  ;;  %v11465_v57 = vcombine.high %v1326_v45, %v1342_v47  ;;  %v1533_v43 = vld [vmem:[%s16079_s3 + $0x26d0] sm:$0xff]  ;;  %v1518_v44 = vld [vmem:[%s16079_s3 + $0x2658] sm:$0xff] }
 0x432   :  { %9553 = vmatprep.subr.bf16.mxu0 %v11273_v58  ;;  %v1357_v58 = vld [vmem:[%s16079_s3 + $0x2150] sm:$0xff] }
 0x433   :  { %v11494_v9 = vcombine.low %v1357_v58, %v1373_v59 }
 0x434   :  { %9431 = vmatpush1.bf16.msra.mxu1 %v11270_v0  ;;  %v11464_v0 = vcombine.low %v1326_v45, %v1342_v47  ;;  %v1534_v45 = vld [vmem:[%s16079_s3 + $0x26d8] sm:$0xff] }
 0x435   :  { %9554 = vmatpush1.bf16.msra.mxu0 %v11272_v2  ;;  %9432 = vmatprep.subr.bf16.mxu1 %v11303_v3  ;;  %v11495_v2 = vcombine.high %v1357_v58, %v1373_v59  ;;  %v11497_v3 = vcombine.high %v1358_v61, %v1374_v62  ;;  %v1565_v58 = vld [vmem:[%s16079_s3 + $0x27d0] sm:$0xff]  ;;  %v1550_v59 = vld [vmem:[%s16079_s3 + $0x2758] sm:$0xff] }
 0x436   :  { %9555 = vmatprep.subr.bf16.mxu0 %v11305_v5  ;;  %v1389_v5 = vld [vmem:[%s16079_s3 + $0x2250] sm:$0xff] }
 0x437   :  { %v11526_v18 = vcombine.low %v1389_v5, %v1405_v6 }
 0x438   :  { %9433 = vmatpush1.bf16.msra.mxu1 %v11302_v11  ;;  %v11496_v11 = vcombine.low %v1358_v61, %v1374_v62  ;;  %v1566_v61 = vld [vmem:[%s16079_s3 + $0x27d8] sm:$0xff] }
 0x439   :  { %9556 = vmatpush1.bf16.msra.mxu0 %v11304_v12  ;;  %9434 = vmatprep.subr.bf16.mxu1 %v11335_v13  ;;  %v11527_v12 = vcombine.high %v1389_v5, %v1405_v6  ;;  %v11529_v13 = vcombine.high %v1390_v7, %v1406_v8  ;;  %v319_v5 = vld [vmem:[%s16079_s3 + $0xe0] sm:$0xff]  ;;  %v304_v6 = vld [vmem:[%s16079_s3 + $0x68] sm:$0xff] }
 0x43a   :  { %9557 = vmatprep.subr.bf16.mxu0 %v11337_v15  ;;  %v1421_v15 = vld [vmem:[%s16079_s3 + $0x2350] sm:$0xff] }
 0x43b   :  { %v11558_v25 = vcombine.low %v1421_v15, %v1437_v16 }
 0x43c   :  { %9435 = vmatpush1.bf16.msra.mxu1 %v11334_v19  ;;  %v11528_v19 = vcombine.low %v1390_v7, %v1406_v8  ;;  %v320_v7 = vld [vmem:[%s16079_s3 + $0xe8] sm:$0xff] }
 0x43d   :  { %9558 = vmatpush1.bf16.msra.mxu0 %v11336_v36  ;;  %9436 = vmatprep.subr.bf16.mxu1 %v11367_v20  ;;  %v11559_v36 = vcombine.high %v1421_v15, %v1437_v16  ;;  %v11561_v20 = vcombine.high %v1422_v52, %v1438_v17  ;;  %v351_v15 = vld [vmem:[%s16079_s3 + $0x1e0] sm:$0xff] }
 0x43e   :  { %9559 = vmatprep.subr.bf16.mxu0 %v11369_v21  ;;  %v1453_v21 = vld [vmem:[%s16079_s3 + $0x2450] sm:$0xff] }
 0x43f   :  { %v11590_v32 = vcombine.low %v1453_v21, %v1469_v22 }
 0x440   :  { %9437 = vmatpush1.bf16.msra.mxu1 %v11366_v26  ;;  %v11560_v26 = vcombine.low %v1422_v52, %v1438_v17  ;;  %v336_v52 = vld [vmem:[%s16079_s3 + $0x168] sm:$0xff] }
 0x441   :  { %9560 = vmatpush1.bf16.msra.mxu0 %v11368_v27  ;;  %9438 = vmatprep.subr.bf16.mxu1 %v11399_v14  ;;  %v11591_v27 = vcombine.high %v1453_v21, %v1469_v22  ;;  %v11593_v14 = vcombine.high %v1454_v23, %v1470_v24  ;;  %v352_v17 = vld [vmem:[%s16079_s3 + $0x1e8] sm:$0xff] }
 0x442   :  { %9561 = vmatprep.subr.bf16.mxu0 %v11401_v28  ;;  %v1485_v28 = vld [vmem:[%s16079_s3 + $0x2550] sm:$0xff]  ;;  %v10477_v21 = vcombine.high %v336_v52, %v352_v17  ;;  %v368_v22 = vld [vmem:[%s16079_s3 + $0x268] sm:$0xff] }
 0x443   :  { %v11622_v47 = vcombine.low %v1485_v28, %v1501_v29 }
 0x444   :  { %9439 = vmatpush1.bf16.msra.mxu1 %v11398_v38  ;;  %v11592_v38 = vcombine.low %v1454_v23, %v1470_v24  ;;  %v384_v23 = vld [vmem:[%s16079_s3 + $0x2e8] sm:$0xff] }
 0x445   :  { %9562 = vmatpush1.bf16.msra.mxu0 %v11400_v39  ;;  %9440 = vmatprep.subr.bf16.mxu1 %v11431_v41  ;;  %v11623_v39 = vcombine.high %v1485_v28, %v1501_v29  ;;  %v11625_v41 = vcombine.high %v1486_v30, %v1502_v31  ;;  %v415_v28 = vld [vmem:[%s16079_s3 + $0x3e0] sm:$0xff]  ;;  %v400_v29 = vld [vmem:[%s16079_s3 + $0x368] sm:$0xff] }
 0x446   :  { %9563 = vmatprep.subr.bf16.mxu0 %v11433_v42  ;;  %v1517_v42 = vld [vmem:[%s16079_s3 + $0x2650] sm:$0xff] }
 0x447   :  { %v11654_v62 = vcombine.low %v1517_v42, %v1533_v43 }
 0x448   :  { %9441 = vmatpush1.bf16.msra.mxu1 %v11430_v48  ;;  %v11624_v48 = vcombine.low %v1486_v30, %v1502_v31  ;;  %v416_v30 = vld [vmem:[%s16079_s3 + $0x3e8] sm:$0xff] }
 0x449   :  { %9564 = vmatpush1.bf16.msra.mxu0 %v11432_v54  ;;  %9451 = vmatprep.subr.bf16.mxu1 %v11463_v56  ;;  %v11655_v54 = vcombine.high %v1517_v42, %v1533_v43  ;;  %v11657_v56 = vcombine.high %v1518_v44, %v1534_v45  ;;  %v447_v42 = vld [vmem:[%s16079_s3 + $0x4e0] sm:$0xff]  ;;  %v432_v43 = vld [vmem:[%s16079_s3 + $0x468] sm:$0xff] }
 0x44a   :  { %9574 = vmatprep.subr.bf16.mxu0 %v11465_v57  ;;  %v1549_v57 = vld [vmem:[%s16079_s3 + $0x2750] sm:$0xff] }
 0x44b   :  { %9443 = vmatmul.mubr.bf16.vlgmr.msra.gmra.mrb[24].mxu1 %v12436_v33  ;;  %v11686_v8 = vcombine.low %v1549_v57, %v1565_v58 }
 0x44c   :  { %9566 = vmatmul.mubr.bf16.vlgmr.msra.gmra.mrb[28].mxu0 %v12436_v33  ;;  %9452 = vmatpush1.bf16.msra.mxu1 %v11462_v34  ;;  %v11656_v34 = vcombine.low %v1518_v44, %v1534_v45  ;;  %v448_v44 = vld [vmem:[%s16079_s3 + $0x4e8] sm:$0xff] }
 0x44d   :  { %9575 = vmatpush1.bf16.msra.mxu0 %v11464_v0  ;;  %9453 = vmatprep.subr.bf16.mxu1 %v11495_v2  ;;  %v11687_v0 = vcombine.high %v1549_v57, %v1565_v58  ;;  %v11689_v2 = vcombine.high %v1550_v59, %v1566_v61  ;;  %v479_v57 = vld [vmem:[%s16079_s3 + $0x5e0] sm:$0xff]  ;;  %v464_v58 = vld [vmem:[%s16079_s3 + $0x568] sm:$0xff] }
 0x44e   :  { %9576 = vmatprep.subr.bf16.mxu0 %v11497_v3  ;;  %9483 = vmatprep.mubr.bf16.mxu1 %v11898_v1  ;;  %v303_v3 = vld [vmem:[%s16079_s3 + $0x60] sm:$0xff] }
 0x44f   :  { %9606 = vmatprep.mubr.bf16.mxu0 %v11898_v1  ;;  %v10442_v16 = vcombine.low %v303_v3, %v319_v5 }
 0x450   :  { %9454 = vmatpush1.bf16.msra.mxu1 %v11494_v9  ;;  %v11688_v9 = vcombine.low %v1550_v59, %v1566_v61  ;;  %v480_v59 = vld [vmem:[%s16079_s3 + $0x5e8] sm:$0xff] }
 0x451   :  { %9577 = vmatpush1.bf16.msra.mxu0 %v11496_v11  ;;  %9455 = vmatprep.subr.bf16.mxu1 %v11527_v12  ;;  %v10443_v11 = vcombine.high %v303_v3, %v319_v5  ;;  %v10445_v12 = vcombine.high %v304_v6, %v320_v7  ;;  %v511_v3 = vld [vmem:[%s16079_s3 + $0x6e0] sm:$0xff]  ;;  %v496_v5 = vld [vmem:[%s16079_s3 + $0x668] sm:$0xff] }
 0x452   :  { %9578 = vmatprep.subr.bf16.mxu0 %v11529_v13  ;;  %v335_v13 = vld [vmem:[%s16079_s3 + $0x160] sm:$0xff] }
 0x453   :  { %v10474_v24 = vcombine.low %v335_v13, %v351_v15 }
 0x454   :  { %9456 = vmatpush1.bf16.msra.mxu1 %v11526_v18  ;;  %v10444_v18 = vcombine.low %v304_v6, %v320_v7  ;;  %v512_v6 = vld [vmem:[%s16079_s3 + $0x6e8] sm:$0xff] }
 0x455   :  { %9579 = vmatpush1.bf16.msra.mxu0 %v11528_v19  ;;  %9457 = vmatprep.subr.bf16.mxu1 %v11559_v36  ;;  %v10475_v19 = vcombine.high %v335_v13, %v351_v15  ;;  %v367_v36 = vld [vmem:[%s16079_s3 + $0x260] sm:$0xff]  ;;  %v528_v15 = vld [vmem:[%s16079_s3 + $0x768] sm:$0xff] }
 0x456   :  { %9580 = vmatprep.subr.bf16.mxu0 %v11561_v20  ;;  %v383_v20 = vld [vmem:[%s16079_s3 + $0x2e0] sm:$0xff] }
 0x457   :  { %v10506_v31 = vcombine.low %v367_v36, %v383_v20  ;;  %v543_v13 = vld [vmem:[%s16079_s3 + $0x7e0] sm:$0xff] }
 0x458   :  { %9458 = vmatpush1.bf16.msra.mxu1 %v11558_v25  ;;  %v10476_v25 = vcombine.low %v336_v52, %v352_v17  ;;  %v10636_v17 = vcombine.low %v496_v5, %v512_v6 }
 0x459   :  { %9581 = vmatpush1.bf16.msra.mxu0 %v11560_v26  ;;  %9459 = vmatprep.subr.bf16.mxu1 %v11591_v27  ;;  %v10507_v26 = vcombine.high %v367_v36, %v383_v20  ;;  %v10509_v27 = vcombine.high %v368_v22, %v384_v23  ;;  %v559_v36 = vld [vmem:[%s16079_s3 + $0x860] sm:$0xff] }
 0x45a   :  { %9582 = vmatprep.subr.bf16.mxu0 %v11593_v14  ;;  %v399_v14 = vld [vmem:[%s16079_s3 + $0x360] sm:$0xff] }
 0x45b   :  { %v10538_v45 = vcombine.low %v399_v14, %v415_v28  ;;  %v575_v20 = vld [vmem:[%s16079_s3 + $0x8e0] sm:$0xff] }
 0x45c   :  { %9460 = vmatpush1.bf16.msra.mxu1 %v11590_v32  ;;  %v10508_v32 = vcombine.low %v368_v22, %v384_v23  ;;  %v576_v22 = vld [vmem:[%s16079_s3 + $0x8e8] sm:$0xff] }
 0x45d   :  { %9583 = vmatpush1.bf16.msra.mxu0 %v11592_v38  ;;  %9461 = vmatprep.subr.bf16.mxu1 %v11623_v39  ;;  %v10539_v38 = vcombine.high %v399_v14, %v415_v28  ;;  %v10541_v39 = vcombine.high %v400_v29, %v416_v30  ;;  %v607_v14 = vld [vmem:[%s16079_s3 + $0x9e0] sm:$0xff]  ;;  %v592_v28 = vld [vmem:[%s16079_s3 + $0x968] sm:$0xff] }
 0x45e   :  { %9584 = vmatprep.subr.bf16.mxu0 %v11625_v41  ;;  %v431_v41 = vld [vmem:[%s16079_s3 + $0x460] sm:$0xff] }
 0x45f   :  { %v10570_v61 = vcombine.low %v431_v41, %v447_v42 }
 0x460   :  { %9462 = vmatpush1.bf16.msra.mxu1 %v11622_v47  ;;  %v10540_v47 = vcombine.low %v400_v29, %v416_v30  ;;  %v608_v29 = vld [vmem:[%s16079_s3 + $0x9e8] sm:$0xff]  ;;  %v10698_v30 = vcombine.low %v559_v36, %v575_v20 }
 0x461   :  { %9585 = vmatpush1.bf16.msra.mxu0 %v11624_v48  ;;  %9463 = vmatprep.subr.bf16.mxu1 %v11655_v54  ;;  %v10571_v48 = vcombine.high %v431_v41, %v447_v42  ;;  %v10573_v54 = vcombine.high %v432_v43, %v448_v44  ;;  %v639_v41 = vld [vmem:[%s16079_s3 + $0xae0] sm:$0xff]  ;;  %v624_v42 = vld [vmem:[%s16079_s3 + $0xa68] sm:$0xff] }
 0x462   :  { %9586 = vmatprep.subr.bf16.mxu0 %v11657_v56  ;;  %v463_v56 = vld [vmem:[%s16079_s3 + $0x560] sm:$0xff] }
 0x463   :  { %v10602_v7 = vcombine.low %v463_v56, %v479_v57 }
 0x464   :  { %9464 = vmatpush1.bf16.msra.mxu1 %v11654_v62  ;;  %v10572_v62 = vcombine.low %v432_v43, %v448_v44  ;;  %v640_v43 = vld [vmem:[%s16079_s3 + $0xae8] sm:$0xff] }
 0x465   :  { %9587 = vmatpush1.bf16.msra.mxu0 %v11656_v34  ;;  %9465 = vmatprep.subr.bf16.mxu1 %v11687_v0  ;;  %v10603_v34 = vcombine.high %v463_v56, %v479_v57  ;;  %v10605_v0 = vcombine.high %v464_v58, %v480_v59  ;;  %v671_v56 = vld [vmem:[%s16079_s3 + $0xbe0] sm:$0xff]  ;;  %v656_v57 = vld [vmem:[%s16079_s3 + $0xb68] sm:$0xff] }
 0x466   :  { %9588 = vmatprep.subr.bf16.mxu0 %v11689_v2  ;;  %v495_v2 = vld [vmem:[%s16079_s3 + $0x660] sm:$0xff] }
 0x467   :  { %v10634_v52 = vcombine.low %v495_v2, %v511_v3 }
 0x468   :  { %9466 = vmatpush1.bf16.msra.mxu1 %v11686_v8  ;;  %v10604_v8 = vcombine.low %v464_v58, %v480_v59  ;;  %v672_v58 = vld [vmem:[%s16079_s3 + $0xbe8] sm:$0xff] }
 0x469   :  { %9589 = vmatpush1.bf16.msra.mxu0 %v11688_v9  ;;  %9615 = vmatprep.subr.bf16.mxu1 %v10443_v11  ;;  %v10635_v9 = vcombine.high %v495_v2, %v511_v3  ;;  %v10637_v11 = vcombine.high %v496_v5, %v512_v6  ;;  %v703_v2 = vld [vmem:[%s16079_s3 + $0xce0] sm:$0xff]  ;;  %v688_v3 = vld [vmem:[%s16079_s3 + $0xc68] sm:$0xff] }
 0x46a   :  { %9738 = vmatprep.subr.bf16.mxu0 %v10445_v12  ;;  %v527_v12 = vld [vmem:[%s16079_s3 + $0x760] sm:$0xff]  ;;  %v704_v5 = vld [vmem:[%s16079_s3 + $0xce8] sm:$0xff] }
 0x46b   :  { %9484 = vmatmul.mubr.bf16.vlgmr.msra.gmra.mrb[24].mxu1 %v12535_v49  ;;  %v10666_v23 = vcombine.low %v527_v12, %v543_v13 }
 0x46c   :  { %9607 = vmatmul.mubr.bf16.vlgmr.msra.gmra.mrb[28].mxu0 %v12535_v49  ;;  %9616 = vmatpush1.bf16.msra.mxu1 %v10442_v16  ;;  %v544_v16 = vld [vmem:[%s16079_s3 + $0x7e8] sm:$0xff] }
 0x46d   :  { %9647 = vmatprep.mubr.bf16.mxu1 %v12224_v60  ;;  %9739 = vmatpush1.bf16.msra.mxu0 %v10444_v18  ;;  %v10667_v18 = vcombine.high %v527_v12, %v543_v13  ;;  %v735_v12 = vld [vmem:[%s16079_s3 + $0xde0] sm:$0xff]  ;;  %v720_v13 = vld [vmem:[%s16079_s3 + $0xd68] sm:$0xff] }
 0x46e   :  { %9770 = vmatprep.mubr.bf16.mxu0 %v12224_v60  ;;  %9617 = vmatprep.subr.bf16.mxu1 %v10475_v19  ;;  %v10669_v19 = vcombine.high %v528_v15, %v544_v16 }
 0x46f   :  { %9740 = vmatprep.subr.bf16.mxu0 %v10477_v21  ;;  %v560_v21 = vld [vmem:[%s16079_s3 + $0x868] sm:$0xff] }
 0x470   :  { %9618 = vmatpush1.bf16.msra.mxu1 %v10474_v24  ;;  %v10668_v24 = vcombine.low %v528_v15, %v544_v16  ;;  %v736_v15 = vld [vmem:[%s16079_s3 + $0xde8] sm:$0xff] }
 0x471   :  { %9741 = vmatpush1.bf16.msra.mxu0 %v10476_v25  ;;  %9619 = vmatprep.subr.bf16.mxu1 %v10507_v26  ;;  %v10699_v25 = vcombine.high %v559_v36, %v575_v20  ;;  %v10701_v26 = vcombine.high %v560_v21, %v576_v22  ;;  %v751_v36 = vld [vmem:[%s16079_s3 + $0xe60] sm:$0xff] }
 0x472   :  { %9742 = vmatprep.subr.bf16.mxu0 %v10509_v27  ;;  %v591_v27 = vld [vmem:[%s16079_s3 + $0x960] sm:$0xff] }
 0x473   :  { %v10730_v44 = vcombine.low %v591_v27, %v607_v14  ;;  %v767_v20 = vld [vmem:[%s16079_s3 + $0xee0] sm:$0xff] }
 0x474   :  { %9620 = vmatpush1.bf16.msra.mxu1 %v10506_v31  ;;  %v10700_v31 = vcombine.low %v560_v21, %v576_v22  ;;  %v752_v22 = vld [vmem:[%s16079_s3 + $0xe68] sm:$0xff] }
 0x475   :  { %9743 = vmatpush1.bf16.msra.mxu0 %v10508_v32  ;;  %9621 = vmatprep.subr.bf16.mxu1 %v10539_v38  ;;  %v10731_v32 = vcombine.high %v591_v27, %v607_v14  ;;  %v10733_v38 = vcombine.high %v592_v28, %v608_v29  ;;  %v10860_v14 = vcombine.low %v720_v13, %v736_v15 }
 0x476   :  { %9744 = vmatprep.subr.bf16.mxu0 %v10541_v39  ;;  %v623_v39 = vld [vmem:[%s16079_s3 + $0xa60] sm:$0xff] }
 0x477   :  { %v10762_v59 = vcombine.low %v623_v39, %v639_v41 }
 0x478   :  { %9622 = vmatpush1.bf16.msra.mxu1 %v10538_v45  ;;  %v10732_v45 = vcombine.low %v592_v28, %v608_v29  ;;  %v10891_v28 = vcombine.high %v751_v36, %v767_v20  ;;  %v783_v29 = vld [vmem:[%s16079_s3 + $0xf60] sm:$0xff] }
 0x479   :  { %9745 = vmatpush1.bf16.msra.mxu0 %v10540_v47  ;;  %9623 = vmatprep.subr.bf16.mxu1 %v10571_v48  ;;  %v10763_v47 = vcombine.high %v623_v39, %v639_v41  ;;  %v10765_v48 = vcombine.high %v624_v42, %v640_v43  ;;  %v800_v39 = vld [vmem:[%s16079_s3 + $0xfe8] sm:$0xff] }
 0x47a   :  { %9746 = vmatprep.subr.bf16.mxu0 %v10573_v54  ;;  %v655_v54 = vld [vmem:[%s16079_s3 + $0xb60] sm:$0xff] }
 0x47b   :  { %v10794_v6 = vcombine.low %v655_v54, %v671_v56 }
 0x47c   :  { %9624 = vmatpush1.bf16.msra.mxu1 %v10570_v61  ;;  %v10764_v61 = vcombine.low %v624_v42, %v640_v43 }
 0x47d   :  { %9747 = vmatpush1.bf16.msra.mxu0 %v10572_v62  ;;  %9625 = vmatprep.subr.bf16.mxu1 %v10603_v34  ;;  %v10795_v62 = vcombine.high %v655_v54, %v671_v56  ;;  %v10797_v34 = vcombine.high %v656_v57, %v672_v58 }
 0x47e   :  { %9748 = vmatprep.subr.bf16.mxu0 %v10605_v0  ;;  %v687_v0 = vld [vmem:[%s16079_s3 + $0xc60] sm:$0xff] }
 0x47f   :  { %v10826_v16 = vcombine.low %v687_v0, %v703_v2 }
 0x480   :  { %9626 = vmatpush1.bf16.msra.mxu1 %v10602_v7  ;;  %v10796_v7 = vcombine.low %v656_v57, %v672_v58  ;;  %v815_v58 = vld [vmem:[%s16079_s3 + $0x1060] sm:$0xff] }
 0x481   :  { %9749 = vmatpush1.bf16.msra.mxu0 %v10604_v8  ;;  %9627 = vmatprep.subr.bf16.mxu1 %v10635_v9  ;;  %v10827_v8 = vcombine.high %v687_v0, %v703_v2  ;;  %v10829_v9 = vcombine.high %v688_v3, %v704_v5  ;;  %v831_v2 = vld [vmem:[%s16079_s3 + $0x10e0] sm:$0xff] }
 0x482   :  { %9750 = vmatprep.subr.bf16.mxu0 %v10637_v11  ;;  %v719_v11 = vld [vmem:[%s16079_s3 + $0xd60] sm:$0xff] }
 0x484   :  { %9628 = vmatpush1.bf16.msra.mxu1 %v10634_v52  ;;  %v1573_v52 = vld [vmem:[%s16082_s4 + $0x10] sm:$0xff] }
 0x485   :  { %9751 = vmatpush1.bf16.msra.mxu0 %v10636_v17  ;;  %9629 = vmatprep.subr.bf16.mxu1 %v10667_v18  ;;  %v10828_v17 = vcombine.low %v688_v3, %v704_v5  ;;  %v10859_v18 = vcombine.high %v719_v11, %v735_v12  ;;  %v1646_v21 = vrot.slane %v1573_v52, %v12191_v35 }
 0x486   :  { %9752 = vmatprep.subr.bf16.mxu0 %v10669_v19  ;;  %v10861_v19 = vcombine.high %v720_v13, %v736_v15  ;;  %v1658_v27 = vrot.slane %v1573_v52, %v12206_v40 }
 0x488   :  { %9630 = vmatpush1.bf16.msra.mxu1 %v10666_v23  ;;  %v768_v23 = vld [vmem:[%s16079_s3 + $0xee8] sm:$0xff] }
 0x489   :  { %9753 = vmatpush1.bf16.msra.mxu0 %v10668_v24  ;;  %9631 = vmatprep.subr.bf16.mxu1 %v10699_v25  ;;  %v1654_v24 = vrot.slane %v1573_v52, %v12374_v50  ;;  %v1650_v25 = vrot.slane %v1573_v52, %v12199_v37  ;;  %v10892_v56 = vcombine.low %v752_v22, %v768_v23 }
 0x48a   :  { %9754 = vmatprep.subr.bf16.mxu0 %v10701_v26  ;;  %v10858_v26 = vcombine.low %v719_v11, %v735_v12  ;;  %v832_v11 = vld [vmem:[%s16079_s3 + $0x10e8] sm:$0xff] }
 0x48c   :  { %9632 = vmatpush1.bf16.msra.mxu1 %v10698_v30  ;;  %v799_v30 = vld [vmem:[%s16079_s3 + $0xfe0] sm:$0xff] }
 0x48d   :  { %9755 = vmatpush1.bf16.msra.mxu0 %v10700_v31  ;;  %9633 = vmatprep.subr.bf16.mxu1 %v10731_v32  ;;  %v10893_v32 = vcombine.high %v752_v22, %v768_v23  ;;  %v10923_v57 = vcombine.high %v783_v29, %v799_v30  ;;  %v10922_v15 = vcombine.low %v783_v29, %v799_v30  ;;  %v863_v22 = vld [vmem:[%s16079_s3 + $0x11e0] sm:$0xff] }
 0x48e   :  { %9756 = vmatprep.subr.bf16.mxu0 %v10733_v38  ;;  %v784_v38 = vld [vmem:[%s16079_s3 + $0xf68] sm:$0xff]  ;;  %v879_v29 = vld [vmem:[%s16079_s3 + $0x1260] sm:$0xff] }
 0x48f   :  { %v10925_v0 = vcombine.high %v784_v38, %v800_v39  ;;  %v895_v30 = vld [vmem:[%s16079_s3 + $0x12e0] sm:$0xff] }
 0x490   :  { %9634 = vmatpush1.bf16.msra.mxu1 %v10730_v44  ;;  %v10890_v44 = vcombine.low %v751_v36, %v767_v20 }
 0x491   :  { %9757 = vmatpush1.bf16.msra.mxu0 %v10732_v45  ;;  %9635 = vmatprep.subr.bf16.mxu1 %v10763_v47 }
 0x492   :  { %9758 = vmatprep.subr.bf16.mxu0 %v10765_v48 }
 0x494   :  { %9636 = vmatpush1.bf16.msra.mxu1 %v10762_v59 }
 0x495   :  { %9759 = vmatpush1.bf16.msra.mxu0 %v10764_v61  ;;  %9637 = vmatprep.subr.bf16.mxu1 %v10795_v62 }
 0x496   :  { %9760 = vmatprep.subr.bf16.mxu0 %v10797_v34 }
 0x498   :  { %9638 = vmatpush1.bf16.msra.mxu1 %v10794_v6 }
 0x499   :  { %9761 = vmatpush1.bf16.msra.mxu0 %v10796_v7  ;;  %9639 = vmatprep.subr.bf16.mxu1 %v10827_v8 }
 0x49a   :  { %9762 = vmatprep.subr.bf16.mxu0 %v10829_v9  ;;  %v816_v9 = vld [vmem:[%s16079_s3 + $0x1068] sm:$0xff] }
 0x49b   :  { %v10957_v36 = vcombine.high %v816_v9, %v832_v11 }
 0x49c   :  { %9640 = vmatpush1.bf16.msra.mxu1 %v10826_v16  ;;  %v10924_v16 = vcombine.low %v784_v38, %v800_v39  ;;  %v896_v38 = vld [vmem:[%s16079_s3 + $0x12e8] sm:$0xff] }
 0x49d   :  { %9763 = vmatpush1.bf16.msra.mxu0 %v10828_v17  ;;  %9641 = vmatprep.subr.bf16.mxu1 %v10859_v18  ;;  %v10955_v18 = vcombine.high %v815_v58, %v831_v2 }
 0x49e   :  { %v9239_v31 = vpop.f32.mrb[20].mxu1  ;;  %9764 = vmatprep.subr.bf16.mxu0 %v10861_v19 }
 0x49f   :  { %v11728_v41 = vadd.f32 %v9239_v31, %v1646_v21  ;;  %v9362_v42 = vpop.f32.mrb[24].mxu0  ;;  %v9241_v43 = vpop.f32.mrb[21].mxu1  ;;  %v847_v21 = vld [vmem:[%s16079_s3 + $0x1160] sm:$0xff] }
 0x4a0   :  { %v11730_v45 = vadd.f32 %v9362_v42, %v1654_v24  ;;  %v11729_v47 = vadd.f32 %v9241_v43, %v1650_v25  ;;  %v9364_v48 = vpop.f32.mrb[25].mxu0  ;;  %v9243_v54 = vpop.f32.mrb[22].mxu1  ;;  %9642 = vmatpush1.bf16.msra.mxu1 %v10858_v26  ;;  %v10954_v24 = vcombine.low %v815_v58, %v831_v2  ;;  %v848_v25 = vld [vmem:[%s16079_s3 + $0x1168] sm:$0xff]  ;;  %v10986_v39 = vcombine.low %v847_v21, %v863_v22 }
 0x4a1   :  { %vm10123_vm8 = vcmp.gt.f32.partialorder %v11728_v41, 0.0  ;;  %v10155_v59 = vmul.f32 0.2, %v11728_v41  ;;  %v11731_v61 = vadd.f32 %v9364_v48, %v1658_v27  ;;  %v9366_v62 = vpop.f32.mrb[26].mxu0  ;;  %9765 = vmatpush1.bf16.msra.mxu0 %v10860_v14  ;;  %v9244_v34 = vpop.f32.mrb[23].mxu1  ;;  %9643 = vmatprep.subr.bf16.mxu1 %v10891_v28  ;;  %v864_v26 = vld [vmem:[%s16079_s3 + $0x11e8] sm:$0xff]  ;;  %v10956_v27 = vcombine.low %v816_v9, %v832_v11 }
 0x4a2   :  { %vm10125_vm9 = vcmp.gt.f32.partialorder %v11730_v45, 0.0  ;;  %v10157_v3 = vmul.f32 0.2, %v11730_v45  ;;  %vm10124_vm10 = vcmp.gt.f32.partialorder %v11729_v47, 0.0  ;;  %v10156_v5 = vmul.f32 0.2, %v11729_v47  ;;  %9766 = vmatprep.subr.bf16.mxu0 %v10893_v32 }
 0x4a3   :  { %v10187_v6 = vsel %vm10123_vm8, %v11728_v41, %v10155_v59  ;;  %vm10126_vm11 = vcmp.gt.f32.partialorder %v11731_v61, 0.0  ;;  %v10158_v7 = vmul.f32 0.2, %v11731_v61  ;;  %v9367_v8 = vpop.f32.mrb[27].mxu0  ;;  %v10987_v28 = vcombine.high %v847_v21, %v863_v22  ;;  %v880_v32 = vld [vmem:[%s16079_s3 + $0x1268] sm:$0xff]  ;;  %v943_v59 = vld [vmem:[%s16079_s3 + $0x1460] sm:$0xff] }
 0x4a4   :  { %v10189_v12 = vsel %vm10125_vm9, %v11730_v45, %v10157_v3  ;;  %v10188_v13 = vsel %vm10124_vm10, %v11729_v47, %v10156_v5  ;;  %9644 = vmatpush1.bf16.msra.mxu1 %v10890_v44  ;;  %v10989_v31 = vcombine.high %v848_v25, %v864_v26  ;;  %v10988_v41 = vcombine.low %v848_v25, %v864_v26  ;;  %v911_v44 = vld [vmem:[%s16079_s3 + $0x1360] sm:$0xff]  ;;  %v912_v47 = vld [vmem:[%s16079_s3 + $0x1368] sm:$0xff]  ;;  %vm10388_vm10 = vmor %vm10387_vm5, %vm10386_vm4 }
 0x4a5   :  { %v10303_v52 = vcombine.low %v10187_v6, %v10188_v13  ;;  %v10190_v17 = vsel %vm10126_vm11, %v11731_v61, %v10158_v7  ;;  %9767 = vmatpush1.bf16.msra.mxu0 %v10892_v56  ;;  %9645 = vmatprep.subr.bf16.mxu1 %v10923_v57  ;;  %v11019_v42 = vcombine.high %v879_v29, %v895_v30  ;;  %v927_v45 = vld [vmem:[%s16079_s3 + $0x13e0] sm:$0xff]  ;;  %v928_v48 = vld [vmem:[%s16079_s3 + $0x13e8] sm:$0xff]  ;;  %vm10389_vm11 = vcmask 1045508  }
 0x4a6   :  { %v10304_v19 = vcombine.low %v10189_v12, %v10190_v17  ;;  %9768 = vmatprep.subr.bf16.mxu0 %v10925_v0  ;;  %v11021_v43 = vcombine.high %v880_v32, %v896_v38  ;;  %v11018_v54 = vcombine.low %v879_v29, %v895_v30  ;;  %v11020_v56 = vcombine.low %v880_v32, %v896_v38  ;;  %v959_v61 = vld [vmem:[%s16079_s3 + $0x14e0] sm:$0xff]  ;;  %v944_v62 = vld [vmem:[%s16079_s3 + $0x1468] sm:$0xff] }
 0x4a7   :  { %v10311_v20 = vrot.slane %v10303_v52, %v13227_v46  ;;  %v11051_v57 = vcombine.high %v911_v44, %v927_v45  ;;  %v11053_v58 = vcombine.high %v912_v47, %v928_v48  ;;  %v960_v34 = vld [vmem:[%s16079_s3 + $0x14e8] sm:$0xff]  ;;  %v11050_v0 = vcombine.low %v911_v44, %v927_v45  ;;  %v975_v6 = vld [vmem:[%s16079_s3 + $0x1560] sm:$0xff] }
 0x4a8   :  { %v10318_v23 = vrot.slane %v10304_v19, %v13227_v46  ;;  %9646 = vmatpush1.bf16.msra.mxu1 %v10922_v15  ;;  %v11052_v2 = vcombine.low %v912_v47, %v928_v48  ;;  %v11083_v3 = vcombine.high %v943_v59, %v959_v61  ;;  %v11085_v5 = vcombine.high %v944_v62, %v960_v34  ;;  %v991_v7 = vld [vmem:[%s16079_s3 + $0x15e0] sm:$0xff]  ;;  %v976_v8 = vld [vmem:[%s16079_s3 + $0x1568] sm:$0xff] }
 0x4a9   :  { %9769 = vmatpush1.bf16.msra.mxu0 %v10924_v16  ;;  %9656 = vmatprep.subr.bf16.mxu1 %v10955_v18  ;;  %v992_v9 = vld [vmem:[%s16079_s3 + $0x15e8] sm:$0xff]  ;;  %v11082_v11 = vcombine.low %v943_v59, %v959_v61  ;;  %v11084_v12 = vcombine.low %v944_v62, %v960_v34  ;;  %v11115_v13 = vcombine.high %v975_v6, %v991_v7  ;;  %v1007_v16 = vld [vmem:[%s16079_s3 + $0x1660] sm:$0xff] }
 0x4aa   :  { %v10319_v14 = vcombine.low %v10311_v20, %v10318_v23  ;;  %9779 = vmatprep.subr.bf16.mxu0 %v10957_v36  ;;  %v11117_v15 = vcombine.high %v976_v8, %v992_v9  ;;  %v1023_v52 = vld [vmem:[%s16079_s3 + $0x16e0] sm:$0xff]  ;;  %v1008_v17 = vld [vmem:[%s16079_s3 + $0x1668] sm:$0xff]  ;;  %v11114_v19 = vcombine.low %v975_v6, %v991_v7  ;;  %v11116_v36 = vcombine.low %v976_v8, %v992_v9 }
 0x4ab   :  { %9648 = vmatmul.mubr.bf16.vlgmr.msra.gmra.mrb[28].mxu1 %v12226_v63  ;;  %v1024_v18 = vld [vmem:[%s16079_s3 + $0x16e8] sm:$0xff]  ;;  %v11147_v20 = vcombine.high %v1007_v16, %v1023_v52  ;;  %v1039_v22 = vld [vmem:[%s16079_s3 + $0x1760] sm:$0xff]  ;;  %v11146_v26 = vcombine.low %v1007_v16, %v1023_v52 }
 0x4ac   :  { %10383 = vst [vmem:[%s16083_s5 + $0x20] sm:$0xff] %v10319_v14  ;;  %9771 = vmatmul.mubr.bf16.vlgmr.msra.gmra.mrb[32].mxu0 %v12226_v63  ;;  %9657 = vmatpush1.bf16.msra.mxu1 %v10954_v24  ;;  %v11149_v21 = vcombine.high %v1008_v17, %v1024_v18  ;;  %v1055_v23 = vld [vmem:[%s16079_s3 + $0x17e0] sm:$0xff]  ;;  %v1040_v24 = vld [vmem:[%s16079_s3 + $0x1768] sm:$0xff] }
 0x4ad   :  { %9688 = vmatprep.mubr.bf16.mxu1 %v12244_v10  ;;  %9780 = vmatpush1.bf16.msra.mxu0 %v10956_v27  ;;  %v1056_v25 = vld [vmem:[%s16079_s3 + $0x17e8] sm:$0xff]  ;;  %v11148_v27 = vcombine.low %v1008_v17, %v1024_v18  ;;  %v11179_v14 = vcombine.high %v1039_v22, %v1055_v23  ;;  %v1071_v29 = vld [vmem:[%s16079_s3 + $0x1860] sm:$0xff]  ;;  %v11178_v38 = vcombine.low %v1039_v22, %v1055_v23 }
 0x4ae   :  { %9811 = vmatprep.mubr.bf16.mxu0 %v12244_v10  ;;  %9658 = vmatprep.subr.bf16.mxu1 %v10987_v28  ;;  %v11181_v28 = vcombine.high %v1040_v24, %v1056_v25  ;;  %v1087_v30 = vld [vmem:[%s16079_s3 + $0x18e0] sm:$0xff]  ;;  %v1088_v32 = vld [vmem:[%s16079_s3 + $0x18e8] sm:$0xff] }
 0x4af   :  { %9781 = vmatprep.subr.bf16.mxu0 %v10989_v31  ;;  %v1072_v31 = vld [vmem:[%s16079_s3 + $0x1868] sm:$0xff]  ;;  %v1119_v44 = vld [vmem:[%s16079_s3 + $0x19e0] sm:$0xff]  ;;  %v11210_v48 = vcombine.low %v1071_v29, %v1087_v30 }
 0x4b0   :  { %9659 = vmatpush1.bf16.msra.mxu1 %v10986_v39  ;;  %v11180_v39 = vcombine.low %v1040_v24, %v1056_v25  ;;  %v1104_v45 = vld [vmem:[%s16079_s3 + $0x1968] sm:$0xff]  ;;  %v1151_v59 = vld [vmem:[%s16079_s3 + $0x1ae0] sm:$0xff] }
 0x4b1   :  { %9782 = vmatpush1.bf16.msra.mxu0 %v10988_v41  ;;  %9660 = vmatprep.subr.bf16.mxu1 %v11019_v42  ;;  %v11211_v41 = vcombine.high %v1071_v29, %v1087_v30  ;;  %v11213_v42 = vcombine.high %v1072_v31, %v1088_v32  ;;  %v1120_v47 = vld [vmem:[%s16079_s3 + $0x19e8] sm:$0xff]  ;;  %v1183_v6 = vld [vmem:[%s16079_s3 + $0x1be0] sm:$0xff] }
 0x4b2   :  { %9783 = vmatprep.subr.bf16.mxu0 %v11021_v43  ;;  %v1103_v43 = vld [vmem:[%s16079_s3 + $0x1960] sm:$0xff]  ;;  %v1136_v61 = vld [vmem:[%s16079_s3 + $0x1a68] sm:$0xff] }
 0x4b3   :  { %v1152_v62 = vld [vmem:[%s16079_s3 + $0x1ae8] sm:$0xff]  ;;  %v11242_v34 = vcombine.low %v1103_v43, %v1119_v44  ;;  %v1215_v16 = vld [vmem:[%s16079_s3 + $0x1ce0] sm:$0xff] }
 0x4b4   :  { %9661 = vmatpush1.bf16.msra.mxu1 %v11018_v54  ;;  %v11212_v54 = vcombine.low %v1072_v31, %v1088_v32  ;;  %v1168_v7 = vld [vmem:[%s16079_s3 + $0x1b68] sm:$0xff]  ;;  %v1247_v22 = vld [vmem:[%s16079_s3 + $0x1de0] sm:$0xff] }
 0x4b5   :  { %9784 = vmatpush1.bf16.msra.mxu0 %v11020_v56  ;;  %9662 = vmatprep.subr.bf16.mxu1 %v11051_v57  ;;  %v11243_v56 = vcombine.high %v1103_v43, %v1119_v44  ;;  %v11245_v57 = vcombine.high %v1104_v45, %v1120_v47  ;;  %v1184_v8 = vld [vmem:[%s16079_s3 + $0x1be8] sm:$0xff]  ;;  %v1279_v29 = vld [vmem:[%s16079_s3 + $0x1ee0] sm:$0xff] }
 0x4b6   :  { %9785 = vmatprep.subr.bf16.mxu0 %v11053_v58  ;;  %v1135_v58 = vld [vmem:[%s16079_s3 + $0x1a60] sm:$0xff]  ;;  %v1200_v52 = vld [vmem:[%s16079_s3 + $0x1c68] sm:$0xff] }
 0x4b7   :  { %v11274_v9 = vcombine.low %v1135_v58, %v1151_v59  ;;  %v1216_v17 = vld [vmem:[%s16079_s3 + $0x1ce8] sm:$0xff]  ;;  %v1311_v43 = vld [vmem:[%s16079_s3 + $0x1fe0] sm:$0xff] }
 0x4b8   :  { %9663 = vmatpush1.bf16.msra.mxu1 %v11050_v0  ;;  %v11244_v0 = vcombine.low %v1104_v45, %v1120_v47  ;;  %v1232_v23 = vld [vmem:[%s16079_s3 + $0x1d68] sm:$0xff] }
 0x4b9   :  { %9786 = vmatpush1.bf16.msra.mxu0 %v11052_v2  ;;  %9664 = vmatprep.subr.bf16.mxu1 %v11083_v3  ;;  %v11275_v2 = vcombine.high %v1135_v58, %v1151_v59  ;;  %v11277_v3 = vcombine.high %v1136_v61, %v1152_v62  ;;  %v1248_v24 = vld [vmem:[%s16079_s3 + $0x1de8] sm:$0xff]  ;;  %v1343_v58 = vld [vmem:[%s16079_s3 + $0x20e0] sm:$0xff] }
 0x4ba   :  { %9787 = vmatprep.subr.bf16.mxu0 %v11085_v5  ;;  %v1167_v5 = vld [vmem:[%s16079_s3 + $0x1b60] sm:$0xff]  ;;  %v1264_v30 = vld [vmem:[%s16079_s3 + $0x1e68] sm:$0xff] }
 0x4bb   :  { %v11306_v18 = vcombine.low %v1167_v5, %v1183_v6  ;;  %v1280_v31 = vld [vmem:[%s16079_s3 + $0x1ee8] sm:$0xff] }
 0x4bc   :  { %9665 = vmatpush1.bf16.msra.mxu1 %v11082_v11  ;;  %v11276_v11 = vcombine.low %v1136_v61, %v1152_v62  ;;  %v1296_v44 = vld [vmem:[%s16079_s3 + $0x1f68] sm:$0xff] }
 0x4bd   :  { %9788 = vmatpush1.bf16.msra.mxu0 %v11084_v12  ;;  %9666 = vmatprep.subr.bf16.mxu1 %v11115_v13  ;;  %v11307_v12 = vcombine.high %v1167_v5, %v1183_v6  ;;  %v11309_v13 = vcombine.high %v1168_v7, %v1184_v8  ;;  %v1312_v45 = vld [vmem:[%s16079_s3 + $0x1fe8] sm:$0xff]  ;;  %v1375_v5 = vld [vmem:[%s16079_s3 + $0x21e0] sm:$0xff] }
 0x4be   :  { %9789 = vmatprep.subr.bf16.mxu0 %v11117_v15  ;;  %v1199_v15 = vld [vmem:[%s16079_s3 + $0x1c60] sm:$0xff]  ;;  %v1328_v59 = vld [vmem:[%s16079_s3 + $0x2068] sm:$0xff] }
 0x4bf   :  { %v11338_v25 = vcombine.low %v1199_v15, %v1215_v16  ;;  %v1344_v61 = vld [vmem:[%s16079_s3 + $0x20e8] sm:$0xff] }
 0x4c0   :  { %9667 = vmatpush1.bf16.msra.mxu1 %v11114_v19  ;;  %v11308_v19 = vcombine.low %v1168_v7, %v1184_v8  ;;  %v1360_v6 = vld [vmem:[%s16079_s3 + $0x2168] sm:$0xff] }
 0x4c1   :  { %9790 = vmatpush1.bf16.msra.mxu0 %v11116_v36  ;;  %9668 = vmatprep.subr.bf16.mxu1 %v11147_v20  ;;  %v11339_v36 = vcombine.high %v1199_v15, %v1215_v16  ;;  %v11341_v20 = vcombine.high %v1200_v52, %v1216_v17  ;;  %v1376_v7 = vld [vmem:[%s16079_s3 + $0x21e8] sm:$0xff]  ;;  %v1407_v15 = vld [vmem:[%s16079_s3 + $0x22e0] sm:$0xff] }
 0x4c2   :  { %9791 = vmatprep.subr.bf16.mxu0 %v11149_v21  ;;  %v1231_v21 = vld [vmem:[%s16079_s3 + $0x1d60] sm:$0xff]  ;;  %v1392_v16 = vld [vmem:[%s16079_s3 + $0x2268] sm:$0xff] }
 0x4c3   :  { %v11370_v32 = vcombine.low %v1231_v21, %v1247_v22 }
 0x4c4   :  { %9669 = vmatpush1.bf16.msra.mxu1 %v11146_v26  ;;  %v11340_v26 = vcombine.low %v1200_v52, %v1216_v17  ;;  %v1408_v52 = vld [vmem:[%s16079_s3 + $0x22e8] sm:$0xff] }
 0x4c5   :  { %9792 = vmatpush1.bf16.msra.mxu0 %v11148_v27  ;;  %9670 = vmatprep.subr.bf16.mxu1 %v11179_v14  ;;  %v11371_v27 = vcombine.high %v1231_v21, %v1247_v22  ;;  %v11373_v14 = vcombine.high %v1232_v23, %v1248_v24  ;;  %v1439_v21 = vld [vmem:[%s16079_s3 + $0x23e0] sm:$0xff]  ;;  %v1424_v22 = vld [vmem:[%s16079_s3 + $0x2368] sm:$0xff] }
 0x4c6   :  { %9793 = vmatprep.subr.bf16.mxu0 %v11181_v28  ;;  %v1263_v28 = vld [vmem:[%s16079_s3 + $0x1e60] sm:$0xff] }
 0x4c7   :  { %v11402_v47 = vcombine.low %v1263_v28, %v1279_v29 }
 0x4c8   :  { %9671 = vmatpush1.bf16.msra.mxu1 %v11178_v38  ;;  %v11372_v38 = vcombine.low %v1232_v23, %v1248_v24  ;;  %v1440_v23 = vld [vmem:[%s16079_s3 + $0x23e8] sm:$0xff] }
 0x4c9   :  { %9794 = vmatpush1.bf16.msra.mxu0 %v11180_v39  ;;  %9672 = vmatprep.subr.bf16.mxu1 %v11211_v41  ;;  %v11403_v39 = vcombine.high %v1263_v28, %v1279_v29  ;;  %v11405_v41 = vcombine.high %v1264_v30, %v1280_v31  ;;  %v1471_v28 = vld [vmem:[%s16079_s3 + $0x24e0] sm:$0xff]  ;;  %v1456_v29 = vld [vmem:[%s16079_s3 + $0x2468] sm:$0xff] }
 0x4ca   :  { %9795 = vmatprep.subr.bf16.mxu0 %v11213_v42  ;;  %v1295_v42 = vld [vmem:[%s16079_s3 + $0x1f60] sm:$0xff] }
 0x4cb   :  { %v11434_v62 = vcombine.low %v1295_v42, %v1311_v43 }
 0x4cc   :  { %9673 = vmatpush1.bf16.msra.mxu1 %v11210_v48  ;;  %v11404_v48 = vcombine.low %v1264_v30, %v1280_v31  ;;  %v1472_v30 = vld [vmem:[%s16079_s3 + $0x24e8] sm:$0xff] }
 0x4cd   :  { %9796 = vmatpush1.bf16.msra.mxu0 %v11212_v54  ;;  %9674 = vmatprep.subr.bf16.mxu1 %v11243_v56  ;;  %v11435_v54 = vcombine.high %v1295_v42, %v1311_v43  ;;  %v11437_v56 = vcombine.high %v1296_v44, %v1312_v45  ;;  %v1503_v42 = vld [vmem:[%s16079_s3 + $0x25e0] sm:$0xff]  ;;  %v1488_v43 = vld [vmem:[%s16079_s3 + $0x2568] sm:$0xff] }
 0x4ce   :  { %9797 = vmatprep.subr.bf16.mxu0 %v11245_v57  ;;  %v1327_v57 = vld [vmem:[%s16079_s3 + $0x2060] sm:$0xff] }
 0x4cf   :  { %v11466_v8 = vcombine.low %v1327_v57, %v1343_v58 }
 0x4d0   :  { %9675 = vmatpush1.bf16.msra.mxu1 %v11242_v34  ;;  %v11436_v34 = vcombine.low %v1296_v44, %v1312_v45  ;;  %v1504_v44 = vld [vmem:[%s16079_s3 + $0x25e8] sm:$0xff] }
 0x4d1   :  { %9798 = vmatpush1.bf16.msra.mxu0 %v11244_v0  ;;  %9676 = vmatprep.subr.bf16.mxu1 %v11275_v2  ;;  %v11467_v0 = vcombine.high %v1327_v57, %v1343_v58  ;;  %v11469_v2 = vcombine.high %v1328_v59, %v1344_v61  ;;  %v1535_v57 = vld [vmem:[%s16079_s3 + $0x26e0] sm:$0xff]  ;;  %v1520_v58 = vld [vmem:[%s16079_s3 + $0x2668] sm:$0xff] }
 0x4d2   :  { %9799 = vmatprep.subr.bf16.mxu0 %v11277_v3  ;;  %v1359_v3 = vld [vmem:[%s16079_s3 + $0x2160] sm:$0xff] }
 0x4d3   :  { %v11498_v17 = vcombine.low %v1359_v3, %v1375_v5 }
 0x4d4   :  { %9677 = vmatpush1.bf16.msra.mxu1 %v11274_v9  ;;  %v11468_v9 = vcombine.low %v1328_v59, %v1344_v61  ;;  %v1536_v59 = vld [vmem:[%s16079_s3 + $0x26e8] sm:$0xff] }
 0x4d5   :  { %9800 = vmatpush1.bf16.msra.mxu0 %v11276_v11  ;;  %9678 = vmatprep.subr.bf16.mxu1 %v11307_v12  ;;  %v11499_v11 = vcombine.high %v1359_v3, %v1375_v5  ;;  %v11501_v12 = vcombine.high %v1360_v6, %v1376_v7  ;;  %v1567_v3 = vld [vmem:[%s16079_s3 + $0x27e0] sm:$0xff]  ;;  %v1552_v5 = vld [vmem:[%s16079_s3 + $0x2768] sm:$0xff] }
 0x4d6   :  { %9801 = vmatprep.subr.bf16.mxu0 %v11309_v13  ;;  %v1391_v13 = vld [vmem:[%s16079_s3 + $0x2260] sm:$0xff] }
 0x4d7   :  { %v11530_v24 = vcombine.low %v1391_v13, %v1407_v15 }
 0x4d8   :  { %9679 = vmatpush1.bf16.msra.mxu1 %v11306_v18  ;;  %v11500_v18 = vcombine.low %v1360_v6, %v1376_v7  ;;  %v1568_v6 = vld [vmem:[%s16079_s3 + $0x27e8] sm:$0xff] }
 0x4d9   :  { %9802 = vmatpush1.bf16.msra.mxu0 %v11308_v19  ;;  %9680 = vmatprep.subr.bf16.mxu1 %v11339_v36  ;;  %v11531_v19 = vcombine.high %v1391_v13, %v1407_v15  ;;  %v11533_v36 = vcombine.high %v1392_v16, %v1408_v52  ;;  %v321_v13 = vld [vmem:[%s16079_s3 + $0xf0] sm:$0xff]  ;;  %v306_v15 = vld [vmem:[%s16079_s3 + $0x78] sm:$0xff] }
 0x4da   :  { %9803 = vmatprep.subr.bf16.mxu0 %v11341_v20  ;;  %v1423_v20 = vld [vmem:[%s16079_s3 + $0x2360] sm:$0xff] }
 0x4db   :  { %v11562_v31 = vcombine.low %v1423_v20, %v1439_v21 }
 0x4dc   :  { %9681 = vmatpush1.bf16.msra.mxu1 %v11338_v25  ;;  %v11532_v25 = vcombine.low %v1392_v16, %v1408_v52  ;;  %v322_v16 = vld [vmem:[%s16079_s3 + $0xf8] sm:$0xff] }
 0x4dd   :  { %9804 = vmatpush1.bf16.msra.mxu0 %v11340_v26  ;;  %9682 = vmatprep.subr.bf16.mxu1 %v11371_v27  ;;  %v11563_v26 = vcombine.high %v1423_v20, %v1439_v21  ;;  %v11565_v27 = vcombine.high %v1424_v22, %v1440_v23  ;;  %v353_v20 = vld [vmem:[%s16079_s3 + $0x1f0] sm:$0xff] }
 0x4de   :  { %9805 = vmatprep.subr.bf16.mxu0 %v11373_v14  ;;  %v1455_v14 = vld [vmem:[%s16079_s3 + $0x2460] sm:$0xff] }
 0x4df   :  { %v11594_v45 = vcombine.low %v1455_v14, %v1471_v28 }
 0x4e0   :  { %9683 = vmatpush1.bf16.msra.mxu1 %v11370_v32  ;;  %v11564_v32 = vcombine.low %v1424_v22, %v1440_v23  ;;  %v338_v22 = vld [vmem:[%s16079_s3 + $0x178] sm:$0xff] }
 0x4e1   :  { %9806 = vmatpush1.bf16.msra.mxu0 %v11372_v38  ;;  %9684 = vmatprep.subr.bf16.mxu1 %v11403_v39  ;;  %v11595_v38 = vcombine.high %v1455_v14, %v1471_v28  ;;  %v11597_v39 = vcombine.high %v1456_v29, %v1472_v30  ;;  %v354_v23 = vld [vmem:[%s16079_s3 + $0x1f8] sm:$0xff] }
 0x4e2   :  { %9807 = vmatprep.subr.bf16.mxu0 %v11405_v41  ;;  %v1487_v41 = vld [vmem:[%s16079_s3 + $0x2560] sm:$0xff]  ;;  %v10481_v14 = vcombine.high %v338_v22, %v354_v23  ;;  %v370_v28 = vld [vmem:[%s16079_s3 + $0x278] sm:$0xff] }
 0x4e3   :  { %v11626_v61 = vcombine.low %v1487_v41, %v1503_v42 }
 0x4e4   :  { %9685 = vmatpush1.bf16.msra.mxu1 %v11402_v47  ;;  %v11596_v47 = vcombine.low %v1456_v29, %v1472_v30  ;;  %v386_v29 = vld [vmem:[%s16079_s3 + $0x2f8] sm:$0xff] }
 0x4e5   :  { %9808 = vmatpush1.bf16.msra.mxu0 %v11404_v48  ;;  %9686 = vmatprep.subr.bf16.mxu1 %v11435_v54  ;;  %v11627_v48 = vcombine.high %v1487_v41, %v1503_v42  ;;  %v11629_v54 = vcombine.high %v1488_v43, %v1504_v44  ;;  %v417_v41 = vld [vmem:[%s16079_s3 + $0x3f0] sm:$0xff]  ;;  %v402_v42 = vld [vmem:[%s16079_s3 + $0x378] sm:$0xff] }
 0x4e6   :  { %9809 = vmatprep.subr.bf16.mxu0 %v11437_v56  ;;  %v1519_v56 = vld [vmem:[%s16079_s3 + $0x2660] sm:$0xff] }
 0x4e7   :  { %v11658_v7 = vcombine.low %v1519_v56, %v1535_v57 }
 0x4e8   :  { %9687 = vmatpush1.bf16.msra.mxu1 %v11434_v62  ;;  %v11628_v62 = vcombine.low %v1488_v43, %v1504_v44  ;;  %v418_v43 = vld [vmem:[%s16079_s3 + $0x3f8] sm:$0xff]  ;;  %v10512_v44 = vcombine.low %v370_v28, %v386_v29 }
 0x4e9   :  { %9810 = vmatpush1.bf16.msra.mxu0 %v11436_v34  ;;  %9697 = vmatprep.subr.bf16.mxu1 %v11467_v0  ;;  %v11659_v34 = vcombine.high %v1519_v56, %v1535_v57  ;;  %v11661_v0 = vcombine.high %v1520_v58, %v1536_v59  ;;  %v434_v56 = vld [vmem:[%s16079_s3 + $0x478] sm:$0xff] }
 0x4ea   :  { %9820 = vmatprep.subr.bf16.mxu0 %v11469_v2  ;;  %v1551_v2 = vld [vmem:[%s16079_s3 + $0x2760] sm:$0xff]  ;;  %v450_v57 = vld [vmem:[%s16079_s3 + $0x4f8] sm:$0xff] }
 0x4eb   :  { %9689 = vmatmul.mubr.bf16.vlgmr.msra.gmra.mrb[28].mxu1 %v12436_v33  ;;  %v11690_v52 = vcombine.low %v1551_v2, %v1567_v3 }
 0x4ec   :  { %9812 = vmatmul.mubr.bf16.vlgmr.msra.gmra.mrb[32].mxu0 %v12436_v33  ;;  %9698 = vmatpush1.bf16.msra.mxu1 %v11466_v8  ;;  %v11660_v8 = vcombine.low %v1520_v58, %v1536_v59  ;;  %v10544_v59 = vcombine.low %v402_v42, %v418_v43 }
 0x4ed   :  { %9821 = vmatpush1.bf16.msra.mxu0 %v11468_v9  ;;  %9699 = vmatprep.subr.bf16.mxu1 %v11499_v11  ;;  %v11691_v9 = vcombine.high %v1551_v2, %v1567_v3  ;;  %v11693_v11 = vcombine.high %v1552_v5, %v1568_v6  ;;  %v466_v2 = vld [vmem:[%s16079_s3 + $0x578] sm:$0xff] }
 0x4ee   :  { %9822 = vmatprep.subr.bf16.mxu0 %v11501_v12  ;;  %9729 = vmatprep.mubr.bf16.mxu1 %v11898_v1  ;;  %v305_v12 = vld [vmem:[%s16079_s3 + $0x70] sm:$0xff]  ;;  %v482_v3 = vld [vmem:[%s16079_s3 + $0x5f8] sm:$0xff] }
 0x4ef   :  { %9852 = vmatprep.mubr.bf16.mxu0 %v11898_v1  ;;  %v10446_v21 = vcombine.low %v305_v12, %v321_v13 }
 0x4f0   :  { %9700 = vmatpush1.bf16.msra.mxu1 %v11498_v17  ;;  %v11692_v17 = vcombine.low %v1552_v5, %v1568_v6  ;;  %v10576_v6 = vcombine.low %v434_v56, %v450_v57 }
 0x4f1   :  { %9823 = vmatpush1.bf16.msra.mxu0 %v11500_v18  ;;  %9701 = vmatprep.subr.bf16.mxu1 %v11531_v19  ;;  %v10447_v18 = vcombine.high %v305_v12, %v321_v13  ;;  %v10449_v19 = vcombine.high %v306_v15, %v322_v16  ;;  %v498_v12 = vld [vmem:[%s16079_s3 + $0x678] sm:$0xff] }
 0x4f2   :  { %9824 = vmatprep.subr.bf16.mxu0 %v11533_v36  ;;  %v337_v36 = vld [vmem:[%s16079_s3 + $0x170] sm:$0xff]  ;;  %v514_v13 = vld [vmem:[%s16079_s3 + $0x6f8] sm:$0xff] }
 0x4f3   :  { %v10478_v30 = vcombine.low %v337_v36, %v353_v20 }
 0x4f4   :  { %9702 = vmatpush1.bf16.msra.mxu1 %v11530_v24  ;;  %v10448_v24 = vcombine.low %v306_v15, %v322_v16  ;;  %v10608_v16 = vcombine.low %v466_v2, %v482_v3 }
 0x4f5   :  { %9825 = vmatpush1.bf16.msra.mxu0 %v11532_v25  ;;  %9703 = vmatprep.subr.bf16.mxu1 %v11563_v26  ;;  %v10479_v25 = vcombine.high %v337_v36, %v353_v20  ;;  %v369_v26 = vld [vmem:[%s16079_s3 + $0x270] sm:$0xff]  ;;  %v530_v36 = vld [vmem:[%s16079_s3 + $0x778] sm:$0xff] }
 0x4f6   :  { %9826 = vmatprep.subr.bf16.mxu0 %v11565_v27  ;;  %v385_v27 = vld [vmem:[%s16079_s3 + $0x2f0] sm:$0xff]  ;;  %v546_v20 = vld [vmem:[%s16079_s3 + $0x7f8] sm:$0xff] }
 0x4f8   :  { %9704 = vmatpush1.bf16.msra.mxu1 %v11562_v31  ;;  %v10480_v31 = vcombine.low %v338_v22, %v354_v23  ;;  %v10640_v22 = vcombine.low %v498_v12, %v514_v13 }
 0x4f9   :  { %9827 = vmatpush1.bf16.msra.mxu0 %v11564_v32  ;;  %9705 = vmatprep.subr.bf16.mxu1 %v11595_v38  ;;  %v10511_v32 = vcombine.high %v369_v26, %v385_v27  ;;  %v10513_v38 = vcombine.high %v370_v28, %v386_v29  ;;  %v10672_v29 = vcombine.low %v530_v36, %v546_v20 }
 0x4fa   :  { %9828 = vmatprep.subr.bf16.mxu0 %v11597_v39  ;;  %v401_v39 = vld [vmem:[%s16079_s3 + $0x370] sm:$0xff] }
 0x4fb   :  { %v10542_v58 = vcombine.low %v401_v39, %v417_v41 }
 0x4fc   :  { %9706 = vmatpush1.bf16.msra.mxu1 %v11594_v45  ;;  %v10543_v45 = vcombine.high %v401_v39, %v417_v41  ;;  %v594_v39 = vld [vmem:[%s16079_s3 + $0x978] sm:$0xff] }
 0x4fd   :  { %9829 = vmatpush1.bf16.msra.mxu0 %v11596_v47  ;;  %9707 = vmatprep.subr.bf16.mxu1 %v11627_v48  ;;  %v10545_v47 = vcombine.high %v402_v42, %v418_v43  ;;  %v433_v48 = vld [vmem:[%s16079_s3 + $0x470] sm:$0xff]  ;;  %v610_v41 = vld [vmem:[%s16079_s3 + $0x9f8] sm:$0xff] }
 0x4fe   :  { %9830 = vmatprep.subr.bf16.mxu0 %v11629_v54  ;;  %v449_v54 = vld [vmem:[%s16079_s3 + $0x4f0] sm:$0xff] }
 0x4ff   :  { %v10574_v5 = vcombine.low %v433_v48, %v449_v54 }
 0x500   :  { %9708 = vmatpush1.bf16.msra.mxu1 %v11626_v61  ;;  %v10575_v61 = vcombine.high %v433_v48, %v449_v54  ;;  %v626_v48 = vld [vmem:[%s16079_s3 + $0xa78] sm:$0xff] }
 0x501   :  { %9831 = vmatpush1.bf16.msra.mxu0 %v11628_v62  ;;  %9709 = vmatprep.subr.bf16.mxu1 %v11659_v34  ;;  %v10577_v62 = vcombine.high %v434_v56, %v450_v57  ;;  %v465_v34 = vld [vmem:[%s16079_s3 + $0x570] sm:$0xff]  ;;  %v642_v54 = vld [vmem:[%s16079_s3 + $0xaf8] sm:$0xff]  ;;  %v10736_v57 = vcombine.low %v594_v39, %v610_v41 }
 0x502   :  { %9832 = vmatprep.subr.bf16.mxu0 %v11661_v0  ;;  %v481_v0 = vld [vmem:[%s16079_s3 + $0x5f0] sm:$0xff] }
 0x503   :  { %v10606_v15 = vcombine.low %v465_v34, %v481_v0 }
 0x504   :  { %9710 = vmatpush1.bf16.msra.mxu1 %v11658_v7  ;;  %v10607_v7 = vcombine.high %v465_v34, %v481_v0  ;;  %v658_v34 = vld [vmem:[%s16079_s3 + $0xb78] sm:$0xff] }
 0x505   :  { %9833 = vmatpush1.bf16.msra.mxu0 %v11660_v8  ;;  %9711 = vmatprep.subr.bf16.mxu1 %v11691_v9  ;;  %v10609_v8 = vcombine.high %v466_v2, %v482_v3  ;;  %v497_v9 = vld [vmem:[%s16079_s3 + $0x670] sm:$0xff]  ;;  %v674_v0 = vld [vmem:[%s16079_s3 + $0xbf8] sm:$0xff]  ;;  %v10768_v3 = vcombine.low %v626_v48, %v642_v54 }
 0x506   :  { %9834 = vmatprep.subr.bf16.mxu0 %v11693_v11  ;;  %v513_v11 = vld [vmem:[%s16079_s3 + $0x6f0] sm:$0xff] }
 0x508   :  { %9712 = vmatpush1.bf16.msra.mxu1 %v11690_v52  ;;  %v10639_v52 = vcombine.high %v497_v9, %v513_v11 }
 0x509   :  { %9835 = vmatpush1.bf16.msra.mxu0 %v11692_v17  ;;  %9861 = vmatprep.subr.bf16.mxu1 %v10447_v18  ;;  %v10641_v17 = vcombine.high %v498_v12, %v514_v13  ;;  %v529_v18 = vld [vmem:[%s16079_s3 + $0x770] sm:$0xff]  ;;  %v10800_v13 = vcombine.low %v658_v34, %v674_v0 }
 0x50a   :  { %9984 = vmatprep.subr.bf16.mxu0 %v10449_v19  ;;  %v545_v19 = vld [vmem:[%s16079_s3 + $0x7f0] sm:$0xff] }
 0x50b   :  { %9730 = vmatmul.mubr.bf16.vlgmr.msra.gmra.mrb[28].mxu1 %v12535_v49  ;;  %v10671_v23 = vcombine.high %v529_v18, %v545_v19  ;;  %v10670_v28 = vcombine.low %v529_v18, %v545_v19  ;;  %v722_v18 = vld [vmem:[%s16079_s3 + $0xd78] sm:$0xff] }
 0x50c   :  { %9853 = vmatmul.mubr.bf16.vlgmr.msra.gmra.mrb[32].mxu0 %v12535_v49  ;;  %9862 = vmatpush1.bf16.msra.mxu1 %v10446_v21  ;;  %v10638_v21 = vcombine.low %v497_v9, %v513_v11  ;;  %v690_v9 = vld [vmem:[%s16079_s3 + $0xc78] sm:$0xff] }
 0x50d   :  { %9893 = vmatprep.mubr.bf16.mxu1 %v12224_v60  ;;  %9985 = vmatpush1.bf16.msra.mxu0 %v10448_v24  ;;  %v10673_v24 = vcombine.high %v530_v36, %v546_v20  ;;  %v706_v11 = vld [vmem:[%s16079_s3 + $0xcf8] sm:$0xff] }
 0x50e   :  { %10016 = vmatprep.mubr.bf16.mxu0 %v12224_v60  ;;  %9863 = vmatprep.subr.bf16.mxu1 %v10479_v25  ;;  %v10510_v60 = vcombine.low %v369_v26, %v385_v27  ;;  %v561_v25 = vld [vmem:[%s16079_s3 + $0x870] sm:$0xff]  ;;  %v562_v27 = vld [vmem:[%s16079_s3 + $0x878] sm:$0xff]  ;;  %v10832_v20 = vcombine.low %v690_v9, %v706_v11 }
 0x50f   :  { %9986 = vmatprep.subr.bf16.mxu0 %v10481_v14  ;;  %v577_v26 = vld [vmem:[%s16079_s3 + $0x8f0] sm:$0xff]  ;;  %v578_v14 = vld [vmem:[%s16079_s3 + $0x8f8] sm:$0xff] }
 0x510   :  { %9864 = vmatpush1.bf16.msra.mxu1 %v10478_v30  ;;  %v10703_v30 = vcombine.high %v561_v25, %v577_v26  ;;  %v10702_v42 = vcombine.low %v561_v25, %v577_v26  ;;  %v10704_v43 = vcombine.low %v562_v27, %v578_v14  ;;  %v738_v19 = vld [vmem:[%s16079_s3 + $0xdf8] sm:$0xff]  ;;  %v11897_v25 = vld [vmem:[%s16082_s4 + $0x10] sm:$0xff] }
 0x511   :  { %9987 = vmatpush1.bf16.msra.mxu0 %v10480_v31  ;;  %9865 = vmatprep.subr.bf16.mxu1 %v10511_v32  ;;  %v10705_v31 = vcombine.high %v562_v27, %v578_v14  ;;  %v593_v32 = vld [vmem:[%s16079_s3 + $0x970] sm:$0xff]  ;;  %v1662_v26 = vrot.slane %v11897_v25, %v12479_v4  ;;  %v754_v27 = vld [vmem:[%s16079_s3 + $0xe78] sm:$0xff] }
 0x512   :  { %9988 = vmatprep.subr.bf16.mxu0 %v10513_v38  ;;  %v609_v38 = vld [vmem:[%s16079_s3 + $0x9f0] sm:$0xff]  ;;  %v770_v14 = vld [vmem:[%s16079_s3 + $0xef8] sm:$0xff] }
 0x513   :  { %v10734_v56 = vcombine.low %v593_v32, %v609_v38 }
 0x514   :  { %9866 = vmatpush1.bf16.msra.mxu1 %v10510_v60  ;;  %v10735_v60 = vcombine.high %v593_v32, %v609_v38  ;;  %v10864_v32 = vcombine.low %v722_v18, %v738_v19 }
 0x515   :  { %9989 = vmatpush1.bf16.msra.mxu0 %v10512_v44  ;;  %9867 = vmatprep.subr.bf16.mxu1 %v10543_v45  ;;  %v10737_v44 = vcombine.high %v594_v39, %v610_v41  ;;  %v625_v45 = vld [vmem:[%s16079_s3 + $0xa70] sm:$0xff] }
 0x516   :  { %9990 = vmatprep.subr.bf16.mxu0 %v10545_v47  ;;  %v641_v47 = vld [vmem:[%s16079_s3 + $0xaf0] sm:$0xff] }
 0x517   :  { %v10766_v2 = vcombine.low %v625_v45, %v641_v47  ;;  %v785_v39 = vld [vmem:[%s16079_s3 + $0xf70] sm:$0xff] }
 0x518   :  { %9868 = vmatpush1.bf16.msra.mxu1 %v10542_v58  ;;  %v10767_v58 = vcombine.high %v625_v45, %v641_v47  ;;  %v801_v41 = vld [vmem:[%s16079_s3 + $0xff0] sm:$0xff] }
 0x519   :  { %9991 = vmatpush1.bf16.msra.mxu0 %v10544_v59  ;;  %9869 = vmatprep.subr.bf16.mxu1 %v10575_v61  ;;  %v10769_v59 = vcombine.high %v626_v48, %v642_v54  ;;  %v657_v61 = vld [vmem:[%s16079_s3 + $0xb70] sm:$0xff] }
 0x51a   :  { %9992 = vmatprep.subr.bf16.mxu0 %v10577_v62  ;;  %v673_v62 = vld [vmem:[%s16079_s3 + $0xbf0] sm:$0xff] }
 0x51b   :  { %v10798_v12 = vcombine.low %v657_v61, %v673_v62 }
 0x51c   :  { %9870 = vmatpush1.bf16.msra.mxu1 %v10574_v5  ;;  %v10799_v5 = vcombine.high %v657_v61, %v673_v62  ;;  %v10896_v61 = vcombine.low %v754_v27, %v770_v14  ;;  %v10927_v62 = vcombine.high %v785_v39, %v801_v41 }
 0x51d   :  { %9993 = vmatpush1.bf16.msra.mxu0 %v10576_v6  ;;  %9871 = vmatprep.subr.bf16.mxu1 %v10607_v7  ;;  %v10801_v6 = vcombine.high %v658_v34, %v674_v0  ;;  %v689_v7 = vld [vmem:[%s16079_s3 + $0xc70] sm:$0xff] }
 0x51e   :  { %9994 = vmatprep.subr.bf16.mxu0 %v10609_v8  ;;  %v705_v8 = vld [vmem:[%s16079_s3 + $0xcf0] sm:$0xff] }
 0x51f   :  { %v10830_v36 = vcombine.low %v689_v7, %v705_v8  ;;  %v817_v34 = vld [vmem:[%s16079_s3 + $0x1070] sm:$0xff] }
 0x520   :  { %9872 = vmatpush1.bf16.msra.mxu1 %v10606_v15  ;;  %v10831_v15 = vcombine.high %v689_v7, %v705_v8  ;;  %v833_v7 = vld [vmem:[%s16079_s3 + $0x10f0] sm:$0xff] }
 0x521   :  { %9995 = vmatpush1.bf16.msra.mxu0 %v10608_v16  ;;  %9873 = vmatprep.subr.bf16.mxu1 %v10639_v52  ;;  %v10833_v16 = vcombine.high %v690_v9, %v706_v11  ;;  %v721_v52 = vld [vmem:[%s16079_s3 + $0xd70] sm:$0xff] }
 0x522   :  { %9996 = vmatprep.subr.bf16.mxu0 %v10641_v17  ;;  %v737_v17 = vld [vmem:[%s16079_s3 + $0xdf0] sm:$0xff] }
 0x524   :  { %9874 = vmatpush1.bf16.msra.mxu1 %v10638_v21  ;;  %v10863_v21 = vcombine.high %v721_v52, %v737_v17 }
 0x525   :  { %9997 = vmatpush1.bf16.msra.mxu0 %v10640_v22  ;;  %9875 = vmatprep.subr.bf16.mxu1 %v10671_v23  ;;  %v10865_v22 = vcombine.high %v722_v18, %v738_v19  ;;  %v753_v23 = vld [vmem:[%s16079_s3 + $0xe70] sm:$0xff]  ;;  %v10926_v18 = vcombine.low %v785_v39, %v801_v41 }
 0x526   :  { %9998 = vmatprep.subr.bf16.mxu0 %v10673_v24  ;;  %v769_v24 = vld [vmem:[%s16079_s3 + $0xef0] sm:$0xff] }
 0x527   :  { %v10895_v38 = vcombine.high %v753_v23, %v769_v24  ;;  %v10894_v54 = vcombine.low %v753_v23, %v769_v24  ;;  %v897_v39 = vld [vmem:[%s16079_s3 + $0x12f0] sm:$0xff] }
 0x528   :  { %9876 = vmatpush1.bf16.msra.mxu1 %v10670_v28  ;;  %v1670_v28 = vrot.slane %v11897_v25, %v13698_v51 }
 0x529   :  { %9999 = vmatpush1.bf16.msra.mxu0 %v10672_v29  ;;  %9877 = vmatprep.subr.bf16.mxu1 %v10703_v30  ;;  %v1666_v29 = vrot.slane %v11897_v25, %v13701_v53  ;;  %v10862_v30 = vcombine.low %v721_v52, %v737_v17 }
 0x52a   :  { %10000 = vmatprep.subr.bf16.mxu0 %v10705_v31  ;;  %v1674_v31 = vrot.slane %v11897_v25, %v13704_v55  ;;  %v849_v25 = vld [vmem:[%s16079_s3 + $0x1170] sm:$0xff] }
 0x52c   :  { %9878 = vmatpush1.bf16.msra.mxu1 %v10702_v42 }
 0x52d   :  { %10001 = vmatpush1.bf16.msra.mxu0 %v10704_v43  ;;  %9879 = vmatprep.subr.bf16.mxu1 %v10735_v60  ;;  %v10897_v43 = vcombine.high %v754_v27, %v770_v14  ;;  %v786_v60 = vld [vmem:[%s16079_s3 + $0xf78] sm:$0xff]  ;;  %v10958_v14 = vcombine.low %v817_v34, %v833_v7 }
 0x52e   :  { %10002 = vmatprep.subr.bf16.mxu0 %v10737_v44  ;;  %v802_v44 = vld [vmem:[%s16079_s3 + $0xff8] sm:$0xff] }
 0x52f   :  { %v10928_v19 = vcombine.low %v786_v60, %v802_v44 }
 0x530   :  { %9880 = vmatpush1.bf16.msra.mxu1 %v10734_v56 }
 0x531   :  { %10003 = vmatpush1.bf16.msra.mxu0 %v10736_v57  ;;  %9881 = vmatprep.subr.bf16.mxu1 %v10767_v58 }
 0x532   :  { %10004 = vmatprep.subr.bf16.mxu0 %v10769_v59 }
 0x534   :  { %9882 = vmatpush1.bf16.msra.mxu1 %v10766_v2 }
 0x535   :  { %10005 = vmatpush1.bf16.msra.mxu0 %v10768_v3  ;;  %9883 = vmatprep.subr.bf16.mxu1 %v10799_v5 }
 0x536   :  { %10006 = vmatprep.subr.bf16.mxu0 %v10801_v6  ;;  %v10929_v6 = vcombine.high %v786_v60, %v802_v44 }
 0x538   :  { %9884 = vmatpush1.bf16.msra.mxu1 %v10798_v12 }
 0x539   :  { %10007 = vmatpush1.bf16.msra.mxu0 %v10800_v13  ;;  %9885 = vmatprep.subr.bf16.mxu1 %v10831_v15  ;;  %v818_v15 = vld [vmem:[%s16079_s3 + $0x1078] sm:$0xff] }
 0x53a   :  { %10008 = vmatprep.subr.bf16.mxu0 %v10833_v16  ;;  %v834_v16 = vld [vmem:[%s16079_s3 + $0x10f8] sm:$0xff] }
 0x53b   :  { %v10961_v23 = vcombine.high %v818_v15, %v834_v16 }
 0x53c   :  { %9886 = vmatpush1.bf16.msra.mxu1 %v10830_v36 }
 0x53d   :  { %10009 = vmatpush1.bf16.msra.mxu0 %v10832_v20  ;;  %9887 = vmatprep.subr.bf16.mxu1 %v10863_v21  ;;  %v10959_v21 = vcombine.high %v817_v34, %v833_v7  ;;  %v946_v34 = vld [vmem:[%s16079_s3 + $0x1478] sm:$0xff]  ;;  %v977_v7 = vld [vmem:[%s16079_s3 + $0x1570] sm:$0xff] }
 0x53e   :  { %v9485_v42 = vpop.f32.mrb[24].mxu1  ;;  %10010 = vmatprep.subr.bf16.mxu0 %v10865_v22 }
 0x53f   :  { %v11732_v45 = vadd.f32 %v9485_v42, %v1662_v26  ;;  %v9608_v47 = vpop.f32.mrb[28].mxu0  ;;  %v9487_v48 = vpop.f32.mrb[25].mxu1  ;;  %v865_v26 = vld [vmem:[%s16079_s3 + $0x11f0] sm:$0xff]  ;;  %v882_v42 = vld [vmem:[%s16079_s3 + $0x1278] sm:$0xff] }
 0x540   :  { %v11734_v56 = vadd.f32 %v9608_v47, %v1670_v28  ;;  %v11733_v57 = vadd.f32 %v9487_v48, %v1666_v29  ;;  %v9610_v58 = vpop.f32.mrb[29].mxu0  ;;  %v9489_v59 = vpop.f32.mrb[26].mxu1  ;;  %9888 = vmatpush1.bf16.msra.mxu1 %v10862_v30  ;;  %v850_v28 = vld [vmem:[%s16079_s3 + $0x1178] sm:$0xff]  ;;  %v10960_v30 = vcombine.low %v818_v15, %v834_v16  ;;  %v10990_v60 = vcombine.low %v849_v25, %v865_v26  ;;  %v913_v48 = vld [vmem:[%s16079_s3 + $0x1370] sm:$0xff] }
 0x541   :  { %vm10127_vm12 = vcmp.gt.f32.partialorder %v11732_v45, 0.0  ;;  %v10159_v0 = vmul.f32 0.2, %v11732_v45  ;;  %v11735_v2 = vadd.f32 %v9610_v58, %v1674_v31  ;;  %v9612_v3 = vpop.f32.mrb[30].mxu0  ;;  %10011 = vmatpush1.bf16.msra.mxu0 %v10864_v32  ;;  %v9490_v5 = vpop.f32.mrb[27].mxu1  ;;  %9889 = vmatprep.subr.bf16.mxu1 %v10895_v38  ;;  %v866_v29 = vld [vmem:[%s16079_s3 + $0x11f8] sm:$0xff]  ;;  %v10991_v32 = vcombine.high %v849_v25, %v865_v26 }
 0x542   :  { %vm10129_vm13 = vcmp.gt.f32.partialorder %v11734_v56, 0.0  ;;  %v10161_v8 = vmul.f32 0.2, %v11734_v56  ;;  %vm10128_vm14 = vcmp.gt.f32.partialorder %v11733_v57, 0.0  ;;  %v10160_v9 = vmul.f32 0.2, %v11733_v57  ;;  %10012 = vmatprep.subr.bf16.mxu0 %v10897_v43 }
 0x543   :  { %v10191_v11 = vsel %vm10127_vm12, %v11732_v45, %v10159_v0  ;;  %vm10130_vm15 = vcmp.gt.f32.partialorder %v11735_v2, 0.0  ;;  %v10162_v12 = vmul.f32 0.2, %v11735_v2  ;;  %v9613_v13 = vpop.f32.mrb[31].mxu0  ;;  %v881_v38 = vld [vmem:[%s16079_s3 + $0x1270] sm:$0xff]  ;;  %v10993_v41 = vcombine.high %v850_v28, %v866_v29  ;;  %v898_v43 = vld [vmem:[%s16079_s3 + $0x12f8] sm:$0xff]  ;;  %vm10390_vm12 = vmor %vm10389_vm11, %vm10388_vm10 }
 0x544   :  { %v10193_v52 = vsel %vm10129_vm13, %v11734_v56, %v10161_v8  ;;  %v10192_v17 = vsel %vm10128_vm14, %v11733_v57, %v10160_v9  ;;  %9890 = vmatpush1.bf16.msra.mxu1 %v10894_v54  ;;  %v10992_v44 = vcombine.low %v850_v28, %v866_v29  ;;  %v11023_v45 = vcombine.high %v881_v38, %v897_v39  ;;  %v929_v54 = vld [vmem:[%s16079_s3 + $0x13f0] sm:$0xff]  ;;  %v930_v56 = vld [vmem:[%s16079_s3 + $0x13f8] sm:$0xff] }
 0x545   :  { %v10320_v36 = vcombine.low %v10191_v11, %v10192_v17  ;;  %v10194_v20 = vsel %vm10130_vm15, %v11735_v2, %v10162_v12  ;;  %10013 = vmatpush1.bf16.msra.mxu0 %v10896_v61  ;;  %9891 = vmatprep.subr.bf16.mxu1 %v10927_v62  ;;  %v11025_v47 = vcombine.high %v882_v42, %v898_v43  ;;  %v945_v61 = vld [vmem:[%s16079_s3 + $0x1470] sm:$0xff]  ;;  %v962_v0 = vld [vmem:[%s16079_s3 + $0x14f8] sm:$0xff]  ;;  %vm10391_vm13 = vcmask 261126  }
 0x546   :  { %v10321_v22 = vcombine.low %v10193_v52, %v10194_v20  ;;  %10014 = vmatprep.subr.bf16.mxu0 %v10929_v6  ;;  %v11024_v57 = vcombine.low %v882_v42, %v898_v43  ;;  %v11055_v58 = vcombine.high %v913_v48, %v929_v54  ;;  %v961_v62 = vld [vmem:[%s16079_s3 + $0x14f0] sm:$0xff]  ;;  %v11054_v2 = vcombine.low %v913_v48, %v929_v54  ;;  %v978_v9 = vld [vmem:[%s16079_s3 + $0x1578] sm:$0xff]  ;;  %vm10392_vm14 = vmor %vm10391_vm13, %vm10390_vm12 }
 0x547   :  { %v10328_v24 = vrot.slane %v10320_v36, %v13227_v46  ;;  %v11087_v5 = vcombine.high %v945_v61, %v961_v62  ;;  %v11089_v6 = vcombine.high %v946_v34, %v962_v0  ;;  %v993_v8 = vld [vmem:[%s16079_s3 + $0x15f0] sm:$0xff]  ;;  %v994_v11 = vld [vmem:[%s16079_s3 + $0x15f8] sm:$0xff]  ;;  %v11086_v12 = vcombine.low %v945_v61, %v961_v62 }
 0x548   :  { %v10335_v27 = vrot.slane %v10321_v22, %v13227_v46  ;;  %9892 = vmatpush1.bf16.msra.mxu1 %v10926_v18  ;;  %v11088_v13 = vcombine.low %v946_v34, %v962_v0  ;;  %v11119_v15 = vcombine.high %v977_v7, %v993_v8  ;;  %v11121_v16 = vcombine.high %v978_v9, %v994_v11  ;;  %v1009_v52 = vld [vmem:[%s16079_s3 + $0x1670] sm:$0xff]  ;;  %v1010_v18 = vld [vmem:[%s16079_s3 + $0x1678] sm:$0xff] }
 0x549   :  { %10015 = vmatpush1.bf16.msra.mxu0 %v10928_v19  ;;  %9902 = vmatprep.subr.bf16.mxu1 %v10959_v21  ;;  %v1025_v17 = vld [vmem:[%s16079_s3 + $0x16f0] sm:$0xff]  ;;  %v1026_v19 = vld [vmem:[%s16079_s3 + $0x16f8] sm:$0xff]  ;;  %v11118_v36 = vcombine.low %v977_v7, %v993_v8  ;;  %v11120_v20 = vcombine.low %v978_v9, %v994_v11 }
 0x54a   :  { %v10336_v31 = vcombine.low %v10328_v24, %v10335_v27  ;;  %10025 = vmatprep.subr.bf16.mxu0 %v10961_v23  ;;  %v11151_v21 = vcombine.high %v1009_v52, %v1025_v17  ;;  %v11153_v22 = vcombine.high %v1010_v18, %v1026_v19  ;;  %v1041_v23 = vld [vmem:[%s16079_s3 + $0x1770] sm:$0xff]  ;;  %v1042_v25 = vld [vmem:[%s16079_s3 + $0x1778] sm:$0xff]  ;;  %v11150_v27 = vcombine.low %v1009_v52, %v1025_v17 }
 0x54b   :  { %9894 = vmatmul.mubr.bf16.vlgmr.msra.gmra.mrb[32].mxu1 %v12226_v63  ;;  %v1057_v24 = vld [vmem:[%s16079_s3 + $0x17f0] sm:$0xff]  ;;  %v1058_v26 = vld [vmem:[%s16079_s3 + $0x17f8] sm:$0xff] }
 0x54c   :  { %10384 = vst [vmem:[%s16083_s5 + $0x28] sm:$0xff] %v10336_v31  ;;  %10017 = vmatmul.mubr.bf16.vlgmr.msra.gmra.mrb[36].mxu0 %v12226_v63  ;;  %9903 = vmatpush1.bf16.msra.mxu1 %v10958_v14  ;;  %v914_v63 = vld [vmem:[%s16079_s3 + $0x1378] sm:$0xff]  ;;  %v11152_v14 = vcombine.low %v1010_v18, %v1026_v19  ;;  %v11183_v28 = vcombine.high %v1041_v23, %v1057_v24  ;;  %v1089_v31 = vld [vmem:[%s16079_s3 + $0x18f0] sm:$0xff] }
 0x54d   :  { %9934 = vmatprep.mubr.bf16.mxu1 %v12244_v10  ;;  %10026 = vmatpush1.bf16.msra.mxu0 %v10960_v30  ;;  %v11057_v59 = vcombine.high %v914_v63, %v930_v56  ;;  %v11056_v3 = vcombine.low %v914_v63, %v930_v56  ;;  %v11185_v29 = vcombine.high %v1042_v25, %v1058_v26  ;;  %v1073_v30 = vld [vmem:[%s16079_s3 + $0x1870] sm:$0xff] }
 0x54e   :  { %10057 = vmatprep.mubr.bf16.mxu0 %v12244_v10  ;;  %9904 = vmatprep.subr.bf16.mxu1 %v10991_v32  ;;  %v11022_v10 = vcombine.low %v881_v38, %v897_v39  ;;  %v1074_v32 = vld [vmem:[%s16079_s3 + $0x1878] sm:$0xff]  ;;  %v11182_v39 = vcombine.low %v1041_v23, %v1057_v24  ;;  %v11215_v42 = vcombine.high %v1073_v30, %v1089_v31 }
 0x54f   :  { %10027 = vmatprep.subr.bf16.mxu0 %v10993_v41  ;;  %v1090_v38 = vld [vmem:[%s16079_s3 + $0x18f8] sm:$0xff]  ;;  %v11184_v41 = vcombine.low %v1042_v25, %v1058_v26  ;;  %v11214_v48 = vcombine.low %v1073_v30, %v1089_v31 }
 0x550   :  { %9905 = vmatpush1.bf16.msra.mxu1 %v10990_v60  ;;  %v11217_v43 = vcombine.high %v1074_v32, %v1090_v38  ;;  %v1105_v60 = vld [vmem:[%s16079_s3 + $0x1970] sm:$0xff]  ;;  %v11216_v54 = vcombine.low %v1074_v32, %v1090_v38 }
 0x551   :  { %10028 = vmatpush1.bf16.msra.mxu0 %v10992_v44  ;;  %9906 = vmatprep.subr.bf16.mxu1 %v11023_v45  ;;  %v1121_v44 = vld [vmem:[%s16079_s3 + $0x19f0] sm:$0xff]  ;;  %v1106_v45 = vld [vmem:[%s16079_s3 + $0x1978] sm:$0xff] }
 0x552   :  { %10029 = vmatprep.subr.bf16.mxu0 %v11025_v47  ;;  %v1122_v47 = vld [vmem:[%s16079_s3 + $0x19f8] sm:$0xff]  ;;  %v11247_v63 = vcombine.high %v1105_v60, %v1121_v44  ;;  %v11246_v61 = vcombine.low %v1105_v60, %v1121_v44 }
 0x553   :  { %v11249_v56 = vcombine.high %v1106_v45, %v1122_v47  ;;  %v11248_v62 = vcombine.low %v1106_v45, %v1122_v47 }
 0x554   :  { %9907 = vmatpush1.bf16.msra.mxu1 %v11022_v10  ;;  %v1137_v10 = vld [vmem:[%s16079_s3 + $0x1a70] sm:$0xff] }
 0x555   :  { %10030 = vmatpush1.bf16.msra.mxu0 %v11024_v57  ;;  %9908 = vmatprep.subr.bf16.mxu1 %v11055_v58  ;;  %v1153_v57 = vld [vmem:[%s16079_s3 + $0x1af0] sm:$0xff]  ;;  %v1138_v58 = vld [vmem:[%s16079_s3 + $0x1a78] sm:$0xff] }
 0x556   :  { %10031 = vmatprep.subr.bf16.mxu0 %v11057_v59  ;;  %v1154_v59 = vld [vmem:[%s16079_s3 + $0x1af8] sm:$0xff]  ;;  %v11279_v34 = vcombine.high %v1137_v10, %v1153_v57  ;;  %v11278_v7 = vcombine.low %v1137_v10, %v1153_v57 }
 0x557   :  { %v11281_v0 = vcombine.high %v1138_v58, %v1154_v59  ;;  %v11280_v8 = vcombine.low %v1138_v58, %v1154_v59 }
 0x558   :  { %9909 = vmatpush1.bf16.msra.mxu1 %v11054_v2  ;;  %v1169_v2 = vld [vmem:[%s16079_s3 + $0x1b70] sm:$0xff] }
 0x559   :  { %10032 = vmatpush1.bf16.msra.mxu0 %v11056_v3  ;;  %9910 = vmatprep.subr.bf16.mxu1 %v11087_v5  ;;  %v1185_v3 = vld [vmem:[%s16079_s3 + $0x1bf0] sm:$0xff]  ;;  %v1170_v5 = vld [vmem:[%s16079_s3 + $0x1b78] sm:$0xff] }
 0x55a   :  { %10033 = vmatprep.subr.bf16.mxu0 %v11089_v6  ;;  %v1186_v6 = vld [vmem:[%s16079_s3 + $0x1bf8] sm:$0xff]  ;;  %v11311_v9 = vcombine.high %v1169_v2, %v1185_v3  ;;  %v11310_v52 = vcombine.low %v1169_v2, %v1185_v3 }
 0x55b   :  { %v11313_v11 = vcombine.high %v1170_v5, %v1186_v6  ;;  %v11312_v17 = vcombine.low %v1170_v5, %v1186_v6 }
 0x55c   :  { %9911 = vmatpush1.bf16.msra.mxu1 %v11086_v12  ;;  %v1201_v12 = vld [vmem:[%s16079_s3 + $0x1c70] sm:$0xff] }
 0x55d   :  { %10034 = vmatpush1.bf16.msra.mxu0 %v11088_v13  ;;  %9912 = vmatprep.subr.bf16.mxu1 %v11119_v15  ;;  %v1217_v13 = vld [vmem:[%s16079_s3 + $0x1cf0] sm:$0xff]  ;;  %v1202_v15 = vld [vmem:[%s16079_s3 + $0x1c78] sm:$0xff] }
 0x55e   :  { %10035 = vmatprep.subr.bf16.mxu0 %v11121_v16  ;;  %v1218_v16 = vld [vmem:[%s16079_s3 + $0x1cf8] sm:$0xff]  ;;  %v11343_v18 = vcombine.high %v1201_v12, %v1217_v13  ;;  %v11342_v23 = vcombine.low %v1201_v12, %v1217_v13 }
 0x55f   :  { %v11345_v19 = vcombine.high %v1202_v15, %v1218_v16  ;;  %v11344_v24 = vcombine.low %v1202_v15, %v1218_v16 }
 0x560   :  { %9913 = vmatpush1.bf16.msra.mxu1 %v11118_v36  ;;  %v1233_v36 = vld [vmem:[%s16079_s3 + $0x1d70] sm:$0xff] }
 0x561   :  { %10036 = vmatpush1.bf16.msra.mxu0 %v11120_v20  ;;  %9914 = vmatprep.subr.bf16.mxu1 %v11151_v21  ;;  %v1249_v20 = vld [vmem:[%s16079_s3 + $0x1df0] sm:$0xff]  ;;  %v1234_v21 = vld [vmem:[%s16079_s3 + $0x1d78] sm:$0xff] }
 0x562   :  { %10037 = vmatprep.subr.bf16.mxu0 %v11153_v22  ;;  %v1250_v22 = vld [vmem:[%s16079_s3 + $0x1df8] sm:$0xff]  ;;  %v11375_v25 = vcombine.high %v1233_v36, %v1249_v20  ;;  %v11374_v30 = vcombine.low %v1233_v36, %v1249_v20 }
 0x563   :  { %v11377_v26 = vcombine.high %v1234_v21, %v1250_v22  ;;  %v11376_v31 = vcombine.low %v1234_v21, %v1250_v22  ;;  %v1457_v22 = vld [vmem:[%s16079_s3 + $0x2470] sm:$0xff] }
 0x564   :  { %9915 = vmatpush1.bf16.msra.mxu1 %v11150_v27  ;;  %v1265_v27 = vld [vmem:[%s16079_s3 + $0x1e70] sm:$0xff] }
 0x565   :  { %10038 = vmatpush1.bf16.msra.mxu0 %v11152_v14  ;;  %9916 = vmatprep.subr.bf16.mxu1 %v11183_v28  ;;  %v1281_v14 = vld [vmem:[%s16079_s3 + $0x1ef0] sm:$0xff]  ;;  %v1266_v28 = vld [vmem:[%s16079_s3 + $0x1e78] sm:$0xff] }
 0x566   :  { %10039 = vmatprep.subr.bf16.mxu0 %v11185_v29  ;;  %v1282_v29 = vld [vmem:[%s16079_s3 + $0x1ef8] sm:$0xff]  ;;  %v11407_v32 = vcombine.high %v1265_v27, %v1281_v14  ;;  %v11406_v60 = vcombine.low %v1265_v27, %v1281_v14 }
 0x567   :  { %v11409_v38 = vcombine.high %v1266_v28, %v1282_v29  ;;  %v11408_v44 = vcombine.low %v1266_v28, %v1282_v29  ;;  %v1489_v28 = vld [vmem:[%s16079_s3 + $0x2570] sm:$0xff] }
 0x568   :  { %9917 = vmatpush1.bf16.msra.mxu1 %v11182_v39  ;;  %v1297_v39 = vld [vmem:[%s16079_s3 + $0x1f70] sm:$0xff] }
 0x569   :  { %10040 = vmatpush1.bf16.msra.mxu0 %v11184_v41  ;;  %9918 = vmatprep.subr.bf16.mxu1 %v11215_v42  ;;  %v1313_v41 = vld [vmem:[%s16079_s3 + $0x1ff0] sm:$0xff]  ;;  %v1298_v42 = vld [vmem:[%s16079_s3 + $0x1f78] sm:$0xff] }
 0x56a   :  { %10041 = vmatprep.subr.bf16.mxu0 %v11217_v43  ;;  %v1314_v43 = vld [vmem:[%s16079_s3 + $0x1ff8] sm:$0xff]  ;;  %v11439_v45 = vcombine.high %v1297_v39, %v1313_v41  ;;  %v11438_v10 = vcombine.low %v1297_v39, %v1313_v41  ;;  %v1505_v29 = vld [vmem:[%s16079_s3 + $0x25f0] sm:$0xff] }
 0x56b   :  { %v11441_v47 = vcombine.high %v1298_v42, %v1314_v43  ;;  %v11440_v57 = vcombine.low %v1298_v42, %v1314_v43  ;;  %v11631_v39 = vcombine.high %v1489_v28, %v1505_v29  ;;  %v1521_v42 = vld [vmem:[%s16079_s3 + $0x2670] sm:$0xff] }
 0x56c   :  { %9919 = vmatpush1.bf16.msra.mxu1 %v11214_v48  ;;  %v1329_v48 = vld [vmem:[%s16079_s3 + $0x2070] sm:$0xff] }
 0x56d   :  { %10042 = vmatpush1.bf16.msra.mxu0 %v11216_v54  ;;  %9920 = vmatprep.subr.bf16.mxu1 %v11247_v63  ;;  %v1345_v54 = vld [vmem:[%s16079_s3 + $0x20f0] sm:$0xff]  ;;  %v1330_v63 = vld [vmem:[%s16079_s3 + $0x2078] sm:$0xff] }
 0x56e   :  { %10043 = vmatprep.subr.bf16.mxu0 %v11249_v56  ;;  %v1346_v56 = vld [vmem:[%s16079_s3 + $0x20f8] sm:$0xff]  ;;  %v11471_v58 = vcombine.high %v1329_v48, %v1345_v54  ;;  %v11470_v2 = vcombine.low %v1329_v48, %v1345_v54  ;;  %v1537_v43 = vld [vmem:[%s16079_s3 + $0x26f0] sm:$0xff] }
 0x56f   :  { %v11473_v59 = vcombine.high %v1330_v63, %v1346_v56  ;;  %v11472_v3 = vcombine.low %v1330_v63, %v1346_v56  ;;  %v11663_v48 = vcombine.high %v1521_v42, %v1537_v43  ;;  %v1553_v63 = vld [vmem:[%s16079_s3 + $0x2770] sm:$0xff] }
 0x570   :  { %9921 = vmatpush1.bf16.msra.mxu1 %v11246_v61  ;;  %v1361_v61 = vld [vmem:[%s16079_s3 + $0x2170] sm:$0xff] }
 0x571   :  { %10044 = vmatpush1.bf16.msra.mxu0 %v11248_v62  ;;  %9922 = vmatprep.subr.bf16.mxu1 %v11279_v34  ;;  %v1377_v62 = vld [vmem:[%s16079_s3 + $0x21f0] sm:$0xff]  ;;  %v1362_v34 = vld [vmem:[%s16079_s3 + $0x2178] sm:$0xff] }
 0x572   :  { %10045 = vmatprep.subr.bf16.mxu0 %v11281_v0  ;;  %v1378_v0 = vld [vmem:[%s16079_s3 + $0x21f8] sm:$0xff]  ;;  %v11503_v5 = vcombine.high %v1361_v61, %v1377_v62  ;;  %v11502_v12 = vcombine.low %v1361_v61, %v1377_v62  ;;  %v1569_v56 = vld [vmem:[%s16079_s3 + $0x27f0] sm:$0xff] }
 0x573   :  { %v11505_v6 = vcombine.high %v1362_v34, %v1378_v0  ;;  %v11504_v13 = vcombine.low %v1362_v34, %v1378_v0  ;;  %v11695_v61 = vcombine.high %v1553_v63, %v1569_v56  ;;  %v11694_v34 = vcombine.low %v1553_v63, %v1569_v56 }
 0x574   :  { %9923 = vmatpush1.bf16.msra.mxu1 %v11278_v7  ;;  %v1393_v7 = vld [vmem:[%s16079_s3 + $0x2270] sm:$0xff] }
 0x575   :  { %10046 = vmatpush1.bf16.msra.mxu0 %v11280_v8  ;;  %9924 = vmatprep.subr.bf16.mxu1 %v11311_v9  ;;  %v1409_v8 = vld [vmem:[%s16079_s3 + $0x22f0] sm:$0xff]  ;;  %v1394_v9 = vld [vmem:[%s16079_s3 + $0x2278] sm:$0xff] }
 0x576   :  { %10047 = vmatprep.subr.bf16.mxu0 %v11313_v11  ;;  %v1410_v11 = vld [vmem:[%s16079_s3 + $0x22f8] sm:$0xff]  ;;  %v11535_v15 = vcombine.high %v1393_v7, %v1409_v8 }
 0x577   :  { %v11537_v16 = vcombine.high %v1394_v9, %v1410_v11  ;;  %v11536_v36 = vcombine.low %v1394_v9, %v1410_v11 }
 0x578   :  { %9925 = vmatpush1.bf16.msra.mxu1 %v11310_v52  ;;  %v1425_v52 = vld [vmem:[%s16079_s3 + $0x2370] sm:$0xff] }
 0x579   :  { %10048 = vmatpush1.bf16.msra.mxu0 %v11312_v17  ;;  %9926 = vmatprep.subr.bf16.mxu1 %v11343_v18  ;;  %v1441_v17 = vld [vmem:[%s16079_s3 + $0x23f0] sm:$0xff]  ;;  %v1442_v18 = vld [vmem:[%s16079_s3 + $0x23f8] sm:$0xff] }
 0x57a   :  { %10049 = vmatprep.subr.bf16.mxu0 %v11345_v19  ;;  %v11534_v19 = vcombine.low %v1393_v7, %v1409_v8  ;;  %v11567_v20 = vcombine.high %v1425_v52, %v1441_v17 }
 0x57c   :  { %9927 = vmatpush1.bf16.msra.mxu1 %v11342_v23  ;;  %v1473_v23 = vld [vmem:[%s16079_s3 + $0x24f0] sm:$0xff] }
 0x57d   :  { %10050 = vmatpush1.bf16.msra.mxu0 %v11344_v24  ;;  %9928 = vmatprep.subr.bf16.mxu1 %v11375_v25  ;;  %v1474_v24 = vld [vmem:[%s16079_s3 + $0x24f8] sm:$0xff]  ;;  %v11566_v25 = vcombine.low %v1425_v52, %v1441_v17  ;;  %v11599_v27 = vcombine.high %v1457_v22, %v1473_v23 }
 0x57e   :  { %10051 = vmatprep.subr.bf16.mxu0 %v11377_v26 }
 0x580   :  { %9929 = vmatpush1.bf16.msra.mxu1 %v11374_v30  ;;  %v1490_v30 = vld [vmem:[%s16079_s3 + $0x2578] sm:$0xff] }
 0x581   :  { %10052 = vmatpush1.bf16.msra.mxu0 %v11376_v31  ;;  %9930 = vmatprep.subr.bf16.mxu1 %v11407_v32  ;;  %v1506_v31 = vld [vmem:[%s16079_s3 + $0x25f8] sm:$0xff]  ;;  %v11598_v32 = vcombine.low %v1457_v22, %v1473_v23 }
 0x582   :  { %10053 = vmatprep.subr.bf16.mxu0 %v11409_v38  ;;  %v11633_v41 = vcombine.high %v1490_v30, %v1506_v31 }
 0x584   :  { %9931 = vmatpush1.bf16.msra.mxu1 %v11406_v60  ;;  %v1522_v60 = vld [vmem:[%s16079_s3 + $0x2678] sm:$0xff] }
 0x585   :  { %10054 = vmatpush1.bf16.msra.mxu0 %v11408_v44  ;;  %9932 = vmatprep.subr.bf16.mxu1 %v11439_v45  ;;  %v1538_v44 = vld [vmem:[%s16079_s3 + $0x26f8] sm:$0xff]  ;;  %v11630_v45 = vcombine.low %v1489_v28, %v1505_v29 }
 0x586   :  { %10055 = vmatprep.subr.bf16.mxu0 %v11441_v47  ;;  %v11632_v47 = vcombine.low %v1490_v30, %v1506_v31  ;;  %v11665_v54 = vcombine.high %v1522_v60, %v1538_v44 }
 0x588   :  { %9933 = vmatpush1.bf16.msra.mxu1 %v11438_v10  ;;  %v1554_v10 = vld [vmem:[%s16079_s3 + $0x2778] sm:$0xff] }
 0x589   :  { %10056 = vmatpush1.bf16.msra.mxu0 %v11440_v57  ;;  %9943 = vmatprep.subr.bf16.mxu1 %v11471_v58  ;;  %v1570_v57 = vld [vmem:[%s16079_s3 + $0x27f8] sm:$0xff]  ;;  %v11662_v58 = vcombine.low %v1521_v42, %v1537_v43 }
 0x58a   :  { %10066 = vmatprep.subr.bf16.mxu0 %v11473_v59  ;;  %v11664_v59 = vcombine.low %v1522_v60, %v1538_v44  ;;  %v11697_v62 = vcombine.high %v1554_v10, %v1570_v57  ;;  %v11696_v0 = vcombine.low %v1554_v10, %v1570_v57 }
 0x58b   :  { %9935 = vmatmul.mubr.bf16.vlgmr.msra.gmra.mrb[32].mxu1 %v12436_v33 }
 0x58c   :  { %10058 = vmatmul.mubr.bf16.vlgmr.msra.gmra.mrb[36].mxu0 %v12436_v33  ;;  %9944 = vmatpush1.bf16.msra.mxu1 %v11470_v2  ;;  %v1426_v33 = vld [vmem:[%s16079_s3 + $0x2378] sm:$0xff] }
 0x58d   :  { %10067 = vmatpush1.bf16.msra.mxu0 %v11472_v3  ;;  %9945 = vmatprep.subr.bf16.mxu1 %v11503_v5  ;;  %v11569_v21 = vcombine.high %v1426_v33, %v1442_v18  ;;  %v11568_v26 = vcombine.low %v1426_v33, %v1442_v18  ;;  %v1574_v2 = vld [vmem:[%s16082_s4 + $0x18] sm:$0xff] }
 0x58e   :  { %10068 = vmatprep.subr.bf16.mxu0 %v11505_v6  ;;  %9975 = vmatprep.mubr.bf16.mxu1 %v11898_v1  ;;  %v1678_v3 = vrot.slane %v1574_v2, %v12191_v35  ;;  %v1686_v5 = vrot.slane %v1574_v2, %v12374_v50  ;;  %v1682_v6 = vrot.slane %v1574_v2, %v12199_v37 }
 0x58f   :  { %10098 = vmatprep.mubr.bf16.mxu0 %v11898_v1  ;;  %v1458_v1 = vld [vmem:[%s16079_s3 + $0x2478] sm:$0xff]  ;;  %v1690_v7 = vrot.slane %v1574_v2, %v12206_v40  ;;  %v1706_v28 = vrot.slane %v1574_v2, %v13704_v55 }
 0x590   :  { %9946 = vmatpush1.bf16.msra.mxu1 %v11502_v12  ;;  %v11601_v14 = vcombine.high %v1458_v1, %v1474_v24  ;;  %v11600_v38 = vcombine.low %v1458_v1, %v1474_v24 }
 0x591   :  { %10069 = vmatpush1.bf16.msra.mxu0 %v11504_v13  ;;  %9947 = vmatprep.subr.bf16.mxu1 %v11535_v15 }
 0x592   :  { %10070 = vmatprep.subr.bf16.mxu0 %v11537_v16 }
 0x594   :  { %9948 = vmatpush1.bf16.msra.mxu1 %v11534_v19 }
 0x595   :  { %10071 = vmatpush1.bf16.msra.mxu0 %v11536_v36  ;;  %9949 = vmatprep.subr.bf16.mxu1 %v11567_v20 }
 0x596   :  { %10072 = vmatprep.subr.bf16.mxu0 %v11569_v21 }
 0x598   :  { %9950 = vmatpush1.bf16.msra.mxu1 %v11566_v25 }
 0x599   :  { %10073 = vmatpush1.bf16.msra.mxu0 %v11568_v26  ;;  %9951 = vmatprep.subr.bf16.mxu1 %v11599_v27  ;;  %v1694_v26 = vrot.slane %v1574_v2, %v12479_v4  ;;  %v1702_v27 = vrot.slane %v1574_v2, %v13698_v51 }
 0x59a   :  { %10074 = vmatprep.subr.bf16.mxu0 %v11601_v14  ;;  %v1698_v14 = vrot.slane %v1574_v2, %v13701_v53 }
 0x59c   :  { %9952 = vmatpush1.bf16.msra.mxu1 %v11598_v32 }
 0x59d   :  { %10075 = vmatpush1.bf16.msra.mxu0 %v11600_v38  ;;  %9953 = vmatprep.subr.bf16.mxu1 %v11631_v39 }
 0x59e   :  { %10076 = vmatprep.subr.bf16.mxu0 %v11633_v41 }
 0x5a0   :  { %9954 = vmatpush1.bf16.msra.mxu1 %v11630_v45 }
 0x5a1   :  { %10077 = vmatpush1.bf16.msra.mxu0 %v11632_v47  ;;  %9955 = vmatprep.subr.bf16.mxu1 %v11663_v48 }
 0x5a2   :  { %10078 = vmatprep.subr.bf16.mxu0 %v11665_v54 }
 0x5a4   :  { %9956 = vmatpush1.bf16.msra.mxu1 %v11662_v58 }
 0x5a5   :  { %10079 = vmatpush1.bf16.msra.mxu0 %v11664_v59  ;;  %9957 = vmatprep.subr.bf16.mxu1 %v11695_v61 }
 0x5a6   :  { %10080 = vmatprep.subr.bf16.mxu0 %v11697_v62 }
 0x5a8   :  { %9958 = vmatpush1.bf16.msra.mxu1 %v11694_v34 }
 0x5a9   :  { %10081 = vmatpush1.bf16.msra.mxu0 %v11696_v0 }
 0x5ab   :  { %9976 = vmatmul.mubr.bf16.vlgmr.msra.gmra.mrb[32].mxu1 %v12535_v49 }
 0x5ac   :  { %10099 = vmatmul.mubr.bf16.vlgmr.msra.gmra.mrb[36].mxu0 %v12535_v49 }
 0x5de   :  { %v9731_v8 = vpop.f32.mrb[28].mxu1 }
 0x5df   :  { %v11736_v9 = vadd.f32 %v9731_v8, %v1678_v3  ;;  %v9854_v11 = vpop.f32.mrb[32].mxu0  ;;  %v9733_v12 = vpop.f32.mrb[29].mxu1 }
 0x5e0   :  { %v11738_v13 = vadd.f32 %v9854_v11, %v1686_v5  ;;  %v11737_v15 = vadd.f32 %v9733_v12, %v1682_v6  ;;  %v9856_v16 = vpop.f32.mrb[33].mxu0  ;;  %v9735_v49 = vpop.f32.mrb[30].mxu1 }
 0x5e1   :  { %vm10131_vm0 = vcmp.gt.f32.partialorder %v11736_v9, 0.0  ;;  %v10163_v52 = vmul.f32 0.2, %v11736_v9  ;;  %v11739_v17 = vadd.f32 %v9856_v16, %v1690_v7  ;;  %v9858_v33 = vpop.f32.mrb[34].mxu0  ;;  %v9736_v18 = vpop.f32.mrb[31].mxu1 }
 0x5e2   :  { %vm10133_vm1 = vcmp.gt.f32.partialorder %v11738_v13, 0.0  ;;  %v10165_v35 = vmul.f32 0.2, %v11738_v13  ;;  %vm10132_vm2 = vcmp.gt.f32.partialorder %v11737_v15, 0.0  ;;  %v10164_v50 = vmul.f32 0.2, %v11737_v15 }
 0x5e3   :  { %v10195_v37 = vsel %vm10131_vm0, %v11736_v9, %v10163_v52  ;;  %vm10134_vm3 = vcmp.gt.f32.partialorder %v11739_v17, 0.0  ;;  %v10166_v40 = vmul.f32 0.2, %v11739_v17  ;;  %v9859_v19 = vpop.f32.mrb[35].mxu0 }
 0x5e4   :  { %v10197_v36 = vsel %vm10133_vm1, %v11738_v13, %v10165_v35  ;;  %v10196_v20 = vsel %vm10132_vm2, %v11737_v15, %v10164_v50 }
 0x5e5   :  { %v10337_v21 = vcombine.low %v10195_v37, %v10196_v20  ;;  %v10198_v22 = vsel %vm10134_vm3, %v11739_v17, %v10166_v40 }
 0x5e6   :  { %v10338_v23 = vcombine.low %v10197_v36, %v10198_v22 }
 0x5e7   :  { %v10345_v1 = vrot.slane %v10337_v21, %v13227_v46 }
 0x5e8   :  { %v10352_v24 = vrot.slane %v10338_v23, %v13227_v46 }
 0x5ea   :  { %v10353_v25 = vcombine.low %v10345_v1, %v10352_v24 }
 0x5ec   :  { %10385 = vst [vmem:[%s16083_s5 + $0x30] sm:$0xff] %v10353_v25 }
 0x67e   :  { %v9977_v29 = vpop.f32.mrb[32].mxu1 }
 0x67f   :  { %v11740_v30 = vadd.f32 %v9977_v29, %v1694_v26  ;;  %v10100_v31 = vpop.f32.mrb[36].mxu0  ;;  %v9979_v32 = vpop.f32.mrb[33].mxu1 }
 0x680   :  { %v11742_v38 = vadd.f32 %v10100_v31, %v1702_v27  ;;  %v11741_v39 = vadd.f32 %v9979_v32, %v1698_v14  ;;  %v10102_v41 = vpop.f32.mrb[37].mxu0  ;;  %v9981_v42 = vpop.f32.mrb[34].mxu1 }
 0x681   :  { %vm10135_vm6 = vcmp.gt.f32.partialorder %v11740_v30, 0.0  ;;  %v10167_v43 = vmul.f32 0.2, %v11740_v30  ;;  %v11743_v60 = vadd.f32 %v10102_v41, %v1706_v28  ;;  %v10104_v4 = vpop.f32.mrb[38].mxu0  ;;  %v9982_v44 = vpop.f32.mrb[35].mxu1 }
 0x682   :  { %vm10137_vm7 = vcmp.gt.f32.partialorder %v11742_v38, 0.0  ;;  %v10169_v51 = vmul.f32 0.2, %v11742_v38  ;;  %vm10136_vm8 = vcmp.gt.f32.partialorder %v11741_v39, 0.0  ;;  %v10168_v53 = vmul.f32 0.2, %v11741_v39 }
 0x683   :  { %v10199_v55 = vsel %vm10135_vm6, %v11740_v30, %v10167_v43  ;;  %vm10138_vm9 = vcmp.gt.f32.partialorder %v11743_v60, 0.0  ;;  %v10170_v45 = vmul.f32 0.2, %v11743_v60  ;;  %v10105_v47 = vpop.f32.mrb[39].mxu0 }
 0x684   :  { %v10201_v48 = vsel %vm10137_vm7, %v11742_v38, %v10169_v51  ;;  %v10200_v54 = vsel %vm10136_vm8, %v11741_v39, %v10168_v53 }
 0x685   :  { %v10354_v63 = vcombine.low %v10199_v55, %v10200_v54  ;;  %v10202_v56 = vsel %vm10138_vm9, %v11743_v60, %v10170_v45 }
 0x686   :  { %v10355_v10 = vcombine.low %v10201_v48, %v10202_v56 }
 0x687   :  { %v10362_v57 = vrot.slane %v10354_v63, %v13227_v46 }
 0x688   :  { %v10369_v58 = vrot.slane %v10355_v10, %v13227_v46 }
 0x68a   :  { %v10370_v59 = vcombine.low %v10362_v57, %v10369_v58 }
 0x68c   :  { %10393 = vst.msk [vmem:[%s16083_s5 + $0x38] sm:$0xff] %vm10392_vm14, %v10370_v59 }

</bundles_post_ra>
